<compile_context>
chip_gen: v5e
topology: v5e:2x2
jax: 0.10.0
libtpu: 0.0.40
codegen_flags: <defaults>
</compile_context>

<pallas_src>
import functools

import jax
import jax.numpy as jnp
import numpy as np
from jax.experimental import pallas as pl
from jax.experimental.pallas import tpu as pltpu


# Left/right halo width (sublane / W axis) of the conv canvas.  8 keeps the interior
# store sublane-aligned; taps read at offsets (_PADW - 1 + dx) for dx in {0,1,2}.
_PADW = 8


# ---------------------------------------------------------------------------
# Fused kernel: whole head for a block of B ROIs, activations resident in VMEM
# ---------------------------------------------------------------------------
def _fused_head_kernel(num_conv, x_ref, *refs):
    # refs = [w_0, b_0, ..., w_{nc-1}, b_{nc-1},     conv weights (9*Cin_k, Cd) bf16, biases (1, Cd) f32
    #         dw, db, pw, pb,                        packed deconv + block-diag predictors (lane-padded)
    #         out_ref,                               (B, H, W, 128) f32 un-interleaved predictions
    #         canvas_0, ..., canvas_{nc-1}]          zero-haloed bf16 VMEM canvases
    n_wb = 2 * num_conv
    conv_refs = refs[:n_wb]
    dw_ref, db_ref, pw_ref, pb_ref = refs[n_wb:n_wb + 4]
    out_ref = refs[n_wb + 4]
    canvases = refs[n_wb + 5:]

    B, H, W, Cin = x_ref.shape
    M = B * H * W
    Wp = W + 2 * _PADW

    def zero_halo(xp_ref):
        # Only the strips that the 3x3 taps actually read outside the interior:
        # rows 0 and H+1, columns _PADW-1 and _PADW+W.  (Interior is overwritten below.)
        C = xp_ref.shape[-1]
        xp_ref[:, 0:1, :, :] = jnp.zeros((B, 1, Wp, C), jnp.bfloat16)
        xp_ref[:, H + 1:H + 2, :, :] = jnp.zeros((B, 1, Wp, C), jnp.bfloat16)
        xp_ref[:, :, _PADW - 1:_PADW, :] = jnp.zeros((B, H + 2, 1, C), jnp.bfloat16)
        xp_ref[:, :, _PADW + W:_PADW + W + 1, :] = jnp.zeros((B, H + 2, 1, C), jnp.bfloat16)

    if num_conv > 0:
        zero_halo(canvases[0])
        canvases[0][:, 1:1 + H, _PADW:_PADW + W, :] = x_ref[...]     # bf16 interior store

        a = None
        for k in range(num_conv):
            w_ref, b_ref = conv_refs[2 * k], conv_refs[2 * k + 1]
            xp_ref = canvases[k]
            C = xp_ref.shape[-1]
            Cout = w_ref.shape[-1]

            # im2col via ref slices of the haloed canvas; one K = 9*C matmul.
            taps = []
            for idx in range(9):
                dy, dx = divmod(idx, 3)
                c0 = _PADW - 1 + dx
                t = xp_ref[:, dy:dy + H, c0:c0 + W, :]               # (B, H, W, C) bf16
                taps.append(t.reshape(M, C))
            patch = jnp.concatenate(taps, axis=-1)                   # (M, 9*C) bf16

            acc = jnp.dot(patch, w_ref[...], preferred_element_type=jnp.float32)
            a = jnp.maximum(acc + b_ref[...], 0.0)                   # (M, Cout) f32

            if k + 1 < num_conv:
                nxt = canvases[k + 1]
                zero_halo(nxt)
                nxt[:, 1:1 + H, _PADW:_PADW + W, :] = (
                    a.astype(jnp.bfloat16).reshape(B, H, W, Cout))
        a_last = a
    else:
        a_last = x_ref[...].astype(jnp.float32).reshape(M, Cin)

    # ---- ConvTranspose2d(k=2, s=2) + ReLU as ONE lane-dense matmul --------------------
    # out[2h+dy, 2w+dx, c] = x[h, w, :] @ W[dy, dx] + b ; columns packed as (dy, dx, c).
    y = jnp.dot(a_last.astype(jnp.bfloat16), dw_ref[...],
                preferred_element_type=jnp.float32) + db_ref[...]
    y = jnp.maximum(y, 0.0)                                          # (M, 4*Cd) f32

    # ---- mask + vertex 1x1 predictors fused (block-diag), output padded to 128 lanes ---
    p = jnp.dot(y.astype(jnp.bfloat16), pw_ref[...],
                preferred_element_type=jnp.float32) + pb_ref[...]
    out_ref[...] = p.reshape(B, H, W, p.shape[-1])                   # (B, H, W, 128) f32


# ---------------------------------------------------------------------------
# pallas_call plumbing
# ---------------------------------------------------------------------------
def _head_pallas_call(x, conv_ws, conv_bs, dw, db4, pw_blk, pb4, roi_block):
    # x: (Npad, H, W, Cin) bf16 ; conv_ws[k]: (9*Cin_k, Cd) bf16 ; conv_bs[k]: (1, Cd) f32
    # dw: (Cd_in, 4*Cd) bf16 ; db4: (1, 4*Cd) f32 ; pw_blk: (4*Cd, 128) bf16 ; pb4: (1, 128) f32
    Npad, H, W, Cin = x.shape
    B = roi_block
    num_conv = len(conv_ws)
    P4p = pw_blk.shape[-1]

    in_specs = [pl.BlockSpec((B, H, W, Cin), lambda n: (n, 0, 0, 0))]
    operands = [x]
    for w, b in zip(conv_ws, conv_bs):
        in_specs.append(pl.BlockSpec(w.shape, lambda n: (0, 0)))
        in_specs.append(pl.BlockSpec(b.shape, lambda n: (0, 0)))
        operands += [w, b]
    for t in (dw, db4, pw_blk, pb4):
        in_specs.append(pl.BlockSpec(t.shape, lambda n: (0, 0)))
        operands.append(t)

    # One zero-haloed bf16 canvas per conv layer: (B, H+2, W+2*_PADW, Cin_k).
    scratch = [pltpu.VMEM((B, H + 2, W + 2 * _PADW, int(w.shape[0]) // 9), jnp.bfloat16)
               for w in conv_ws]

    return pl.pallas_call(
        functools.partial(_fused_head_kernel, num_conv),
        out_shape=jax.ShapeDtypeStruct((Npad, H, W, P4p), jnp.float32),
        grid_spec=pltpu.PrefetchScalarGridSpec(
            num_scalar_prefetch=0,
            grid=(Npad // B,),
            in_specs=in_specs,
            out_specs=pl.BlockSpec((B, H, W, P4p), lambda n: (n, 0, 0, 0)),
            scratch_shapes=scratch,
        ),
        compiler_params=pltpu.CompilerParams(
            # ROI-block axis is independent -> shard across both TensorCores on v7x.
            dimension_semantics=("parallel",),
            # Explicit limit: safe on v5e's 16 MiB scoped default and v7x's 64 MiB physical.
            vmem_limit_bytes=32 * 1024 * 1024,
        ),
    )(*operands)


def _choose_roi_block(n):
    # Keep >= 2 grid steps when possible (v7x has 2 TCs) and cap per-step VMEM footprint.
    return max(1, min(8, pl.cdiv(n, 2)))


# ---------------------------------------------------------------------------
# Module: parameters + forward
# ---------------------------------------------------------------------------
def init_params(key, input_channels, conv_dims, num_conv, num_mask_classes, num_keypoints):
    keys = jax.random.split(key, num_conv + 3)
    params = {"convs": []}
    cin = input_channels
    for k in range(num_conv):
        # c2_msra_fill: kaiming normal (fan_out), bias = 0
        std = np.sqrt(2.0 / (3 * 3 * conv_dims))
        w = jax.random.normal(keys[k], (3, 3, cin, conv_dims), jnp.float32) * std
        b = jnp.zeros((conv_dims,), jnp.float32)
        params["convs"].append((w, b))
        cin = conv_dims
    std = np.sqrt(2.0 / (2 * 2 * conv_dims))
    params["deconv_w"] = jax.random.normal(keys[num_conv], (2, 2, cin, conv_dims), jnp.float32) * std
    params["deconv_b"] = jnp.zeros((conv_dims,), jnp.float32)
    # predictors: normal(std=0.001), bias = 0
    params["mask_w"] = jax.random.normal(keys[num_conv + 1], (conv_dims, num_mask_classes), jnp.float32) * 1e-3
    params["mask_b"] = jnp.zeros((num_mask_classes,), jnp.float32)
    params["vertex_w"] = jax.random.normal(keys[num_conv + 2], (conv_dims, 2 * num_keypoints), jnp.float32) * 1e-3
    params["vertex_b"] = jnp.zeros((2 * num_keypoints,), jnp.float32)
    return params


@jax.jit
def mask_rcnn_conv_upsample_head_forward(x_nchw, params):
    """Fused Pallas forward. Input NCHW (PyTorch convention); outputs NCHW."""
    x = jnp.transpose(x_nchw, (0, 2, 3, 1)).astype(jnp.bfloat16)      # NCHW -> NHWC, bf16 DMA
    N, H, W, _ = x.shape

    B = _choose_roi_block(N)
    Npad = pl.cdiv(N, B) * B
    if Npad != N:                                                      # tail-pad ROI axis
        x = jnp.pad(x, ((0, Npad - N), (0, 0), (0, 0), (0, 0)))

    # Pack weights (done once per call by XLA, trivially small).
    conv_ws = [jnp.reshape(w, (9 * w.shape[2], w.shape[3])).astype(jnp.bfloat16)  # (ky,kx,cin) rows
               for (w, _) in params["convs"]]
    conv_bs = [b.reshape(1, -1).astype(jnp.float32) for (_, b) in params["convs"]]

    wd = params["deconv_w"]                                            # (2, 2, Cd_in, Cd)
    Cd_in, Cd = wd.shape[2], wd.shape[3]
    dw = jnp.transpose(wd, (2, 0, 1, 3)).reshape(Cd_in, 4 * Cd).astype(jnp.bfloat16)  # cols (dy,dx,c)
    db4 = jnp.tile(params["deconv_b"].reshape(1, Cd), (1, 4)).astype(jnp.float32)

    Cm = params["mask_w"].shape[-1]
    pw = jnp.concatenate([params["mask_w"], params["vertex_w"]], axis=1)    # (Cd, P)
    P = pw.shape[-1]
    P4 = 4 * P
    P4p = ((P4 + 127) // 128) * 128                                    # lane-dense output width
    pw_blk = jnp.kron(jnp.eye(4, dtype=jnp.float32), pw)               # block-diag (4*Cd, 4*P)
    pw_blk = jnp.pad(pw_blk, ((0, 0), (0, P4p - P4))).astype(jnp.bfloat16)
    pb = jnp.concatenate([params["mask_b"], params["vertex_b"]]).reshape(1, P)
    pb4 = jnp.pad(jnp.tile(pb, (1, 4)), ((0, 0), (0, P4p - P4))).astype(jnp.float32)

    out = _head_pallas_call(x, conv_ws, conv_bs, dw, db4, pw_blk, pb4, B)   # (Npad, H, W, 128)
    out = out[:N, :, :, :P4]

    # Interleave the (dy, dx) taps into spatial dims (tiny final tensor; done by XLA):
    # out[n, h, w, dy, dx, p] -> up[n, 2h+dy, 2w+dx, p]
    up = out.reshape(N, H, W, 2, 2, P).transpose(0, 1, 3, 2, 4, 5).reshape(N, 2 * H, 2 * W, P)
    mask, vertex = up[..., :Cm], up[..., Cm:]
    return {
        "mask": jnp.transpose(mask, (0, 3, 1, 2)),
        "vertex": jnp.transpose(vertex, (0, 3, 1, 2)),
    }


# ---------------------------------------------------------------------------
# Pure-JAX reference (correctness check only)
# ---------------------------------------------------------------------------
def _ref_forward(x_nchw, params):
    hp = jax.lax.Precision.HIGHEST
    x = jnp.transpose(x_nchw, (0, 2, 3, 1)).astype(jnp.float32)
    for (w, b) in params["convs"]:
        x = jax.lax.conv_general_dilated(
            x, w, (1, 1), ((1, 1), (1, 1)),
            dimension_numbers=("NHWC", "HWIO", "NHWC"), precision=hp) + b
        x = jnp.maximum(x, 0.0)
    N, H, W, _ = x.shape
    wd = params["deconv_w"]
    Cout = wd.shape[-1]
    y = jnp.einsum("nhwc,ijcd->nhwijd", x, wd, precision=hp) + params["deconv_b"]
    y = jnp.maximum(y, 0.0)
    y = y.transpose(0, 1, 3, 2, 4, 5).reshape(N, 2 * H, 2 * W, Cout)
    mask = jnp.einsum("nhwc,cd->nhwd", y, params["mask_w"], precision=hp) + params["mask_b"]
    vertex = jnp.einsum("nhwc,cd->nhwd", y, params["vertex_w"], precision=hp) + params["vertex_b"]
    return {
        "mask": jnp.transpose(mask, (0, 3, 1, 2)),
        "vertex": jnp.transpose(vertex, (0, 3, 1, 2)),
    }


if __name__ == "__main__":
    # Small synthetic config (consistent with the module's __init__):
    N, INPUT_CHANNELS, H, W = 2, 4, 16, 16
    CONV_DIMS = 32          # cfg.MODEL.ROI_PVNET_HEAD.CONV_HEAD_DIM
    NUM_CONV = 2            # cfg.MODEL.ROI_PVNET_HEAD.NUM_STACKED_CONVS
    NUM_CLASSES = 2         # cfg.MODEL.ROI_HEADS.NUM_CLASSES (cls_agnostic_mask = False)
    NUM_KEYPOINTS = 9       # cfg.MODEL.ROI_PVNET_HEAD.NUM_KEYPOINTS

    key = jax.random.PRNGKey(0)
    kx, kx2, kp = jax.random.split(key, 3)
    params = init_params(kp, INPUT_CHANNELS, CONV_DIMS, NUM_CONV, NUM_CLASSES, NUM_KEYPOINTS)

    # bf16 MXU inputs vs f32 HIGHEST-precision reference -> modest tolerances.
    RTOL, ATOL = 2e-2, 1e-3

    # --- primary case (N=2, B=1, grid=2) ------------------------------------------------
    x = jax.random.normal(kx, (N, INPUT_CHANNELS, H, W), jnp.float32)   # NCHW input
    out = mask_rcnn_conv_upsample_head_forward(x, params)
    jax.block_until_ready(out)
    assert out["mask"].shape == (N, NUM_CLASSES, 2 * H, 2 * W)
    assert out["vertex"].shape == (N, 2 * NUM_KEYPOINTS, 2 * H, 2 * W)
    ref = _ref_forward(x, params)
    np.testing.assert_allclose(np.asarray(out["mask"]), np.asarray(ref["mask"]), rtol=RTOL, atol=ATOL)
    np.testing.assert_allclose(np.asarray(out["vertex"]), np.asarray(ref["vertex"]), rtol=RTOL, atol=ATOL)

    # --- exercise ROI blocking (B>1) + tail padding (N=5 -> B=3, Npad=6, grid=2) ---------
    N2 = 5
    x2 = jax.random.normal(kx2, (N2, INPUT_CHANNELS, H, W), jnp.float32)
    out2 = mask_rcnn_conv_upsample_head_forward(x2, params)
    jax.block_until_ready(out2)
    assert out2["mask"].shape == (N2, NUM_CLASSES, 2 * H, 2 * W)
    assert out2["vertex"].shape == (N2, 2 * NUM_KEYPOINTS, 2 * H, 2 * W)
    ref2 = _ref_forward(x2, params)
    np.testing.assert_allclose(np.asarray(out2["mask"]), np.asarray(ref2["mask"]), rtol=RTOL, atol=ATOL)
    np.testing.assert_allclose(np.asarray(out2["vertex"]), np.asarray(ref2["vertex"]), rtol=RTOL, atol=ATOL)

    print("KERNEL_OK")
</pallas_src>

<mosaic_0001>
module attributes {stable_mosaic.version = 11 : i64} {
  func.func @_fused_head_kernel(%arg0: i32, %arg1: memref<1x16x16x4xbf16, #tpu.memory_space<vmem>>, %arg2: memref<36x32xbf16, #tpu.memory_space<vmem>>, %arg3: memref<1x32xf32, #tpu.memory_space<vmem>>, %arg4: memref<288x32xbf16, #tpu.memory_space<vmem>>, %arg5: memref<1x32xf32, #tpu.memory_space<vmem>>, %arg6: memref<32x128xbf16, #tpu.memory_space<vmem>>, %arg7: memref<1x128xf32, #tpu.memory_space<vmem>>, %arg8: memref<128x128xbf16, #tpu.memory_space<vmem>>, %arg9: memref<1x128xf32, #tpu.memory_space<vmem>>, %arg10: memref<1x16x16x128xf32, #tpu.memory_space<vmem>>, %arg11: memref<1x18x32x4xbf16, #tpu.memory_space<vmem>>, %arg12: memref<1x18x32x32xbf16, #tpu.memory_space<vmem>>) attributes {dimension_semantics = [#tpu.dimension_semantics<parallel>], iteration_bounds = array<i64: 2>, scalar_prefetch = 0 : i64, scratch_operands = 2 : i64, tpu.core_type = #tpu.core_type<tc>, window_params = [{transform_indices = @transform_0, window_bounds = array<i64: 1, 16, 16, 4>}, {pipeline_mode = #tpu.pipeline_mode<synchronous>, transform_indices = @transform_1, window_bounds = array<i64: 36, 32>}, {pipeline_mode = #tpu.pipeline_mode<synchronous>, transform_indices = @transform_2, window_bounds = array<i64: 1, 32>}, {pipeline_mode = #tpu.pipeline_mode<synchronous>, transform_indices = @transform_3, window_bounds = array<i64: 288, 32>}, {pipeline_mode = #tpu.pipeline_mode<synchronous>, transform_indices = @transform_4, window_bounds = array<i64: 1, 32>}, {pipeline_mode = #tpu.pipeline_mode<synchronous>, transform_indices = @transform_5, window_bounds = array<i64: 32, 128>}, {pipeline_mode = #tpu.pipeline_mode<synchronous>, transform_indices = @transform_6, window_bounds = array<i64: 1, 128>}, {pipeline_mode = #tpu.pipeline_mode<synchronous>, transform_indices = @transform_7, window_bounds = array<i64: 128, 128>}, {pipeline_mode = #tpu.pipeline_mode<synchronous>, transform_indices = @transform_8, window_bounds = array<i64: 1, 128>}, {transform_indices = @transform_9, window_bounds = array<i64: 1, 16, 16, 128>}]} {
    %cst = arith.constant 0.000000e+00 : bf16
    %0 = vector.broadcast %cst : bf16 to vector<1x1x32x4xbf16>
    %c0 = arith.constant 0 : index
    %c0_0 = arith.constant 0 : index
    %c0_1 = arith.constant 0 : index
    %c0_2 = arith.constant 0 : index
    %1 = vector.load %arg11[%c0, %c0_0, %c0_1, %c0_2] : memref<1x18x32x4xbf16, #tpu.memory_space<vmem>>, vector<1x1x32x4xbf16>
    tpu.vector_store %arg11[%c0, %c0_0, %c0_1, %c0_2], %0 {strides = array<i32>} : memref<1x18x32x4xbf16, #tpu.memory_space<vmem>>, vector<1x1x32x4xbf16>,
    %cst_3 = arith.constant 0.000000e+00 : bf16
    %2 = vector.broadcast %cst_3 : bf16 to vector<1x1x32x4xbf16>
    %c0_4 = arith.constant 0 : index
    %c17 = arith.constant 17 : index
    %c0_5 = arith.constant 0 : index
    %c0_6 = arith.constant 0 : index
    %3 = vector.load %arg11[%c0_4, %c17, %c0_5, %c0_6] : memref<1x18x32x4xbf16, #tpu.memory_space<vmem>>, vector<1x1x32x4xbf16>
    tpu.vector_store %arg11[%c0_4, %c17, %c0_5, %c0_6], %2 {strides = array<i32>} : memref<1x18x32x4xbf16, #tpu.memory_space<vmem>>, vector<1x1x32x4xbf16>,
    %cst_7 = arith.constant 0.000000e+00 : bf16
    %4 = vector.broadcast %cst_7 : bf16 to vector<1x18x1x4xbf16>
    %c0_8 = arith.constant 0 : index
    %c0_9 = arith.constant 0 : index
    %c7 = arith.constant 7 : index
    %c0_10 = arith.constant 0 : index
    %5 = vector.load %arg11[%c0_8, %c0_9, %c7, %c0_10] : memref<1x18x32x4xbf16, #tpu.memory_space<vmem>>, vector<1x18x1x4xbf16>
    tpu.vector_store %arg11[%c0_8, %c0_9, %c7, %c0_10], %4 {strides = array<i32>} : memref<1x18x32x4xbf16, #tpu.memory_space<vmem>>, vector<1x18x1x4xbf16>,
    %cst_11 = arith.constant 0.000000e+00 : bf16
    %6 = vector.broadcast %cst_11 : bf16 to vector<1x18x1x4xbf16>
    %c0_12 = arith.constant 0 : index
    %c0_13 = arith.constant 0 : index
    %c24 = arith.constant 24 : index
    %c0_14 = arith.constant 0 : index
    %7 = vector.load %arg11[%c0_12, %c0_13, %c24, %c0_14] : memref<1x18x32x4xbf16, #tpu.memory_space<vmem>>, vector<1x18x1x4xbf16>
    tpu.vector_store %arg11[%c0_12, %c0_13, %c24, %c0_14], %6 {strides = array<i32>} : memref<1x18x32x4xbf16, #tpu.memory_space<vmem>>, vector<1x18x1x4xbf16>,
    %c0_15 = arith.constant 0 : index
    %c0_16 = arith.constant 0 : index
    %c0_17 = arith.constant 0 : index
    %c0_18 = arith.constant 0 : index
    %8 = vector.load %arg1[%c0_15, %c0_16, %c0_17, %c0_18] : memref<1x16x16x4xbf16, #tpu.memory_space<vmem>>, vector<1x16x16x4xbf16>
    %c0_19 = arith.constant 0 : index
    %c1 = arith.constant 1 : index
    %c8 = arith.constant 8 : index
    %c0_20 = arith.constant 0 : index
    %9 = vector.load %arg11[%c0_19, %c1, %c8, %c0_20] : memref<1x18x32x4xbf16, #tpu.memory_space<vmem>>, vector<1x16x16x4xbf16>
    tpu.vector_store %arg11[%c0_19, %c1, %c8, %c0_20], %8 {strides = array<i32>} : memref<1x18x32x4xbf16, #tpu.memory_space<vmem>>, vector<1x16x16x4xbf16>,
    %c0_21 = arith.constant 0 : index
    %c0_22 = arith.constant 0 : index
    %c7_23 = arith.constant 7 : index
    %c0_24 = arith.constant 0 : index
    %10 = vector.load %arg11[%c0_21, %c0_22, %c7_23, %c0_24] : memref<1x18x32x4xbf16, #tpu.memory_space<vmem>>, vector<1x16x16x4xbf16>
    %11 = vector.shape_cast %10 : vector<1x16x16x4xbf16> to vector<256x4xbf16>
    %c0_25 = arith.constant 0 : index
    %c0_26 = arith.constant 0 : index
    %c8_27 = arith.constant 8 : index
    %c0_28 = arith.constant 0 : index
    %12 = vector.load %arg11[%c0_25, %c0_26, %c8_27, %c0_28] : memref<1x18x32x4xbf16, #tpu.memory_space<vmem>>, vector<1x16x16x4xbf16>
    %13 = vector.shape_cast %12 : vector<1x16x16x4xbf16> to vector<256x4xbf16>
    %c0_29 = arith.constant 0 : index
    %c0_30 = arith.constant 0 : index
    %c9 = arith.constant 9 : index
    %c0_31 = arith.constant 0 : index
    %14 = vector.load %arg11[%c0_29, %c0_30, %c9, %c0_31] : memref<1x18x32x4xbf16, #tpu.memory_space<vmem>>, vector<1x16x16x4xbf16>
    %15 = vector.shape_cast %14 : vector<1x16x16x4xbf16> to vector<256x4xbf16>
    %c0_32 = arith.constant 0 : index
    %c1_33 = arith.constant 1 : index
    %c7_34 = arith.constant 7 : index
    %c0_35 = arith.constant 0 : index
    %16 = vector.load %arg11[%c0_32, %c1_33, %c7_34, %c0_35] : memref<1x18x32x4xbf16, #tpu.memory_space<vmem>>, vector<1x16x16x4xbf16>
    %17 = vector.shape_cast %16 : vector<1x16x16x4xbf16> to vector<256x4xbf16>
    %c0_36 = arith.constant 0 : index
    %c1_37 = arith.constant 1 : index
    %c8_38 = arith.constant 8 : index
    %c0_39 = arith.constant 0 : index
    %18 = vector.load %arg11[%c0_36, %c1_37, %c8_38, %c0_39] : memref<1x18x32x4xbf16, #tpu.memory_space<vmem>>, vector<1x16x16x4xbf16>
    %19 = vector.shape_cast %18 : vector<1x16x16x4xbf16> to vector<256x4xbf16>
    %c0_40 = arith.constant 0 : index
    %c1_41 = arith.constant 1 : index
    %c9_42 = arith.constant 9 : index
    %c0_43 = arith.constant 0 : index
    %20 = vector.load %arg11[%c0_40, %c1_41, %c9_42, %c0_43] : memref<1x18x32x4xbf16, #tpu.memory_space<vmem>>, vector<1x16x16x4xbf16>
    %21 = vector.shape_cast %20 : vector<1x16x16x4xbf16> to vector<256x4xbf16>
    %c0_44 = arith.constant 0 : index
    %c2 = arith.constant 2 : index
    %c7_45 = arith.constant 7 : index
    %c0_46 = arith.constant 0 : index
    %22 = vector.load %arg11[%c0_44, %c2, %c7_45, %c0_46] : memref<1x18x32x4xbf16, #tpu.memory_space<vmem>>, vector<1x16x16x4xbf16>
    %23 = vector.shape_cast %22 : vector<1x16x16x4xbf16> to vector<256x4xbf16>
    %c0_47 = arith.constant 0 : index
    %c2_48 = arith.constant 2 : index
    %c8_49 = arith.constant 8 : index
    %c0_50 = arith.constant 0 : index
    %24 = vector.load %arg11[%c0_47, %c2_48, %c8_49, %c0_50] : memref<1x18x32x4xbf16, #tpu.memory_space<vmem>>, vector<1x16x16x4xbf16>
    %25 = vector.shape_cast %24 : vector<1x16x16x4xbf16> to vector<256x4xbf16>
    %c0_51 = arith.constant 0 : index
    %c2_52 = arith.constant 2 : index
    %c9_53 = arith.constant 9 : index
    %c0_54 = arith.constant 0 : index
    %26 = vector.load %arg11[%c0_51, %c2_52, %c9_53, %c0_54] : memref<1x18x32x4xbf16, #tpu.memory_space<vmem>>, vector<1x16x16x4xbf16>
    %27 = vector.shape_cast %26 : vector<1x16x16x4xbf16> to vector<256x4xbf16>
    %28 = tpu.concatenate %11, %13, %15, %17, %19, %21, %23, %25, %27 in 1 : vector<256x4xbf16>, vector<256x4xbf16>, vector<256x4xbf16>, vector<256x4xbf16>, vector<256x4xbf16>, vector<256x4xbf16>, vector<256x4xbf16>, vector<256x4xbf16>, vector<256x4xbf16> -> vector<256x36xbf16>
    %c0_55 = arith.constant 0 : index
    %c0_56 = arith.constant 0 : index
    %29 = vector.load %arg2[%c0_55, %c0_56] : memref<36x32xbf16, #tpu.memory_space<vmem>>, vector<36x32xbf16>
    %cst_57 = arith.constant dense<0.000000e+00> : vector<256x32xf32>
    %30 = tpu.matmul %28, %29, %cst_57 {dimension_numbers = #tpu.dot_dimension_numbers<[1], [0], [0], [1], [0, 0, 1, 1], [], []>} : vector<256x36xbf16>, vector<36x32xbf16>, vector<256x32xf32> -> vector<256x32xf32>
    %c0_58 = arith.constant 0 : index
    %c0_59 = arith.constant 0 : index
    %31 = vector.load %arg3[%c0_58, %c0_59] : memref<1x32xf32, #tpu.memory_space<vmem>>, vector<1x32xf32>
    %32 = vector.broadcast %31 : vector<1x32xf32> to vector<256x32xf32>
    %33 = arith.addf %30, %32 : vector<256x32xf32>
    %cst_60 = arith.constant 0.000000e+00 : f32
    %34 = vector.broadcast %cst_60 : f32 to vector<256x32xf32>
    %35 = arith.maximumf %33, %34 : vector<256x32xf32>
    %cst_61 = arith.constant 0.000000e+00 : bf16
    %36 = vector.broadcast %cst_61 : bf16 to vector<1x1x32x32xbf16>
    %c0_62 = arith.constant 0 : index
    %c0_63 = arith.constant 0 : index
    %c0_64 = arith.constant 0 : index
    %c0_65 = arith.constant 0 : index
    %37 = vector.load %arg12[%c0_62, %c0_63, %c0_64, %c0_65] : memref<1x18x32x32xbf16, #tpu.memory_space<vmem>>, vector<1x1x32x32xbf16>
    tpu.vector_store %arg12[%c0_62, %c0_63, %c0_64, %c0_65], %36 {strides = array<i32>} : memref<1x18x32x32xbf16, #tpu.memory_space<vmem>>, vector<1x1x32x32xbf16>,
    %cst_66 = arith.constant 0.000000e+00 : bf16
    %38 = vector.broadcast %cst_66 : bf16 to vector<1x1x32x32xbf16>
    %c0_67 = arith.constant 0 : index
    %c17_68 = arith.constant 17 : index
    %c0_69 = arith.constant 0 : index
    %c0_70 = arith.constant 0 : index
    %39 = vector.load %arg12[%c0_67, %c17_68, %c0_69, %c0_70] : memref<1x18x32x32xbf16, #tpu.memory_space<vmem>>, vector<1x1x32x32xbf16>
    tpu.vector_store %arg12[%c0_67, %c17_68, %c0_69, %c0_70], %38 {strides = array<i32>} : memref<1x18x32x32xbf16, #tpu.memory_space<vmem>>, vector<1x1x32x32xbf16>,
    %cst_71 = arith.constant 0.000000e+00 : bf16
    %40 = vector.broadcast %cst_71 : bf16 to vector<1x18x1x32xbf16>
    %c0_72 = arith.constant 0 : index
    %c0_73 = arith.constant 0 : index
    %c7_74 = arith.constant 7 : index
    %c0_75 = arith.constant 0 : index
    %41 = vector.load %arg12[%c0_72, %c0_73, %c7_74, %c0_75] : memref<1x18x32x32xbf16, #tpu.memory_space<vmem>>, vector<1x18x1x32xbf16>
    tpu.vector_store %arg12[%c0_72, %c0_73, %c7_74, %c0_75], %40 {strides = array<i32>} : memref<1x18x32x32xbf16, #tpu.memory_space<vmem>>, vector<1x18x1x32xbf16>,
    %cst_76 = arith.constant 0.000000e+00 : bf16
    %42 = vector.broadcast %cst_76 : bf16 to vector<1x18x1x32xbf16>
    %c0_77 = arith.constant 0 : index
    %c0_78 = arith.constant 0 : index
    %c24_79 = arith.constant 24 : index
    %c0_80 = arith.constant 0 : index
    %43 = vector.load %arg12[%c0_77, %c0_78, %c24_79, %c0_80] : memref<1x18x32x32xbf16, #tpu.memory_space<vmem>>, vector<1x18x1x32xbf16>
    tpu.vector_store %arg12[%c0_77, %c0_78, %c24_79, %c0_80], %42 {strides = array<i32>} : memref<1x18x32x32xbf16, #tpu.memory_space<vmem>>, vector<1x18x1x32xbf16>,
    %44 = arith.truncf %35 : vector<256x32xf32> to vector<256x32xbf16>
    %45 = vector.shape_cast %44 : vector<256x32xbf16> to vector<1x16x16x32xbf16>
    %c0_81 = arith.constant 0 : index
    %c1_82 = arith.constant 1 : index
    %c8_83 = arith.constant 8 : index
    %c0_84 = arith.constant 0 : index
    %46 = vector.load %arg12[%c0_81, %c1_82, %c8_83, %c0_84] : memref<1x18x32x32xbf16, #tpu.memory_space<vmem>>, vector<1x16x16x32xbf16>
    tpu.vector_store %arg12[%c0_81, %c1_82, %c8_83, %c0_84], %45 {strides = array<i32>} : memref<1x18x32x32xbf16, #tpu.memory_space<vmem>>, vector<1x16x16x32xbf16>,
    %c0_85 = arith.constant 0 : index
    %c0_86 = arith.constant 0 : index
    %c7_87 = arith.constant 7 : index
    %c0_88 = arith.constant 0 : index
    %47 = vector.load %arg12[%c0_85, %c0_86, %c7_87, %c0_88] : memref<1x18x32x32xbf16, #tpu.memory_space<vmem>>, vector<1x16x16x32xbf16>
    %48 = vector.shape_cast %47 : vector<1x16x16x32xbf16> to vector<256x32xbf16>
    %c0_89 = arith.constant 0 : index
    %c0_90 = arith.constant 0 : index
    %c8_91 = arith.constant 8 : index
    %c0_92 = arith.constant 0 : index
    %49 = vector.load %arg12[%c0_89, %c0_90, %c8_91, %c0_92] : memref<1x18x32x32xbf16, #tpu.memory_space<vmem>>, vector<1x16x16x32xbf16>
    %50 = vector.shape_cast %49 : vector<1x16x16x32xbf16> to vector<256x32xbf16>
    %c0_93 = arith.constant 0 : index
    %c0_94 = arith.constant 0 : index
    %c9_95 = arith.constant 9 : index
    %c0_96 = arith.constant 0 : index
    %51 = vector.load %arg12[%c0_93, %c0_94, %c9_95, %c0_96] : memref<1x18x32x32xbf16, #tpu.memory_space<vmem>>, vector<1x16x16x32xbf16>
    %52 = vector.shape_cast %51 : vector<1x16x16x32xbf16> to vector<256x32xbf16>
    %c0_97 = arith.constant 0 : index
    %c1_98 = arith.constant 1 : index
    %c7_99 = arith.constant 7 : index
    %c0_100 = arith.constant 0 : index
    %53 = vector.load %arg12[%c0_97, %c1_98, %c7_99, %c0_100] : memref<1x18x32x32xbf16, #tpu.memory_space<vmem>>, vector<1x16x16x32xbf16>
    %54 = vector.shape_cast %53 : vector<1x16x16x32xbf16> to vector<256x32xbf16>
    %c0_101 = arith.constant 0 : index
    %c1_102 = arith.constant 1 : index
    %c8_103 = arith.constant 8 : index
    %c0_104 = arith.constant 0 : index
    %55 = vector.load %arg12[%c0_101, %c1_102, %c8_103, %c0_104] : memref<1x18x32x32xbf16, #tpu.memory_space<vmem>>, vector<1x16x16x32xbf16>
    %56 = vector.shape_cast %55 : vector<1x16x16x32xbf16> to vector<256x32xbf16>
    %c0_105 = arith.constant 0 : index
    %c1_106 = arith.constant 1 : index
    %c9_107 = arith.constant 9 : index
    %c0_108 = arith.constant 0 : index
    %57 = vector.load %arg12[%c0_105, %c1_106, %c9_107, %c0_108] : memref<1x18x32x32xbf16, #tpu.memory_space<vmem>>, vector<1x16x16x32xbf16>
    %58 = vector.shape_cast %57 : vector<1x16x16x32xbf16> to vector<256x32xbf16>
    %c0_109 = arith.constant 0 : index
    %c2_110 = arith.constant 2 : index
    %c7_111 = arith.constant 7 : index
    %c0_112 = arith.constant 0 : index
    %59 = vector.load %arg12[%c0_109, %c2_110, %c7_111, %c0_112] : memref<1x18x32x32xbf16, #tpu.memory_space<vmem>>, vector<1x16x16x32xbf16>
    %60 = vector.shape_cast %59 : vector<1x16x16x32xbf16> to vector<256x32xbf16>
    %c0_113 = arith.constant 0 : index
    %c2_114 = arith.constant 2 : index
    %c8_115 = arith.constant 8 : index
    %c0_116 = arith.constant 0 : index
    %61 = vector.load %arg12[%c0_113, %c2_114, %c8_115, %c0_116] : memref<1x18x32x32xbf16, #tpu.memory_space<vmem>>, vector<1x16x16x32xbf16>
    %62 = vector.shape_cast %61 : vector<1x16x16x32xbf16> to vector<256x32xbf16>
    %c0_117 = arith.constant 0 : index
    %c2_118 = arith.constant 2 : index
    %c9_119 = arith.constant 9 : index
    %c0_120 = arith.constant 0 : index
    %63 = vector.load %arg12[%c0_117, %c2_118, %c9_119, %c0_120] : memref<1x18x32x32xbf16, #tpu.memory_space<vmem>>, vector<1x16x16x32xbf16>
    %64 = vector.shape_cast %63 : vector<1x16x16x32xbf16> to vector<256x32xbf16>
    %65 = tpu.concatenate %48, %50, %52, %54, %56, %58, %60, %62, %64 in 1 : vector<256x32xbf16>, vector<256x32xbf16>, vector<256x32xbf16>, vector<256x32xbf16>, vector<256x32xbf16>, vector<256x32xbf16>, vector<256x32xbf16>, vector<256x32xbf16>, vector<256x32xbf16> -> vector<256x288xbf16>
    %c0_121 = arith.constant 0 : index
    %c0_122 = arith.constant 0 : index
    %66 = vector.load %arg4[%c0_121, %c0_122] : memref<288x32xbf16, #tpu.memory_space<vmem>>, vector<288x32xbf16>
    %cst_123 = arith.constant dense<0.000000e+00> : vector<256x32xf32>
    %67 = tpu.matmul %65, %66, %cst_123 {dimension_numbers = #tpu.dot_dimension_numbers<[1], [0], [0], [1], [0, 0, 1, 1], [], []>} : vector<256x288xbf16>, vector<288x32xbf16>, vector<256x32xf32> -> vector<256x32xf32>
    %c0_124 = arith.constant 0 : index
    %c0_125 = arith.constant 0 : index
    %68 = vector.load %arg5[%c0_124, %c0_125] : memref<1x32xf32, #tpu.memory_space<vmem>>, vector<1x32xf32>
    %69 = vector.broadcast %68 : vector<1x32xf32> to vector<256x32xf32>
    %70 = arith.addf %67, %69 : vector<256x32xf32>
    %cst_126 = arith.constant 0.000000e+00 : f32
    %71 = vector.broadcast %cst_126 : f32 to vector<256x32xf32>
    %72 = arith.maximumf %70, %71 : vector<256x32xf32>
    %73 = arith.truncf %72 : vector<256x32xf32> to vector<256x32xbf16>
    %c0_127 = arith.constant 0 : index
    %c0_128 = arith.constant 0 : index
    %74 = vector.load %arg6[%c0_127, %c0_128] : memref<32x128xbf16, #tpu.memory_space<vmem>>, vector<32x128xbf16>
    %cst_129 = arith.constant dense<0.000000e+00> : vector<256x128xf32>
    %75 = tpu.matmul %73, %74, %cst_129 {dimension_numbers = #tpu.dot_dimension_numbers<[1], [0], [0], [1], [0, 0, 1, 1], [], []>} : vector<256x32xbf16>, vector<32x128xbf16>, vector<256x128xf32> -> vector<256x128xf32>
    %c0_130 = arith.constant 0 : index
    %c0_131 = arith.constant 0 : index
    %76 = vector.load %arg7[%c0_130, %c0_131] : memref<1x128xf32, #tpu.memory_space<vmem>>, vector<1x128xf32>
    %77 = vector.broadcast %76 : vector<1x128xf32> to vector<256x128xf32>
    %78 = arith.addf %75, %77 : vector<256x128xf32>
    %cst_132 = arith.constant 0.000000e+00 : f32
    %79 = vector.broadcast %cst_132 : f32 to vector<256x128xf32>
    %80 = arith.maximumf %78, %79 : vector<256x128xf32>
    %81 = arith.truncf %80 : vector<256x128xf32> to vector<256x128xbf16>
    %c0_133 = arith.constant 0 : index
    %c0_134 = arith.constant 0 : index
    %82 = vector.load %arg8[%c0_133, %c0_134] : memref<128x128xbf16, #tpu.memory_space<vmem>>, vector<128x128xbf16>
    %cst_135 = arith.constant dense<0.000000e+00> : vector<256x128xf32>
    %83 = tpu.matmul %81, %82, %cst_135 {dimension_numbers = #tpu.dot_dimension_numbers<[1], [0], [0], [1], [0, 0, 1, 1], [], []>} : vector<256x128xbf16>, vector<128x128xbf16>, vector<256x128xf32> -> vector<256x128xf32>
    %c0_136 = arith.constant 0 : index
    %c0_137 = arith.constant 0 : index
    %84 = vector.load %arg9[%c0_136, %c0_137] : memref<1x128xf32, #tpu.memory_space<vmem>>, vector<1x128xf32>
    %85 = vector.broadcast %84 : vector<1x128xf32> to vector<256x128xf32>
    %86 = arith.addf %83, %85 : vector<256x128xf32>
    %87 = vector.shape_cast %86 : vector<256x128xf32> to vector<1x16x16x128xf32>
    %c0_138 = arith.constant 0 : index
    %c0_139 = arith.constant 0 : index
    %c0_140 = arith.constant 0 : index
    %c0_141 = arith.constant 0 : index
    %88 = vector.load %arg10[%c0_138, %c0_139, %c0_140, %c0_141] : memref<1x16x16x128xf32, #tpu.memory_space<vmem>>, vector<1x16x16x128xf32>
    tpu.vector_store %arg10[%c0_138, %c0_139, %c0_140, %c0_141], %87 {strides = array<i32>} : memref<1x16x16x128xf32, #tpu.memory_space<vmem>>, vector<1x16x16x128xf32>,
    return
  }
  func.func @transform_0(%arg0: i32) -> (i32, i32, i32, i32) {
    %c0_i32 = arith.constant 0 : i32
    %c0_i32_0 = arith.constant 0 : i32
    %c0_i32_1 = arith.constant 0 : i32
    %c0_i32_2 = arith.constant 0 : i32
    return %arg0, %c0_i32, %c0_i32_0, %c0_i32_1 : i32, i32, i32, i32
  }
  func.func @transform_1(%arg0: i32) -> (i32, i32) {
    %c0_i32 = arith.constant 0 : i32
    %c0_i32_0 = arith.constant 0 : i32
    %c0_i32_1 = arith.constant 0 : i32
    return %c0_i32, %c0_i32_0 : i32, i32
  }
  func.func @transform_2(%arg0: i32) -> (i32, i32) {
    %c0_i32 = arith.constant 0 : i32
    %c0_i32_0 = arith.constant 0 : i32
    %c0_i32_1 = arith.constant 0 : i32
    return %c0_i32, %c0_i32_0 : i32, i32
  }
  func.func @transform_3(%arg0: i32) -> (i32, i32) {
    %c0_i32 = arith.constant 0 : i32
    %c0_i32_0 = arith.constant 0 : i32
    %c0_i32_1 = arith.constant 0 : i32
    return %c0_i32, %c0_i32_0 : i32, i32
  }
  func.func @transform_4(%arg0: i32) -> (i32, i32) {
    %c0_i32 = arith.constant 0 : i32
    %c0_i32_0 = arith.constant 0 : i32
    %c0_i32_1 = arith.constant 0 : i32
    return %c0_i32, %c0_i32_0 : i32, i32
  }
  func.func @transform_5(%arg0: i32) -> (i32, i32) {
    %c0_i32 = arith.constant 0 : i32
    %c0_i32_0 = arith.constant 0 : i32
    %c0_i32_1 = arith.constant 0 : i32
    return %c0_i32, %c0_i32_0 : i32, i32
  }
  func.func @transform_6(%arg0: i32) -> (i32, i32) {
    %c0_i32 = arith.constant 0 : i32
    %c0_i32_0 = arith.constant 0 : i32
    %c0_i32_1 = arith.constant 0 : i32
    return %c0_i32, %c0_i32_0 : i32, i32
  }
  func.func @transform_7(%arg0: i32) -> (i32, i32) {
    %c0_i32 = arith.constant 0 : i32
    %c0_i32_0 = arith.constant 0 : i32
    %c0_i32_1 = arith.constant 0 : i32
    return %c0_i32, %c0_i32_0 : i32, i32
  }
  func.func @transform_8(%arg0: i32) -> (i32, i32) {
    %c0_i32 = arith.constant 0 : i32
    %c0_i32_0 = arith.constant 0 : i32
    %c0_i32_1 = arith.constant 0 : i32
    return %c0_i32, %c0_i32_0 : i32, i32
  }
  func.func @transform_9(%arg0: i32) -> (i32, i32, i32, i32) {
    %c0_i32 = arith.constant 0 : i32
    %c0_i32_0 = arith.constant 0 : i32
    %c0_i32_1 = arith.constant 0 : i32
    %c0_i32_2 = arith.constant 0 : i32
    return %arg0, %c0_i32, %c0_i32_0, %c0_i32_1 : i32, i32, i32, i32
  }
}

</mosaic_0001>

<bundles_post_ra>
// kernel: mask_rcnn_conv_upsample_head_forward.1
= control target key start
LH: loop header
LB: loop body
LE: loop exit
PB: predicated region body
PF: predicated region fallthrough
CT: control target
= control target key end

     0   :  { %s8628_s30 = smov 0   ;;  %s12765_s0 = inlined_call_operand.vmem [shape: bf16[2,16,16,4], index: 0, kind: input, shape index: {}]   ;;  %s12766_s1 = inlined_call_operand.vmem [shape: bf16[36,32], index: 1, kind: input, shape index: {}]   ;;  %s12767_s2 = inlined_call_operand.vmem [shape: f32[1,32], index: 2, kind: input, shape index: {}]   ;;  %s12768_s3 = inlined_call_operand.vmem [shape: bf16[288,32], index: 3, kind: input, shape index: {}]   ;;  %s12769_s4 = inlined_call_operand.vmem [shape: f32[1,32], index: 4, kind: input, shape index: {}]   ;;  %s12770_s5 = inlined_call_operand.vmem [shape: bf16[32,128], index: 5, kind: input, shape index: {}]   ;;  %s12771_s6 = inlined_call_operand.vmem [shape: f32[1,128], index: 6, kind: input, shape index: {}]   ;;  %s12772_s7 = inlined_call_operand.vmem [shape: bf16[128,128], index: 7, kind: input, shape index: {}]   ;;  %s12773_s8 = inlined_call_operand.vmem [shape: f32[1,128], index: 8, kind: input, shape index: {}]   ;;  %s12774_s9 = inlined_call_operand.vmem [shape: f32[2,16,16,128], index: 9, kind: output, shape index: {}]  }
   0x1 LB: > { %s7741_s10 = sadd.s32 4294967295, %s8565_s30   ;;  %p7745_p0 = scmp.ge.s32.totalorder %s8565_s30, 1  ;;  %s8565_s30 = sphi %s8628_s30, %s19_s30  }
   0x2   : > { %p287_p1 = scmp.lt.s32.totalorder %s8565_s30, 3 }
   0x4   : > { %p288_p2 = pnand %p7745_p0, %p287_p1 }
   0x6   : > { %291 = sbr.rel (%p288_p2) target bundleno = 1569 (0x621), region = 56 }
   0xb   : > { %vm334_vm0 = vcmask 27648   ;;  %p323_p3 = scmp.lt.s32.totalorder %s7741_s10, 1  ;;  %v12775_v0 = vmov 0   ;;  %vm344_vm1 = vcmask 27651   ;;  %vm12794_vm2 = vsmask.f32 7950 }
   0xc   : > { %336 = vst.msk [vmem:[#allocation2 + $0x4] sm:$0xf] %vm334_vm0, %v12775_v0  ;;  %vm401_vm3 = vcmask 24576   ;;  %v350_v1 = vld [vmem:[#allocation2 + $0x10] sm:$0x8]  ;;  %vm8664_vm6 = vmand %vm344_vm1, %vm12794_vm2  ;;  %s8568_s15 = smov 4  }
   0xd   : > { %337 = vst.msk [vmem:[#allocation2 + $0x8] sm:$0xf] %vm334_vm0, %v12775_v0  ;;  %s13353_s10 = smov (!%p323_p3, %s7741_s10), 1  ;;  %vm402_vm4 = vsmask.f32 256  ;;  %v351_v13 = vsel %vm8664_vm6, 0, %v350_v1 }
   0xe   : > { %335 = vst.msk [vmem:[#allocation2] sm:$0xf] %vm334_vm0, %v12775_v0  ;;  %s8400_s11 = sshll.u32 %s13353_s10, 7  ;;  %vm941_vm5 = vsmask.f32 3328  ;;  %vm8675_vm7 = vmand %vm401_vm3, %vm402_vm4  ;;  %s8569_s16 = smov 16  }
   0xf   : > { %338 = vst.msk [vmem:[#allocation2 + $0xc] sm:$0xf] %vm334_vm0, %v12775_v0  ;;  %s8652_s14 = scalar_lea.vmem %s12765_s0, %s8400_s11  ;;  %v353_v8 = vld [vmem:[#allocation2 + $0x20] sm:$0x8]  ;;  %vm942_vm8 = vsmask.f32 7440 }
  0x10   : > { %340 = vst.msk [vmem:[#allocation2 + $0x110] sm:$0xf] %vm334_vm0, %v12775_v0  ;;  %v458_v2 = vld [vmem:[%s8652_s14] sm:$0xf]  ;;  %v459_v3 = vld [vmem:[%s8652_s14 + $0x4] sm:$0xf]  ;;  %vm8710_vm10 = vmor %vm941_vm5, %vm942_vm8 }
  0x11   : > { %341 = vst.msk [vmem:[#allocation2 + $0x114] sm:$0xf] %vm334_vm0, %v12775_v0  ;;  %v460_v4 = vld [vmem:[%s8652_s14 + $0x8] sm:$0xf]  ;;  %v461_v5 = vld [vmem:[%s8652_s14 + $0xc] sm:$0xf] }
  0x12   : > { %342 = vst.msk [vmem:[#allocation2 + $0x118] sm:$0xf] %vm334_vm0, %v12775_v0  ;;  %v354_v19 = vsel %vm8664_vm6, 0, %v353_v8  ;;  %v407_v24 = vld [vmem:[#allocation2 + $0x1c] sm:$0x1]  ;;  %s8570_s17 = smov 28  }
  0x13   : > { %343 = vst.msk [vmem:[#allocation2 + $0x11c] sm:$0xf] %vm334_vm0, %v12775_v0  ;;  %v8670_v7 = vld [vmem:[#allocation2 + $0x4] sm:$0xf]  ;;  %v408_v26 = vsel %vm8675_vm7, 0, %v407_v24  ;;  %s8571_s18 = smov 12  }
  0x14   : > { %v8402_v9 = vld [vmem:[#allocation2 + $0x4] sm:$0xff]  ;;  %491 = vst.msk [vmem:[#allocation2 + $0x14] sm:$0xf] %vm334_vm0, %v458_v2  ;;  %v579_v12 = vshrl.u32 %v8670_v7, 16  ;;  %v582_v14 = vshll.u32 %v8670_v7, 16  ;;  %s8572_s19 = smov 8  }
  0x15   : > { %v8679_v11 = vld [vmem:[#allocation2 + $0x8] sm:$0xf]  ;;  %492 = vst.msk [vmem:[#allocation2 + $0x18] sm:$0xf] %vm334_vm0, %v459_v3  ;;  %2577 = vrot.lane.b32.xlu0 %v8402_v9, %s8568_s15  ;;  %vm571_vm9 = vsmask.f32 4368 }
  0x16   : > { %v588_v15 = vshrl.u32 %v8679_v11, 16  ;;  %v591_v16 = vshll.u32 %v8679_v11, 16  ;;  %493 = vst.msk [vmem:[#allocation2 + $0x24] sm:$0xf] %vm334_vm0, %v460_v4  ;;  %v404_v17 = vld [vmem:[#allocation2 + $0xc] sm:$0x1]  ;;  %vm8744_vm11 = vmor %vm402_vm4, %vm571_vm9 }
  0x17   : > { %v944_v18 = vrot.slane %v579_v12, 4  ;;  %494 = vst.msk [vmem:[#allocation2 + $0x28] sm:$0xf] %vm334_vm0, %v461_v5  ;;  %v405_v20 = vsel %vm8675_vm7, 0, %v404_v17  ;;  %v945_v21 = vrot.slane %v582_v14, 5  ;;  %s8573_s20 = smov 24  }
  0x18   : > { %v948_v22 = vrot.slane %v591_v16, 5  ;;  %v950_v23 = vrot.slane %v588_v15, 4  ;;  %352 = vst [vmem:[#allocation2 + $0x10] sm:$0x8] %v351_v13  ;;  %v8705_v28 = vld [vmem:[#allocation2 + $0x2c] sm:$0x1] }
  0x19   : > { %406 = vst [vmem:[#allocation2 + $0xc] sm:$0x1] %v405_v20  ;;  %v946_v25 = vor.u32 %v945_v21, %v944_v18  ;;  %v411_v40 = vsel %vm8675_vm7, 0, %v8705_v28  ;;  %s8574_s21 = smov 20   ;;  %s8575_s22 = smov 32   ;;  %vm3233_vm12 = vcmask 31744  }
  0x1a   : > { %v951_v27 = vor.u32 %v950_v23, %v948_v22  ;;  %355 = vst [vmem:[#allocation2 + $0x20] sm:$0x8] %v354_v19  ;;  %v462_v19 = vld [vmem:[%s8652_s14 + $0x10] sm:$0xf]  ;;  %vm3282_vm13 = vcmask 64512   ;;  %vm3315_vm14 = vcmask 97280  }
  0x1b   : > { %v8707_v29 = vld [vmem:[#allocation2 + $0x14] sm:$0xf]  ;;  %v947_v31 = vrot.slane %v946_v25, 4  ;;  %409 = vst [vmem:[#allocation2 + $0x1c] sm:$0x1] %v408_v26  ;;  %vm3348_vm15 = vcmask 130048  }
  0x1c   : > { %v8403_v32 = vld [vmem:[#allocation2 + $0x14] sm:$0xff]  ;;  %v1222_v35 = vshrl.u32 %v8707_v29, 16  ;;  %v1225_v36 = vshll.u32 %v8707_v29, 16  ;;  %v952_v44 = vrot.slane %v951_v27, 4  ;;  %412 = vst [vmem:[#allocation2 + $0x2c] sm:$0x1] %v411_v40 }
  0x1d   : > { %v8418_v33 = vld [vmem:[#allocation2 + $0x14] sm:$0xff]  ;;  %v8720_v39 = vld [vmem:[#allocation2 + $0x24] sm:$0xf]  ;;  %2579 = vrot.lane.b32.xlu2 %v8403_v32, %s8568_s15  ;;  %v949_v43 = vsel %vm8710_vm10, %v947_v31, %v948_v22  ;;  %495 = vst.msk [vmem:[#allocation2 + $0x34] sm:$0xf] %vm334_vm0, %v462_v19  ;;  %vm3570_vm1 = vcmask 1041408  }
  0x1e   : > { %v8714_v34 = vld [vmem:[#allocation2 + $0x18] sm:$0xf]  ;;  %2849 = vrot.lane.b32.xlu1 %v8418_v33, %s8569_s16  ;;  %v8434_v41 = vld [vmem:[#allocation2 + $0x24] sm:$0xff]  ;;  %v1224_v42 = vrot.slane %v1222_v35, 7  ;;  %v1863_v46 = vshrl.u32 %v8720_v39, 16  ;;  %v1866_v49 = vshll.u32 %v8720_v39, 16  ;;  %v2609_v61 = vunpack.c.l.b16 %v949_v43 }
  0x1f   : > { %v1231_v37 = vshrl.u32 %v8714_v34, 16  ;;  %v1234_v38 = vshll.u32 %v8714_v34, 16  ;;  %v8731_v45 = vld [vmem:[#allocation2 + $0x28] sm:$0xf]  ;;  %v1168_v47 = vld [vmem:[#allocation2 + $0x10] sm:$0x8]  ;;  %3121 = vrot.lane.b32.xlu0 %v8434_v41, %s8570_s17 }
  0x20   : > { %v1872_v50 = vshrl.u32 %v8731_v45, 16  ;;  %v1875_v51 = vshll.u32 %v8731_v45, 16  ;;  %v8739_v52 = vld [vmem:[#allocation2 + $0x24] sm:$0xf]  ;;  %v1217_v54 = vshrl.u32 %v1168_v47, 16  ;;  %v1227_v55 = vor.u32 %v1225_v36, %v1224_v42  ;;  %s8576_s12 = smov 96  }
  0x21   : > { %v1233_v48 = vrot.slane %v1231_v37, 7  ;;  %v1229_v56 = vrot.slane %v1224_v42, 4  ;;  %v925_v57 = vld [vmem:[#allocation2 + $0xc] sm:$0x1]  ;;  %v1865_v58 = vrot.slane %v1863_v46, 7  ;;  %v8419_v2 = vld [vmem:[#allocation2 + $0x24] sm:$0xff] }
  0x22   : > { %v954_v60 = vshll.u32 %v925_v57, 16  ;;  %v1809_v62 = vld [vmem:[#allocation2 + $0x20] sm:$0x8]  ;;  %v1874_v63 = vrot.slane %v1872_v50, 7  ;;  %v7766_v3 = vrot.slane %v1217_v54, 11  ;;  %v1244_v24 = vshrl.u32 %v8739_v52, 16 }
  0x23   : > { %v1236_v59 = vor.u32 %v1234_v38, %v1233_v48  ;;  %v1171_v1 = vld [vmem:[#allocation2 + $0x20] sm:$0x8]  ;;  %v1858_v4 = vshrl.u32 %v1809_v62, 16  ;;  %v1868_v5 = vor.u32 %v1866_v49, %v1865_v58  ;;  %v1870_v8 = vrot.slane %v1865_v58, 4  ;;  %v8765_v23 = vld [vmem:[#allocation2 + $0x28] sm:$0xf] }
  0x24   : > { %v956_v13 = vrot.slane %v954_v60, 5  ;;  %v1877_v17 = vor.u32 %v1875_v51, %v1874_v63  ;;  %v1239_v18 = vshrl.u32 %v1171_v1, 16  ;;  %v1228_v20 = vsel %vm8744_vm11, %v7766_v3, %v1227_v55  ;;  %v8768_v25 = vld [vmem:[#allocation2 + $0x14] sm:$0xf]  ;;  %v8780_v47 = vld [vmem:[#allocation2 + $0x18] sm:$0xf] }
  0x25   : > { %v1237_v9 = vsel %vm8744_vm11, %v1229_v56, %v1236_v59  ;;  %v7782_v22 = vrot.slane %v1858_v4, 11  ;;  %v2689_v26 = vunpack.c.l.b16 %v1228_v20  ;;  %v463_v32 = vld [vmem:[%s8652_s14 + $0x14] sm:$0xf]  ;;  %2851 = vrot.lane.b32.xlu2 %v8419_v2, %s8569_s16  ;;  %v1246_v43 = vrot.slane %v1244_v24, 7  ;;  %v926_v55 = vld [vmem:[#allocation2 + $0x1c] sm:$0x1] }
  0x26   : > { %v2690_v21 = vunpack.c.l.b16 %v1237_v9  ;;  %v957_v27 = vsel %vm8710_vm10, %v952_v44, %v956_v13  ;;  %v1878_v28 = vsel %vm8744_vm11, %v1870_v8, %v1877_v17  ;;  %v7767_v31 = vrot.slane %v1239_v18, 11  ;;  %496 = vst.msk [vmem:[#allocation2 + $0x38] sm:$0xf] %vm334_vm0, %v463_v32  ;;  %v1568_v17 = vld [vmem:[#allocation2 + $0x1c] sm:$0x1]  ;;  %s8577_s13 = smov 64  }
  0x27   : > { %v2610_v33 = vunpack.c.l.b16 %v957_v27  ;;  %v1869_v41 = vsel %vm8744_vm11, %v7782_v22, %v1868_v5  ;;  %v2962_v42 = vunpack.c.l.b16 %v1878_v28  ;;  %v1247_v54 = vshll.u32 %v8739_v52, 16  ;;  %v464_v5 = vld [vmem:[%s8652_s14 + $0x18] sm:$0xf]  ;;  %s8401_s27 = sshll.u32 %s13353_s10, 8 }
  0x28   : > { %v2721_v44 = vpack.c.b16 %v2690_v21, %v2689_v26  ;;  %v2961_v48 = vunpack.c.l.b16 %v1869_v41  ;;  %v1253_v40 = vshrl.u32 %v8765_v23, 16  ;;  %v1251_v57 = vrot.slane %v1246_v43, 4  ;;  %497 = vst.msk [vmem:[#allocation2 + $0x44] sm:$0xf] %vm334_vm0, %v464_v5  ;;  %s12682_s23 = scalar_lea.vmem %s12774_s9, %s8401_s27 }
  0x29   : > { %v2641_v56 = vpack.c.b16 %v2610_v33, %v2609_v61  ;;  %v1256_v58 = vshll.u32 %v8765_v23, 16  ;;  %v601_v59 = vshrl.u32 %v8768_v25, 16  ;;  %v1249_v62 = vor.u32 %v1247_v54, %v1246_v43 }
  0x2a   : > { %2737 = vrot.lane.b32.xlu1 %v2721_v44, %s8571_s18  ;;  %v2993_v60 = vpack.c.b16 %v2962_v42, %v2961_v48  ;;  %v1255_v63 = vrot.slane %v1253_v40, 7  ;;  %v604_v1 = vshll.u32 %v8768_v25, 16  ;;  %v610_v61 = vshrl.u32 %v8780_v47, 16  ;;  %v465_v42 = vld [vmem:[%s8652_s14 + $0x1c] sm:$0xf] }
  0x2b   : > { %2657 = vrot.lane.b32.xlu0 %v2641_v56, %s8572_s19  ;;  %v613_v2 = vshll.u32 %v8780_v47, 16  ;;  %v958_v3 = vrot.slane %v601_v59, 4  ;;  %v968_v4 = vshll.u32 %v926_v55, 16  ;;  %v1250_v8 = vsel %vm8744_vm11, %v7767_v31, %v1249_v62  ;;  %498 = vst.msk [vmem:[#allocation2 + $0x48] sm:$0xf] %vm334_vm0, %v465_v42 }
  0x2c   : > { %v1258_v9 = vor.u32 %v1256_v58, %v1255_v63  ;;  %v959_v13 = vrot.slane %v604_v1, 5  ;;  %v1584_v18 = vrot.slane %v1222_v35, 4  ;;  %v2691_v19 = vunpack.c.l.b16 %v1250_v8  ;;  %v413_v42 = vld [vmem:[#allocation2 + $0x3c] sm:$0x1] }
  0x2d   : > { %v962_v20 = vrot.slane %v613_v2, 5  ;;  %v964_v21 = vrot.slane %v610_v61, 4  ;;  %v970_v22 = vrot.slane %v968_v4, 5  ;;  %v1585_v28 = vrot.slane %v1225_v36, 5  ;;  %3009 = vrot.lane.b32.xlu2 %v2993_v60, %s8573_s20 }
  0x2e   : > { %v1259_v26 = vsel %vm8744_vm11, %v1251_v57, %v1258_v9  ;;  %v960_v27 = vor.u32 %v959_v13, %v958_v3  ;;  %v1588_v35 = vrot.slane %v1234_v38, 5  ;;  %v1590_v33 = vrot.slane %v1231_v37, 4  ;;  %v2209_v57 = vld [vmem:[#allocation2 + $0x2c] sm:$0x1]  ;;  %v356_v3 = vld [vmem:[#allocation2 + $0x30] sm:$0x8] }
  0x2f   : > { %v2692_v31 = vunpack.c.l.b16 %v1259_v26  ;;  %v965_v32 = vor.u32 %v964_v21, %v962_v20  ;;  %v1594_v41 = vshll.u32 %v1568_v17, 16  ;;  %v1586_v44 = vor.u32 %v1585_v28, %v1584_v18  ;;  %v1569_v18 = vld [vmem:[#allocation2 + $0x2c] sm:$0x1] }
  0x30   : > { %v961_v43 = vrot.slane %v960_v27, 4  ;;  %v2225_v48 = vrot.slane %v1863_v46, 4  ;;  %v2226_v29 = vrot.slane %v1866_v49, 5  ;;  %v1591_v55 = vor.u32 %v1590_v33, %v1588_v35 }
  0x31   : > { %v2722_v36 = vpack.c.b16 %v2692_v31, %v2691_v19  ;;  %v966_v38 = vrot.slane %v965_v32, 4  ;;  %v1596_v56 = vrot.slane %v1594_v41, 5  ;;  %v1587_v34 = vrot.slane %v1586_v44, 4  ;;  %v1814_v31 = vld [vmem:[#allocation2 + $0x38] sm:$0xf] }
  0x32   : > { %v963_v60 = vsel %vm8710_vm10, %v961_v43, %v962_v20  ;;  %v2227_v37 = vor.u32 %v2226_v29, %v2225_v48  ;;  %v2229_v62 = vrot.slane %v1875_v51, 5  ;;  %v1592_v49 = vrot.slane %v1591_v55, 4 }
  0x33   : > { %2739 = vrot.lane.b32.xlu1 %v2722_v36, %s8571_s18  ;;  %v971_v39 = vsel %vm8710_vm10, %v966_v38, %v970_v22  ;;  %v2611_v46 = vunpack.c.l.b16 %v963_v60  ;;  %v2231_v63 = vrot.slane %v1872_v50, 4  ;;  %v1589_v5 = vsel %vm8710_vm10, %v1587_v34, %v1588_v35  ;;  %v1813_v22 = vld [vmem:[#allocation2 + $0x34] sm:$0xf] }
  0x34   : > { %v2612_v4 = vunpack.c.l.b16 %v971_v39  ;;  %v2228_v8 = vrot.slane %v2227_v37, 4  ;;  %v2235_v9 = vshll.u32 %v2209_v57, 16  ;;  %v1597_v51 = vsel %vm8710_vm10, %v1592_v49, %v1596_v56  ;;  %v8859_v56 = vld [vmem:[#allocation2 + $0x24] sm:$0xf] }
  0x35   : > { %v2881_v13 = vunpack.c.l.b16 %v1589_v5  ;;  %v2232_v17 = vor.u32 %v2231_v63, %v2229_v62  ;;  %v1598_v19 = vrot.slane %v1244_v24, 4  ;;  %v2882_v21 = vunpack.c.l.b16 %v1597_v51  ;;  %v8863_v63 = vld [vmem:[#allocation2 + $0x28] sm:$0xf]  ;;  %v8435_v5 = vld [vmem:[#allocation2 + $0x34] sm:$0xff] }
  0x36   : > { %v2642_v20 = vpack.c.b16 %v2612_v4, %v2611_v46  ;;  %v2230_v45 = vsel %vm8710_vm10, %v2228_v8, %v2229_v62  ;;  %v2237_v50 = vrot.slane %v2235_v9, 5  ;;  %v1599_v28 = vrot.slane %v1247_v54, 5 }
  0x37   : > { %v2233_v26 = vrot.slane %v2232_v17, 4  ;;  %v3153_v27 = vunpack.c.l.b16 %v2230_v45  ;;  %v1602_v35 = vrot.slane %v1256_v58, 5  ;;  %v2913_v32 = vpack.c.b16 %v2882_v21, %v2881_v13 }
  0x38   : > { %2659 = vrot.lane.b32.xlu0 %v2642_v20, %s8572_s19  ;;  %v1604_v24 = vrot.slane %v1253_v40, 4  ;;  %v1608_v33 = vshll.u32 %v1569_v18, 16  ;;  %v357_v41 = vsel %vm8664_vm6, 0, %v356_v3  ;;  %v1600_v52 = vor.u32 %v1599_v28, %v1598_v19  ;;  %v927_v19 = vld [vmem:[#allocation2 + $0x2c] sm:$0x1] }
  0x39   : > { %v2238_v43 = vsel %vm8710_vm10, %v2233_v26, %v2237_v50  ;;  %358 = vst [vmem:[#allocation2 + $0x30] sm:$0x8] %v357_v41  ;;  %v1885_v54 = vshrl.u32 %v1813_v22, 16  ;;  %v1888_v44 = vshll.u32 %v1813_v22, 16  ;;  %2929 = vrot.lane.b32.xlu2 %v2913_v32, %s8574_s21  ;;  %v1894_v23 = vshrl.u32 %v1814_v31, 16 }
  0x3a   : > { %v3154_v58 = vunpack.c.l.b16 %v2238_v43  ;;  %v1605_v48 = vor.u32 %v1604_v24, %v1602_v35  ;;  %v1610_v29 = vrot.slane %v1608_v33, 5  ;;  %v1601_v40 = vrot.slane %v1600_v52, 4 }
  0x3b   : > { %v1887_v36 = vrot.slane %v1885_v54, 7  ;;  %v1897_v38 = vshll.u32 %v1814_v31, 16  ;;  %v414_v55 = vsel %vm8675_vm7, 0, %v413_v42  ;;  %v1896_v34 = vrot.slane %v1894_v23, 7  ;;  %v1175_v31 = vld [vmem:[#allocation2 + $0x34] sm:$0xf] }
  0x3c   : > { %v3185_v57 = vpack.c.b16 %v3154_v58, %v3153_v27  ;;  %v1606_v60 = vrot.slane %v1605_v48, 4  ;;  %415 = vst [vmem:[#allocation2 + $0x3c] sm:$0x1] %v414_v55  ;;  %v2239_v37 = vrot.slane %v1885_v54, 4  ;;  %v1603_v62 = vsel %vm8710_vm10, %v1601_v40, %v1602_v35 }
  0x3d   : > { %v1890_v39 = vor.u32 %v1888_v44, %v1887_v36  ;;  %v1892_v46 = vrot.slane %v1887_v36, 4  ;;  %v2240_v49 = vrot.slane %v1888_v44, 5  ;;  %v2883_v4 = vunpack.c.l.b16 %v1603_v62  ;;  %v1176_v36 = vld [vmem:[#allocation2 + $0x38] sm:$0xf] }
  0x3e   : > { %3201 = vrot.lane.b32.xlu1 %v3185_v57, %s8575_s22  ;;  %v1611_v3 = vsel %vm8710_vm10, %v1606_v60, %v1610_v29  ;;  %v1899_v8 = vor.u32 %v1897_v38, %v1896_v34  ;;  %v2243_v9 = vrot.slane %v1897_v38, 5  ;;  %v2245_v17 = vrot.slane %v1894_v23, 4 }
  0x3f   : > { %v2884_v51 = vunpack.c.l.b16 %v1611_v3  ;;  %v2241_v13 = vor.u32 %v2240_v49, %v2239_v37  ;;  %v623_v18 = vshrl.u32 %v8859_v56, 16  ;;  %v626_v45 = vshll.u32 %v8859_v56, 16 }
  0x40   : > { %v1812_v20 = vld [vmem:[#allocation2 + $0x30] sm:$0x8]  ;;  %v1900_v21 = vsel %vm8744_vm11, %v1892_v46, %v1899_v8  ;;  %v632_v50 = vshrl.u32 %v8863_v63, 16  ;;  %v635_v22 = vshll.u32 %v8863_v63, 16  ;;  %v2246_v32 = vor.u32 %v2245_v17, %v2243_v9  ;;  %v467_v17 = vld [vmem:[%s8652_s14 + $0x24] sm:$0xf] }
  0x41   : > { %v2914_v26 = vpack.c.b16 %v2884_v51, %v2883_v4  ;;  %v1880_v27 = vshrl.u32 %v1812_v20, 16  ;;  %v2964_v28 = vunpack.c.l.b16 %v1900_v21  ;;  %v2242_v35 = vrot.slane %v2241_v13, 4  ;;  %3123 = vrot.lane.b32.xlu2 %v8435_v5, %s8570_s17  ;;  %v1174_v42 = vld [vmem:[#allocation2 + $0x30] sm:$0x8]  ;;  %v466_v13 = vld [vmem:[%s8652_s14 + $0x20] sm:$0xf] }
  0x42   : > { %v972_v24 = vrot.slane %v623_v18, 4  ;;  %v973_v33 = vrot.slane %v626_v45, 5  ;;  %v976_v41 = vrot.slane %v635_v22, 5  ;;  %v978_v44 = vrot.slane %v632_v50, 4  ;;  %499 = vst.msk [vmem:[#allocation2 + $0x54] sm:$0xf] %vm334_vm0, %v466_v13 }
  0x43   : > { %2931 = vrot.lane.b32.xlu0 %v2914_v26, %s8574_s21  ;;  %v7783_v43 = vrot.slane %v1880_v27, 11  ;;  %v2210_v52 = vld [vmem:[#allocation2 + $0x3c] sm:$0x1]  ;;  %v2244_v54 = vsel %vm8710_vm10, %v2242_v35, %v2243_v9  ;;  %v982_v58 = vshll.u32 %v927_v19, 16  ;;  %v2247_v48 = vrot.slane %v2246_v32, 4 }
  0x44   : > { %v2249_v29 = vshll.u32 %v2210_v52, 16  ;;  %v3155_v23 = vunpack.c.l.b16 %v2244_v54  ;;  %v974_v40 = vor.u32 %v973_v33, %v972_v24  ;;  %v979_v55 = vor.u32 %v978_v44, %v976_v41  ;;  %v359_v27 = vld [vmem:[#allocation2 + $0x40] sm:$0x8]  ;;  %v1570_v24 = vld [vmem:[#allocation2 + $0x3c] sm:$0x1] }
  0x45   : > { %v1891_v38 = vsel %vm8744_vm11, %v7783_v43, %v1890_v39  ;;  %v984_v57 = vrot.slane %v982_v58, 5  ;;  %v1261_v60 = vshrl.u32 %v1174_v42, 16  ;;  %v1266_v46 = vshrl.u32 %v1175_v31, 16  ;;  %500 = vst.msk [vmem:[#allocation2 + $0x58] sm:$0xf] %vm334_vm0, %v467_v17 }
  0x46   : > { %v2963_v34 = vunpack.c.l.b16 %v1891_v38  ;;  %v2251_v37 = vrot.slane %v2249_v29, 5  ;;  %v975_v62 = vrot.slane %v974_v40, 4  ;;  %v980_v49 = vrot.slane %v979_v55, 4  ;;  %v1816_v52 = vld [vmem:[#allocation2 + $0x44] sm:$0xf] }
  0x47   : > { %v7768_v3 = vrot.slane %v1261_v60, 11  ;;  %v1269_v4 = vshll.u32 %v1175_v31, 16  ;;  %v1275_v5 = vshrl.u32 %v1176_v36, 16  ;;  %v1268_v51 = vrot.slane %v1266_v46, 7  ;;  %v1817_v29 = vld [vmem:[#allocation2 + $0x48] sm:$0xf] }
  0x48   : > { %v2994_v8 = vpack.c.b16 %v2964_v28, %v2963_v34  ;;  %v2252_v9 = vsel %vm8710_vm10, %v2247_v48, %v2251_v37  ;;  %v977_v39 = vsel %vm8710_vm10, %v975_v62, %v976_v41  ;;  %v985_v20 = vsel %vm8710_vm10, %v980_v49, %v984_v57  ;;  %v8404_v57 = vld [vmem:[#allocation2 + $0x24] sm:$0xff] }
  0x49   : > { %v3156_v19 = vunpack.c.l.b16 %v2252_v9  ;;  %v2613_v21 = vunpack.c.l.b16 %v977_v39  ;;  %v1277_v26 = vrot.slane %v1275_v5, 7  ;;  %v2614_v28 = vunpack.c.l.b16 %v985_v20 }
  0x4a   : > { %3011 = vrot.lane.b32.xlu1 %v2994_v8, %s8573_s20  ;;  %v1271_v35 = vor.u32 %v1269_v4, %v1268_v51  ;;  %v1273_v31 = vrot.slane %v1268_v51, 4  ;;  %v1278_v32 = vshll.u32 %v1176_v36, 16  ;;  %v1612_v41 = vrot.slane %v1266_v46, 4  ;;  %v8909_v51 = vld [vmem:[#allocation2 + $0x44] sm:$0xf] }
  0x4b   : > { %v3186_v33 = vpack.c.b16 %v3156_v19, %v3155_v23  ;;  %v1613_v42 = vrot.slane %v1269_v4, 5  ;;  %v1618_v43 = vrot.slane %v1275_v5, 4  ;;  %v2643_v54 = vpack.c.b16 %v2614_v28, %v2613_v21  ;;  %v416_v23 = vld [vmem:[#allocation2 + $0x4c] sm:$0x1]  ;;  %v8913_v21 = vld [vmem:[#allocation2 + $0x48] sm:$0xf] }
  0x4c   : > { %v1272_v44 = vsel %vm8744_vm11, %v7768_v3, %v1271_v35  ;;  %v1280_v58 = vor.u32 %v1278_v32, %v1277_v26  ;;  %v1616_v48 = vrot.slane %v1278_v32, 5  ;;  %v1622_v36 = vshll.u32 %v1570_v24, 16 }
  0x4d   : > { %3203 = vrot.lane.b32.xlu0 %v3186_v33, %s8575_s22  ;;  %v2693_v40 = vunpack.c.l.b16 %v1272_v44  ;;  %v1614_v38 = vor.u32 %v1613_v42, %v1612_v41  ;;  %v360_v55 = vsel %vm8664_vm6, 0, %v359_v27  ;;  %2661 = vrot.lane.b32.xlu2 %v2643_v54, %s8572_s19  ;;  %v1907_v37 = vshrl.u32 %v1816_v52, 16  ;;  %v8921_v54 = vld [vmem:[#allocation2 + $0x34] sm:$0xf] }
  0x4e   : > { %v1281_v60 = vsel %vm8744_vm11, %v1273_v31, %v1280_v58  ;;  %v1619_v34 = vor.u32 %v1618_v43, %v1616_v48  ;;  %361 = vst [vmem:[#allocation2 + $0x40] sm:$0x8] %v360_v55  ;;  %v1910_v62 = vshll.u32 %v1816_v52, 16  ;;  %v1624_v3 = vrot.slane %v1622_v36, 5  ;;  %v8420_v36 = vld [vmem:[#allocation2 + $0x34] sm:$0xff] }
  0x4f   : > { %v2694_v46 = vunpack.c.l.b16 %v1281_v60  ;;  %v1615_v49 = vrot.slane %v1614_v38, 4  ;;  %v1916_v4 = vshrl.u32 %v1817_v29, 16  ;;  %v1909_v8 = vrot.slane %v1907_v37, 7 }
  0x50   : > { %v1620_v5 = vrot.slane %v1619_v34, 4  ;;  %v1919_v9 = vshll.u32 %v1817_v29, 16  ;;  %v417_v39 = vsel %vm8675_vm7, 0, %v416_v23  ;;  %v2253_v20 = vrot.slane %v1907_v37, 4 }
  0x51   : > { %v2723_v13 = vpack.c.b16 %v2694_v46, %v2693_v40  ;;  %v1617_v17 = vsel %vm8710_vm10, %v1615_v49, %v1616_v48  ;;  %v1918_v19 = vrot.slane %v1916_v4, 7  ;;  %418 = vst [vmem:[#allocation2 + $0x4c] sm:$0x1] %v417_v39  ;;  %v1912_v28 = vor.u32 %v1910_v62, %v1909_v8  ;;  %v8932_v46 = vld [vmem:[#allocation2 + $0x38] sm:$0xf] }
  0x52   : > { %2581 = vrot.lane.b32.xlu1 %v8404_v57, %s8568_s15  ;;  %v1625_v26 = vsel %vm8710_vm10, %v1620_v5, %v1624_v3  ;;  %v2885_v27 = vunpack.c.l.b16 %v1617_v17  ;;  %v1914_v35 = vrot.slane %v1909_v8, 4  ;;  %v2254_v24 = vrot.slane %v1910_v62, 5 }
  0x53   : > { %v2886_v31 = vunpack.c.l.b16 %v1625_v26  ;;  %v1921_v32 = vor.u32 %v1919_v9, %v1918_v19  ;;  %v2257_v33 = vrot.slane %v1919_v9, 5  ;;  %v2259_v41 = vrot.slane %v1916_v4, 4 }
  0x54   : > { %v1288_v42 = vshrl.u32 %v8909_v51, 16  ;;  %v1291_v43 = vshll.u32 %v8909_v51, 16  ;;  %v1297_v52 = vshrl.u32 %v8913_v21, 16  ;;  %v2255_v29 = vor.u32 %v2254_v24, %v2253_v20 }
  0x55   : > { %2741 = vrot.lane.b32.xlu0 %v2723_v13, %s8571_s18  ;;  %v2915_v44 = vpack.c.b16 %v2886_v31, %v2885_v27  ;;  %v1815_v58 = vld [vmem:[#allocation2 + $0x40] sm:$0x8]  ;;  %v1922_v48 = vsel %vm8744_vm11, %v1914_v35, %v1921_v32  ;;  %v1300_v38 = vshll.u32 %v8913_v21, 16  ;;  %v2260_v57 = vor.u32 %v2259_v41, %v2257_v33  ;;  %v928_v31 = vld [vmem:[#allocation2 + $0x3c] sm:$0x1] }
  0x56   : > { %v1177_v40 = vld [vmem:[#allocation2 + $0x40] sm:$0x8]  ;;  %v1902_v55 = vshrl.u32 %v1815_v58, 16  ;;  %v2966_v23 = vunpack.c.l.b16 %v1922_v48  ;;  %v2256_v34 = vrot.slane %v2255_v29, 4  ;;  %v1290_v37 = vrot.slane %v1288_v42, 7 }
  0x57   : > { %v1283_v60 = vshrl.u32 %v1177_v40, 16  ;;  %2933 = vrot.lane.b32.xlu2 %v2915_v44, %s8574_s21  ;;  %v1299_v62 = vrot.slane %v1297_v52, 7  ;;  %v645_v49 = vshrl.u32 %v8921_v54, 16  ;;  %v2261_v5 = vrot.slane %v2260_v57, 4  ;;  %v362_v32 = vld [vmem:[#allocation2 + $0x50] sm:$0x8] }
  0x58   : > { %v7784_v3 = vrot.slane %v1902_v55, 11  ;;  %v2211_v4 = vld [vmem:[#allocation2 + $0x4c] sm:$0x1]  ;;  %v648_v9 = vshll.u32 %v8921_v54, 16  ;;  %v2258_v39 = vsel %vm8710_vm10, %v2256_v34, %v2257_v33  ;;  %v1293_v17 = vor.u32 %v1291_v43, %v1290_v37  ;;  %v468_v58 = vld [vmem:[%s8652_s14 + $0x28] sm:$0xf] }
  0x59   : > { %v7769_v8 = vrot.slane %v1283_v60, 11  ;;  %v2263_v13 = vshll.u32 %v2211_v4, 16  ;;  %v1295_v19 = vrot.slane %v1290_v37, 4  ;;  %v3157_v26 = vunpack.c.l.b16 %v2258_v39  ;;  %v469_v48 = vld [vmem:[%s8652_s14 + $0x2c] sm:$0xf] }
  0x5a   : > { %2853 = vrot.lane.b32.xlu1 %v8420_v36, %s8569_s16  ;;  %v1913_v20 = vsel %vm8744_vm11, %v7784_v3, %v1912_v28  ;;  %v1302_v27 = vor.u32 %v1300_v38, %v1299_v62  ;;  %v654_v35 = vshrl.u32 %v8932_v46, 16  ;;  %v12777_v44 = vshll.u32 %v8932_v46, 16  ;;  %v1819_v55 = vld [vmem:[#allocation2 + $0x54] sm:$0xf]  ;;  %501 = vst.msk [vmem:[#allocation2 + $0x64] sm:$0xf] %vm334_vm0, %v468_v58 }
  0x5b   : > { %v2965_v24 = vunpack.c.l.b16 %v1913_v20  ;;  %v2265_v33 = vrot.slane %v2263_v13, 5  ;;  %v1294_v41 = vsel %vm8744_vm11, %v7769_v8, %v1293_v17  ;;  %v986_v40 = vrot.slane %v645_v49, 4  ;;  %502 = vst.msk [vmem:[#allocation2 + $0x68] sm:$0xf] %vm334_vm0, %v469_v48  ;;  %v8436_v3 = vld [vmem:[#allocation2 + $0x44] sm:$0xff] }
  0x5c   : > { %v1303_v28 = vsel %vm8744_vm11, %v1295_v19, %v1302_v27  ;;  %v2695_v29 = vunpack.c.l.b16 %v1294_v41  ;;  %v987_v36 = vrot.slane %v648_v9, 5  ;;  %v990_v37 = vrot.slane %v12777_v44, 5  ;;  %v1820_v13 = vld [vmem:[#allocation2 + $0x58] sm:$0xf] }
  0x5d   : > { %v2995_v57 = vpack.c.b16 %v2966_v23, %v2965_v24  ;;  %v2266_v60 = vsel %vm8710_vm10, %v2261_v5, %v2265_v33  ;;  %v2696_v34 = vunpack.c.l.b16 %v1303_v28  ;;  %v992_v8 = vrot.slane %v654_v35, 4  ;;  %v1571_v28 = vld [vmem:[#allocation2 + $0x4c] sm:$0x1] }
  0x5e   : > { %v3158_v62 = vunpack.c.l.b16 %v2266_v60  ;;  %v988_v4 = vor.u32 %v987_v36, %v986_v40  ;;  %v996_v39 = vshll.u32 %v928_v31, 16  ;;  %v363_v5 = vsel %vm8664_vm6, 0, %v362_v32  ;;  %v419_v36 = vld [vmem:[#allocation2 + $0x5c] sm:$0x1] }
  0x5f   : > { %3013 = vrot.lane.b32.xlu0 %v2995_v57, %s8573_s20  ;;  %v2724_v23 = vpack.c.b16 %v2696_v34, %v2695_v29  ;;  %v1929_v17 = vshrl.u32 %v1819_v55, 16  ;;  %v1932_v19 = vshll.u32 %v1819_v55, 16  ;;  %v993_v24 = vor.u32 %v992_v8, %v990_v37  ;;  %364 = vst [vmem:[#allocation2 + $0x50] sm:$0x8] %v363_v5  ;;  %v8405_v55 = vld [vmem:[#allocation2 + $0x34] sm:$0xff] }
  0x60   : > { %v3187_v20 = vpack.c.b16 %v3158_v62, %v3157_v26  ;;  %v989_v27 = vrot.slane %v988_v4, 4  ;;  %v998_v33 = vrot.slane %v996_v39, 5  ;;  %v1938_v58 = vshrl.u32 %v1820_v13, 16  ;;  %v8984_v39 = vld [vmem:[#allocation2 + $0x44] sm:$0xf] }
  0x61   : > { %v1931_v41 = vrot.slane %v1929_v17, 7  ;;  %v1941_v48 = vshll.u32 %v1820_v13, 16  ;;  %v1626_v31 = vrot.slane %v1288_v42, 4  ;;  %v994_v29 = vrot.slane %v993_v24, 4  ;;  %v1822_v47 = vld [vmem:[#allocation2 + $0x64] sm:$0xf] }
  0x62   : > { %3205 = vrot.lane.b32.xlu2 %v3187_v20, %s8575_s22  ;;  %3125 = vrot.lane.b32.xlu1 %v8436_v3, %s8570_s17  ;;  %v991_v32 = vsel %vm8710_vm10, %v989_v27, %v990_v37  ;;  %v1627_v26 = vrot.slane %v1291_v43, 5  ;;  %v1630_v40 = vrot.slane %v1300_v38, 5  ;;  %v1940_v42 = vrot.slane %v1938_v58, 7 }
  0x63   : > { %v2615_v57 = vunpack.c.l.b16 %v991_v32  ;;  %v1934_v60 = vor.u32 %v1932_v19, %v1931_v41  ;;  %v1936_v34 = vrot.slane %v1931_v41, 4  ;;  %v999_v62 = vsel %vm8710_vm10, %v994_v29, %v998_v33 }
  0x64   : > { %v1628_v3 = vor.u32 %v1627_v26, %v1626_v31  ;;  %v1632_v37 = vrot.slane %v1297_v52, 4  ;;  %v1636_v4 = vshll.u32 %v1571_v28, 16  ;;  %v2616_v8 = vunpack.c.l.b16 %v999_v62  ;;  %v8989_v28 = vld [vmem:[#allocation2 + $0x48] sm:$0xf] }
  0x65   : > { %v1943_v51 = vor.u32 %v1941_v48, %v1940_v42  ;;  %v420_v43 = vsel %vm8675_vm7, 0, %v419_v36  ;;  %v2267_v38 = vrot.slane %v1929_v17, 4  ;;  %v2268_v27 = vrot.slane %v1932_v19, 5  ;;  %v929_v42 = vld [vmem:[#allocation2 + $0x4c] sm:$0x1] }
  0x66   : > { %v1629_v13 = vrot.slane %v1628_v3, 4  ;;  %v1633_v5 = vor.u32 %v1632_v37, %v1630_v40  ;;  %v1638_v20 = vrot.slane %v1636_v4, 5  ;;  %421 = vst [vmem:[#allocation2 + $0x5c] sm:$0x1] %v420_v43  ;;  %v2644_v24 = vpack.c.b16 %v2616_v8, %v2615_v57  ;;  %v1818_v33 = vld [vmem:[#allocation2 + $0x50] sm:$0x8] }
  0x67   : > { %2583 = vrot.lane.b32.xlu0 %v8405_v55, %s8568_s15  ;;  %v1944_v21 = vsel %vm8744_vm11, %v1936_v34, %v1943_v51  ;;  %v2271_v52 = vrot.slane %v1941_v48, 5  ;;  %v2273_v41 = vrot.slane %v1938_v58, 4  ;;  %v1924_v31 = vshrl.u32 %v1818_v33, 16  ;;  %v1181_v8 = vld [vmem:[#allocation2 + $0x54] sm:$0xf] }
  0x68   : > { %v2968_v17 = vunpack.c.l.b16 %v1944_v21  ;;  %v1631_v32 = vsel %vm8710_vm10, %v1629_v13, %v1630_v40  ;;  %v1634_v29 = vrot.slane %v1633_v5, 4  ;;  %v2269_v36 = vor.u32 %v2268_v27, %v2267_v38  ;;  %v8421_v40 = vld [vmem:[#allocation2 + $0x44] sm:$0xff]  ;;  %v1180_v13 = vld [vmem:[#allocation2 + $0x50] sm:$0x8] }
  0x69   : > { %v2887_v26 = vunpack.c.l.b16 %v1631_v32  ;;  %v2274_v19 = vor.u32 %v2273_v41, %v2271_v52  ;;  %v667_v55 = vshrl.u32 %v8984_v39, 16  ;;  %v7785_v57 = vrot.slane %v1924_v31, 11  ;;  %v1182_v32 = vld [vmem:[#allocation2 + $0x58] sm:$0xf] }
  0x6a   : > { %2743 = vrot.lane.b32.xlu2 %v2724_v23, %s8571_s18  ;;  %2663 = vrot.lane.b32.xlu1 %v2644_v24, %s8572_s19  ;;  %v1639_v58 = vsel %vm8710_vm10, %v1634_v29, %v1638_v20  ;;  %v670_v48 = vshll.u32 %v8984_v39, 16  ;;  %v676_v34 = vshrl.u32 %v8989_v28, 16  ;;  %v2270_v3 = vrot.slane %v2269_v36, 4 }
  0x6b   : > { %v2888_v62 = vunpack.c.l.b16 %v1639_v58  ;;  %v2275_v37 = vrot.slane %v2274_v19, 4  ;;  %v679_v4 = vshll.u32 %v8989_v28, 16  ;;  %v1935_v23 = vsel %vm8744_vm11, %v7785_v57, %v1934_v60  ;;  %v526_v57 = vld [vmem:[#allocation2 + $0x10] sm:$0x8] }
  0x6c   : > { %v1000_v51 = vrot.slane %v667_v55, 4  ;;  %v1001_v43 = vrot.slane %v670_v48, 5  ;;  %v1006_v38 = vrot.slane %v676_v34, 4  ;;  %v2967_v5 = vunpack.c.l.b16 %v1935_v23  ;;  %v470_v23 = vld [vmem:[%s8652_s14 + $0x30] sm:$0xf] }
  0x6d   : > { %v2916_v20 = vpack.c.b16 %v2888_v62, %v2887_v26  ;;  %v2212_v27 = vld [vmem:[#allocation2 + $0x5c] sm:$0x1]  ;;  %v2272_v24 = vsel %vm8710_vm10, %v2270_v3, %v2271_v52  ;;  %v1004_v33 = vrot.slane %v679_v4, 5  ;;  %v1010_v31 = vshll.u32 %v929_v42, 16  ;;  %503 = vst.msk [vmem:[#allocation2 + $0x74] sm:$0xf] %vm334_vm0, %v470_v23 }
  0x6e   : > { %v2277_v60 = vshll.u32 %v2212_v27, 16  ;;  %v9013_v21 = vunpack.c.l.b16 %v2272_v24  ;;  %v1002_v41 = vor.u32 %v1001_v43, %v1000_v51  ;;  %v2996_v29 = vpack.c.b16 %v2968_v17, %v2967_v5  ;;  %v471_v51 = vld [vmem:[%s8652_s14 + $0x34] sm:$0xf] }
  0x6f   : > { %2855 = vrot.lane.b32.xlu0 %v8421_v40, %s8569_s16  ;;  %v1007_v36 = vor.u32 %v1006_v38, %v1004_v33  ;;  %v1305_v26 = vshrl.u32 %v1180_v13, 16  ;;  %v1310_v19 = vshrl.u32 %v1181_v8, 16  ;;  %v1012_v62 = vrot.slane %v1010_v31, 5  ;;  %504 = vst.msk [vmem:[#allocation2 + $0x78] sm:$0xf] %vm334_vm0, %v471_v51 }
  0x70   : > { %v2279_v58 = vrot.slane %v2277_v60, 5  ;;  %v1003_v52 = vrot.slane %v1002_v41, 4  ;;  %v1313_v3 = vshll.u32 %v1181_v8, 16  ;;  %v1319_v44 = vshrl.u32 %v1182_v32, 16  ;;  %v8437_v8 = vld [vmem:[#allocation2 + $0x54] sm:$0xff] }
  0x71   : > { %v1008_v0 = vrot.slane %v1007_v36, 4  ;;  %v7770_v27 = vrot.slane %v1305_v26, 11  ;;  %v1312_v24 = vrot.slane %v1310_v19, 7  ;;  %v1322_v40 = vshll.u32 %v1182_v32, 16  ;;  %v8406_v36 = vld [vmem:[#allocation2 + $0x44] sm:$0xff] }
  0x72   : > { %3015 = vrot.lane.b32.xlu2 %v2996_v29, %s8573_s20  ;;  %2935 = vrot.lane.b32.xlu1 %v2916_v20, %s8574_s21  ;;  %v2280_v17 = vsel %vm8710_vm10, %v2275_v37, %v2279_v58  ;;  %v1005_v42 = vsel %vm8710_vm10, %v1003_v52, %v1004_v33  ;;  %v596_v43 = vshrl.u32 %v526_v57, 16  ;;  %v1321_v31 = vrot.slane %v1319_v44, 7  ;;  %v1572_v52 = vld [vmem:[#allocation2 + $0x5c] sm:$0x1] }
  0x73   : > { %v3160_v38 = vunpack.c.l.b16 %v2280_v17  ;;  %v1013_v13 = vsel %vm8710_vm10, %v1008_v0, %v1012_v62  ;;  %v2617_v5 = vunpack.c.l.b16 %v1005_v42  ;;  %v1315_v60 = vor.u32 %v1313_v3, %v1312_v24  ;;  %v365_v62 = vld [vmem:[#allocation2 + $0x60] sm:$0x8] }
  0x74   : > { %v2618_v20 = vunpack.c.l.b16 %v1013_v13  ;;  %v1317_v41 = vrot.slane %v1312_v24, 4  ;;  %v7751_v32 = vrot.slane %v596_v43, 11  ;;  %v612_v29 = vrot.slane %v610_v61, 7 }
  0x75   : > { %v3188_v37 = vpack.c.b16 %v3160_v38, %v9013_v21  ;;  %v1316_v33 = vsel %vm8744_vm11, %v7770_v27, %v1315_v60  ;;  %v1324_v57 = vor.u32 %v1322_v40, %v1321_v31  ;;  %v603_v58 = vrot.slane %v601_v59, 7  ;;  %v422_v60 = vld [vmem:[#allocation2 + $0x6c] sm:$0x1] }
  0x76   : > { %v2645_v26 = vpack.c.b16 %v2618_v20, %v2617_v5  ;;  %v2697_v0 = vunpack.c.l.b16 %v1316_v33  ;;  %v615_v21 = vor.u32 %v613_v2, %v612_v29  ;;  %v1640_v23 = vrot.slane %v1310_v19, 4 }
  0x77   : > { %3127 = vrot.lane.b32.xlu0 %v8437_v8, %s8570_s17  ;;  %v1641_v27 = vrot.slane %v1313_v3, 5  ;;  %v1644_v24 = vrot.slane %v1322_v40, 5  ;;  %v1325_v61 = vsel %vm8744_vm11, %v1317_v41, %v1324_v57  ;;  %v606_v51 = vor.u32 %v604_v1, %v603_v58  ;;  %v2580_v59 = vpop.permute.xlu2 %2579  ;;  %v8422_v57 = vld [vmem:[#allocation2 + $0x54] sm:$0xff] }
  0x78   : > { %v608_v17 = vrot.slane %v603_v58, 4  ;;  %v1646_v42 = vrot.slane %v1319_v44, 4  ;;  %v2698_v43 = vunpack.c.l.b16 %v1325_v61  ;;  %v1650_v13 = vshll.u32 %v1572_v52, 16  ;;  %v1823_v44 = vld [vmem:[#allocation2 + $0x68] sm:$0xf] }
  0x79   : > { %v1642_v38 = vor.u32 %v1641_v27, %v1640_v23  ;;  %v366_v8 = vsel %vm8664_vm6, 0, %v365_v62  ;;  %v607_v2 = vsel %vm8744_vm11, %v7751_v32, %v606_v51  ;;  %v1951_v31 = vshrl.u32 %v1822_v47, 16  ;;  %v9062_v51 = vld [vmem:[#allocation2 + $0x58] sm:$0xf] }
  0x7a   : > { %2585 = vrot.lane.b32.xlu2 %v8406_v36, %s8568_s15  ;;  %3207 = vrot.lane.b32.xlu1 %v3188_v37, %s8575_s22  ;;  %v616_v25 = vsel %vm8744_vm11, %v608_v17, %v615_v21  ;;  %v1647_v1 = vor.u32 %v1646_v42, %v1644_v24  ;;  %367 = vst [vmem:[#allocation2 + $0x60] sm:$0x8] %v366_v8  ;;  %v2451_v3 = vunpack.c.l.b16 %v607_v2  ;;  %v1652_v41 = vrot.slane %v1650_v13, 5  ;;  %v9056_v21 = vld [vmem:[#allocation2 + $0x54] sm:$0xf] }
  0x7b   : > { %v2725_v19 = vpack.c.b16 %v2698_v43, %v2697_v0  ;;  %v2452_v40 = vunpack.c.l.b16 %v616_v25  ;;  %v1643_v5 = vrot.slane %v1642_v38, 4  ;;  %v1954_v33 = vshll.u32 %v1822_v47, 16 }
  0x7c   : > { %v1648_v20 = vrot.slane %v1647_v1, 4  ;;  %v1960_v32 = vshrl.u32 %v1823_v44, 16  ;;  %v1963_v36 = vshll.u32 %v1823_v44, 16  ;;  %v1953_v0 = vrot.slane %v1951_v31, 7 }
  0x7d   : > { %v2482_v37 = vpack.c.b16 %v2452_v40, %v2451_v3  ;;  %v1645_v29 = vsel %vm8710_vm10, %v1643_v5, %v1644_v24  ;;  %v423_v62 = vsel %vm8675_vm7, 0, %v422_v60  ;;  %v2281_v61 = vrot.slane %v1951_v31, 4  ;;  %v930_v40 = vld [vmem:[#allocation2 + $0x5c] sm:$0x1] }
  0x7e   : > { %v1653_v58 = vsel %vm8710_vm10, %v1648_v20, %v1652_v41  ;;  %v2889_v52 = vunpack.c.l.b16 %v1645_v29  ;;  %v1962_v24 = vrot.slane %v1960_v32, 7  ;;  %424 = vst [vmem:[#allocation2 + $0x6c] sm:$0x1] %v423_v62  ;;  %v1956_v17 = vor.u32 %v1954_v33, %v1953_v0 }
  0x7f   : > { %2665 = vrot.lane.b32.xlu0 %v2645_v26, %s8572_s19  ;;  %v9060_v23 = vsel %vm3233_vm12, %v2482_v37, %v2580_v59  ;;  %v2890_v27 = vunpack.c.l.b16 %v1653_v58  ;;  %v1958_v42 = vrot.slane %v1953_v0, 4  ;;  %v2282_v43 = vrot.slane %v1954_v33, 5  ;;  %v9064_v2 = vpop.permute.xlu2 %2851  ;;  %v8438_v0 = vld [vmem:[#allocation2 + $0x64] sm:$0xff] }
  0x80   : > { %v2285_v38 = vrot.slane %v1963_v36, 5  ;;  %v1965_v47 = vor.u32 %v1963_v36, %v1962_v24  ;;  %v2287_v25 = vrot.slane %v1960_v32, 4  ;;  %v12785_v26 = vshrl.u32 %v9056_v21, 16 }
  0x81   : > { %v2917_v13 = vpack.c.b16 %v2890_v27, %v2889_v52  ;;  %v1821_v8 = vld [vmem:[#allocation2 + $0x60] sm:$0x8]  ;;  %v2283_v1 = vor.u32 %v2282_v43, %v2281_v61  ;;  %v12780_v44 = vshll.u32 %v9056_v21, 16  ;;  %v12779_v3 = vshrl.u32 %v9062_v51, 16  ;;  %v1184_v52 = vld [vmem:[#allocation2 + $0x64] sm:$0xf] }
  0x82   : > { %2857 = vrot.lane.b32.xlu2 %v8422_v57, %s8569_s16  ;;  %2745 = vrot.lane.b32.xlu1 %v2725_v19, %s8571_s18  ;;  %v1946_v59 = vshrl.u32 %v1821_v8, 16  ;;  %v1966_v5 = vsel %vm8744_vm11, %v1958_v42, %v1965_v47  ;;  %v2288_v60 = vor.u32 %v2287_v25, %v2285_v38  ;;  %v12778_v20 = vshll.u32 %v9062_v51, 16  ;;  %v1183_v31 = vld [vmem:[#allocation2 + $0x60] sm:$0x8] }
  0x83   : > { %v1014_v41 = vrot.slane %v12785_v26, 4  ;;  %v2970_v37 = vunpack.c.l.b16 %v1966_v5  ;;  %v2284_v19 = vrot.slane %v2283_v1, 4  ;;  %v1015_v29 = vrot.slane %v12780_v44, 5 }
  0x84   : > { %v7786_v33 = vrot.slane %v1946_v59, 11  ;;  %v2289_v32 = vrot.slane %v2288_v60, 4  ;;  %v1018_v36 = vrot.slane %v12778_v20, 5  ;;  %v1020_v57 = vrot.slane %v12779_v3, 4  ;;  %v1185_v59 = vld [vmem:[#allocation2 + $0x68] sm:$0xf] }
  0x85   : > { %v1024_v58 = vshll.u32 %v930_v40, 16  ;;  %v2213_v27 = vld [vmem:[#allocation2 + $0x6c] sm:$0x1]  ;;  %v2286_v24 = vsel %vm8710_vm10, %v2284_v19, %v2285_v38  ;;  %v1016_v61 = vor.u32 %v1015_v29, %v1014_v41  ;;  %v1327_v42 = vshrl.u32 %v1183_v31, 16  ;;  %v347_v19 = vld [vmem:[#allocation2] sm:$0x8] }
  0x86   : > { %v1957_v62 = vsel %vm8744_vm11, %v7786_v33, %v1956_v17  ;;  %v2291_v8 = vshll.u32 %v2213_v27, 16  ;;  %v3161_v47 = vunpack.c.l.b16 %v2286_v24  ;;  %v1021_v25 = vor.u32 %v1020_v57, %v1018_v36 }
  0x87   : > { %2937 = vrot.lane.b32.xlu0 %v2917_v13, %s8574_s21  ;;  %v2969_v43 = vunpack.c.l.b16 %v1957_v62  ;;  %v1017_v1 = vrot.slane %v1016_v61, 4  ;;  %v1026_v40 = vrot.slane %v1024_v58, 5  ;;  %v7771_v5 = vrot.slane %v1327_v42, 11  ;;  %v9087_v44 = vpop.permute.xlu0 %2577  ;;  %v9097_v58 = vpop.permute.xlu2 %3009  ;;  %v368_v61 = vld [vmem:[#allocation2 + $0x70] sm:$0x8] }
  0x88   : > { %v1332_v60 = vshrl.u32 %v1184_v52, 16  ;;  %v2293_v3 = vrot.slane %v2291_v8, 5  ;;  %v1022_v17 = vrot.slane %v1021_v25, 4  ;;  %v1335_v33 = vshll.u32 %v1184_v52, 16  ;;  %v473_v42 = vld [vmem:[%s8652_s14 + $0x3c] sm:$0xf] }
  0x89   : > { %v2997_v20 = vpack.c.b16 %v2970_v37, %v2969_v43  ;;  %v1019_v38 = vsel %vm8710_vm10, %v1017_v1, %v1018_v36  ;;  %v1341_v41 = vshrl.u32 %v1185_v59, 16  ;;  %v1344_v31 = vshll.u32 %v1185_v59, 16  ;;  %v472_v36 = vld [vmem:[%s8652_s14 + $0x38] sm:$0xf]  ;;  %506 = vst.msk [vmem:[#allocation2 + $0x88] sm:$0xf] %vm334_vm0, %v473_v42 }
  0x8a   : > { %3129 = vrot.lane.b32.xlu2 %v8438_v0, %s8570_s17  ;;  %v1334_v13 = vrot.slane %v1332_v60, 7  ;;  %v2294_v37 = vsel %vm8710_vm10, %v2289_v32, %v2293_v3  ;;  %v1027_v29 = vsel %vm8710_vm10, %v1022_v17, %v1026_v40  ;;  %v2619_v57 = vunpack.c.l.b16 %v1019_v38  ;;  %505 = vst.msk [vmem:[#allocation2 + $0x84] sm:$0xf] %vm334_vm0, %v472_v36  ;;  %v1825_v40 = vld [vmem:[#allocation2 + $0x74] sm:$0xf] }
  0x8b   : > { %3017 = vrot.lane.b32.xlu1 %v2997_v20, %s8573_s20  ;;  %v590_v52 = vrot.slane %v588_v15, 7  ;;  %v3162_v0 = vunpack.c.l.b16 %v2294_v37  ;;  %v2620_v62 = vunpack.c.l.b16 %v1027_v29  ;;  %v1343_v20 = vrot.slane %v1341_v41, 7  ;;  %v1573_v15 = vld [vmem:[#allocation2 + $0x6c] sm:$0x1]  ;;  %v8407_v17 = vld [vmem:[#allocation2 + $0x54] sm:$0xff] }
  0x8c   : > { %v1337_v27 = vor.u32 %v1335_v33, %v1334_v13  ;;  %v1339_v24 = vrot.slane %v1334_v13, 4  ;;  %v348_v32 = vsel %vm8664_vm6, 0, %v347_v19  ;;  %v581_v43 = vrot.slane %v579_v12, 7  ;;  %v425_v36 = vld [vmem:[#allocation2 + $0x7c] sm:$0x1] }
  0x8d   : > { %v593_v3 = vor.u32 %v591_v16, %v590_v52  ;;  %v3189_v8 = vpack.c.b16 %v3162_v0, %v3161_v47  ;;  %v2646_v25 = vpack.c.b16 %v2620_v62, %v2619_v57  ;;  %349 = vst [vmem:[#allocation2] sm:$0x8] %v348_v32  ;;  %v1654_v1 = vrot.slane %v1332_v60, 4 }
  0x8e   : > { %v1338_v59 = vsel %vm8744_vm11, %v7771_v5, %v1337_v27  ;;  %v1346_v38 = vor.u32 %v1344_v31, %v1343_v20  ;;  %v9114_v11 = vor.u32 %v582_v14, %v581_v43  ;;  %v586_v16 = vrot.slane %v581_v43, 4  ;;  %v1826_v5 = vld [vmem:[#allocation2 + $0x78] sm:$0xf] }
  0x8f   : > { %v2699_v13 = vunpack.c.l.b16 %v1338_v59  ;;  %3209 = vrot.lane.b32.xlu0 %v3189_v8, %s8575_s22  ;;  %v1655_v12 = vrot.slane %v1335_v33, 5  ;;  %v1658_v47 = vrot.slane %v1344_v31, 5  ;;  %v1660_v19 = vrot.slane %v1341_v41, 4 }
  0x90   : > { %v1664_v37 = vshll.u32 %v1573_v15, 16  ;;  %v1347_v60 = vsel %vm8744_vm11, %v1339_v24, %v1346_v38  ;;  %v9122_v29 = vsel %vm8744_vm11, %v586_v16, %v593_v3  ;;  %v369_v7 = vsel %vm8664_vm6, 0, %v368_v61  ;;  %v9128_v52 = vpop.permute.xlu1 %2849 }
  0x91   : > { %v1973_v14 = vshrl.u32 %v1825_v40, 16  ;;  %v2700_v57 = vunpack.c.l.b16 %v1347_v60  ;;  %v2450_v33 = vunpack.c.l.b16 %v9122_v29  ;;  %v1656_v31 = vor.u32 %v1655_v12, %v1654_v1  ;;  %370 = vst [vmem:[#allocation2 + $0x70] sm:$0x8] %v369_v7  ;;  %v9131_v42 = vpop.permute.xlu0 %3121 }
  0x92   : > { %2667 = vrot.lane.b32.xlu2 %v2646_v25, %s8572_s19  ;;  %v1661_v41 = vor.u32 %v1660_v19, %v1658_v47  ;;  %v1666_v0 = vrot.slane %v1664_v37, 5  ;;  %v1976_v27 = vshll.u32 %v1825_v40, 16  ;;  %v1982_v24 = vshrl.u32 %v1826_v5, 16  ;;  %v8423_v19 = vld [vmem:[#allocation2 + $0x64] sm:$0xff] }
  0x93   : > { %2587 = vrot.lane.b32.xlu1 %v8407_v17, %s8568_s15  ;;  %v1975_v62 = vrot.slane %v1973_v14, 7  ;;  %v2726_v61 = vpack.c.b16 %v2700_v57, %v2699_v13  ;;  %v1657_v20 = vrot.slane %v1656_v31, 4  ;;  %v1985_v32 = vshll.u32 %v1826_v5, 16  ;;  %v9133_v15 = vpop.permute.xlu2 %2929  ;;  %v9142_v57 = vld [vmem:[#allocation2 + $0x74] sm:$0xf] }
  0x94   : > { %v1662_v3 = vrot.slane %v1661_v41, 4  ;;  %v523_v43 = vld [vmem:[#allocation2] sm:$0x8]  ;;  %v1984_v59 = vrot.slane %v1982_v24, 7  ;;  %v426_v1 = vsel %vm8675_vm7, 0, %v425_v36  ;;  %v2295_v13 = vrot.slane %v1973_v14, 4 }
  0x95   : > { %v1978_v8 = vor.u32 %v1976_v27, %v1975_v62  ;;  %v1980_v25 = vrot.slane %v1975_v62, 4  ;;  %v574_v17 = vshrl.u32 %v523_v43, 16  ;;  %v1659_v40 = vsel %vm8710_vm10, %v1657_v20, %v1658_v47  ;;  %427 = vst [vmem:[#allocation2 + $0x7c] sm:$0x1] %v426_v1  ;;  %v9149_v20 = vld [vmem:[#allocation2 + $0x78] sm:$0xf] }
  0x96   : > { %v1667_v38 = vsel %vm8710_vm10, %v1662_v3, %v1666_v0  ;;  %v2891_v16 = vunpack.c.l.b16 %v1659_v40  ;;  %v1987_v37 = vor.u32 %v1985_v32, %v1984_v59  ;;  %v2296_v5 = vrot.slane %v1976_v27, 5 }
  0x97   : > { %v2892_v12 = vunpack.c.l.b16 %v1667_v38  ;;  %2747 = vrot.lane.b32.xlu0 %v2726_v61, %s8571_s18  ;;  %v7750_v60 = vrot.slane %v574_v17, 11  ;;  %v2299_v29 = vrot.slane %v1985_v32, 5  ;;  %v2301_v7 = vrot.slane %v1982_v24, 4 }
  0x98   : > { %v1824_v47 = vld [vmem:[#allocation2 + $0x70] sm:$0x8]  ;;  %v1988_v41 = vsel %vm8744_vm11, %v1980_v25, %v1987_v37  ;;  %v2297_v36 = vor.u32 %v2296_v5, %v2295_v13  ;;  %v1354_v1 = vshrl.u32 %v9142_v57, 16  ;;  %vm12798_vm3 = vcmask 162816  }
  0x99   : > { %v2918_v31 = vpack.c.b16 %v2892_v12, %v2891_v16  ;;  %v1186_v14 = vld [vmem:[#allocation2 + $0x70] sm:$0x8]  ;;  %v585_v0 = vsel %vm8744_vm11, %v7750_v60, %v9114_v11  ;;  %v1968_v62 = vshrl.u32 %v1824_v47, 16  ;;  %v2972_v27 = vunpack.c.l.b16 %v1988_v41 }
  0x9a   : > { %v2302_v61 = vor.u32 %v2301_v7, %v2299_v29  ;;  %v2449_v24 = vunpack.c.l.b16 %v585_v0  ;;  %v2298_v3 = vrot.slane %v2297_v36, 4  ;;  %v1349_v32 = vshrl.u32 %v1186_v14, 16  ;;  %v9162_v7 = vld [vmem:[#allocation2 + $0x64] sm:$0xf] }
  0x9b   : > { %2939 = vrot.lane.b32.xlu2 %v2918_v31, %s8574_s21  ;;  %2859 = vrot.lane.b32.xlu1 %v8423_v19, %s8569_s16  ;;  %v7787_v43 = vrot.slane %v1968_v62, 11  ;;  %v1357_v11 = vshll.u32 %v9142_v57, 16  ;;  %v1363_v12 = vshrl.u32 %v9149_v20, 16  ;;  %v1356_v60 = vrot.slane %v1354_v1, 7  ;;  %v9166_v47 = vpop.permute.xlu2 %3123 }
  0x9c   : > { %v2303_v25 = vrot.slane %v2302_v61, 4  ;;  %v2738_v59 = vpop.permute.xlu1 %2737  ;;  %v2481_v17 = vpack.c.b16 %v2450_v33, %v2449_v24  ;;  %v2214_v40 = vld [vmem:[#allocation2 + $0x7c] sm:$0x1]  ;;  %v2300_v38 = vsel %vm8710_vm10, %v2298_v3, %v2299_v29  ;;  %v7772_v16 = vrot.slane %v1349_v32, 11  ;;  %v8439_v29 = vld [vmem:[#allocation2 + $0x74] sm:$0xff] }
  0x9d   : > { %v2658_v13 = vpop.permute.xlu0 %2657  ;;  %v1979_v19 = vsel %vm8744_vm11, %v7787_v43, %v1978_v8  ;;  %v2305_v37 = vshll.u32 %v2214_v40, 16  ;;  %v3163_v5 = vunpack.c.l.b16 %v2300_v38  ;;  %v1365_v41 = vrot.slane %v1363_v12, 7  ;;  %v9174_v61 = vld [vmem:[#allocation2 + $0x68] sm:$0xf]  ;;  %v475_v40 = vld [vmem:[%s8652_s14 + $0x44] sm:$0xf] }
  0x9e   : > { %v3236_v33 = vsel %vm3233_vm12, %v2481_v17, %v9087_v44  ;;  %v2971_v31 = vunpack.c.l.b16 %v1979_v19  ;;  %v1366_v8 = vshll.u32 %v9149_v20, 16  ;;  %v1359_v0 = vor.u32 %v1357_v11, %v1356_v60  ;;  %v931_v44 = vld [vmem:[#allocation2 + $0x6c] sm:$0x1]  ;;  %v474_v17 = vld [vmem:[%s8652_s14 + $0x40] sm:$0xf]  ;;  %v8424_v20 = vld [vmem:[#allocation2 + $0x74] sm:$0xff] }
  0x9f   : > { %v2307_v36 = vrot.slane %v2305_v37, 5  ;;  %v3284_v14 = vsel %vm3282_vm13, %v3236_v33, %v2658_v13  ;;  %v1361_v62 = vrot.slane %v1356_v60, 4  ;;  %v12784_v43 = vshrl.u32 %v9162_v7, 16  ;;  %507 = vst.msk [vmem:[#allocation2 + $0x94] sm:$0xf] %vm334_vm0, %v474_v17 }
  0xa0   : > { %v2998_v24 = vpack.c.b16 %v2972_v27, %v2971_v31  ;;  %v3317_v3 = vsel %vm3315_vm14, %v3284_v14, %v2738_v59  ;;  %v1368_v32 = vor.u32 %v1366_v8, %v1365_v41  ;;  %v1360_v19 = vsel %vm8744_vm11, %v7772_v16, %v1359_v0  ;;  %v3517_v59 = vld [vmem:[%s12766_s1 + $0x10] sm:$0x3]  ;;  %v371_v16 = vld [vmem:[#allocation2 + $0x80] sm:$0x8]  ;;  %508 = vst.msk [vmem:[#allocation2 + $0x98] sm:$0xf] %vm334_vm0, %v475_v40 }
  0xa1   : > { %v2308_v38 = vsel %vm8710_vm10, %v2303_v25, %v2307_v36  ;;  %v9186_v13 = vsel %vm3348_vm15, %v3317_v3, %v9128_v52  ;;  %v12781_v27 = vshll.u32 %v9162_v7, 16  ;;  %v2701_v25 = vunpack.c.l.b16 %v1360_v19  ;;  %v9206_v14 = vld [vmem:[#allocation2 + $0x84] sm:$0xf]  ;;  %v9210_v3 = vld [vmem:[#allocation2 + $0x88] sm:$0xf] }
  0xa2   : > { %3019 = vrot.lane.b32.xlu0 %v2998_v24, %s8573_s20  ;;  %v3164_v37 = vunpack.c.l.b16 %v2308_v38  ;;  %v1369_v52 = vsel %vm8744_vm11, %v1361_v62, %v1368_v32  ;;  %v12783_v60 = vshrl.u32 %v9174_v61, 16  ;;  %v12782_v31 = vshll.u32 %v9174_v61, 16  ;;  %v8408_v19 = vld [vmem:[#allocation2 + $0x64] sm:$0xff] }
  0xa3   : > { %3131 = vrot.lane.b32.xlu1 %v8439_v29, %s8570_s17  ;;  %v2702_v33 = vunpack.c.l.b16 %v1369_v52  ;;  %v1028_v41 = vrot.slane %v12784_v43, 4  ;;  %v1029_v36 = vrot.slane %v12781_v27, 5  ;;  %v1038_v62 = vshll.u32 %v931_v44, 16 }
  0xa4   : > { %v3190_v29 = vpack.c.b16 %v3164_v37, %v3163_v5  ;;  %v1034_v0 = vrot.slane %v12783_v60, 4  ;;  %v3531_v24 = vunpack.c.l.b16 %v3517_v59  ;;  %v1032_v40 = vrot.slane %v12782_v31, 5  ;;  %v1574_v31 = vld [vmem:[#allocation2 + $0x7c] sm:$0x1] }
  0xa5   : > { %v2727_v32 = vpack.c.b16 %v2702_v33, %v2701_v25  ;;  %v1030_v17 = vor.u32 %v1029_v36, %v1028_v41  ;;  %v2740_v38 = vpop.permute.xlu1 %2739  ;;  %v1040_v52 = vrot.slane %v1038_v62, 5  ;;  %v372_v5 = vsel %vm8664_vm6, 0, %v371_v16 }
  0xa6   : > { %3211 = vrot.lane.b32.xlu2 %v3190_v29, %s8575_s22  ;;  %v3534_v27 = vpack.c.b16 %v3531_v24, %v3531_v24  ;;  %v1995_v44 = vshrl.u32 %v9206_v14, 16  ;;  %v1035_v37 = vor.u32 %v1034_v0, %v1032_v40  ;;  %373 = vst [vmem:[#allocation2 + $0x80] sm:$0x8] %v372_v5  ;;  %v1998_v25 = vshll.u32 %v9206_v14, 16 }
  0xa7   : > { %v1031_v59 = vrot.slane %v1030_v17, 4  ;;  %v2004_v33 = vshrl.u32 %v9210_v3, 16  ;;  %v9220_v36 = vpop.permute.xlu2 %2661  ;;  %v2007_v62 = vshll.u32 %v9210_v3, 16  ;;  %v1668_v16 = vrot.slane %v1354_v1, 4 }
  0xa8   : > { %v3572_v41 = vsel %vm3570_vm1, %v3534_v27, 0  ;;  %v1997_v29 = vrot.slane %v1995_v44, 7  ;;  %v1036_v0 = vrot.slane %v1035_v37, 4  ;;  %v8451_v27 = vld [vmem:[%s12766_s1 + $0x8] sm:$0xff]  ;;  %v1669_v60 = vrot.slane %v1357_v11, 5 }
  0xa9   : > { %v1033_v24 = vsel %vm8710_vm10, %v1031_v59, %v1032_v40  ;;  %3579 = vmatpush.bf16.msra.mxu0 %v3572_v41  ;;  %v2006_v5 = vrot.slane %v2004_v33, 7  ;;  %8528 = vmatpush.bf16.msra.mxu1 %v3572_v41  ;;  %vm3414_vm5 = vcmask 195584   ;;  %vm3447_vm8 = vcmask 228352  }
  0xaa   : > { %v2660_v17 = vpop.permute.xlu0 %2659  ;;  %2589 = vrot.lane.b32.xlu0 %v8408_v19, %s8568_s15  ;;  %v2621_v1 = vunpack.c.l.b16 %v1033_v24  ;;  %v2000_v59 = vor.u32 %v1998_v25, %v1997_v29  ;;  %v2002_v37 = vrot.slane %v1997_v29, 4  ;;  %v1041_v43 = vsel %vm8710_vm10, %v1036_v0, %v1040_v52 }
  0xab   : > { %v3286_v40 = vsel %vm3282_vm13, %v9060_v23, %v2660_v17  ;;  %v2009_v57 = vor.u32 %v2007_v62, %v2006_v5  ;;  %v1670_v11 = vor.u32 %v1669_v60, %v1668_v16  ;;  %v2622_v41 = vunpack.c.l.b16 %v1041_v43 }
  0xac   : > { %v3319_v26 = vsel %vm3315_vm14, %v3286_v40, %v2740_v38  ;;  %v1672_v19 = vrot.slane %v1366_v8, 5  ;;  %v1674_v23 = vrot.slane %v1363_v12, 4  ;;  %v1678_v24 = vshll.u32 %v1574_v31, 16  ;;  %v8450_v38 = vld [vmem:[%s12766_s1] sm:$0xff] }
  0xad   : > { %3580 = vmatpush.bf16.msra.mxu0 %v8451_v27  ;;  %v2010_v29 = vsel %vm8744_vm11, %v2002_v37, %v2009_v57  ;;  %v1671_v17 = vrot.slane %v1670_v11, 4  ;;  %v3352_v43 = vsel %vm3348_vm15, %v3319_v26, %v9064_v2  ;;  %8529 = vmatpush.bf16.msra.mxu1 %v8451_v27  ;;  %v2647_v8 = vpack.c.b16 %v2622_v41, %v2621_v1  ;;  %v1827_v12 = vld [vmem:[#allocation2 + $0x80] sm:$0x8]  ;;  %v428_v2 = vld [vmem:[#allocation2 + $0x8c] sm:$0x1] }
  0xae   : > { %2749 = vrot.lane.b32.xlu2 %v2727_v32, %s8571_s18  ;;  %v2974_v60 = vunpack.c.l.b16 %v2010_v29  ;;  %v1675_v31 = vor.u32 %v1674_v23, %v1672_v19  ;;  %v1680_v52 = vrot.slane %v1678_v24, 5  ;;  %v1990_v16 = vshrl.u32 %v1827_v12, 16  ;;  %v9268_v57 = vld [vmem:[#allocation2 + $0x74] sm:$0xf]  ;;  %v9280_v41 = vld [vmem:[#allocation2 + $0x78] sm:$0xf] }
  0xaf   : > { %v1673_v0 = vsel %vm8710_vm10, %v1671_v17, %v1672_v19  ;;  %v3383_v40 = vsel %vm12798_vm3, %v9186_v13, %v9133_v15  ;;  %2669 = vrot.lane.b32.xlu1 %v2647_v8, %s8572_s19  ;;  %vm3480_vm9 = vcmask 261120   ;;  %vm12797_vm1 = vcmask 293888  }
  0xb0   : > { %v3202_v5 = vpop.permute.xlu1 %3201  ;;  %v1676_v26 = vrot.slane %v1675_v31, 4  ;;  %v2893_v32 = vunpack.c.l.b16 %v1673_v0  ;;  %v3416_v27 = vsel %vm3414_vm5, %v3383_v40, %v9097_v58  ;;  %v7788_v1 = vrot.slane %v1990_v16, 11  ;;  %v8440_v0 = vld [vmem:[#allocation2 + $0x84] sm:$0xff] }
  0xb1   : > { %3581 = vmatpush.bf16.msra.mxu0 %v8450_v38  ;;  %v3449_v37 = vsel %vm3447_vm8, %v3416_v27, %v9131_v42  ;;  %8530 = vmatpush.bf16.msra.mxu1 %v8450_v38  ;;  %v9273_v13 = vpop.permute.xlu2 %2933  ;;  %v429_v11 = vsel %vm8675_vm7, 0, %v428_v2  ;;  %v2309_v42 = vrot.slane %v1995_v44, 4  ;;  %v2310_v24 = vrot.slane %v1998_v25, 5  ;;  %v1191_v27 = vld [vmem:[#allocation2 + $0x88] sm:$0xf] }
  0xb2   : > { %2861 = vrot.lane.b32.xlu0 %v8424_v20, %s8569_s16  ;;  %v1681_v15 = vsel %vm8710_vm10, %v1676_v26, %v1680_v52  ;;  %v3482_v58 = vsel %vm3480_vm9, %v3449_v37, %v3202_v5  ;;  %v2001_v19 = vsel %vm8744_vm11, %v7788_v1, %v2000_v59  ;;  %430 = vst [vmem:[#allocation2 + $0x8c] sm:$0x1] %v429_v11  ;;  %v2313_v29 = vrot.slane %v2007_v62, 5  ;;  %v932_v59 = vld [vmem:[#allocation2 + $0x7c] sm:$0x1] }
  0xb3   : > { %v2894_v23 = vunpack.c.l.b16 %v1681_v15  ;;  %v2973_v17 = vunpack.c.l.b16 %v2001_v19  ;;  %v2315_v44 = vrot.slane %v2004_v33, 4  ;;  %v733_v8 = vshrl.u32 %v9268_v57, 16  ;;  %v1189_v52 = vld [vmem:[#allocation2 + $0x80] sm:$0x8]  ;;  %v9295_v62 = vld [vmem:[#allocation2 + $0x84] sm:$0xf] }
  0xb4   : > { %7998 = vmatmul.msk.bf16.vlgmr.msra.gmra.mxu0 %vm12797_vm1, %v3482_v58  ;;  %v736_v20 = vshll.u32 %v9268_v57, 16  ;;  %v2311_v14 = vor.u32 %v2310_v24, %v2309_v42  ;;  %v742_v25 = vshrl.u32 %v9280_v41, 16  ;;  %v12786_v3 = vshll.u32 %v9280_v41, 16 }
  0xb5   : > { %v2932_v38 = vpop.permute.xlu0 %2931  ;;  %v2919_v12 = vpack.c.b16 %v2894_v23, %v2893_v32  ;;  %v2999_v16 = vpack.c.b16 %v2974_v60, %v2973_v17  ;;  %v2316_v5 = vor.u32 %v2315_v44, %v2313_v29  ;;  %v1042_v33 = vrot.slane %v733_v8, 4  ;;  %v529_v44 = vld [vmem:[#allocation2 + $0x20] sm:$0x8] }
  0xb6   : > { %v3385_v31 = vsel %vm12798_vm3, %v3352_v43, %v2932_v38  ;;  %v2312_v40 = vrot.slane %v2311_v14, 4  ;;  %v1043_v2 = vrot.slane %v736_v20, 5  ;;  %v1048_v43 = vrot.slane %v742_v25, 4 }
  0xb7   : > { %v1052_v26 = vshll.u32 %v932_v59, 16  ;;  %3021 = vrot.lane.b32.xlu2 %v2999_v16, %s8573_s20  ;;  %2941 = vrot.lane.b32.xlu1 %v2919_v12, %s8574_s21  ;;  %v2317_v60 = vrot.slane %v2316_v5, 4  ;;  %v1046_v32 = vrot.slane %v12786_v3, 5  ;;  %v1371_v1 = vshrl.u32 %v1189_v52, 16  ;;  %v8409_v5 = vld [vmem:[#allocation2 + $0x74] sm:$0xff] }
  0xb8   : > { %v1376_v37 = vshrl.u32 %v9295_v62, 16  ;;  %v2314_v15 = vsel %vm8710_vm10, %v2312_v40, %v2313_v29  ;;  %v1044_v58 = vor.u32 %v1043_v2, %v1042_v33  ;;  %v1379_v42 = vshll.u32 %v9295_v62, 16 }
  0xb9   : > { %v1054_v11 = vrot.slane %v1052_v26, 5  ;;  %v2215_v19 = vld [vmem:[#allocation2 + $0x8c] sm:$0x1]  ;;  %v3165_v23 = vunpack.c.l.b16 %v2314_v15  ;;  %v1049_v24 = vor.u32 %v1048_v43, %v1046_v32  ;;  %v7773_v17 = vrot.slane %v1371_v1, 11 }
  0xba   : > { %3133 = vrot.lane.b32.xlu0 %v8440_v0, %s8570_s17  ;;  %v1378_v38 = vrot.slane %v1376_v37, 7  ;;  %v2319_v59 = vshll.u32 %v2215_v19, 16  ;;  %v1045_v14 = vrot.slane %v1044_v58, 4  ;;  %v1385_v52 = vshrl.u32 %v1191_v27, 16 }
  0xbb   : > { %v1388_v16 = vshll.u32 %v1191_v27, 16  ;;  %v1050_v33 = vrot.slane %v1049_v24, 4  ;;  %v618_v26 = vshrl.u32 %v529_v44, 16  ;;  %vm3695_vm2 = vcmask 257024  }
  0xbc   : > { %v3012_v12 = vpop.permute.xlu1 %3011  ;;  %v9313_v3 = vpop.permute.xlu2 %3205  ;;  %v1381_v62 = vor.u32 %v1379_v42, %v1378_v38  ;;  %v1383_v40 = vrot.slane %v1378_v38, 4  ;;  %v2321_v0 = vrot.slane %v2319_v59, 5  ;;  %v1047_v2 = vsel %vm8710_vm10, %v1045_v14, %v1046_v32  ;;  %v476_v14 = vld [vmem:[%s8652_s14 + $0x48] sm:$0xf] }
  0xbd   : > { %v3418_v29 = vsel %vm3414_vm5, %v3385_v31, %v3012_v12  ;;  %v1387_v43 = vrot.slane %v1385_v52, 7  ;;  %v1055_v1 = vsel %vm8710_vm10, %v1050_v33, %v1054_v11  ;;  %v2623_v27 = vunpack.c.l.b16 %v1047_v2  ;;  %v477_v33 = vld [vmem:[%s8652_s14 + $0x4c] sm:$0xf]  ;;  %509 = vst.msk [vmem:[#allocation2 + $0xa4] sm:$0xf] %vm334_vm0, %v476_v14 }
  0xbe   : > { %v1382_v58 = vsel %vm8744_vm11, %v7773_v17, %v1381_v62  ;;  %v625_v31 = vrot.slane %v623_v18, 7  ;;  %v2322_v19 = vsel %vm8710_vm10, %v2317_v60, %v2321_v0  ;;  %v2624_v24 = vunpack.c.l.b16 %v1055_v1  ;;  %v1575_v62 = vld [vmem:[#allocation2 + $0x8c] sm:$0x1]  ;;  %510 = vst.msk [vmem:[#allocation2 + $0xa8] sm:$0xf] %vm334_vm0, %v477_v33 }
  0xbf   : > { %v3204_v15 = vpop.permute.xlu0 %3203  ;;  %v1390_v32 = vor.u32 %v1388_v16, %v1387_v43  ;;  %v2703_v38 = vunpack.c.l.b16 %v1382_v58  ;;  %2591 = vrot.lane.b32.xlu2 %v8409_v5, %s8568_s15  ;;  %v3166_v44 = vunpack.c.l.b16 %v2322_v19  ;;  %v7752_v59 = vrot.slane %v618_v26, 11  ;;  %v374_v43 = vld [vmem:[#allocation2 + $0x90] sm:$0x8] }
  0xc0   : > { %v628_v11 = vor.u32 %v626_v45, %v625_v31  ;;  %v630_v12 = vrot.slane %v625_v31, 4  ;;  %v2648_v17 = vpack.c.b16 %v2624_v24, %v2623_v27  ;;  %v634_v60 = vrot.slane %v632_v50, 7  ;;  %v1831_v27 = vld [vmem:[#allocation2 + $0x94] sm:$0xf]  ;;  %v1832_v24 = vld [vmem:[#allocation2 + $0x98] sm:$0xf] }
  0xc1   : > { %v1391_v18 = vsel %vm8744_vm11, %v1383_v40, %v1390_v32  ;;  %v1682_v0 = vrot.slane %v1376_v37, 4  ;;  %v3191_v5 = vpack.c.b16 %v3166_v44, %v3165_v23  ;;  %v1683_v45 = vrot.slane %v1379_v42, 5  ;;  %v8425_v23 = vld [vmem:[#allocation2 + $0x84] sm:$0xff] }
  0xc2   : > { %v2704_v2 = vunpack.c.l.b16 %v1391_v18  ;;  %v629_v56 = vsel %vm8744_vm11, %v7752_v59, %v628_v11  ;;  %2671 = vrot.lane.b32.xlu0 %v2648_v17, %s8572_s19  ;;  %v637_v40 = vor.u32 %v635_v22, %v634_v60  ;;  %v1686_v1 = vrot.slane %v1388_v16, 5  ;;  %v431_v16 = vld [vmem:[#allocation2 + $0x9c] sm:$0x1] }
  0xc3   : > { %v2453_v26 = vunpack.c.l.b16 %v629_v56  ;;  %v1688_v37 = vrot.slane %v1385_v52, 4  ;;  %3213 = vrot.lane.b32.xlu1 %v3191_v5, %s8575_s22  ;;  %v1684_v31 = vor.u32 %v1683_v45, %v1682_v0  ;;  %v1692_v19 = vshll.u32 %v1575_v62, 16  ;;  %v9360_v45 = vld [vmem:[#allocation2 + $0x84] sm:$0xf] }
  0xc4   : > { %v2582_v50 = vpop.permute.xlu1 %2581  ;;  %v2728_v58 = vpack.c.b16 %v2704_v2, %v2703_v38  ;;  %v3451_v42 = vsel %vm3447_vm8, %v3418_v29, %v9166_v47  ;;  %v638_v32 = vsel %vm8744_vm11, %v630_v12, %v637_v40  ;;  %v375_v52 = vsel %vm8664_vm6, 0, %v374_v43  ;;  %v9350_v44 = vpop.permute.xlu2 %2743 }
  0xc5   : > { %v1689_v63 = vor.u32 %v1688_v37, %v1686_v1  ;;  %v3484_v22 = vsel %vm3480_vm9, %v3451_v42, %v3204_v15  ;;  %v2454_v59 = vunpack.c.l.b16 %v638_v32  ;;  %v1685_v38 = vrot.slane %v1684_v31, 4  ;;  %376 = vst [vmem:[#allocation2 + $0x90] sm:$0x8] %v375_v52  ;;  %v8441_v32 = vld [vmem:[#allocation2 + $0x94] sm:$0xff] }
  0xc6   : > { %v1694_v11 = vrot.slane %v1692_v19, 5  ;;  %7999 = vmatmul.msk.bf16.gmra.mxu0 %vm12797_vm1, %v3484_v22  ;;  %v2017_v47 = vshrl.u32 %v1831_v27, 16  ;;  %v2020_v33 = vshll.u32 %v1831_v27, 16  ;;  %v2026_v12 = vshrl.u32 %v1832_v24, 16  ;;  %v9367_v22 = vld [vmem:[#allocation2 + $0x88] sm:$0xf] }
  0xc7   : > { %v2742_v14 = vpop.permute.xlu0 %2741  ;;  %v1690_v29 = vrot.slane %v1689_v63, 4  ;;  %v2029_v17 = vshll.u32 %v1832_v24, 16  ;;  %2863 = vrot.lane.b32.xlu2 %v8425_v23, %s8569_s16  ;;  %v2483_v15 = vpack.c.b16 %v2454_v59, %v2453_v26  ;;  %v1687_v18 = vsel %vm8710_vm10, %v1685_v38, %v1686_v1 }
  0xc8   : > { %v2019_v60 = vrot.slane %v2017_v47, 7  ;;  %v432_v62 = vsel %vm8675_vm7, 0, %v431_v16  ;;  %v2895_v5 = vunpack.c.l.b16 %v1687_v18  ;;  %v2028_v2 = vrot.slane %v2026_v12, 7  ;;  %v535_v18 = vld [vmem:[#allocation2 + $0x40] sm:$0x8] }
  0xc9   : > { %v1695_v0 = vsel %vm8710_vm10, %v1690_v29, %v1694_v11  ;;  %433 = vst [vmem:[#allocation2 + $0x9c] sm:$0x1] %v432_v62  ;;  %v2323_v56 = vrot.slane %v2017_v47, 4  ;;  %v3242_v43 = vsel %vm3233_vm12, %v2483_v15, %v2582_v50  ;;  %v2324_v31 = vrot.slane %v2020_v33, 5  ;;  %v933_v11 = vld [vmem:[#allocation2 + $0x8c] sm:$0x1] }
  0xca   : > { %v2896_v40 = vunpack.c.l.b16 %v1695_v0  ;;  %v2022_v26 = vor.u32 %v2020_v33, %v2019_v60  ;;  %v2024_v37 = vrot.slane %v2019_v60, 4  ;;  %v3288_v1 = vsel %vm3282_vm13, %v3242_v43, %v9220_v36 }
  0xcb   : > { %v2031_v27 = vor.u32 %v2029_v17, %v2028_v2  ;;  %v2327_v19 = vrot.slane %v2029_v17, 5  ;;  %2751 = vrot.lane.b32.xlu1 %v2728_v58, %s8571_s18  ;;  %v3321_v24 = vsel %vm3315_vm14, %v3288_v1, %v2742_v14  ;;  %v2329_v63 = vrot.slane %v2026_v12, 4 }
  0xcc   : > { %v2854_v23 = vpop.permute.xlu1 %2853  ;;  %v2920_v42 = vpack.c.b16 %v2896_v40, %v2895_v5  ;;  %v755_v50 = vshrl.u32 %v9360_v45, 16  ;;  %v1830_v52 = vld [vmem:[#allocation2 + $0x90] sm:$0x8]  ;;  %v2325_v59 = vor.u32 %v2324_v31, %v2323_v56  ;;  %v758_v38 = vshll.u32 %v9360_v45, 16  ;;  %v9382_v62 = vpop.permute.xlu2 %3015 }
  0xcd   : > { %v2032_v16 = vsel %vm8744_vm11, %v2024_v37, %v2031_v27  ;;  %v3354_v36 = vsel %vm3348_vm15, %v3321_v24, %v2854_v23  ;;  %v2012_v58 = vshrl.u32 %v1830_v52, 16  ;;  %v2330_v47 = vor.u32 %v2329_v63, %v2327_v19 }
  0xce   : > { %2943 = vrot.lane.b32.xlu0 %v2920_v42, %s8574_s21  ;;  %v2976_v14 = vunpack.c.l.b16 %v2032_v16  ;;  %v3387_v29 = vsel %vm12798_vm3, %v3354_v36, %v9273_v13  ;;  %v2326_v33 = vrot.slane %v2325_v59, 4  ;;  %v764_v12 = vshrl.u32 %v9367_v22, 16 }
  0xcf   : > { %v767_v17 = vshll.u32 %v9367_v22, 16  ;;  %v1056_v15 = vrot.slane %v755_v50, 4  ;;  %3135 = vrot.lane.b32.xlu2 %v8441_v32, %s8570_s17  ;;  %v7789_v60 = vrot.slane %v2012_v58, 11  ;;  %v2331_v5 = vrot.slane %v2330_v47, 4  ;;  %v1192_v58 = vld [vmem:[#allocation2 + $0x90] sm:$0x8] }
  0xd0   : > { %v2216_v0 = vld [vmem:[#allocation2 + $0x9c] sm:$0x1]  ;;  %v1057_v13 = vrot.slane %v758_v38, 5  ;;  %v1066_v56 = vshll.u32 %v933_v11, 16  ;;  %v2328_v43 = vsel %vm8710_vm10, %v2326_v33, %v2327_v19  ;;  %v1062_v42 = vrot.slane %v764_v12, 4 }
  0xd1   : > { %v3014_v2 = vpop.permute.xlu0 %3013  ;;  %v2333_v40 = vshll.u32 %v2216_v0, 16  ;;  %v1060_v1 = vrot.slane %v767_v17, 5  ;;  %v2023_v27 = vsel %vm8744_vm11, %v7789_v60, %v2022_v26  ;;  %v3167_v23 = vunpack.c.l.b16 %v2328_v43 }
  0xd2   : > { %v3420_v37 = vsel %vm3414_vm5, %v3387_v29, %v3014_v2  ;;  %v1058_v31 = vor.u32 %v1057_v13, %v1056_v15  ;;  %v2975_v24 = vunpack.c.l.b16 %v2023_v27  ;;  %v1068_v63 = vrot.slane %v1066_v56, 5  ;;  %v1193_v15 = vld [vmem:[#allocation2 + $0x94] sm:$0xf]  ;;  %v1194_v2 = vld [vmem:[#allocation2 + $0x98] sm:$0xf] }
  0xd3   : > { %v2335_v32 = vrot.slane %v2333_v40, 5  ;;  %v662_v52 = vshrl.u32 %v535_v18, 16  ;;  %v1063_v36 = vor.u32 %v1062_v42, %v1060_v1  ;;  %v669_v59 = vrot.slane %v667_v55, 7  ;;  %v532_v56 = vld [vmem:[#allocation2 + $0x30] sm:$0x8] }
  0xd4   : > { %v3126_v16 = vpop.permute.xlu1 %3125  ;;  %v1059_v19 = vrot.slane %v1058_v31, 4  ;;  %v678_v11 = vrot.slane %v676_v34, 7  ;;  %v3000_v26 = vpack.c.b16 %v2976_v14, %v2975_v24  ;;  %v1393_v13 = vshrl.u32 %v1192_v58, 16  ;;  %v479_v27 = vld [vmem:[%s8652_s14 + $0x54] sm:$0xf]  ;;  %v2586_v24 = vpop.permute.xlu2 %2585 }
  0xd5   : > { %v2336_v47 = vsel %vm8710_vm10, %v2331_v5, %v2335_v32  ;;  %v7754_v29 = vrot.slane %v662_v52, 11  ;;  %v3453_v33 = vsel %vm3447_vm8, %v3420_v37, %v3126_v16  ;;  %v1064_v0 = vrot.slane %v1063_v36, 4  ;;  %512 = vst.msk [vmem:[#allocation2 + $0xb8] sm:$0xf] %vm334_vm0, %v479_v27 }
  0xd6   : > { %v3168_v60 = vunpack.c.l.b16 %v2336_v47  ;;  %v1061_v18 = vsel %vm8710_vm10, %v1059_v19, %v1060_v1  ;;  %v672_v55 = vor.u32 %v670_v48, %v669_v59  ;;  %3023 = vrot.lane.b32.xlu1 %v3000_v26, %s8573_s20  ;;  %v674_v14 = vrot.slane %v669_v59, 4  ;;  %v478_v48 = vld [vmem:[%s8652_s14 + $0x50] sm:$0xf]  ;;  %v8410_v19 = vld [vmem:[#allocation2 + $0x84] sm:$0xff] }
  0xd7   : > { %v2625_v34 = vunpack.c.l.b16 %v1061_v18  ;;  %v681_v5 = vor.u32 %v679_v4, %v678_v11  ;;  %v1069_v40 = vsel %vm8710_vm10, %v1064_v0, %v1068_v63  ;;  %v1398_v1 = vshrl.u32 %v1193_v15, 16  ;;  %511 = vst.msk [vmem:[#allocation2 + $0xb4] sm:$0xf] %vm334_vm0, %v478_v48 }
  0xd8   : > { %v3192_v43 = vpack.c.b16 %v3168_v60, %v3167_v23  ;;  %v673_v37 = vsel %vm8744_vm11, %v7754_v29, %v672_v55  ;;  %v2626_v31 = vunpack.c.l.b16 %v1069_v40  ;;  %v7774_v42 = vrot.slane %v1393_v13, 11  ;;  %v1834_v40 = vld [vmem:[#allocation2 + $0xa4] sm:$0xf] }
  0xd9   : > { %v9413_v39 = vpop.permute.xlu0 %2583  ;;  %v682_v28 = vsel %vm8744_vm11, %v674_v14, %v681_v5  ;;  %v2457_v4 = vunpack.c.l.b16 %v673_v37  ;;  %v1400_v32 = vrot.slane %v1398_v1, 7  ;;  %v1401_v63 = vshll.u32 %v1193_v15, 16 }
  0xda   : > { %3215 = vrot.lane.b32.xlu0 %v3192_v43, %s8575_s22  ;;  %v2458_v23 = vunpack.c.l.b16 %v682_v28  ;;  %v1407_v52 = vshrl.u32 %v1194_v2, 16  ;;  %v2649_v16 = vpack.c.b16 %v2626_v31, %v2625_v34  ;;  %v1410_v36 = vshll.u32 %v1194_v2, 16  ;;  %v1576_v2 = vld [vmem:[#allocation2 + $0x9c] sm:$0x1]  ;;  %v377_v43 = vld [vmem:[#allocation2 + $0xa0] sm:$0x8] }
  0xdb   : > { %v640_v59 = vshrl.u32 %v532_v56, 16  ;;  %v647_v11 = vrot.slane %v645_v49, 7  ;;  %v1403_v47 = vor.u32 %v1401_v63, %v1400_v32  ;;  %v1405_v29 = vrot.slane %v1400_v32, 4 }
  0xdc   : > { %v9424_v58 = vpop.permute.xlu1 %2663  ;;  %v2485_v26 = vpack.c.b16 %v2458_v23, %v2457_v4  ;;  %v1409_v60 = vrot.slane %v1407_v52, 7  ;;  %2673 = vrot.lane.b32.xlu2 %v2649_v16, %s8572_s19  ;;  %v656_v55 = vrot.slane %v654_v35, 7  ;;  %v3486_v5 = vsel %vm3480_vm9, %v3453_v33, %v9313_v3  ;;  %v434_v16 = vld [vmem:[#allocation2 + $0xac] sm:$0x1] }
  0xdd   : > { %v7753_v18 = vrot.slane %v640_v59, 11  ;;  %v650_v15 = vor.u32 %v648_v9, %v647_v11  ;;  %v652_v0 = vrot.slane %v647_v11, 4  ;;  %v1404_v49 = vsel %vm8744_vm11, %v7774_v42, %v1403_v47  ;;  %8000 = vmatmul.msk.bf16.gmra.mxu0 %vm12797_vm1, %v3486_v5 }
  0xde   : > { %v9432_v34 = vsel %vm3233_vm12, %v2485_v26, %v2586_v24  ;;  %v1412_v14 = vor.u32 %v1410_v36, %v1409_v60  ;;  %2593 = vrot.lane.b32.xlu1 %v8410_v19, %s8568_s15  ;;  %v2705_v13 = vunpack.c.l.b16 %v1404_v49  ;;  %v13020_v9 = vshll.u32 %v8932_v46, 16  ;;  %v1835_v46 = vld [vmem:[#allocation2 + $0xa8] sm:$0xf]  ;;  %v9450_v60 = vpop.permute.xlu2 %2857 }
  0xdf   : > { %v651_v54 = vsel %vm8744_vm11, %v7753_v18, %v650_v15  ;;  %v1696_v56 = vrot.slane %v1398_v1, 4  ;;  %v1697_v3 = vrot.slane %v1401_v63, 5  ;;  %v1700_v33 = vrot.slane %v1410_v36, 5  ;;  %v8426_v63 = vld [vmem:[#allocation2 + $0x94] sm:$0xff] }
  0xe0   : > { %v659_v35 = vor.u32 %v13020_v9, %v656_v55  ;;  %v1413_v37 = vsel %vm8744_vm11, %v1405_v29, %v1412_v14  ;;  %v2455_v48 = vunpack.c.l.b16 %v651_v54  ;;  %v1702_v4 = vrot.slane %v1407_v52, 4  ;;  %v9459_v54 = vld [vmem:[#allocation2 + $0xa4] sm:$0xf] }
  0xe1   : > { %v2856_v27 = vpop.permute.xlu0 %2855  ;;  %v2706_v31 = vunpack.c.l.b16 %v1413_v37  ;;  %v1706_v42 = vshll.u32 %v1576_v2, 16  ;;  %v1698_v24 = vor.u32 %v1697_v3, %v1696_v56  ;;  %v378_v1 = vsel %vm8664_vm6, 0, %v377_v43 }
  0xe2   : > { %v660_v28 = vsel %vm8744_vm11, %v652_v0, %v659_v35  ;;  %v2039_v32 = vshrl.u32 %v1834_v40, 16  ;;  %v1703_v59 = vor.u32 %v1702_v4, %v1700_v33  ;;  %379 = vst [vmem:[#allocation2 + $0xa0] sm:$0x8] %v378_v1  ;;  %v2042_v36 = vshll.u32 %v1834_v40, 16  ;;  %v9469_v4 = vld [vmem:[#allocation2 + $0xa8] sm:$0xf] }
  0xe3   : > { %v2456_v23 = vunpack.c.l.b16 %v660_v28  ;;  %v2729_v19 = vpack.c.b16 %v2706_v31, %v2705_v13  ;;  %v1708_v11 = vrot.slane %v1706_v42, 5  ;;  %v1699_v29 = vrot.slane %v1698_v24, 4 }
  0xe4   : > { %v2936_v26 = vpop.permute.xlu1 %2935  ;;  %v2041_v52 = vrot.slane %v2039_v32, 7  ;;  %v2048_v18 = vshrl.u32 %v1835_v46, 16  ;;  %v1704_v15 = vrot.slane %v1703_v59, 4  ;;  %v2051_v0 = vshll.u32 %v1835_v46, 16  ;;  %v8442_v59 = vld [vmem:[#allocation2 + $0xa4] sm:$0xff] }
  0xe5   : > { %v2484_v47 = vpack.c.b16 %v2456_v23, %v2455_v48  ;;  %2753 = vrot.lane.b32.xlu0 %v2729_v19, %s8571_s18  ;;  %v435_v55 = vsel %vm8675_vm7, 0, %v434_v16  ;;  %v2337_v49 = vrot.slane %v2039_v32, 4  ;;  %v1701_v5 = vsel %vm8710_vm10, %v1699_v29, %v1700_v33  ;;  %v9480_v29 = vld [vmem:[#allocation2 + $0x94] sm:$0xf] }
  0xe6   : > { %v2044_v2 = vor.u32 %v2042_v36, %v2041_v52  ;;  %v2046_v13 = vrot.slane %v2041_v52, 4  ;;  %436 = vst [vmem:[#allocation2 + $0xac] sm:$0x1] %v435_v55  ;;  %v1709_v9 = vsel %vm8710_vm10, %v1704_v15, %v1708_v11  ;;  %v2897_v35 = vunpack.c.l.b16 %v1701_v5  ;;  %2865 = vrot.lane.b32.xlu1 %v8426_v63, %s8569_s16 }
  0xe7   : > { %v3245_v14 = vsel %vm3233_vm12, %v2484_v47, %v9413_v39  ;;  %v2050_v43 = vrot.slane %v2048_v18, 7  ;;  %v2898_v40 = vunpack.c.l.b16 %v1709_v9  ;;  %v2338_v37 = vrot.slane %v2042_v36, 5  ;;  %v9490_v9 = vld [vmem:[#allocation2 + $0x98] sm:$0xf] }
  0xe8   : > { %v3290_v56 = vsel %vm3282_vm13, %v3245_v14, %v9424_v58  ;;  %v2341_v48 = vrot.slane %v2051_v0, 5  ;;  %v2343_v28 = vrot.slane %v2048_v18, 4  ;;  %v1420_v42 = vshrl.u32 %v9459_v54, 16  ;;  %v9487_v14 = vpop.permute.xlu2 %3129 }
  0xe9   : > { %v3323_v39 = vsel %vm3315_vm14, %v3290_v56, %v9350_v44  ;;  %v3128_v3 = vpop.permute.xlu0 %3127  ;;  %v2053_v33 = vor.u32 %v2051_v0, %v2050_v43  ;;  %v2921_v46 = vpack.c.b16 %v2898_v40, %v2897_v35  ;;  %v1833_v23 = vld [vmem:[#allocation2 + $0xa0] sm:$0x8]  ;;  %v2339_v24 = vor.u32 %v2338_v37, %v2337_v49 }
  0xea   : > { %v3356_v31 = vsel %vm3348_vm15, %v3323_v39, %v2856_v27  ;;  %v1195_v1 = vld [vmem:[#allocation2 + $0xa0] sm:$0x8]  ;;  %v1423_v32 = vshll.u32 %v9459_v54, 16  ;;  %v2034_v44 = vshrl.u32 %v1833_v23, 16  ;;  %v2344_v19 = vor.u32 %v2343_v28, %v2341_v48 }
  0xeb   : > { %v3389_v58 = vsel %vm12798_vm3, %v3356_v31, %v2936_v26  ;;  %v2054_v16 = vsel %vm8744_vm11, %v2046_v13, %v2053_v33  ;;  %2945 = vrot.lane.b32.xlu2 %v2921_v46, %s8574_s21  ;;  %v2340_v36 = vrot.slane %v2339_v24, 4  ;;  %v1415_v26 = vshrl.u32 %v1195_v1, 16  ;;  %v934_v33 = vld [vmem:[#allocation2 + $0x9c] sm:$0x1]  ;;  %v380_v24 = vld [vmem:[#allocation2 + $0xb0] sm:$0x8] }
  0xec   : > { %v3422_v27 = vsel %vm3414_vm5, %v3389_v58, %v9382_v62  ;;  %v3208_v11 = vpop.permute.xlu1 %3207  ;;  %v2978_v63 = vunpack.c.l.b16 %v2054_v16  ;;  %v7790_v52 = vrot.slane %v2034_v44, 11  ;;  %v2345_v15 = vrot.slane %v2344_v19, 4  ;;  %v480_v58 = vld [vmem:[%s8652_s14 + $0x58] sm:$0xf] }
  0xed   : > { %v3455_v47 = vsel %vm3447_vm8, %v3422_v27, %v3128_v3  ;;  %v2217_v18 = vld [vmem:[#allocation2 + $0xac] sm:$0x1]  ;;  %v1422_v0 = vrot.slane %v1420_v42, 7  ;;  %v1429_v55 = vshrl.u32 %v9469_v4, 16  ;;  %v2342_v62 = vsel %vm8710_vm10, %v2340_v36, %v2341_v48  ;;  %v481_v27 = vld [vmem:[%s8652_s14 + $0x5c] sm:$0xf] }
  0xee   : > { %v2347_v49 = vshll.u32 %v2217_v18, 16  ;;  %v7775_v5 = vrot.slane %v1415_v26, 11  ;;  %v1432_v13 = vshll.u32 %v9469_v4, 16  ;;  %v2045_v35 = vsel %vm8744_vm11, %v7790_v52, %v2044_v2  ;;  %3137 = vrot.lane.b32.xlu1 %v8442_v59, %s8570_s17  ;;  %v9510_v59 = vld [vmem:[#allocation2 + $0xb4] sm:$0xf] }
  0xef   : > { %v3169_v56 = vunpack.c.l.b16 %v2342_v62  ;;  %v1425_v43 = vor.u32 %v1423_v32, %v1422_v0  ;;  %v1427_v40 = vrot.slane %v1422_v0, 4  ;;  %v2977_v39 = vunpack.c.l.b16 %v2045_v35  ;;  %513 = vst.msk [vmem:[#allocation2 + $0xc4] sm:$0xf] %vm334_vm0, %v480_v58 }
  0xf0   : > { %v2349_v37 = vrot.slane %v2347_v49, 5  ;;  %v1431_v48 = vrot.slane %v1429_v55, 7  ;;  %v777_v3 = vshrl.u32 %v9480_v29, 16  ;;  %v780_v28 = vshll.u32 %v9480_v29, 16  ;;  %514 = vst.msk [vmem:[#allocation2 + $0xc8] sm:$0xf] %vm334_vm0, %v481_v27 }
  0xf1   : > { %v2666_v31 = vpop.permute.xlu0 %2665  ;;  %v1426_v2 = vsel %vm8744_vm11, %v7775_v5, %v1425_v43  ;;  %v786_v46 = vshrl.u32 %v9490_v9, 16  ;;  %v789_v23 = vshll.u32 %v9490_v9, 16  ;;  %v3001_v1 = vpack.c.b16 %v2978_v63, %v2977_v39  ;;  %v9528_v5 = vld [vmem:[#allocation2 + $0xb8] sm:$0xf] }
  0xf2   : > { %v2350_v44 = vsel %vm8710_vm10, %v2345_v15, %v2349_v37  ;;  %v1434_v16 = vor.u32 %v1432_v13, %v1431_v48  ;;  %v2707_v19 = vunpack.c.l.b16 %v1426_v2  ;;  %v1070_v26 = vrot.slane %v777_v3, 4 }
  0xf3   : > { %v3170_v36 = vunpack.c.l.b16 %v2350_v44  ;;  %v1071_v52 = vrot.slane %v780_v28, 5  ;;  %v1074_v63 = vrot.slane %v789_v23, 5  ;;  %3025 = vrot.lane.b32.xlu0 %v3001_v1, %s8573_s20  ;;  %v1076_v0 = vrot.slane %v786_v46, 4 }
  0xf4   : > { %v2746_v18 = vpop.permute.xlu1 %2745  ;;  %v1435_v15 = vsel %vm8744_vm11, %v1427_v40, %v1434_v16  ;;  %v1080_v62 = vshll.u32 %v934_v33, 16  ;;  %v3292_v49 = vsel %vm3282_vm13, %v9432_v34, %v2666_v31  ;;  %v3488_v37 = vsel %vm3480_vm9, %v3455_v47, %v3208_v11  ;;  %v8411_v33 = vld [vmem:[#allocation2 + $0x94] sm:$0xff]  ;;  %v9538_v47 = vpop.permute.xlu2 %2667 }
  0xf5   : > { %v3193_v35 = vpack.c.b16 %v3170_v36, %v3169_v56  ;;  %v2708_v43 = vunpack.c.l.b16 %v1435_v15  ;;  %v1072_v39 = vor.u32 %v1071_v52, %v1070_v26  ;;  %v1077_v48 = vor.u32 %v1076_v0, %v1074_v63  ;;  %8001 = vmatmul.msk.bf16.gmra.mxu0 %vm12797_vm1, %v3488_v37  ;;  %v437_v36 = vld [vmem:[#allocation2 + $0xbc] sm:$0x1]  ;;  %v1577_v52 = vld [vmem:[#allocation2 + $0xac] sm:$0x1] }
  0xf6   : > { %v1082_v2 = vrot.slane %v1080_v62, 5  ;;  %v381_v40 = vsel %vm8664_vm6, 0, %v380_v24  ;;  %v2061_v58 = vshrl.u32 %v9510_v59, 16  ;;  %v2064_v56 = vshll.u32 %v9510_v59, 16 }
  0xf7   : > { %3217 = vrot.lane.b32.xlu2 %v3193_v35, %s8575_s22  ;;  %v2730_v34 = vpack.c.b16 %v2708_v43, %v2707_v19  ;;  %v1073_v31 = vrot.slane %v1072_v39, 4  ;;  %382 = vst [vmem:[#allocation2 + $0xb0] sm:$0x8] %v381_v40  ;;  %v2070_v1 = vshrl.u32 %v9528_v5, 16  ;;  %v1078_v11 = vrot.slane %v1077_v48, 4 }
  0xf8   : > { %v2063_v44 = vrot.slane %v2061_v58, 7  ;;  %v2073_v16 = vshll.u32 %v9528_v5, 16  ;;  %v1710_v24 = vrot.slane %v1420_v42, 4  ;;  %v1711_v59 = vrot.slane %v1423_v32, 5 }
  0xf9   : > { %v2938_v27 = vpop.permute.xlu0 %2937  ;;  %v1075_v19 = vsel %vm8710_vm10, %v1073_v31, %v1074_v63  ;;  %v2072_v26 = vrot.slane %v2070_v1, 7  ;;  %v1714_v15 = vrot.slane %v1432_v13, 5  ;;  %v1083_v0 = vsel %vm8710_vm10, %v1078_v11, %v1082_v2 }
  0xfa   : > { %v2627_v62 = vunpack.c.l.b16 %v1075_v19  ;;  %v2066_v5 = vor.u32 %v2064_v56, %v2063_v44  ;;  %v2068_v35 = vrot.slane %v2063_v44, 4  ;;  %v2628_v42 = vunpack.c.l.b16 %v1083_v0 }
  0xfb   : > { %v2075_v43 = vor.u32 %v2073_v16, %v2072_v26  ;;  %v1712_v39 = vor.u32 %v1711_v59, %v1710_v24  ;;  %v1716_v63 = vrot.slane %v1429_v55, 4  ;;  %2595 = vrot.lane.b32.xlu0 %v8411_v33, %s8568_s15  ;;  %v1720_v37 = vshll.u32 %v1577_v52, 16  ;;  %v8427_v26 = vld [vmem:[#allocation2 + $0xa4] sm:$0xff] }
  0xfc   : > { %v3325_v54 = vsel %vm3315_vm14, %v3292_v49, %v2746_v18  ;;  %v438_v32 = vsel %vm8675_vm7, 0, %v437_v36  ;;  %v2351_v13 = vrot.slane %v2061_v58, 4  ;;  %v2650_v2 = vpack.c.b16 %v2628_v42, %v2627_v62  ;;  %v9561_v18 = vld [vmem:[#allocation2 + $0xa4] sm:$0xf] }
  0xfd   : > { %v3018_v48 = vpop.permute.xlu1 %3017  ;;  %v2076_v40 = vsel %vm8744_vm11, %v2068_v35, %v2075_v43  ;;  %v1713_v31 = vrot.slane %v1712_v39, 4  ;;  %v1717_v11 = vor.u32 %v1716_v63, %v1714_v15  ;;  %439 = vst [vmem:[#allocation2 + $0xbc] sm:$0x1] %v438_v32  ;;  %v1722_v55 = vrot.slane %v1720_v37, 5  ;;  %v935_v32 = vld [vmem:[#allocation2 + $0xac] sm:$0x1] }
  0xfe   : > { %v1836_v44 = vld [vmem:[#allocation2 + $0xb0] sm:$0x8]  ;;  %v2980_v4 = vunpack.c.l.b16 %v2076_v40  ;;  %v3358_v33 = vsel %vm3348_vm15, %v3325_v54, %v9450_v60  ;;  %v2352_v24 = vrot.slane %v2064_v56, 5  ;;  %2675 = vrot.lane.b32.xlu1 %v2650_v2, %s8572_s19  ;;  %v2355_v0 = vrot.slane %v2073_v16, 5  ;;  %v9568_v60 = vld [vmem:[#allocation2 + $0xa8] sm:$0xf] }
  0xff   : > { %2755 = vrot.lane.b32.xlu2 %v2730_v34, %s8571_s18  ;;  %v2056_v49 = vshrl.u32 %v1836_v44, 16  ;;  %v1715_v58 = vsel %vm8710_vm10, %v1713_v31, %v1714_v15  ;;  %v1718_v36 = vrot.slane %v1717_v11, 4  ;;  %v3391_v19 = vsel %vm12798_vm3, %v3358_v33, %v2938_v27  ;;  %v9574_v15 = vpop.permute.xlu2 %2939  ;;  %v1198_v44 = vld [vmem:[#allocation2 + $0xb0] sm:$0x8] }
 0x100   : > { %v2899_v52 = vunpack.c.l.b16 %v1715_v58  ;;  %v2353_v59 = vor.u32 %v2352_v24, %v2351_v13  ;;  %v2357_v62 = vrot.slane %v2070_v1, 4  ;;  %v3424_v35 = vsel %vm3414_vm5, %v3391_v19, %v3018_v48 }
 0x101   : > { %v7791_v56 = vrot.slane %v2056_v49, 11  ;;  %v1723_v34 = vsel %vm8710_vm10, %v1718_v36, %v1722_v55  ;;  %v799_v42 = vshrl.u32 %v9561_v18, 16  ;;  %v802_v63 = vshll.u32 %v9561_v18, 16  ;;  %v3210_v37 = vpop.permute.xlu0 %3209  ;;  %v9590_v49 = vld [vmem:[#allocation2 + $0xb4] sm:$0xf] }
 0x102   : > { %v2900_v43 = vunpack.c.l.b16 %v1723_v34  ;;  %v2354_v39 = vrot.slane %v2353_v59, 4  ;;  %v2358_v27 = vor.u32 %v2357_v62, %v2355_v0  ;;  %v808_v16 = vshrl.u32 %v9568_v60, 16 }
 0x103   : > { %v2067_v1 = vsel %vm8744_vm11, %v7791_v56, %v2066_v5  ;;  %v811_v54 = vshll.u32 %v9568_v60, 16  ;;  %v1084_v13 = vrot.slane %v799_v42, 4  ;;  %2867 = vrot.lane.b32.xlu0 %v8427_v26, %s8569_s16  ;;  %v1085_v33 = vrot.slane %v802_v63, 5 }
 0x104   : > { %v2979_v48 = vunpack.c.l.b16 %v2067_v1  ;;  %v2922_v2 = vpack.c.b16 %v2900_v43, %v2899_v52  ;;  %v2218_v40 = vld [vmem:[#allocation2 + $0xbc] sm:$0x1]  ;;  %v2356_v31 = vsel %vm8710_vm10, %v2354_v39, %v2355_v0  ;;  %v2359_v11 = vrot.slane %v2358_v27, 4  ;;  %v9596_v52 = vld [vmem:[#allocation2 + $0xb8] sm:$0xf] }
 0x105   : > { %v2361_v55 = vshll.u32 %v2218_v40, 16  ;;  %v3171_v5 = vunpack.c.l.b16 %v2356_v31  ;;  %v1088_v24 = vrot.slane %v811_v54, 5  ;;  %v1090_v36 = vrot.slane %v808_v16, 4  ;;  %v9598_v59 = vpop.permute.xlu1 %2587  ;;  %v538_v27 = vld [vmem:[#allocation2 + $0x50] sm:$0x8] }
 0x106   : > { %v3002_v58 = vpack.c.b16 %v2980_v4, %v2979_v48  ;;  %v1094_v19 = vshll.u32 %v935_v32, 16  ;;  %v3457_v26 = vsel %vm3447_vm8, %v3424_v35, %v9487_v14  ;;  %2947 = vrot.lane.b32.xlu1 %v2922_v2, %s8574_s21  ;;  %v1086_v62 = vor.u32 %v1085_v33, %v1084_v13  ;;  %v8443_v4 = vld [vmem:[#allocation2 + $0xb4] sm:$0xff] }
 0x107   : > { %v2363_v0 = vrot.slane %v2361_v55, 5  ;;  %v3490_v56 = vsel %vm3480_vm9, %v3457_v26, %v3210_v37  ;;  %v1437_v34 = vshrl.u32 %v1198_v44, 16  ;;  %v1091_v43 = vor.u32 %v1090_v36, %v1088_v24 }
 0x108   : > { %3027 = vrot.lane.b32.xlu2 %v3002_v58, %s8573_s20  ;;  %v1096_v39 = vrot.slane %v1094_v19, 5  ;;  %8002 = vmatmul.msk.bf16.gmra.mxu0 %vm12797_vm1, %v3490_v56  ;;  %v1442_v14 = vshrl.u32 %v9590_v49, 16  ;;  %v1445_v35 = vshll.u32 %v9590_v49, 16  ;;  %v1087_v32 = vrot.slane %v1086_v62, 4  ;;  %v9615_v19 = vpop.permute.xlu2 %3211 }
 0x109   : > { %v2364_v1 = vsel %vm8710_vm10, %v2359_v11, %v2363_v0  ;;  %v7776_v13 = vrot.slane %v1437_v34, 11  ;;  %v1451_v37 = vshrl.u32 %v9596_v52, 16  ;;  %v1092_v2 = vrot.slane %v1091_v43, 4  ;;  %v8412_v11 = vld [vmem:[#allocation2 + $0xa4] sm:$0xff]  ;;  %v9619_v62 = vpop.permute.xlu0 %2747 }
 0x10a   : > { %v3172_v48 = vunpack.c.l.b16 %v2364_v1  ;;  %v1444_v40 = vrot.slane %v1442_v14, 7  ;;  %v1454_v31 = vshll.u32 %v9596_v52, 16  ;;  %v1089_v44 = vsel %vm8710_vm10, %v1087_v32, %v1088_v24  ;;  %v483_v1 = vld [vmem:[%s8652_s14 + $0x64] sm:$0xf] }
 0x10b   : > { %v1453_v55 = vrot.slane %v1451_v37, 7  ;;  %v684_v33 = vshrl.u32 %v538_v27, 16  ;;  %v13021_v49 = vshrl.u32 %v9056_v21, 16  ;;  %3139 = vrot.lane.b32.xlu0 %v8443_v4, %s8570_s17  ;;  %v1097_v26 = vsel %vm8710_vm10, %v1092_v2, %v1096_v39  ;;  %v482_v27 = vld [vmem:[%s8652_s14 + $0x60] sm:$0xf] }
 0x10c   : > { %v3194_v36 = vpack.c.b16 %v3172_v48, %v3171_v5  ;;  %v2629_v52 = vunpack.c.l.b16 %v1089_v44  ;;  %v1447_v0 = vor.u32 %v1445_v35, %v1444_v40  ;;  %v2630_v24 = vunpack.c.l.b16 %v1097_v26  ;;  %v1578_v2 = vld [vmem:[#allocation2 + $0xbc] sm:$0x1]  ;;  %515 = vst.msk [vmem:[#allocation2 + $0xd4] sm:$0xf] %vm334_vm0, %v482_v27  ;;  %v383_v26 = vld [vmem:[#allocation2 + $0xc0] sm:$0x8] }
 0x10d   : > { %v691_v58 = vrot.slane %v13021_v49, 7  ;;  %v1449_v56 = vrot.slane %v1444_v40, 4  ;;  %v1456_v34 = vor.u32 %v1454_v31, %v1453_v55  ;;  %v7755_v43 = vrot.slane %v684_v33, 11  ;;  %516 = vst.msk [vmem:[#allocation2 + $0xd8] sm:$0xf] %vm334_vm0, %v483_v1 }
 0x10e   : > { %v1448_v4 = vsel %vm8744_vm11, %v7776_v13, %v1447_v0  ;;  %v13022_v5 = vshll.u32 %v9056_v21, 16  ;;  %v13023_v49 = vshrl.u32 %v9062_v51, 16  ;;  %3219 = vrot.lane.b32.xlu1 %v3194_v36, %s8575_s22  ;;  %v2651_v40 = vpack.c.b16 %v2630_v24, %v2629_v52  ;;  %v1840_v36 = vld [vmem:[#allocation2 + $0xc4] sm:$0xf]  ;;  %v2860_v52 = vpop.permute.xlu1 %2859 }
 0x10f   : > { %v696_v48 = vrot.slane %v691_v58, 4  ;;  %v1457_v44 = vsel %vm8744_vm11, %v1449_v56, %v1456_v34  ;;  %v2709_v55 = vunpack.c.l.b16 %v1448_v4  ;;  %v1724_v33 = vrot.slane %v1442_v14, 4  ;;  %v1841_v14 = vld [vmem:[#allocation2 + $0xc8] sm:$0xf] }
 0x110   : > { %v694_v32 = vor.u32 %v13022_v5, %v691_v58  ;;  %v700_v39 = vrot.slane %v13023_v49, 7  ;;  %2597 = vrot.lane.b32.xlu2 %v8412_v11, %s8568_s15  ;;  %v2710_v21 = vunpack.c.l.b16 %v1457_v44  ;;  %v13024_v58 = vshll.u32 %v9062_v51, 16 }
 0x111   : > { %v1725_v27 = vrot.slane %v1445_v35, 5  ;;  %v1728_v5 = vrot.slane %v1454_v31, 5  ;;  %v1730_v56 = vrot.slane %v1451_v37, 4  ;;  %v1734_v34 = vshll.u32 %v1578_v2, 16  ;;  %v8428_v31 = vld [vmem:[#allocation2 + $0xb4] sm:$0xff] }
 0x112   : > { %v695_v13 = vsel %vm8744_vm11, %v7755_v43, %v694_v32  ;;  %v703_v0 = vor.u32 %v13024_v58, %v700_v39  ;;  %v2731_v4 = vpack.c.b16 %v2710_v21, %v2709_v55  ;;  %v384_v49 = vsel %vm8664_vm6, 0, %v383_v26  ;;  %v440_v43 = vld [vmem:[#allocation2 + $0xcc] sm:$0x1]  ;;  %v9646_v26 = vpop.permute.xlu2 %2749 }
 0x113   : > { %v2459_v24 = vunpack.c.l.b16 %v695_v13  ;;  %v1726_v11 = vor.u32 %v1725_v27, %v1724_v33  ;;  %v1731_v51 = vor.u32 %v1730_v56, %v1728_v5  ;;  %v1736_v39 = vrot.slane %v1734_v34, 5  ;;  %385 = vst [vmem:[#allocation2 + $0xc0] sm:$0x8] %v384_v49  ;;  %2677 = vrot.lane.b32.xlu0 %v2651_v40, %s8572_s19 }
 0x114   : > { %v704_v1 = vsel %vm8744_vm11, %v696_v48, %v703_v0  ;;  %v2083_v35 = vshrl.u32 %v1840_v36, 16  ;;  %v2086_v2 = vshll.u32 %v1840_v36, 16  ;;  %v2092_v44 = vshrl.u32 %v1841_v14, 16  ;;  %v3020_v56 = vpop.permute.xlu0 %3019 }
 0x115   : > { %v2460_v32 = vunpack.c.l.b16 %v704_v1  ;;  %v1727_v37 = vrot.slane %v1726_v11, 4  ;;  %v2095_v55 = vshll.u32 %v1841_v14, 16  ;;  %v1732_v13 = vrot.slane %v1731_v51, 4  ;;  %v9655_v1 = vld [vmem:[#allocation2 + $0xb4] sm:$0xf] }
 0x116   : > { %v2085_v48 = vrot.slane %v2083_v35, 7  ;;  %v441_v33 = vsel %vm8675_vm7, 0, %v440_v43  ;;  %v2094_v0 = vrot.slane %v2092_v44, 7  ;;  %v2365_v27 = vrot.slane %v2083_v35, 4  ;;  %2757 = vrot.lane.b32.xlu1 %v2731_v4, %s8571_s18  ;;  %v9662_v35 = vld [vmem:[#allocation2 + $0xb8] sm:$0xf] }
 0x117   : > { %v2486_v21 = vpack.c.b16 %v2460_v32, %v2459_v24  ;;  %v1729_v58 = vsel %vm8710_vm10, %v1727_v37, %v1728_v5  ;;  %442 = vst [vmem:[#allocation2 + $0xcc] sm:$0x1] %v441_v33  ;;  %v2366_v40 = vrot.slane %v2086_v2, 5  ;;  %v1737_v24 = vsel %vm8710_vm10, %v1732_v13, %v1736_v39 }
 0x118   : > { %v2901_v34 = vunpack.c.l.b16 %v1729_v58  ;;  %v2088_v14 = vor.u32 %v2086_v2, %v2085_v48  ;;  %2869 = vrot.lane.b32.xlu2 %v8428_v31, %s8569_s16  ;;  %v2902_v5 = vunpack.c.l.b16 %v1737_v24  ;;  %v2090_v49 = vrot.slane %v2085_v48, 4 }
 0x119   : > { %v3251_v36 = vsel %vm3233_vm12, %v2486_v21, %v9598_v59  ;;  %v2097_v43 = vor.u32 %v2095_v55, %v2094_v0  ;;  %v2367_v32 = vor.u32 %v2366_v40, %v2365_v27  ;;  %v2369_v59 = vrot.slane %v2095_v55, 5 }
 0x11a   : > { %v3294_v11 = vsel %vm3282_vm13, %v3251_v36, %v9538_v47  ;;  %v2371_v51 = vrot.slane %v2092_v44, 4  ;;  %v2923_v39 = vpack.c.b16 %v2902_v5, %v2901_v34  ;;  %v1839_v37 = vld [vmem:[#allocation2 + $0xc0] sm:$0x8]  ;;  %v821_v21 = vshrl.u32 %v9655_v1, 16  ;;  %v3132_v47 = vpop.permute.xlu1 %3131 }
 0x11b   : > { %v3327_v4 = vsel %vm3315_vm14, %v3294_v11, %v9619_v62  ;;  %v2098_v2 = vsel %vm8744_vm11, %v2090_v49, %v2097_v43  ;;  %v2078_v13 = vshrl.u32 %v1839_v37, 16  ;;  %v2368_v33 = vrot.slane %v2367_v32, 4  ;;  %v8444_v62 = vld [vmem:[#allocation2 + $0xc4] sm:$0xff]  ;;  %v544_v11 = vld [vmem:[#allocation2 + $0x70] sm:$0x8]  ;;  %v9688_v37 = vpop.permute.xlu2 %3021 }
 0x11c   : > { %v3360_v31 = vsel %vm3348_vm15, %v3327_v4, %v2860_v52  ;;  %v2982_v48 = vunpack.c.l.b16 %v2098_v2  ;;  %v2372_v58 = vor.u32 %v2371_v51, %v2369_v59  ;;  %2949 = vrot.lane.b32.xlu0 %v2923_v39, %s8574_s21  ;;  %v12791_v55 = vshll.u32 %v9655_v1, 16  ;;  %v936_v52 = vld [vmem:[#allocation2 + $0xbc] sm:$0x1] }
 0x11d   : > { %v3393_v44 = vsel %vm12798_vm3, %v3360_v31, %v9574_v15  ;;  %v12792_v0 = vshrl.u32 %v9662_v35, 16  ;;  %v12789_v27 = vshll.u32 %v9662_v35, 16  ;;  %v7792_v40 = vrot.slane %v2078_v13, 11 }
 0x11e   : > { %v2219_v36 = vld [vmem:[#allocation2 + $0xcc] sm:$0x1]  ;;  %v2370_v24 = vsel %vm8710_vm10, %v2368_v33, %v2369_v59  ;;  %v2373_v34 = vrot.slane %v2372_v58, 4  ;;  %v3426_v5 = vsel %vm3414_vm5, %v3393_v44, %v3020_v56  ;;  %v1098_v15 = vrot.slane %v821_v21, 4  ;;  %v9690_v33 = vpop.permute.xlu0 %2589 }
 0x11f   : > { %v2375_v49 = vshll.u32 %v2219_v36, 16  ;;  %v3173_v43 = vunpack.c.l.b16 %v2370_v24  ;;  %v1099_v4 = vrot.slane %v12791_v55, 5  ;;  %v2089_v32 = vsel %vm8744_vm11, %v7792_v40, %v2088_v14  ;;  %v1201_v36 = vld [vmem:[#allocation2 + $0xc0] sm:$0x8] }
 0x120   : > { %v1102_v51 = vrot.slane %v12789_v27, 5  ;;  %v1104_v59 = vrot.slane %v12792_v0, 4  ;;  %v1108_v39 = vshll.u32 %v936_v52, 16  ;;  %3141 = vrot.lane.b32.xlu2 %v8444_v62, %s8570_s17  ;;  %v2981_v56 = vunpack.c.l.b16 %v2089_v32  ;;  %v486_v27 = vld [vmem:[%s8652_s14 + $0x70] sm:$0xf] }
 0x121   : > { %v2377_v2 = vrot.slane %v2375_v49, 5  ;;  %v1100_v31 = vor.u32 %v1099_v4, %v1098_v15  ;;  %v728_v13 = vshrl.u32 %v544_v11, 16  ;;  %v735_v14 = vrot.slane %v733_v8, 7  ;;  %519 = vst.msk [vmem:[#allocation2 + $0xf4] sm:$0xf] %vm334_vm0, %v486_v27 }
 0x122   : > { %v1105_v58 = vor.u32 %v1104_v59, %v1102_v51  ;;  %v1110_v44 = vrot.slane %v1108_v39, 5  ;;  %v744_v40 = vrot.slane %v742_v25, 7  ;;  %v3003_v52 = vpack.c.b16 %v2982_v48, %v2981_v56  ;;  %v1202_v59 = vld [vmem:[#allocation2 + $0xc4] sm:$0xf]  ;;  %v1203_v39 = vld [vmem:[#allocation2 + $0xc8] sm:$0xf] }
 0x123   : > { %v2378_v62 = vsel %vm8710_vm10, %v2373_v34, %v2377_v2  ;;  %v1101_v24 = vrot.slane %v1100_v31, 4  ;;  %v7757_v32 = vrot.slane %v728_v13, 11  ;;  %v738_v11 = vor.u32 %v736_v20, %v735_v14  ;;  %v9706_v2 = vpop.permute.xlu1 %2669 }
 0x124   : > { %v3174_v49 = vunpack.c.l.b16 %v2378_v62  ;;  %v1106_v15 = vrot.slane %v1105_v58, 4  ;;  %v740_v4 = vrot.slane %v735_v14, 4  ;;  %3029 = vrot.lane.b32.xlu1 %v3003_v52, %s8573_s20  ;;  %v13025_v25 = vshll.u32 %v9280_v41, 16  ;;  %v541_v58 = vld [vmem:[#allocation2 + $0x60] sm:$0x8] }
 0x125   : > { %v1103_v8 = vsel %vm8710_vm10, %v1101_v24, %v1102_v51  ;;  %v3459_v34 = vsel %vm3447_vm8, %v3426_v5, %v3132_v47  ;;  %v1459_v56 = vshrl.u32 %v1201_v36, 16  ;;  %v739_v13 = vsel %vm8744_vm11, %v7757_v32, %v738_v11  ;;  %v484_v51 = vld [vmem:[%s8652_s14 + $0x68] sm:$0xf]  ;;  %v485_v14 = vld [vmem:[%s8652_s14 + $0x6c] sm:$0xf]  ;;  %v8413_v24 = vld [vmem:[#allocation2 + $0xb4] sm:$0xff] }
 0x126   : > { %v747_v48 = vor.u32 %v13025_v25, %v744_v40  ;;  %v3195_v57 = vpack.c.b16 %v3174_v49, %v3173_v43  ;;  %v1111_v20 = vsel %vm8710_vm10, %v1106_v15, %v1110_v44  ;;  %v2631_v31 = vunpack.c.l.b16 %v1103_v8  ;;  %517 = vst.msk [vmem:[#allocation2 + $0xe4] sm:$0xf] %vm334_vm0, %v484_v51 }
 0x127   : > { %v2632_v41 = vunpack.c.l.b16 %v1111_v20  ;;  %v2463_v5 = vunpack.c.l.b16 %v739_v13  ;;  %v7777_v40 = vrot.slane %v1459_v56, 11  ;;  %v1464_v36 = vshrl.u32 %v1202_v59, 16  ;;  %518 = vst.msk [vmem:[#allocation2 + $0xe8] sm:$0xf] %vm334_vm0, %v485_v14 }
 0x128   : > { %v748_v47 = vsel %vm8744_vm11, %v740_v4, %v747_v48  ;;  %3221 = vrot.lane.b32.xlu0 %v3195_v57, %s8575_s22  ;;  %v1467_v44 = vshll.u32 %v1202_v59, 16  ;;  %v1473_v52 = vshrl.u32 %v1203_v39, 16  ;;  %v1476_v32 = vshll.u32 %v1203_v39, 16  ;;  %v2592_v57 = vpop.permute.xlu2 %2591 }
 0x129   : > { %v2464_v43 = vunpack.c.l.b16 %v748_v47  ;;  %v2652_v62 = vpack.c.b16 %v2632_v41, %v2631_v31  ;;  %v706_v49 = vshrl.u32 %v541_v58, 16  ;;  %v13026_v15 = vshrl.u32 %v9162_v7, 16  ;;  %v9728_v58 = vpop.permute.xlu0 %2861 }
 0x12a   : > { %v1466_v8 = vrot.slane %v1464_v36, 7  ;;  %v1475_v25 = vrot.slane %v1473_v52, 7  ;;  %v13027_v48 = vshrl.u32 %v9174_v61, 16  ;;  %v13028_v20 = vshll.u32 %v9162_v7, 16 }
 0x12b   : > { %v713_v11 = vrot.slane %v13026_v15, 7  ;;  %v2488_v4 = vpack.c.b16 %v2464_v43, %v2463_v5  ;;  %2679 = vrot.lane.b32.xlu2 %v2652_v62, %s8572_s19  ;;  %v7756_v59 = vrot.slane %v706_v49, 11  ;;  %v3492_v39 = vsel %vm3480_vm9, %v3459_v34, %v9615_v19  ;;  %v1579_v62 = vld [vmem:[#allocation2 + $0xcc] sm:$0x1]  ;;  %v386_v49 = vld [vmem:[#allocation2 + $0xd0] sm:$0x8] }
 0x12c   : > { %v722_v56 = vrot.slane %v13027_v48, 7  ;;  %v1469_v14 = vor.u32 %v1467_v44, %v1466_v8  ;;  %v1471_v41 = vrot.slane %v1466_v8, 4  ;;  %v1478_v47 = vor.u32 %v1476_v32, %v1475_v25  ;;  %8003 = vmatmul.msk.bf16.gmra.mxu0 %vm12797_vm1, %v3492_v39  ;;  %2599 = vrot.lane.b32.xlu1 %v8413_v24, %s8568_s15  ;;  %v1843_v25 = vld [vmem:[#allocation2 + $0xd4] sm:$0xf] }
 0x12d   : > { %v716_v13 = vor.u32 %v13028_v20, %v713_v11  ;;  %v718_v31 = vrot.slane %v713_v11, 4  ;;  %v9731_v51 = vsel %vm3233_vm12, %v2488_v4, %v2592_v57  ;;  %v13029_v5 = vshll.u32 %v9174_v61, 16 }
 0x12e   : > { %v1738_v19 = vrot.slane %v1464_v36, 4  ;;  %v1739_v34 = vrot.slane %v1467_v44, 5  ;;  %v1470_v15 = vsel %vm8744_vm11, %v7777_v40, %v1469_v14  ;;  %v1479_v11 = vsel %vm8744_vm11, %v1471_v41, %v1478_v47  ;;  %v8429_v41 = vld [vmem:[#allocation2 + $0xc4] sm:$0xff] }
 0x12f   : > { %v717_v7 = vsel %vm8744_vm11, %v7756_v59, %v716_v13  ;;  %v725_v43 = vor.u32 %v13029_v5, %v722_v56  ;;  %v1742_v8 = vrot.slane %v1476_v32, 5  ;;  %v2711_v24 = vunpack.c.l.b16 %v1470_v15  ;;  %v1844_v56 = vld [vmem:[#allocation2 + $0xd8] sm:$0xf]  ;;  %v2942_v59 = vpop.permute.xlu1 %2941  ;;  %v443_v13 = vld [vmem:[#allocation2 + $0xdc] sm:$0x1] }
 0x130   : > { %v2461_v4 = vunpack.c.l.b16 %v717_v7  ;;  %v2712_v48 = vunpack.c.l.b16 %v1479_v11  ;;  %v1740_v61 = vor.u32 %v1739_v34, %v1738_v19  ;;  %v1744_v44 = vrot.slane %v1473_v52, 4 }
 0x131   : > { %v726_v57 = vsel %vm8744_vm11, %v718_v31, %v725_v43  ;;  %v1748_v20 = vshll.u32 %v1579_v62, 16  ;;  %v387_v40 = vsel %vm8664_vm6, 0, %v386_v49  ;;  %v2105_v32 = vshrl.u32 %v1843_v25, 16 }
 0x132   : > { %v2462_v36 = vunpack.c.l.b16 %v726_v57  ;;  %v2732_v39 = vpack.c.b16 %v2712_v48, %v2711_v24  ;;  %v1741_v14 = vrot.slane %v1740_v61, 4  ;;  %388 = vst [vmem:[#allocation2 + $0xd0] sm:$0x8] %v387_v40  ;;  %v2108_v47 = vshll.u32 %v1843_v25, 16  ;;  %v3134_v57 = vpop.permute.xlu0 %3133  ;;  %v9757_v61 = vld [vmem:[#allocation2 + $0xd4] sm:$0xf] }
 0x133   : > { %v1745_v5 = vor.u32 %v1744_v44, %v1742_v8  ;;  %v1750_v15 = vrot.slane %v1748_v20, 5  ;;  %v2114_v31 = vshrl.u32 %v1844_v56, 16  ;;  %v2107_v43 = vrot.slane %v2105_v32, 7 }
 0x134   : > { %v2487_v7 = vpack.c.b16 %v2462_v36, %v2461_v4  ;;  %2759 = vrot.lane.b32.xlu0 %v2732_v39, %s8571_s18  ;;  %v1743_v52 = vsel %vm8710_vm10, %v1741_v14, %v1742_v8  ;;  %v2117_v62 = vshll.u32 %v1844_v56, 16  ;;  %v444_v19 = vsel %vm8675_vm7, 0, %v443_v13  ;;  %2871 = vrot.lane.b32.xlu1 %v8429_v41, %s8569_s16  ;;  %v9761_v36 = vpop.permute.xlu2 %2863 }
 0x135   : > { %v1746_v49 = vrot.slane %v1745_v5, 4  ;;  %v2903_v11 = vunpack.c.l.b16 %v1743_v52  ;;  %v2116_v25 = vrot.slane %v2114_v31, 7  ;;  %445 = vst [vmem:[#allocation2 + $0xdc] sm:$0x1] %v444_v19  ;;  %v2110_v24 = vor.u32 %v2108_v47, %v2107_v43  ;;  %v8445_v19 = vld [vmem:[#allocation2 + $0xd4] sm:$0xff] }
 0x136   : > { %v3254_v34 = vsel %vm3233_vm12, %v2487_v7, %v9690_v33  ;;  %v2112_v48 = vrot.slane %v2107_v43, 4  ;;  %v2379_v8 = vrot.slane %v2105_v32, 4  ;;  %v2380_v20 = vrot.slane %v2108_v47, 5 }
 0x137   : > { %v3296_v4 = vsel %vm3282_vm13, %v3254_v34, %v9706_v2  ;;  %v1751_v56 = vsel %vm8710_vm10, %v1746_v49, %v1750_v15  ;;  %v2119_v33 = vor.u32 %v2117_v62, %v2116_v25  ;;  %v2383_v13 = vrot.slane %v2117_v62, 5  ;;  %v9771_v34 = vld [vmem:[#allocation2 + $0xd8] sm:$0xf] }
 0x138   : > { %v3329_v44 = vsel %vm3315_vm14, %v3296_v4, %v9646_v26  ;;  %v2904_v40 = vunpack.c.l.b16 %v1751_v56  ;;  %v2385_v39 = vrot.slane %v2114_v31, 4  ;;  %v2381_v32 = vor.u32 %v2380_v20, %v2379_v8 }
 0x139   : > { %v3362_v2 = vsel %vm3348_vm15, %v3329_v44, %v9728_v58  ;;  %v1842_v14 = vld [vmem:[#allocation2 + $0xd0] sm:$0x8]  ;;  %v2120_v41 = vsel %vm8744_vm11, %v2112_v48, %v2119_v33  ;;  %v1486_v15 = vshrl.u32 %v9757_v61, 16  ;;  %v3214_v58 = vpop.permute.xlu1 %3213  ;;  %v1489_v56 = vshll.u32 %v9757_v61, 16 }
 0x13a   : > { %v3395_v7 = vsel %vm12798_vm3, %v3362_v2, %v2942_v59  ;;  %v1204_v5 = vld [vmem:[#allocation2 + $0xd0] sm:$0x8]  ;;  %v2924_v52 = vpack.c.b16 %v2904_v40, %v2903_v11  ;;  %v2100_v43 = vshrl.u32 %v1842_v14, 16  ;;  %v2984_v26 = vunpack.c.l.b16 %v2120_v41  ;;  %v9777_v59 = vld [vmem:[#allocation2 + $0xc4] sm:$0xf] }
 0x13b   : > { %v2386_v47 = vor.u32 %v2385_v39, %v2383_v13  ;;  %v2382_v62 = vrot.slane %v2381_v32, 4  ;;  %v3428_v31 = vsel %vm3414_vm5, %v3395_v7, %v9688_v37  ;;  %v1481_v49 = vshrl.u32 %v1204_v5, 16  ;;  %v9784_v40 = vld [vmem:[#allocation2 + $0xc8] sm:$0xf] }
 0x13c   : > { %v1488_v25 = vrot.slane %v1486_v15, 7  ;;  %2951 = vrot.lane.b32.xlu2 %v2924_v52, %s8574_s21  ;;  %v7793_v11 = vrot.slane %v2100_v43, 11  ;;  %v2220_v4 = vld [vmem:[#allocation2 + $0xdc] sm:$0x1]  ;;  %v3461_v8 = vsel %vm3447_vm8, %v3428_v31, %v3134_v57  ;;  %3143 = vrot.lane.b32.xlu1 %v8445_v19, %s8570_s17  ;;  %v1495_v57 = vshrl.u32 %v9771_v34, 16  ;;  %v2672_v19 = vpop.permute.xlu0 %2671 }
 0x13d   : > { %v2387_v48 = vrot.slane %v2386_v47, 4  ;;  %v2384_v33 = vsel %vm8710_vm10, %v2382_v62, %v2383_v13  ;;  %v2389_v44 = vshll.u32 %v2220_v4, 16  ;;  %v7778_v37 = vrot.slane %v1481_v49, 11  ;;  %v937_v47 = vld [vmem:[#allocation2 + $0xcc] sm:$0x1]  ;;  %v9800_v49 = vpop.permute.xlu2 %3135 }
 0x13e   : > { %v1493_v20 = vrot.slane %v1488_v25, 4  ;;  %v2111_v2 = vsel %vm8744_vm11, %v7793_v11, %v2110_v24  ;;  %v3175_v39 = vunpack.c.l.b16 %v2384_v33  ;;  %v1491_v14 = vor.u32 %v1489_v56, %v1488_v25 }
 0x13f   : > { %v2983_v41 = vunpack.c.l.b16 %v2111_v2  ;;  %v2391_v32 = vrot.slane %v2389_v44, 5  ;;  %v1498_v13 = vshll.u32 %v9771_v34, 16  ;;  %v12788_v7 = vshrl.u32 %v9777_v59, 16 }
 0x140   : > { %v1492_v5 = vsel %vm8744_vm11, %v7778_v37, %v1491_v14  ;;  %v1497_v52 = vrot.slane %v1495_v57, 7  ;;  %v12787_v24 = vshll.u32 %v9777_v59, 16  ;;  %v12793_v43 = vshrl.u32 %v9784_v40, 16  ;;  %v389_v37 = vld [vmem:[#allocation2 + $0xe0] sm:$0x8] }
 0x141   : > { %v3004_v62 = vpack.c.b16 %v2984_v26, %v2983_v41  ;;  %v2392_v31 = vsel %vm8710_vm10, %v2387_v48, %v2391_v32  ;;  %v2713_v25 = vunpack.c.l.b16 %v1492_v5  ;;  %v12790_v34 = vshll.u32 %v9784_v40, 16  ;;  %v9807_v26 = vld [vmem:[#allocation2 + $0xe4] sm:$0xf]  ;;  %v9816_v32 = vld [vmem:[#allocation2 + $0xe8] sm:$0xf] }
 0x142   : > { %v3176_v11 = vunpack.c.l.b16 %v2392_v31  ;;  %v1500_v4 = vor.u32 %v1498_v13, %v1497_v52  ;;  %v1112_v33 = vrot.slane %v12788_v7, 4  ;;  %v1113_v44 = vrot.slane %v12787_v24, 5  ;;  %v2752_v7 = vpop.permute.xlu1 %2751 }
 0x143   : > { %3031 = vrot.lane.b32.xlu0 %v3004_v62, %s8573_s20  ;;  %v1116_v48 = vrot.slane %v12790_v34, 5  ;;  %v1118_v2 = vrot.slane %v12793_v43, 4  ;;  %v1122_v14 = vshll.u32 %v937_v47, 16  ;;  %v3298_v41 = vsel %vm3282_vm13, %v9731_v51, %v2672_v19  ;;  %v3583_v62 = vpop.f32.mrf.mxu0  ;;  %v487_v34 = vld [vmem:[%s8652_s14 + $0x74] sm:$0xf]  ;;  %v8414_v47 = vld [vmem:[#allocation2 + $0xc4] sm:$0xff] }
 0x144   : > { %v3196_v5 = vpack.c.b16 %v3176_v11, %v3175_v39  ;;  %v1501_v52 = vsel %vm8744_vm11, %v1493_v20, %v1500_v4  ;;  %v1114_v31 = vor.u32 %v1113_v44, %v1112_v33  ;;  %v3494_v24 = vsel %vm3480_vm9, %v3461_v8, %v3214_v58  ;;  %v9829_v39 = vld [vmem:[%s12767_s2] ss:$0 sm:$0xff]  ;;  %520 = vst.msk [vmem:[#allocation2 + $0xf8] sm:$0xf] %vm334_vm0, %v487_v34  ;;  %v2944_v34 = vpop.permute.xlu0 %2943 }
 0x145   : > { %v2714_v55 = vunpack.c.l.b16 %v1501_v52  ;;  %v1119_v0 = vor.u32 %v1118_v2, %v1116_v48  ;;  %v1124_v43 = vrot.slane %v1122_v14, 5  ;;  %8004 = vmatmul.msk.bf16.gmra.mxu0 %vm12797_vm1, %v3494_v24  ;;  %v390_v51 = vsel %vm8664_vm6, 0, %v389_v37  ;;  %v1580_v2 = vld [vmem:[#allocation2 + $0xdc] sm:$0x1] }
 0x146   : > { %3223 = vrot.lane.b32.xlu2 %v3196_v5, %s8575_s22  ;;  %v1115_v58 = vrot.slane %v1114_v31, 4  ;;  %391 = vst [vmem:[#allocation2 + $0xe0] sm:$0x8] %v390_v51  ;;  %v2127_v8 = vshrl.u32 %v9807_v26, 16  ;;  %v2130_v20 = vshll.u32 %v9807_v26, 16  ;;  %v2136_v24 = vshrl.u32 %v9816_v32, 16 }
 0x147   : > { %v2733_v19 = vpack.c.b16 %v2714_v55, %v2713_v25  ;;  %v1120_v11 = vrot.slane %v1119_v0, 4  ;;  %v2139_v4 = vshll.u32 %v9816_v32, 16  ;;  %v1752_v33 = vrot.slane %v1486_v15, 4 }
 0x148   : > { %v1117_v27 = vsel %vm8710_vm10, %v1115_v58, %v1116_v48  ;;  %v2129_v44 = vrot.slane %v2127_v8, 7  ;;  %v2138_v37 = vrot.slane %v2136_v24, 7  ;;  %v1753_v26 = vrot.slane %v1489_v56, 5  ;;  %v9847_v48 = vpop.permute.xlu2 %2673  ;;  %v9850_v56 = vld [vmem:[#allocation2 + $0xec] sm:$0x1] }
 0x149   : > { %v1125_v55 = vsel %vm8710_vm10, %v1120_v11, %v1124_v43  ;;  %v2633_v0 = vunpack.c.l.b16 %v1117_v27  ;;  %v1756_v25 = vrot.slane %v1498_v13, 5  ;;  %v1758_v14 = vrot.slane %v1495_v57, 4 }
 0x14a   : > { %v2634_v32 = vunpack.c.l.b16 %v1125_v55  ;;  %v2132_v5 = vor.u32 %v2130_v20, %v2129_v44  ;;  %v2134_v15 = vrot.slane %v2129_v44, 4  ;;  %v2141_v52 = vor.u32 %v2139_v4, %v2138_v37  ;;  %v3024_v55 = vpop.permute.xlu1 %3023 }
 0x14b   : > { %2601 = vrot.lane.b32.xlu0 %v8414_v47, %s8568_s15  ;;  %v1754_v31 = vor.u32 %v1753_v26, %v1752_v33  ;;  %v1759_v51 = vor.u32 %v1758_v14, %v1756_v25  ;;  %v1762_v58 = vshll.u32 %v1580_v2, 16  ;;  %v3584_v61 = vadd.f32 %v9829_v39, %v3583_v62  ;;  %v1850_v22 = vld [vmem:[#allocation2 + $0xf8] sm:$0xf] }
 0x14c   : > { %v2653_v43 = vpack.c.b16 %v2634_v32, %v2633_v0  ;;  %v2142_v57 = vsel %vm8744_vm11, %v2134_v15, %v2141_v52  ;;  %v3331_v13 = vsel %vm3315_vm14, %v3298_v41, %v2752_v7  ;;  %v13030_v2 = vmov 0   ;;  %v3585_v41 = vpop.f32.mrf.mxu0  ;;  %v8430_v0 = vld [vmem:[#allocation2 + $0xd4] sm:$0xff] }
 0x14d   : > { %v1845_v11 = vld [vmem:[#allocation2 + $0xe0] sm:$0x8]  ;;  %v2986_v27 = vunpack.c.l.b16 %v2142_v57  ;;  %v1755_v44 = vrot.slane %v1754_v31, 4  ;;  %v1760_v47 = vrot.slane %v1759_v51, 4  ;;  %v1764_v37 = vrot.slane %v1762_v58, 5 }
 0x14e   : > { %2761 = vrot.lane.b32.xlu2 %v2733_v19, %s8571_s18  ;;  %2681 = vrot.lane.b32.xlu1 %v2653_v43, %s8572_s19  ;;  %v2122_v33 = vshrl.u32 %v1845_v11, 16  ;;  %v3663_v62 = vmax.f32 %v3584_v61, 0.0  ;;  %3696 = vst.msk [vmem:[#allocation3] sm:$0xf] %vm3695_vm2, %v13030_v2  ;;  %v3364_v26 = vsel %vm3348_vm15, %v3331_v13, %v9761_v36  ;;  %v447_v7 = vsel %vm8675_vm7, 0, %v9850_v56 }
 0x14f   : > { %v1757_v19 = vsel %vm8710_vm10, %v1755_v44, %v1756_v25  ;;  %v1765_v14 = vsel %vm8710_vm10, %v1760_v47, %v1764_v37  ;;  %3697 = vst.msk [vmem:[#allocation3 + $0x4] sm:$0xf] %vm3695_vm2, %v13030_v2  ;;  %v3397_v32 = vsel %vm12798_vm3, %v3364_v26, %v2944_v34  ;;  %v2393_v15 = vrot.slane %v2127_v8, 4  ;;  %v9871_v36 = vld [vmem:[#allocation2 + $0xd4] sm:$0xf] }
 0x150   : > { %v7794_v52 = vrot.slane %v2122_v33, 11  ;;  %v2905_v31 = vunpack.c.l.b16 %v1757_v19  ;;  %v2906_v51 = vunpack.c.l.b16 %v1765_v14  ;;  %v3817_v58 = vpack.c.bf16 %v3663_v62, %v3663_v62  ;;  %3698 = vst.msk [vmem:[#allocation3 + $0x8] sm:$0xf] %vm3695_vm2, %v13030_v2  ;;  %v9875_v61 = vld [vmem:[#allocation2 + $0xd8] sm:$0xf]  ;;  %v9899_v19 = vpop.permute.xlu2 %2945  ;;  %v8446_v14 = vld [vmem:[#allocation2 + $0xe4] sm:$0xff] }
 0x151   : > { %3699 = vst.msk [vmem:[#allocation3 + $0xc] sm:$0xf] %vm3695_vm2, %v13030_v2  ;;  %v2394_v25 = vrot.slane %v2130_v20, 5  ;;  %v2397_v56 = vrot.slane %v2139_v4, 5  ;;  %v2399_v43 = vrot.slane %v2136_v24, 4  ;;  %v3586_v34 = vadd.f32 %v9829_v39, %v3585_v41 }
 0x152   : > { %v938_v8 = vld [vmem:[#allocation2 + $0xdc] sm:$0x1]  ;;  %v2133_v57 = vsel %vm8744_vm11, %v7794_v52, %v2132_v5  ;;  %v2925_v13 = vpack.c.b16 %v2906_v51, %v2905_v31  ;;  %3850 = vst.msk [vmem:[#allocation3 + $0x14] sm:$0xf] %vm3695_vm2, %v3817_v58  ;;  %v3430_v11 = vsel %vm3414_vm5, %v3397_v32, %v3024_v55  ;;  %v12820_v44 = vshrl.u32 %v9871_v36, 16  ;;  %v3216_v55 = vpop.permute.xlu0 %3215 }
 0x153   : > { %v9885_v47 = vld [vmem:[#allocation2 + $0xe4] sm:$0xf]  ;;  %2873 = vrot.lane.b32.xlu0 %v8430_v0, %s8569_s16  ;;  %v2985_v20 = vunpack.c.l.b16 %v2133_v57  ;;  %3701 = vst.msk [vmem:[#allocation3 + $0x110] sm:$0xf] %vm3695_vm2, %v13030_v2  ;;  %v2395_v24 = vor.u32 %v2394_v25, %v2393_v15  ;;  %v2400_v4 = vor.u32 %v2399_v43, %v2397_v56  ;;  %v3664_v37 = vmax.f32 %v3586_v34, 0.0 }
 0x154   : > { %v1207_v33 = vld [vmem:[#allocation2 + $0xe0] sm:$0x8]  ;;  %3702 = vst.msk [vmem:[#allocation3 + $0x114] sm:$0xf] %vm3695_vm2, %v13030_v2  ;;  %v12796_v5 = vshll.u32 %v9871_v36, 16  ;;  %v12819_v62 = vshrl.u32 %v9875_v61, 16  ;;  %v3463_v43 = vsel %vm3447_vm8, %v3430_v11, %v9800_v49 }
 0x155   : > { %v12795_v26 = vshll.u32 %v9875_v61, 16  ;;  %v1126_v41 = vrot.slane %v12820_v44, 4  ;;  %v3005_v0 = vpack.c.b16 %v2986_v27, %v2985_v20  ;;  %3703 = vst.msk [vmem:[#allocation3 + $0x118] sm:$0xf] %vm3695_vm2, %v13030_v2  ;;  %v2396_v32 = vrot.slane %v2395_v24, 4 }
 0x156   : > { %v9901_v15 = vrot.slane %v2400_v4, 4  ;;  %v3818_v52 = vpack.c.bf16 %v3664_v37, %v3664_v37  ;;  %2953 = vrot.lane.b32.xlu1 %v2925_v13, %s8574_s21  ;;  %3704 = vst.msk [vmem:[#allocation3 + $0x11c] sm:$0xf] %vm3695_vm2, %v13030_v2  ;;  %v1127_v31 = vrot.slane %v12796_v5, 5  ;;  %v1132_v51 = vrot.slane %v12819_v62, 4  ;;  %v3588_v4 = vpop.f32.mrf.mxu0 }
 0x157   : > { %v1130_v27 = vrot.slane %v12795_v26, 5  ;;  %v1136_v58 = vshll.u32 %v938_v8, 16  ;;  %3033 = vrot.lane.b32.xlu2 %v3005_v0, %s8573_s20  ;;  %448 = vst [vmem:[#allocation2 + $0xec] sm:$0x1] %v447_v7  ;;  %v2398_v25 = vsel %vm8710_vm10, %v2396_v32, %v2397_v56  ;;  %v1209_v2 = vld [vmem:[#allocation2 + $0xe8] sm:$0xf]  ;;  %v9921_v7 = vpop.permute.xlu1 %2593  ;;  %v3496_v56 = vsel %vm3480_vm9, %v3463_v43, %v3216_v55 }
 0x158   : > { %v1503_v34 = vshrl.u32 %v1207_v33, 16  ;;  %v1508_v57 = vshrl.u32 %v9885_v47, 16  ;;  %v9918_v13 = vunpack.c.l.b16 %v2398_v25  ;;  %3851 = vst.msk [vmem:[#allocation3 + $0x18] sm:$0xf] %vm3695_vm2, %v3818_v52  ;;  %v1128_v20 = vor.u32 %v1127_v31, %v1126_v41  ;;  %v547_v37 = vld [vmem:[#allocation2 + $0x80] sm:$0x8]  ;;  %8005 = vmatmul.msk.bf16.gmra.mxu0 %vm12797_vm1, %v3496_v56 }
 0x159   : > { %v1133_v24 = vor.u32 %v1132_v51, %v1130_v27  ;;  %v1138_v8 = vrot.slane %v1136_v58, 5  ;;  %v1511_v49 = vshll.u32 %v9885_v47, 16  ;;  %v1517_v25 = vshrl.u32 %v1209_v2, 16  ;;  %v8415_v41 = vld [vmem:[#allocation2 + $0xd4] sm:$0xff] }
 0x15a   : > { %v7779_v0 = vrot.slane %v1503_v34, 11  ;;  %v1510_v32 = vrot.slane %v1508_v57, 7  ;;  %v1129_v11 = vrot.slane %v1128_v20, 4  ;;  %v1520_v26 = vshll.u32 %v1209_v2, 16 }
 0x15b   : > { %v1134_v33 = vrot.slane %v1133_v24, 4  ;;  %3145 = vrot.lane.b32.xlu0 %v8446_v14, %s8570_s17  ;;  %v3589_v51 = vadd.f32 %v9829_v39, %v3588_v4  ;;  %v750_v58 = vshrl.u32 %v547_v37, 16  ;;  %v1519_v43 = vrot.slane %v1517_v25, 7 }
 0x15c   : > { %v1513_v52 = vor.u32 %v1511_v49, %v1510_v32  ;;  %v1515_v31 = vrot.slane %v1510_v32, 4  ;;  %v1131_v55 = vsel %vm8710_vm10, %v1129_v11, %v1130_v27  ;;  %v757_v34 = vrot.slane %v755_v50, 7  ;;  %v9938_v11 = vpop.permute.xlu0 %2753 }
 0x15d   : > { %v1139_v47 = vsel %vm8710_vm10, %v1134_v33, %v1138_v8  ;;  %v2635_v20 = vunpack.c.l.b16 %v1131_v55  ;;  %v3665_v24 = vmax.f32 %v3589_v51, 0.0  ;;  %v1522_v32 = vor.u32 %v1520_v26, %v1519_v43  ;;  %v9941_v33 = vpop.permute.xlu2 %3217  ;;  %v392_v51 = vld [vmem:[#allocation2 + $0xf0] sm:$0x8] }
 0x15e   : > { %v2636_v2 = vunpack.c.l.b16 %v1139_v47  ;;  %v1514_v14 = vsel %vm8744_vm11, %v7779_v0, %v1513_v52  ;;  %v2221_v56 = vld [vmem:[#allocation2 + $0xec] sm:$0x1]  ;;  %v7758_v37 = vrot.slane %v750_v58, 11  ;;  %v760_v27 = vor.u32 %v758_v38, %v757_v34 }
 0x15f   : > { %v2715_v4 = vunpack.c.l.b16 %v1514_v14  ;;  %2603 = vrot.lane.b32.xlu2 %v8415_v41, %s8568_s15  ;;  %v2403_v8 = vshll.u32 %v2221_v56, 16  ;;  %v3819_v55 = vpack.c.bf16 %v3665_v24, %v3665_v24  ;;  %v762_v47 = vrot.slane %v757_v34, 4  ;;  %v1581_v5 = vld [vmem:[#allocation2 + $0xec] sm:$0x1]  ;;  %v1849_v24 = vld [vmem:[#allocation2 + $0xf4] sm:$0xf]  ;;  %v2866_v56 = vpop.permute.xlu1 %2865 }
 0x160   : > { %v2654_v50 = vpack.c.b16 %v2636_v2, %v2635_v20  ;;  %v1523_v0 = vsel %vm8744_vm11, %v1515_v31, %v1522_v32  ;;  %v761_v52 = vsel %vm8744_vm11, %v7758_v37, %v760_v27  ;;  %v766_v45 = vrot.slane %v764_v12, 7  ;;  %v3590_v27 = vpop.f32.mrf.mxu0 }
 0x161   : > { %v1766_v38 = vrot.slane %v1508_v57, 4  ;;  %v2405_v58 = vrot.slane %v2403_v8, 5  ;;  %v2716_v41 = vunpack.c.l.b16 %v1523_v0  ;;  %3852 = vst.msk [vmem:[#allocation3 + $0x24] sm:$0xf] %vm3695_vm2, %v3819_v55  ;;  %v2465_v43 = vunpack.c.l.b16 %v761_v52  ;;  %v8431_v57 = vld [vmem:[#allocation2 + $0xe4] sm:$0xff] }
 0x162   : > { %v1767_v20 = vrot.slane %v1511_v49, 5  ;;  %v769_v34 = vor.u32 %v767_v17, %v766_v45  ;;  %v1770_v2 = vrot.slane %v1520_v26, 5  ;;  %v1772_v14 = vrot.slane %v1517_v25, 4  ;;  %v449_v0 = vld [vmem:[#allocation2 + $0xfc] sm:$0x1] }
 0x163   : > { %v1776_v31 = vshll.u32 %v1581_v5, 16  ;;  %v2406_v12 = vsel %vm8710_vm10, %v9901_v15, %v2405_v58  ;;  %2683 = vrot.lane.b32.xlu0 %v2654_v50, %s8572_s19  ;;  %v9956_v32 = vpack.c.b16 %v2716_v41, %v2715_v4  ;;  %v393_v49 = vsel %vm8664_vm6, 0, %v392_v51 }
 0x164   : > { %v1768_v37 = vor.u32 %v1767_v20, %v1766_v38  ;;  %v3178_v17 = vunpack.c.l.b16 %v2406_v12  ;;  %v770_v5 = vsel %vm8744_vm11, %v762_v47, %v769_v34  ;;  %v1773_v26 = vor.u32 %v1772_v14, %v1770_v2  ;;  %394 = vst [vmem:[#allocation2 + $0xf0] sm:$0x8] %v393_v49  ;;  %v8447_v49 = vld [vmem:[#allocation2 + $0xf4] sm:$0xff] }
 0x165   : > { %v1778_v25 = vrot.slane %v1776_v31, 5  ;;  %v2466_v8 = vunpack.c.l.b16 %v770_v5  ;;  %v2149_v55 = vshrl.u32 %v1849_v24, 16  ;;  %v2152_v50 = vshll.u32 %v1849_v24, 16  ;;  %v9972_v31 = vpop.permute.xlu0 %3025  ;;  %v9974_v24 = vpop.permute.xlu2 %2755 }
 0x166   : > { %v1769_v15 = vrot.slane %v1768_v37, 4  ;;  %v3197_v4 = vpack.c.b16 %v3178_v17, %v9918_v13  ;;  %v1774_v52 = vrot.slane %v1773_v26, 4  ;;  %v2158_v45 = vshrl.u32 %v1850_v22, 16  ;;  %v9980_v26 = vld [vmem:[#allocation2 + $0xe4] sm:$0xf] }
 0x167   : > { %v2161_v38 = vshll.u32 %v1850_v22, 16  ;;  %2875 = vrot.lane.b32.xlu2 %v8431_v57, %s8569_s16  ;;  %v2489_v51 = vpack.c.b16 %v2466_v8, %v2465_v43  ;;  %v2151_v58 = vrot.slane %v2149_v55, 7  ;;  %v3591_v41 = vadd.f32 %v9829_v39, %v3590_v27 }
 0x168   : > { %v1771_v47 = vsel %vm8710_vm10, %v1769_v15, %v1770_v2  ;;  %3225 = vrot.lane.b32.xlu1 %v3197_v4, %s8575_s22  ;;  %v1779_v20 = vsel %vm8710_vm10, %v1774_v52, %v1778_v25  ;;  %v2160_v14 = vrot.slane %v2158_v45, 7  ;;  %v450_v13 = vsel %vm8675_vm7, 0, %v449_v0  ;;  %v9984_v0 = vld [vmem:[#allocation2 + $0xe8] sm:$0xf] }
 0x169   : > { %v2907_v34 = vunpack.c.l.b16 %v1771_v47  ;;  %v3260_v43 = vsel %vm3233_vm12, %v2489_v51, %v9921_v7  ;;  %v2908_v2 = vunpack.c.l.b16 %v1779_v20  ;;  %v2154_v12 = vor.u32 %v2152_v50, %v2151_v58  ;;  %451 = vst [vmem:[#allocation2 + $0xfc] sm:$0x1] %v450_v13  ;;  %v9989_v47 = vpop.permute.xlu1 %3137 }
 0x16a   : > { %v2156_v57 = vrot.slane %v2151_v58, 4  ;;  %v3300_v37 = vsel %vm3282_vm13, %v3260_v43, %v9847_v48  ;;  %v2163_v22 = vor.u32 %v2161_v38, %v2160_v14  ;;  %v3666_v17 = vmax.f32 %v3591_v41, 0.0  ;;  %v488_v58 = vld [vmem:[%s8652_s14 + $0x78] sm:$0xf] }
 0x16b   : > { %v2407_v5 = vrot.slane %v2149_v55, 4  ;;  %v2926_v25 = vpack.c.b16 %v2908_v2, %v2907_v34  ;;  %v3333_v27 = vsel %vm3315_vm14, %v3300_v37, %v9938_v11  ;;  %v1848_v7 = vld [vmem:[#allocation2 + $0xf0] sm:$0x8]  ;;  %v2408_v8 = vrot.slane %v2152_v50, 5  ;;  %v939_v55 = vld [vmem:[#allocation2 + $0xec] sm:$0x1] }
 0x16c   : > { %v2411_v15 = vrot.slane %v2161_v38, 5  ;;  %v2144_v4 = vshrl.u32 %v1848_v7, 16  ;;  %v2164_v48 = vsel %vm8744_vm11, %v2156_v57, %v2163_v22  ;;  %v3820_v52 = vpack.c.bf16 %v3666_v17, %v3666_v17  ;;  %v489_v50 = vld [vmem:[%s8652_s14 + $0x7c] sm:$0xf]  ;;  %521 = vst.msk [vmem:[#allocation2 + $0x104] sm:$0xf] %vm334_vm0, %v488_v58 }
 0x16d   : > { %v3366_v51 = vsel %vm3348_vm15, %v3333_v27, %v2866_v56  ;;  %2955 = vrot.lane.b32.xlu0 %v2926_v25, %s8574_s21  ;;  %v2988_v11 = vunpack.c.l.b16 %v2164_v48  ;;  %v2409_v41 = vor.u32 %v2408_v8, %v2407_v5  ;;  %v2413_v20 = vrot.slane %v2158_v45, 4  ;;  %v553_v57 = vld [vmem:[#allocation2 + $0xa0] sm:$0x8]  ;;  %v10011_v5 = vpop.permute.xlu0 %2595  ;;  %522 = vst.msk [vmem:[#allocation2 + $0x108] sm:$0xf] %vm334_vm0, %v489_v50 }
 0x16e   : > { %v7795_v38 = vrot.slane %v2144_v4, 11  ;;  %3853 = vst.msk [vmem:[#allocation3 + $0x28] sm:$0xf] %vm3695_vm2, %v3820_v52  ;;  %v3399_v34 = vsel %vm12798_vm3, %v3366_v51, %v9899_v19  ;;  %v12818_v56 = vshrl.u32 %v9980_v26, 16  ;;  %v12812_v14 = vshll.u32 %v9980_v26, 16 }
 0x16f   : > { %3147 = vrot.lane.b32.xlu2 %v8447_v49, %s8570_s17  ;;  %v2410_v13 = vrot.slane %v2409_v41, 4  ;;  %v2414_v43 = vor.u32 %v2413_v20, %v2411_v15  ;;  %v12814_v2 = vshrl.u32 %v9984_v0, 16  ;;  %v12811_v45 = vshll.u32 %v9984_v0, 16  ;;  %v1210_v52 = vld [vmem:[#allocation2 + $0xf0] sm:$0x8] }
 0x170   : > { %2763 = vrot.lane.b32.xlu1 %v9956_v32, %s8571_s18  ;;  %v2155_v37 = vsel %vm8744_vm11, %v7795_v38, %v2154_v12  ;;  %v2222_v19 = vld [vmem:[#allocation2 + $0xfc] sm:$0x1]  ;;  %v1140_v22 = vrot.slane %v12818_v56, 4  ;;  %v1141_v49 = vrot.slane %v12812_v14, 5  ;;  %v1150_v17 = vshll.u32 %v939_v55, 16  ;;  %v10020_v55 = vpop.permute.xlu2 %3027 }
 0x171   : > { %v2987_v25 = vunpack.c.l.b16 %v2155_v37  ;;  %v2412_v27 = vsel %vm8710_vm10, %v2410_v13, %v2411_v15  ;;  %v2415_v7 = vrot.slane %v2414_v43, 4  ;;  %v2417_v8 = vshll.u32 %v2222_v19, 16  ;;  %v10028_v19 = vld [vmem:[#allocation2 + $0xf4] sm:$0xf] }
 0x172   : > { %v3179_v32 = vunpack.c.l.b16 %v2412_v27  ;;  %v1142_v12 = vor.u32 %v1141_v49, %v1140_v22  ;;  %v1144_v4 = vrot.slane %v12811_v45, 5  ;;  %v1146_v48 = vrot.slane %v12814_v2, 4  ;;  %v10309_v45 = vld [vmem:[#allocation2 + $0x114] sm:$0xf] }
 0x173   : > { %v3006_v51 = vpack.c.b16 %v2988_v11, %v2987_v25  ;;  %v2419_v58 = vrot.slane %v2417_v8, 5  ;;  %v1152_v41 = vrot.slane %v1150_v17, 5  ;;  %v794_v20 = vshrl.u32 %v553_v57, 16  ;;  %v10034_v25 = vpop.permute.xlu1 %2675  ;;  %v1212_v8 = vld [vmem:[#allocation2 + $0xf8] sm:$0xf] }
 0x174   : > { %v1143_v15 = vrot.slane %v1142_v12, 4  ;;  %v1147_v38 = vor.u32 %v1146_v48, %v1144_v4  ;;  %v801_v50 = vrot.slane %v799_v42, 7  ;;  %v810_v13 = vrot.slane %v808_v16, 7  ;;  %v3593_v48 = vpop.f32.mrf.mxu0 }
 0x175   : > { %v2420_v43 = vsel %vm8710_vm10, %v2415_v7, %v2419_v58  ;;  %v7760_v37 = vrot.slane %v794_v20, 11  ;;  %v1525_v11 = vshrl.u32 %v1210_v52, 16  ;;  %v3432_v42 = vsel %vm3414_vm5, %v3399_v34, %v9972_v31  ;;  %v550_v52 = vld [vmem:[#allocation2 + $0x90] sm:$0x8]  ;;  %v10049_v58 = vpop.permute.xlu0 %2867 }
 0x176   : > { %v3180_v22 = vunpack.c.l.b16 %v2420_v43  ;;  %v1145_v49 = vsel %vm8710_vm10, %v1143_v15, %v1144_v4  ;;  %v1148_v57 = vrot.slane %v1147_v38, 4  ;;  %v804_v17 = vor.u32 %v802_v63, %v801_v50 }
 0x177   : > { %v2637_v16 = vunpack.c.l.b16 %v1145_v49  ;;  %v806_v27 = vrot.slane %v801_v50, 4  ;;  %v813_v7 = vor.u32 %v811_v54, %v810_v13  ;;  %v3465_v18 = vsel %vm3447_vm8, %v3432_v42, %v9989_v47  ;;  %v8416_v13 = vld [vmem:[#allocation2 + $0xe4] sm:$0xff] }
 0x178   : > { %3035 = vrot.lane.b32.xlu1 %v3006_v51, %s8573_s20  ;;  %v3198_v12 = vpack.c.b16 %v3180_v22, %v3179_v32  ;;  %v1153_v4 = vsel %vm8710_vm10, %v1148_v57, %v1152_v41  ;;  %v1530_v63 = vshrl.u32 %v10028_v19, 16  ;;  %v805_v34 = vsel %vm8744_vm11, %v7760_v37, %v804_v17  ;;  %v10063_v49 = vpop.permute.xlu2 %2597 }
 0x179   : > { %v2638_v31 = vunpack.c.l.b16 %v1153_v4  ;;  %v7780_v60 = vrot.slane %v1525_v11, 11  ;;  %v1533_v54 = vshll.u32 %v10028_v19, 16  ;;  %v10054_v32 = vsel %vm8744_vm11, %v806_v27, %v813_v7 }
 0x17a   : > { %3227 = vrot.lane.b32.xlu0 %v3198_v12, %s8575_s22  ;;  %v1532_v47 = vrot.slane %v1530_v63, 7  ;;  %v1539_v51 = vshrl.u32 %v1212_v8, 16  ;;  %v1542_v41 = vshll.u32 %v1212_v8, 16  ;;  %v3594_v15 = vadd.f32 %v9829_v39, %v3593_v48 }
 0x17b   : > { %v2655_v20 = vpack.c.b16 %v2638_v31, %v2637_v16  ;;  %v772_v38 = vshrl.u32 %v550_v52, 16  ;;  %v779_v50 = vrot.slane %v777_v3, 7  ;;  %v10059_v43 = vunpack.c.l.b16 %v805_v34  ;;  %v1582_v52 = vld [vmem:[#allocation2 + $0xfc] sm:$0x1]  ;;  %v10075_v31 = vld [vmem:[#allocation3 + $0x14] sm:$0xf] }
 0x17c   : > { %v1535_v37 = vor.u32 %v1533_v54, %v1532_v47  ;;  %v1537_v19 = vrot.slane %v1532_v47, 4  ;;  %v1541_v11 = vrot.slane %v1539_v51, 7  ;;  %v2470_v22 = vunpack.c.l.b16 %v10054_v32  ;;  %v10083_v47 = vld [vmem:[#allocation3 + $0x18] sm:$0xf] }
 0x17d   : > { %2685 = vrot.lane.b32.xlu2 %v2655_v20, %s8572_s19  ;;  %v3667_v57 = vmax.f32 %v3594_v15, 0.0  ;;  %v7759_v17 = vrot.slane %v772_v38, 11  ;;  %v782_v42 = vor.u32 %v780_v28, %v779_v50  ;;  %v784_v27 = vrot.slane %v779_v50, 4  ;;  %v10085_v20 = vpop.permute.xlu1 %2947 }
 0x17e   : > { %v1536_v3 = vsel %vm8744_vm11, %v7780_v60, %v1535_v37  ;;  %v1544_v16 = vor.u32 %v1542_v41, %v1541_v11  ;;  %v788_v7 = vrot.slane %v786_v46, 7  ;;  %v3498_v48 = vsel %vm3480_vm9, %v3465_v18, %v9941_v33  ;;  %v3766_v60 = vld [vmem:[#allocation3 + $0x1c] sm:$0x1] }
 0x17f   : > { %v2717_v8 = vunpack.c.l.b16 %v1536_v3  ;;  %v3821_v12 = vpack.c.bf16 %v3667_v57, %v3667_v57  ;;  %v783_v4 = vsel %vm8744_vm11, %v7759_v17, %v782_v42  ;;  %8006 = vmatmul.msk.bf16.gmra.mxu0 %vm12797_vm1, %v3498_v48  ;;  %v1780_v34 = vrot.slane %v1530_v63, 4  ;;  %v3595_v57 = vpop.f32.mrf.mxu0 }
 0x180   : > { %2605 = vrot.lane.b32.xlu1 %v8416_v13, %s8568_s15  ;;  %v1545_v29 = vsel %vm8744_vm11, %v1537_v19, %v1544_v16  ;;  %v791_v28 = vor.u32 %v789_v23, %v788_v7  ;;  %v2467_v46 = vunpack.c.l.b16 %v783_v4  ;;  %v1781_v18 = vrot.slane %v1533_v54, 5  ;;  %v10096_v54 = vpop.permute.xlu0 %3139 }
 0x181   : > { %v2718_v33 = vunpack.c.l.b16 %v1545_v29  ;;  %3854 = vst.msk [vmem:[#allocation3 + $0x34] sm:$0xf] %vm3695_vm2, %v3821_v12  ;;  %v1784_v15 = vrot.slane %v1542_v41, 5  ;;  %v1786_v38 = vrot.slane %v1539_v51, 4  ;;  %v1790_v9 = vshll.u32 %v1582_v52, 16 }
 0x182   : > { %v792_v50 = vsel %vm8744_vm11, %v784_v27, %v791_v28  ;;  %vm3761_vm0 = vcmask 253952   ;;  %v12805_v23 = vshrl.u32 %v10075_v31, 16  ;;  %v1782_v37 = vor.u32 %v1781_v18, %v1780_v34  ;;  %v452_v52 = vld [vmem:[#allocation2 + $0x10c] sm:$0x1] }
 0x183   : > { %v2735_v13 = vpack.c.b16 %v2718_v33, %v2717_v8  ;;  %v2468_v63 = vunpack.c.l.b16 %v792_v50  ;;  %v1787_v19 = vor.u32 %v1786_v38, %v1784_v15  ;;  %vm10092_vm1 = vmand %vm3761_vm0, %vm402_vm4  ;;  %v13031_v11 = vmov 0  ;;  %v10121_v33 = vld [vmem:[#allocation2 + $0x104] sm:$0xf] }
 0x184   : > { %v13032_v11 = vsel %vm10092_vm1, 4294967295, %v13031_v11  ;;  %v1792_v51 = vrot.slane %v1790_v9, 5  ;;  %v3767_v41 = vsel %vm10092_vm1, 0, %v3766_v60  ;;  %v12799_v17 = vshll.u32 %v10075_v31, 16  ;;  %v10119_v60 = vpop.permute.xlu2 %2869 }
 0x185   : > { %13033 = vst [vmem:[#allocation4_spill] sm:$0xff] %v13032_v11  ;;  %v12806_v42 = vshrl.u32 %v10083_v47, 16  ;;  %2765 = vrot.lane.b32.xlu0 %v2735_v13, %s8571_s18  ;;  %v2490_v3 = vpack.c.b16 %v2468_v63, %v2467_v46  ;;  %v1783_v16 = vrot.slane %v1782_v37, 4  ;;  %v1788_v27 = vrot.slane %v1787_v19, 4 }
 0x186   : > { %3768 = vst [vmem:[#allocation3 + $0x1c] sm:$0x1] %v3767_v41  ;;  %v12804_v7 = vshll.u32 %v10083_v47, 16  ;;  %v4938_v8 = vrot.slane %v12805_v23, 4  ;;  %v4939_v12 = vrot.slane %v12799_v17, 5  ;;  %v3596_v48 = vadd.f32 %v9829_v39, %v3595_v57 }
 0x187   : > { %v4944_v4 = vrot.slane %v12806_v42, 4  ;;  %v3263_v29 = vsel %vm3233_vm12, %v2490_v3, %v10011_v5  ;;  %v1785_v28 = vsel %vm8710_vm10, %v1783_v16, %v1784_v15  ;;  %v1793_v46 = vsel %vm8710_vm10, %v1788_v27, %v1792_v51  ;;  %v1853_v5 = vld [vmem:[#allocation2 + $0x108] sm:$0xf] }
 0x188   : > { %v4942_v34 = vrot.slane %v12804_v7, 5  ;;  %v2909_v18 = vunpack.c.l.b16 %v1785_v28  ;;  %v2910_v38 = vunpack.c.l.b16 %v1793_v46  ;;  %v4940_v50 = vor.u32 %v4939_v12, %v4938_v8  ;;  %v8484_v15 = vld [vmem:[#allocation3 + $0x24] sm:$0xff]  ;;  %v395_v12 = vld [vmem:[#allocation2 + $0x100] sm:$0x8]  ;;  %v10145_v46 = vpop.permute.xlu0 %2677 }
 0x189   : > { %v3302_v9 = vsel %vm3282_vm13, %v3263_v29, %v10034_v25  ;;  %v3668_v63 = vmax.f32 %v3596_v48, 0.0  ;;  %v453_v19 = vsel %vm8675_vm7, 0, %v452_v52  ;;  %v2491_v57 = vpack.c.b16 %v2470_v22, %v10059_v43  ;;  %v10133_v25 = vpop.permute.xlu1 %3219 }
 0x18a   : > { %v4945_v13 = vor.u32 %v4944_v4, %v4942_v34  ;;  %v3335_v37 = vsel %vm3315_vm14, %v3302_v9, %v9974_v24  ;;  %v2927_v51 = vpack.c.b16 %v2910_v38, %v2909_v18  ;;  %v4941_v41 = vrot.slane %v4940_v50, 4  ;;  %454 = vst [vmem:[#allocation2 + $0x10c] sm:$0x1] %v453_v19  ;;  %v3713_v50 = vld [vmem:[#allocation3 + $0x20] sm:$0x8] }
 0x18b   : > { %v2171_v3 = vshrl.u32 %v10121_v33, 16  ;;  %v3822_v16 = vpack.c.bf16 %v3668_v63, %v3668_v63  ;;  %v3368_v27 = vsel %vm3348_vm15, %v3335_v37, %v10049_v58  ;;  %v2174_v24 = vshll.u32 %v10121_v33, 16 }
 0x18c   : > { %v2180_v8 = vshrl.u32 %v1853_v5, 16  ;;  %2957 = vrot.lane.b32.xlu2 %v2927_v51, %s8574_s21  ;;  %v4943_v32 = vsel %vm8710_vm10, %v4941_v41, %v4942_v34  ;;  %v4946_v43 = vrot.slane %v4945_v13, 4  ;;  %v2183_v22 = vshll.u32 %v1853_v5, 16  ;;  %v5164_v51 = vld [vmem:[#allocation3 + $0x24] sm:$0xf] }
 0x18d   : > { %v4922_v4 = vld [vmem:[#allocation3 + $0x1c] sm:$0x1]  ;;  %v2421_v48 = vrot.slane %v2171_v3, 4  ;;  %3855 = vst.msk [vmem:[#allocation3 + $0x38] sm:$0xf] %vm3695_vm2, %v3822_v16  ;;  %6443 = vrot.lane.b32.xlu0 %v8484_v15, %s8576_s12  ;;  %v2422_v58 = vrot.slane %v2174_v24, 5  ;;  %v3401_v28 = vsel %vm12798_vm3, %v3368_v27, %v10085_v20  ;;  %v10151_v9 = vsel %vm3233_vm12, %v2491_v57, %v10063_v49  ;;  %v10160_v57 = vpop.permute.xlu2 %3141 }
 0x18e   : > { %v4948_v52 = vshll.u32 %v4922_v4, 16  ;;  %v2427_v29 = vrot.slane %v2180_v8, 4  ;;  %v2425_v33 = vrot.slane %v2183_v22, 5  ;;  %v396_v34 = vsel %vm8664_vm6, 0, %v395_v12 }
 0x18f   : > { %v2173_v18 = vrot.slane %v2171_v3, 7  ;;  %v2182_v38 = vrot.slane %v2180_v8, 7  ;;  %v2423_v13 = vor.u32 %v2422_v58, %v2421_v48  ;;  %397 = vst [vmem:[#allocation2 + $0x100] sm:$0x8] %v396_v34  ;;  %vm3705_vm4 = vcmask 257027  }
 0x190   : > { %v4950_v5 = vrot.slane %v4948_v52, 5  ;;  %v6203_v63 = vunpack.c.l.b16 %v4943_v32  ;;  %v2428_v15 = vor.u32 %v2427_v29, %v2425_v33  ;;  %vm13034_vm0 = vsmask.f32 7950  ;;  %v5165_v8 = vld [vmem:[#allocation3 + $0x28] sm:$0xf]  ;;  %v3598_v29 = vpop.f32.mrf.mxu0 }
 0x191   : > { %v2178_v20 = vrot.slane %v2173_v18, 4  ;;  %v2185_v37 = vor.u32 %v2183_v22, %v2182_v38  ;;  %vm10154_vm3 = vmand %vm3705_vm4, %vm13034_vm0  ;;  %v13035_v19 = vmov 0  ;;  %v2223_v3 = vld [vmem:[#allocation2 + $0x10c] sm:$0x1]  ;;  %v2424_v49 = vrot.slane %v2423_v13, 4 }
 0x192   : > { %v13036_v19 = vsel %vm10154_vm3, 4294967295, %v13035_v19  ;;  %v4951_v41 = vsel %vm8710_vm10, %v4946_v43, %v4950_v5  ;;  %v3434_v16 = vsel %vm3414_vm5, %v3401_v28, %v10020_v55  ;;  %v3714_v27 = vsel %vm10154_vm3, 0, %v3713_v50  ;;  %v10170_v50 = vpop.permute.xlu1 %2757 }
 0x193   : > { %13037 = vst [vmem:[#allocation5_spill] sm:$0xff] %v13036_v19  ;;  %v6204_v12 = vunpack.c.l.b16 %v4951_v41  ;;  %v2429_v4 = vrot.slane %v2428_v15, 4  ;;  %v2431_v32 = vshll.u32 %v2223_v3, 16  ;;  %v2176_v22 = vor.u32 %v2174_v24, %v2173_v18  ;;  %v3769_v18 = vld [vmem:[#allocation3 + $0x2c] sm:$0x1] }
 0x194   : > { %3715 = vst [vmem:[#allocation3 + $0x20] sm:$0x8] %v3714_v27  ;;  %v2426_v48 = vsel %vm8710_vm10, %v2424_v49, %v2425_v33  ;;  %v2186_v43 = vsel %vm8744_vm11, %v2178_v20, %v2185_v37  ;;  %v5217_v52 = vshrl.u32 %v5164_v51, 16  ;;  %v5220_v58 = vshll.u32 %v5164_v51, 16  ;;  %v10182_v41 = vld [vmem:[#allocation3 + $0x24] sm:$0xf] }
 0x195   : > { %v6235_v34 = vpack.c.b16 %v6204_v12, %v6203_v63  ;;  %v2433_v55 = vrot.slane %v2431_v32, 5  ;;  %v3181_v28 = vunpack.c.l.b16 %v2426_v48  ;;  %v5226_v38 = vshrl.u32 %v5165_v8, 16  ;;  %v10184_v12 = vpop.permute.xlu0 %2949 }
 0x196   : > { %v5219_v5 = vrot.slane %v5217_v52, 7  ;;  %v5229_v13 = vshll.u32 %v5165_v8, 16  ;;  %v10172_v15 = vrot.slane %v5217_v52, 4  ;;  %v10174_v24 = vrot.slane %v5220_v58, 5  ;;  %v1851_v20 = vld [vmem:[#allocation2 + $0x100] sm:$0x8] }
 0x197   : > { %6251 = vrot.lane.b32.xlu1 %v6235_v34, %s8575_s22  ;;  %v2434_v33 = vsel %vm8710_vm10, %v2429_v4, %v2433_v55  ;;  %v5228_v37 = vrot.slane %v5226_v38, 7  ;;  %v10179_v63 = vrot.slane %v5226_v38, 4  ;;  %v3599_v51 = vadd.f32 %v9829_v39, %v3598_v29  ;;  %v10190_v34 = vld [vmem:[#allocation3 + $0x28] sm:$0xf] }
 0x198   : > { %v3182_v3 = vunpack.c.l.b16 %v2434_v33  ;;  %v2166_v49 = vshrl.u32 %v1851_v20, 16  ;;  %v2990_v27 = vunpack.c.l.b16 %v2186_v43  ;;  %v5224_v8 = vrot.slane %v5219_v5, 4  ;;  %v8432_v33 = vld [vmem:[#allocation2 + $0xf4] sm:$0xff] }
 0x199   : > { %v5231_v32 = vor.u32 %v5229_v13, %v5228_v37  ;;  %v10188_v52 = vrot.slane %v5229_v13, 5  ;;  %v3669_v4 = vmax.f32 %v3599_v51, 0.0  ;;  %v3770_v29 = vsel %vm10092_vm1, 0, %v3769_v18  ;;  %v10204_v51 = vpop.permute.xlu2 %2679 }
 0x19a   : > { %v3199_v55 = vpack.c.b16 %v3182_v3, %v3181_v28  ;;  %v7796_v38 = vrot.slane %v2166_v49, 11  ;;  %v12803_v43 = vshrl.u32 %v10182_v41, 16  ;;  %v5222_v17 = vor.u32 %v5220_v58, %v5219_v5  ;;  %3771 = vst [vmem:[#allocation3 + $0x2c] sm:$0x1] %v3770_v29  ;;  %v10207_v5 = vld [vmem:[#allocation2 + $0xf4] sm:$0xf] }
 0x19b   : > { %v5163_v39 = vld [vmem:[#allocation3 + $0x20] sm:$0x8]  ;;  %v5232_v37 = vsel %vm8744_vm11, %v5224_v8, %v5231_v32  ;;  %v3467_v18 = vsel %vm3447_vm8, %v3434_v16, %v10096_v54  ;;  %v3823_v3 = vpack.c.bf16 %v3669_v4, %v3669_v4  ;;  %v12800_v58 = vshll.u32 %v10182_v41, 16  ;;  %v10210_v29 = vld [vmem:[#allocation2 + $0xf8] sm:$0xf] }
 0x19c   : > { %v5212_v20 = vshrl.u32 %v5163_v39, 16  ;;  %3229 = vrot.lane.b32.xlu2 %v3199_v55, %s8575_s22  ;;  %v2177_v28 = vsel %vm8744_vm11, %v7796_v38, %v2176_v22  ;;  %v6284_v32 = vunpack.c.l.b16 %v5232_v37  ;;  %v12802_v39 = vshrl.u32 %v10190_v34, 16  ;;  %v940_v55 = vld [vmem:[#allocation2 + $0xfc] sm:$0x1] }
 0x19d   : > { %v2989_v49 = vunpack.c.l.b16 %v2177_v28  ;;  %3856 = vst.msk [vmem:[#allocation3 + $0x44] sm:$0xf] %vm3695_vm2, %v3823_v3  ;;  %v12801_v22 = vshll.u32 %v10190_v34, 16  ;;  %v4952_v54 = vrot.slane %v12803_v43, 4  ;;  %v4953_v16 = vrot.slane %v12800_v58, 5  ;;  %v10229_v3 = vpop.permute.xlu1 %3029 }
 0x19e   : > { %v8046_v8 = vrot.slane %v5212_v20, 11  ;;  %v3500_v4 = vsel %vm3480_vm9, %v3467_v18, %v10133_v25  ;;  %v4958_v37 = vrot.slane %v12802_v39, 4  ;;  %vm13038_vm4 = vcmask 293888   ;;  %v10242_v39 = vpop.permute.xlu0 %3221 }
 0x19f   : > { %2877 = vrot.lane.b32.xlu1 %v8432_v33, %s8569_s16  ;;  %v3007_v38 = vpack.c.b16 %v2990_v27, %v2989_v49  ;;  %8007 = vmatmul.msk.bf16.vlgmr.msra.gmra.mxu1 %vm13038_vm4, %v3500_v4  ;;  %v3304_v28 = vsel %vm3282_vm13, %v10151_v9, %v10145_v46  ;;  %v4954_v58 = vor.u32 %v4953_v16, %v4952_v54  ;;  %v4956_v25 = vrot.slane %v12801_v22, 5  ;;  %v3600_v46 = vpop.f32.mrf.mxu0  ;;  %v10240_v22 = vld [vmem:[#allocation2 + $0x104] sm:$0xf] }
 0x1a0   : > { %v5223_v20 = vsel %vm8744_vm11, %v8046_v8, %v5222_v17  ;;  %v12810_v27 = vshrl.u32 %v10207_v5, 16  ;;  %v8448_v17 = vld [vmem:[#allocation2 + $0x104] sm:$0xff]  ;;  %v12808_v33 = vshll.u32 %v10207_v5, 16  ;;  %v12809_v18 = vshrl.u32 %v10210_v29, 16 }
 0x1a1   : > { %v6283_v13 = vunpack.c.l.b16 %v5223_v20  ;;  %3037 = vrot.lane.b32.xlu0 %v3007_v38, %s8573_s20  ;;  %v12807_v49 = vshll.u32 %v10210_v29, 16  ;;  %v1164_v8 = vshll.u32 %v940_v55, 16  ;;  %v4923_v4 = vld [vmem:[#allocation3 + $0x2c] sm:$0x1]  ;;  %v4955_v20 = vrot.slane %v4954_v58, 4 }
 0x1a2   : > { %v4959_v54 = vor.u32 %v4958_v37, %v4956_v25  ;;  %v1154_v16 = vrot.slane %v12810_v27, 4  ;;  %v4962_v38 = vshll.u32 %v4923_v4, 16  ;;  %v1155_v48 = vrot.slane %v12808_v33, 5  ;;  %v10256_v37 = vld [vmem:[%s12767_s2] ss:$0 sm:$0xff]  ;;  %v10259_v33 = vpop.permute.xlu2 %2951 }
 0x1a3   : > { %v6315_v9 = vpack.c.b16 %v6284_v32, %v6283_v13  ;;  %v1158_v43 = vrot.slane %v12807_v49, 5  ;;  %v1160_v13 = vrot.slane %v12809_v18, 4  ;;  %v1213_v32 = vld [vmem:[#allocation2 + $0x100] sm:$0x8]  ;;  %v4957_v58 = vsel %vm8710_vm10, %v4955_v20, %v4956_v25 }
 0x1a4   : > { %v4960_v55 = vrot.slane %v4959_v54, 4  ;;  %v3601_v4 = vadd.f32 %v10256_v37, %v3600_v46  ;;  %v4964_v7 = vrot.slane %v4962_v38, 5  ;;  %v1156_v23 = vor.u32 %v1155_v48, %v1154_v16  ;;  %v10267_v48 = vld [vmem:[#allocation2 + $0x108] sm:$0xf] }
 0x1a5   : > { %6331 = vrot.lane.b32.xlu2 %v6315_v9, %s8577_s13  ;;  %v1161_v42 = vor.u32 %v1160_v13, %v1158_v43  ;;  %v1166_v49 = vrot.slane %v1164_v8, 5  ;;  %v3337_v9 = vsel %vm3315_vm14, %v3304_v28, %v10170_v50  ;;  %v1547_v27 = vshrl.u32 %v1213_v32, 16  ;;  %v3716_v50 = vld [vmem:[#allocation3 + $0x30] sm:$0x8]  ;;  %v10280_v32 = vpop.permute.xlu1 %2599 }
 0x1a6   : > { %v3670_v18 = vmax.f32 %v3601_v4, 0.0  ;;  %v1552_v25 = vshrl.u32 %v10240_v22, 16  ;;  %v4965_v20 = vsel %vm8710_vm10, %v4960_v55, %v4964_v7  ;;  %v6205_v54 = vunpack.c.l.b16 %v4957_v58  ;;  %v8485_v58 = vld [vmem:[#allocation3 + $0x34] sm:$0xff] }
 0x1a7   : > { %3149 = vrot.lane.b32.xlu1 %v8448_v17, %s8570_s17  ;;  %v1157_v46 = vrot.slane %v1156_v23, 4  ;;  %v1162_v38 = vrot.slane %v1161_v42, 4  ;;  %v6206_v8 = vunpack.c.l.b16 %v4965_v20  ;;  %v3370_v13 = vsel %vm3348_vm15, %v3337_v9, %v10119_v60  ;;  %v10278_v42 = vld [vmem:[#allocation3 + $0x34] sm:$0xf]  ;;  %v10284_v55 = vld [vmem:[#allocation3 + $0x38] sm:$0xf] }
 0x1a8   : > { %v3824_v16 = vpack.c.bf16 %v3670_v18, %v3670_v18  ;;  %v7781_v4 = vrot.slane %v1547_v27, 11  ;;  %v1554_v7 = vrot.slane %v1552_v25, 7  ;;  %v1555_v23 = vshll.u32 %v10240_v22, 16  ;;  %13039 = vst [vmem:[#allocation6_spill] sm:$0xff] %v10278_v42 }
 0x1a9   : > { %v1159_v28 = vsel %vm8710_vm10, %v1157_v46, %v1158_v43  ;;  %v1167_v17 = vsel %vm8710_vm10, %v1162_v38, %v1166_v49  ;;  %v6236_v18 = vpack.c.b16 %v6206_v8, %v6205_v54  ;;  %v1561_v43 = vshrl.u32 %v10267_v48, 16  ;;  %13040 = vst [vmem:[#allocation7_spill] sm:$0xff] %v10284_v55  ;;  %v398_v46 = vld [vmem:[#allocation2 + $0x110] sm:$0x8] }
 0x1aa   : > { %v2639_v60 = vunpack.c.l.b16 %v1159_v28  ;;  %v2640_v27 = vunpack.c.l.b16 %v1167_v17  ;;  %3857 = vst.msk [vmem:[#allocation3 + $0x48] sm:$0xf] %vm3695_vm2, %v3824_v16  ;;  %vm13041_vm0 = vcmask 162816   ;;  %v1557_v9 = vor.u32 %v1555_v23, %v1554_v7  ;;  %v10298_v28 = vpop.permute.xlu0 %2759  ;;  %v10325_v2 = vpop.permute.xlu2 %3223 }
 0x1ab   : > { %v3403_v49 = vsel %vm13041_vm0, %v3370_v13, %v10184_v12  ;;  %v1564_v20 = vshll.u32 %v10267_v48, 16  ;;  %v3717_v54 = vsel %vm10154_vm3, 0, %v3716_v50  ;;  %6253 = vrot.lane.b32.xlu0 %v6236_v18, %s8575_s22  ;;  %v1559_v8 = vrot.slane %v1554_v7, 4  ;;  %v3603_v13 = vpop.f32.mrf.mxu0 }
 0x1ac   : > { %v2656_v38 = vpack.c.b16 %v2640_v27, %v2639_v60  ;;  %v1563_v16 = vrot.slane %v1561_v43, 7  ;;  %3718 = vst [vmem:[#allocation3 + $0x30] sm:$0x8] %v3717_v54  ;;  %v12813_v12 = vshrl.u32 %v10278_v42, 16  ;;  %v1558_v17 = vsel %vm8744_vm11, %v7781_v4, %v1557_v9 }
 0x1ad   : > { %6445 = vrot.lane.b32.xlu2 %v8485_v58, %s8576_s12  ;;  %v12815_v50 = vshll.u32 %v10278_v42, 16  ;;  %v12816_v18 = vshrl.u32 %v10284_v55, 16  ;;  %v3436_v58 = vsel %vm3414_vm5, %v3403_v49, %v10229_v3  ;;  %v2719_v60 = vunpack.c.l.b16 %v1558_v17  ;;  %v10319_v49 = vld [vmem:[#allocation2 + $0x118] sm:$0xf] }
 0x1ae   : > { %v1566_v7 = vor.u32 %v1564_v20, %v1563_v16  ;;  %v5241_v27 = vrot.slane %v12813_v12, 7  ;;  %v12817_v54 = vshll.u32 %v10284_v55, 16  ;;  %v3604_v9 = vadd.f32 %v10256_v37, %v3603_v13  ;;  %v8417_v16 = vld [vmem:[#allocation2 + $0xf4] sm:$0xff] }
 0x1af   : > { %2687 = vrot.lane.b32.xlu1 %v2656_v38, %s8572_s19  ;;  %v5250_v4 = vrot.slane %v12816_v18, 7  ;;  %v3469_v14 = vsel %vm3447_vm8, %v3436_v58, %v10160_v57  ;;  %v399_v3 = vsel %vm8664_vm6, 0, %v398_v46  ;;  %vm13042_vm6 = vmmov %vm13038_vm4  ;;  %v12824_v58 = vshrl.u32 %v10309_v45, 16 }
 0x1b0   : > { %v1567_v17 = vsel %vm8744_vm11, %v1559_v8, %v1566_v7  ;;  %v5244_v38 = vor.u32 %v12815_v50, %v5241_v27  ;;  %v5246_v12 = vrot.slane %v5241_v27, 4  ;;  %v3502_v13 = vsel %vm3480_vm9, %v3469_v14, %v10242_v39  ;;  %400 = vst [vmem:[#allocation2 + $0x110] sm:$0x8] %v399_v3 }
 0x1b1   : > { %v2720_v57 = vunpack.c.l.b16 %v1567_v17  ;;  %v5253_v6 = vor.u32 %v12817_v54, %v5250_v4  ;;  %v3671_v46 = vmax.f32 %v3604_v9, 0.0  ;;  %8008 = vmatmul.msk.bf16.gmra.mxu1 %vm13042_vm6, %v3502_v13  ;;  %v12823_v8 = vshll.u32 %v10309_v45, 16  ;;  %v1583_v17 = vld [vmem:[#allocation2 + $0x10c] sm:$0x1]  ;;  %v10342_v13 = vpop.permute.xlu1 %2871  ;;  %vm13065_vm6 = vmmov %vm13038_vm4 }
 0x1b2   : > { %v12821_v7 = vshrl.u32 %v10319_v49, 16  ;;  %v12822_v27 = vshll.u32 %v10319_v49, 16  ;;  %v1794_v50 = vrot.slane %v1552_v25, 4  ;;  %v2195_v9 = vrot.slane %v12824_v58, 7 }
 0x1b3   : > { %v2736_v14 = vpack.c.b16 %v2720_v57, %v2719_v60  ;;  %v5166_v39 = vld [vmem:[#allocation3 + $0x30] sm:$0x8]  ;;  %v5254_v3 = vsel %vm8744_vm11, %v5246_v12, %v5253_v6  ;;  %v3825_v4 = vpack.c.bf16 %v3671_v46, %v3671_v46  ;;  %2607 = vrot.lane.b32.xlu0 %v8417_v16, %s8568_s15  ;;  %v1795_v25 = vrot.slane %v1555_v23, 5 }
 0x1b4   : > { %v5234_v18 = vshrl.u32 %v5166_v39, 16  ;;  %v6286_v54 = vunpack.c.l.b16 %v5254_v3  ;;  %v2204_v56 = vrot.slane %v12821_v7, 7  ;;  %v556_v60 = vld [vmem:[#allocation2 + $0xb0] sm:$0x8]  ;;  %v2198_v12 = vor.u32 %v12823_v8, %v2195_v9  ;;  %v10369_v8 = vpop.permute.xlu2 %2761 }
 0x1b5   : > { %2767 = vrot.lane.b32.xlu2 %v2736_v14, %s8571_s18  ;;  %3858 = vst.msk [vmem:[#allocation3 + $0x54] sm:$0xf] %vm3695_vm2, %v3825_v4  ;;  %v2200_v57 = vrot.slane %v2195_v9, 4  ;;  %v1798_v6 = vrot.slane %v1564_v20, 5  ;;  %v1800_v16 = vrot.slane %v1561_v43, 4  ;;  %v1796_v3 = vor.u32 %v1795_v25, %v1794_v50  ;;  %v10357_v23 = vpop.permute.xlu0 %3031  ;;  %v8433_v43 = vld [vmem:[#allocation2 + $0x104] sm:$0xff] }
 0x1b6   : > { %v8047_v46 = vrot.slane %v5234_v18, 11  ;;  %v2207_v39 = vor.u32 %v12822_v27, %v2204_v56  ;;  %v1804_v22 = vshll.u32 %v1583_v17, 16  ;;  %v816_v44 = vshrl.u32 %v556_v60, 16  ;;  %v3605_v60 = vpop.f32.mrf.mxu0 }
 0x1b7   : > { %v1854_v62 = vld [vmem:[#allocation2 + $0x110] sm:$0x8]  ;;  %v1801_v14 = vor.u32 %v1800_v16, %v1798_v6  ;;  %v823_v4 = vrot.slane %v821_v21, 7  ;;  %v13043_v9 = vshrl.u32 %v9662_v35, 16  ;;  %v1797_v50 = vrot.slane %v1796_v3, 4 }
 0x1b8   : > { %v5245_v48 = vsel %vm8744_vm11, %v8047_v46, %v5244_v38  ;;  %v2188_v18 = vshrl.u32 %v1854_v62, 16  ;;  %v2208_v56 = vsel %vm8744_vm11, %v2200_v57, %v2207_v39  ;;  %v1806_v16 = vrot.slane %v1804_v22, 5  ;;  %v3772_v62 = vld [vmem:[#allocation3 + $0x3c] sm:$0x1] }
 0x1b9   : > { %v832_v20 = vrot.slane %v13043_v9, 7  ;;  %v6285_v17 = vunpack.c.l.b16 %v5245_v48  ;;  %v2992_v25 = vunpack.c.l.b16 %v2208_v56  ;;  %v1802_v7 = vrot.slane %v1801_v14, 4  ;;  %v10375_v14 = vld [vmem:[#allocation3 + $0x34] sm:$0xf]  ;;  %v455_v56 = vld [vmem:[#allocation2 + $0x11c] sm:$0x1] }
 0x1ba   : > { %v7797_v27 = vrot.slane %v2188_v18, 11  ;;  %v1799_v21 = vsel %vm8710_vm10, %v1797_v50, %v1798_v6  ;;  %v7761_v9 = vrot.slane %v816_v44, 11  ;;  %v13044_v38 = vshll.u32 %v9655_v1, 16 }
 0x1bb   : > { %v6316_v58 = vpack.c.b16 %v6286_v54, %v6285_v17  ;;  %v1807_v57 = vsel %vm8710_vm10, %v1802_v7, %v1806_v16  ;;  %v2911_v39 = vunpack.c.l.b16 %v1799_v21  ;;  %v828_v3 = vrot.slane %v823_v4, 4  ;;  %2879 = vrot.lane.b32.xlu0 %v8433_v43, %s8569_s16  ;;  %v10384_v54 = vld [vmem:[#allocation3 + $0x38] sm:$0xf] }
 0x1bc   : > { %v826_v46 = vor.u32 %v13044_v38, %v823_v4  ;;  %v2199_v6 = vsel %vm8744_vm11, %v7797_v27, %v2198_v12  ;;  %v2912_v22 = vunpack.c.l.b16 %v1807_v57  ;;  %v13045_v1 = vshll.u32 %v9662_v35, 16  ;;  %v10390_v27 = vpop.permute.xlu1 %3143  ;;  %v3719_v38 = vld [vmem:[#allocation3 + $0x40] sm:$0x8] }
 0x1bd   : > { %6333 = vrot.lane.b32.xlu1 %v6316_v58, %s8577_s13  ;;  %v2991_v7 = vunpack.c.l.b16 %v2199_v6  ;;  %v3606_v18 = vadd.f32 %v10256_v37, %v3605_v60  ;;  %v3773_v43 = vsel %vm10092_vm1, 0, %v3772_v62  ;;  %v12836_v35 = vshrl.u32 %v10375_v14, 16  ;;  %v10396_v58 = vpop.permute.xlu0 %2601  ;;  %v8449_v60 = vld [vmem:[#allocation2 + $0x114] sm:$0xff] }
 0x1be   : > { %v827_v44 = vsel %vm8744_vm11, %v7761_v9, %v826_v46  ;;  %v835_v48 = vor.u32 %v13045_v1, %v832_v20  ;;  %v2928_v12 = vpack.c.b16 %v2912_v22, %v2911_v39  ;;  %3774 = vst [vmem:[#allocation3 + $0x3c] sm:$0x1] %v3773_v43  ;;  %v12832_v20 = vshll.u32 %v10375_v14, 16 }
 0x1bf   : > { %v2471_v4 = vunpack.c.l.b16 %v827_v44  ;;  %v3008_v17 = vpack.c.b16 %v2992_v25, %v2991_v7  ;;  %v3672_v21 = vmax.f32 %v3606_v18, 0.0  ;;  %v12834_v9 = vshrl.u32 %v10384_v54, 16 }
 0x1c0   : > { %v836_v50 = vsel %vm8744_vm11, %v828_v3, %v835_v48  ;;  %v12827_v46 = vshll.u32 %v10384_v54, 16  ;;  %v4966_v62 = vrot.slane %v12836_v35, 4  ;;  %v4967_v57 = vrot.slane %v12832_v20, 5  ;;  %v10406_v3 = vld [vmem:[#allocation3 + $0x44] sm:$0xf]  ;;  %v10413_v48 = vpop.f32.mrf.mxu0 }
 0x1c1   : > { %v2472_v16 = vunpack.c.l.b16 %v836_v50  ;;  %v456_v39 = vsel %vm8675_vm7, 0, %v455_v56  ;;  %13046 = vst [vmem:[#allocation8_spill] sm:$0xff] %v10406_v3  ;;  %3039 = vrot.lane.b32.xlu2 %v3008_v17, %s8573_s20  ;;  %v3826_v6 = vpack.c.bf16 %v3672_v21, %v3672_v21  ;;  %v4972_v22 = vrot.slane %v12834_v9, 4  ;;  %vm13052_vm7 = vmmov %vm13041_vm0 }
 0x1c2   : > { %457 = vst [vmem:[#allocation2 + $0x11c] sm:$0x1] %v456_v39  ;;  %v13047_v44 = vshrl.u32 %v10309_v45, 16  ;;  %v4968_v7 = vor.u32 %v4967_v57, %v4966_v62  ;;  %v4970_v10 = vrot.slane %v12827_v46, 5  ;;  %v13048_v18 = vshll.u32 %v10309_v45, 16 }
 0x1c3   : > { %v2492_v25 = vpack.c.b16 %v2472_v16, %v2471_v4  ;;  %v13049_v56 = vshll.u32 %v10319_v49, 16  ;;  %3859 = vst.msk [vmem:[#allocation3 + $0x58] sm:$0xf] %vm3695_vm2, %v3826_v6  ;;  %v13050_v17 = vshrl.u32 %v10319_v49, 16  ;;  %v3720_v21 = vsel %vm10154_vm3, 0, %v3719_v38  ;;  %3151 = vrot.lane.b32.xlu0 %v8449_v60, %s8570_s17 }
 0x1c4   : > { %v2435_v1 = vrot.slane %v13047_v44, 4  ;;  %v2436_v43 = vrot.slane %v13048_v18, 5  ;;  %v12825_v62 = vshrl.u32 %v10406_v3, 16  ;;  %v4969_v57 = vrot.slane %v4968_v7, 4  ;;  %v10432_v18 = vpop.permute.xlu2 %3033  ;;  %3721 = vst [vmem:[#allocation3 + $0x40] sm:$0x8] %v3720_v21 }
 0x1c5   : > { %v2439_v4 = vrot.slane %v13049_v56, 5  ;;  %v3269_v50 = vsel %vm3233_vm12, %v2492_v25, %v10280_v32  ;;  %v2441_v16 = vrot.slane %v13050_v17, 4  ;;  %v4973_v39 = vor.u32 %v4972_v22, %v4970_v10  ;;  %2959 = vrot.lane.b32.xlu1 %v2928_v12, %s8574_s21  ;;  %v4924_v49 = vld [vmem:[#allocation3 + $0x3c] sm:$0x1]  ;;  %v10437_v25 = vld [vmem:[#allocation3 + $0x48] sm:$0xf]  ;;  %v10448_v17 = vpop.permute.xlu0 %2873 }
 0x1c6   : > { %v3306_v45 = vsel %vm3282_vm13, %v3269_v50, %v10204_v51  ;;  %v2437_v44 = vor.u32 %v2436_v43, %v2435_v1  ;;  %13051 = vst [vmem:[#allocation9_spill] sm:$0xff] %v10437_v25  ;;  %v5263_v60 = vrot.slane %v12825_v62, 7  ;;  %v12826_v51 = vshll.u32 %v10406_v3, 16  ;;  %v3775_v56 = vld [vmem:[#allocation3 + $0x4c] sm:$0x1]  ;;  %v10446_v50 = vpop.permute.xlu1 %2681 }
 0x1c7   : > { %v3339_v32 = vsel %vm3315_vm14, %v3306_v45, %v10298_v28  ;;  %v2442_v38 = vor.u32 %v2441_v16, %v2439_v4  ;;  %v4971_v6 = vsel %vm8710_vm10, %v4969_v57, %v4970_v10  ;;  %v4974_v22 = vrot.slane %v4973_v39, 4  ;;  %v10455_v39 = vld [vmem:[#allocation3 + $0x44] sm:$0xf] }
 0x1c8   : > { %v4976_v1 = vshll.u32 %v4924_v49, 16  ;;  %v2438_v7 = vrot.slane %v2437_v44, 4  ;;  %v6207_v43 = vunpack.c.l.b16 %v4971_v6  ;;  %v3372_v28 = vsel %vm3348_vm15, %v3339_v32, %v10342_v13  ;;  %v10471_v46 = vpop.f32.mrf.mxu0 }
 0x1c9   : > { %v2443_v12 = vrot.slane %v2442_v38, 4  ;;  %v2224_v21 = vld [vmem:[#allocation2 + $0x11c] sm:$0x1]  ;;  %v5266_v10 = vor.u32 %v12826_v51, %v5263_v60  ;;  %v12828_v57 = vshrl.u32 %v10437_v25, 16  ;;  %v5268_v13 = vrot.slane %v5263_v60, 4 }
 0x1ca   : > { %v4978_v16 = vrot.slane %v4976_v1, 5  ;;  %v2440_v45 = vsel %vm8710_vm10, %v2438_v7, %v2439_v4  ;;  %v2445_v44 = vshll.u32 %v2224_v21, 16  ;;  %v12829_v32 = vshll.u32 %v10437_v25, 16  ;;  %v10458_v38 = vld [vmem:[#allocation3 + $0x48] sm:$0xf] }
 0x1cb   : > { %v3183_v49 = vunpack.c.l.b16 %v2440_v45  ;;  %v5272_v4 = vrot.slane %v12828_v57, 7  ;;  %v3405_v1 = vsel %vm13052_vm7, %v3372_v28, %v10259_v33  ;;  %v3776_v7 = vsel %vm10092_vm1, 0, %v3775_v56  ;;  %v5169_v45 = vld [vmem:[#allocation3 + $0x40] sm:$0x8]  ;;  %v562_v56 = vld [vmem:[#allocation2 + $0xd0] sm:$0x8]  ;;  %vm13066_vm7 = vmmov %vm13041_vm0 }
 0x1cc   : > { %v4979_v6 = vsel %vm8710_vm10, %v4974_v22, %v4978_v16  ;;  %v2447_v21 = vrot.slane %v2445_v44, 5  ;;  %v3438_v60 = vsel %vm3414_vm5, %v3405_v1, %v10357_v23  ;;  %3777 = vst [vmem:[#allocation3 + $0x4c] sm:$0x1] %v3776_v7  ;;  %v12831_v51 = vshrl.u32 %v10455_v39, 16  ;;  %v3805_v25 = vld [vmem:[#allocation3 + $0xec] sm:$0x1] }
 0x1cd   : > { %v6208_v62 = vunpack.c.l.b16 %v4979_v6  ;;  %v5256_v22 = vshrl.u32 %v5169_v45, 16  ;;  %v5275_v16 = vor.u32 %v12829_v32, %v5272_v4  ;;  %v12830_v33 = vshll.u32 %v10455_v39, 16  ;;  %v10486_v32 = vpop.permute.xlu2 %2603  ;;  %v10504_v35 = vpop.permute.xlu0 %3145 }
 0x1ce   : > { %v12835_v28 = vshrl.u32 %v10458_v38, 16  ;;  %v2448_v44 = vsel %vm8710_vm10, %v2443_v12, %v2447_v21  ;;  %v12833_v23 = vshll.u32 %v10458_v38, 16  ;;  %v4980_v1 = vrot.slane %v12831_v51, 4 }
 0x1cf   : > { %v6237_v6 = vpack.c.b16 %v6208_v62, %v6207_v43  ;;  %v3184_v7 = vunpack.c.l.b16 %v2448_v44  ;;  %v8048_v57 = vrot.slane %v5256_v22, 11  ;;  %v5276_v45 = vsel %vm8744_vm11, %v5268_v13, %v5275_v16  ;;  %v8515_v22 = vld [vmem:[%s12768_s3 + $0x78] sm:$0xff] }
 0x1d0   : > { %v4981_v4 = vrot.slane %v12830_v33, 5  ;;  %v6288_v62 = vunpack.c.l.b16 %v5276_v45  ;;  %v4984_v43 = vrot.slane %v12833_v23, 5  ;;  %v4986_v12 = vrot.slane %v12835_v28, 4  ;;  %v559_v28 = vld [vmem:[#allocation2 + $0xc0] sm:$0x8]  ;;  %7066 = vmatpush.bf16.msra.mxu2 %v8515_v22  ;;  %v10516_v3 = vpop.f32.mrf.mxu0 }
 0x1d1   : > { %6255 = vrot.lane.b32.xlu2 %v6237_v6, %s8575_s22  ;;  %v860_v21 = vshrl.u32 %v562_v56, 16  ;;  %v3200_v13 = vpack.c.b16 %v3184_v7, %v3183_v49  ;;  %v5267_v16 = vsel %vm8744_vm11, %v8048_v57, %v5266_v10  ;;  %v13053_v33 = vshrl.u32 %v9871_v36, 16  ;;  %v10502_v56 = vpop.permute.xlu1 %2953  ;;  %v8514_v10 = vld [vmem:[%s12768_s3 + $0x70] sm:$0xff] }
 0x1d2   : > { %v4982_v44 = vor.u32 %v4981_v4, %v4980_v1  ;;  %v6287_v45 = vunpack.c.l.b16 %v5267_v16  ;;  %v4987_v51 = vor.u32 %v4986_v12, %v4984_v43  ;;  %v13054_v23 = vshrl.u32 %v9875_v61, 16 }
 0x1d3   : > { %v867_v6 = vrot.slane %v13053_v33, 7  ;;  %v7763_v20 = vrot.slane %v860_v21, 11  ;;  %3231 = vrot.lane.b32.xlu1 %v3200_v13, %s8575_s22  ;;  %v4925_v57 = vld [vmem:[#allocation3 + $0x4c] sm:$0x1]  ;;  %v13055_v33 = vshll.u32 %v9871_v36, 16  ;;  %v13056_v22 = vshll.u32 %v9875_v61, 16 }
 0x1d4   : > { %v876_v9 = vrot.slane %v13054_v23, 7  ;;  %v4983_v49 = vrot.slane %v4982_v44, 4  ;;  %v3471_v23 = vsel %vm3447_vm8, %v3438_v60, %v10390_v27  ;;  %v6317_v4 = vpack.c.b16 %v6288_v62, %v6287_v45  ;;  %7067 = vmatpush.bf16.msra.mxu2 %v8514_v10  ;;  %v10537_v10 = vld [vmem:[#allocation3 + $0x54] sm:$0xf] }
 0x1d5   : > { %v870_v1 = vor.u32 %v13055_v33, %v867_v6  ;;  %v872_v7 = vrot.slane %v867_v6, 4  ;;  %v4988_v12 = vrot.slane %v4987_v51, 4  ;;  %v4990_v21 = vshll.u32 %v4925_v57, 16  ;;  %13059 = vst [vmem:[#allocation10_spill] sm:$0xff] %v10537_v10 }
 0x1d6   : > { %v879_v16 = vor.u32 %v13056_v22, %v876_v9  ;;  %v4985_v13 = vsel %vm8710_vm10, %v4983_v49, %v4984_v43  ;;  %v3609_v36 = vadd.f32 %v10256_v37, %v10413_v48  ;;  %v838_v6 = vshrl.u32 %v559_v28, 16  ;;  %6335 = vrot.lane.b32.xlu0 %v6317_v4, %s8577_s13  ;;  %v8486_v4 = vld [vmem:[#allocation3 + $0x44] sm:$0xff] }
 0x1d7   : > { %v871_v44 = vsel %vm8744_vm11, %v7763_v20, %v870_v1  ;;  %v4992_v27 = vrot.slane %v4990_v21, 5  ;;  %v6209_v51 = vunpack.c.l.b16 %v4985_v13  ;;  %v13057_v43 = vshrl.u32 %v9777_v59, 16  ;;  %v3722_v20 = vld [vmem:[#allocation3 + $0x50] sm:$0x8] }
 0x1d8   : > { %v880_v61 = vsel %vm8744_vm11, %v872_v7, %v879_v16  ;;  %v2475_v9 = vunpack.c.l.b16 %v871_v44  ;;  %v3673_v62 = vmax.f32 %v3609_v36, 0.0  ;;  %v7762_v45 = vrot.slane %v838_v6, 11  ;;  %v10544_v44 = vld [vmem:[#allocation3 + $0x54] sm:$0xf] }
 0x1d9   : > { %v2476_v60 = vunpack.c.l.b16 %v880_v61  ;;  %v845_v57 = vrot.slane %v13057_v43, 7  ;;  %v4993_v48 = vsel %vm8710_vm10, %v4988_v12, %v4992_v27  ;;  %v13058_v28 = vshrl.u32 %v9784_v40, 16  ;;  %v10542_v12 = vpop.permute.xlu2 %2875  ;;  %v10550_v27 = vld [vmem:[#allocation3 + $0x58] sm:$0xf] }
 0x1da   : > { %v3504_v33 = vsel %vm3480_vm9, %v3471_v23, %v10325_v2  ;;  %v3611_v1 = vadd.f32 %v10256_v37, %v10471_v46  ;;  %v6210_v7 = vunpack.c.l.b16 %v4993_v48  ;;  %v3827_v22 = vpack.c.bf16 %v3673_v62, %v3673_v62  ;;  %13062 = vst [vmem:[#allocation11_spill] sm:$0xff] %v10550_v27 }
 0x1db   : > { %v854_v49 = vrot.slane %v13058_v28, 7  ;;  %v2494_v21 = vpack.c.b16 %v2476_v60, %v2475_v9  ;;  %v13060_v16 = vshll.u32 %v9777_v59, 16  ;;  %8009 = vmatmul.msk.bf16.gmra.mxu1 %vm13038_vm4, %v3504_v33  ;;  %v850_v36 = vrot.slane %v845_v57, 4  ;;  %6447 = vrot.lane.b32.xlu1 %v8486_v4, %s8576_s12  ;;  %v3778_v60 = vld [vmem:[#allocation3 + $0x5c] sm:$0x1]  ;;  %v8513_v33 = vld [vmem:[%s12768_s3 + $0x68] sm:$0xff] }
 0x1dc   : > { %v13061_v2 = vshll.u32 %v9784_v40, 16  ;;  %v3674_v46 = vmax.f32 %v3611_v1, 0.0  ;;  %v3723_v6 = vsel %vm10154_vm3, 0, %v3722_v20  ;;  %v6238_v61 = vpack.c.b16 %v6210_v7, %v6209_v51  ;;  %3860 = vst.msk [vmem:[#allocation3 + $0x64] sm:$0xf] %vm3695_vm2, %v3827_v22  ;;  %v2684_v20 = vpop.permute.xlu0 %2683  ;;  %7068 = vmatpush.bf16.msra.mxu2 %v8513_v33 }
 0x1dd   : > { %v848_v13 = vor.u32 %v13060_v16, %v845_v57  ;;  %v12839_v9 = vshrl.u32 %v10537_v10, 16  ;;  %3724 = vst [vmem:[#allocation3 + $0x50] sm:$0x8] %v3723_v6  ;;  %v10559_v57 = vpop.permute.xlu1 %3225  ;;  %v3275_v51 = vsel %vm3233_vm12, %v2494_v21, %v10486_v32  ;;  %v12840_v28 = vshrl.u32 %v10550_v27, 16  ;;  %v3615_v21 = vpop.f32.mrf.mxu0 }
 0x1de   : > { %v857_v23 = vor.u32 %v13061_v2, %v854_v49  ;;  %v3828_v43 = vpack.c.bf16 %v3674_v46, %v3674_v46  ;;  %6257 = vrot.lane.b32.xlu2 %v6238_v61, %s8575_s22  ;;  %v10567_v49 = vld [vmem:[#allocation3 + $0x58] sm:$0xf]  ;;  %v12845_v1 = vshll.u32 %v10537_v10, 16  ;;  %v3779_v7 = vsel %vm10092_vm1, 0, %v3778_v60  ;;  %v8512_v2 = vld [vmem:[%s12768_s3 + $0x60] sm:$0xff] }
 0x1df   : > { %v849_v59 = vsel %vm8744_vm11, %v7762_v45, %v848_v13  ;;  %v5285_v45 = vrot.slane %v12839_v9, 7  ;;  %v12862_v32 = vshrl.u32 %v10544_v44, 16  ;;  %v12851_v4 = vshll.u32 %v10544_v44, 16  ;;  %3780 = vst [vmem:[#allocation3 + $0x5c] sm:$0x1] %v3779_v7  ;;  %v8487_v60 = vld [vmem:[#allocation3 + $0x54] sm:$0xff] }
 0x1e0   : > { %v858_v40 = vsel %vm8744_vm11, %v850_v36, %v857_v23  ;;  %v2473_v62 = vunpack.c.l.b16 %v849_v59  ;;  %3861 = vst.msk [vmem:[#allocation3 + $0x68] sm:$0xf] %vm3695_vm2, %v3828_v43  ;;  %v5294_v13 = vrot.slane %v12840_v28, 7  ;;  %v12841_v36 = vshll.u32 %v10550_v27, 16  ;;  %7069 = vmatpush.bf16.msra.mxu2 %v8512_v2  ;;  %v3725_v2 = vld [vmem:[#allocation3 + $0x60] sm:$0x8] }
 0x1e1   : > { %v2474_v48 = vunpack.c.l.b16 %v858_v40  ;;  %v5290_v16 = vrot.slane %v5285_v45, 4  ;;  %v12853_v23 = vshrl.u32 %v10567_v49, 16  ;;  %v12850_v46 = vshll.u32 %v10567_v49, 16 }
 0x1e2   : > { %v4994_v6 = vrot.slane %v12862_v32, 4  ;;  %v4995_v61 = vrot.slane %v12851_v4, 5  ;;  %v5297_v40 = vor.u32 %v12841_v36, %v5294_v13  ;;  %v3310_v43 = vsel %vm3282_vm13, %v3275_v51, %v2684_v20  ;;  %v10608_v20 = vpop.permute.xlu2 %3147  ;;  %v8511_v13 = vld [vmem:[%s12768_s3 + $0x58] sm:$0xff] }
 0x1e3   : > { %v2493_v22 = vpack.c.b16 %v2474_v48, %v2473_v62  ;;  %v3614_v62 = vadd.f32 %v10256_v37, %v10516_v3  ;;  %v4998_v7 = vrot.slane %v12850_v46, 5  ;;  %v5000_v9 = vrot.slane %v12853_v23, 4  ;;  %6449 = vrot.lane.b32.xlu1 %v8487_v60, %s8576_s12 }
 0x1e4   : > { %v4996_v33 = vor.u32 %v4995_v61, %v4994_v6  ;;  %v5298_v3 = vsel %vm8744_vm11, %v5290_v16, %v5297_v40  ;;  %7070 = vmatpush.bf16.msra.mxu2 %v8511_v13  ;;  %v3726_v13 = vsel %vm10154_vm3, 0, %v3725_v2 }
 0x1e5   : > { %v3272_v59 = vsel %vm3233_vm12, %v2493_v22, %v10396_v58  ;;  %v5172_v22 = vld [vmem:[#allocation3 + $0x50] sm:$0x8]  ;;  %v3675_v51 = vmax.f32 %v3614_v62, 0.0  ;;  %v2764_v60 = vpop.permute.xlu1 %2763  ;;  %v5001_v16 = vor.u32 %v5000_v9, %v4998_v7  ;;  %v6290_v36 = vunpack.c.l.b16 %v5298_v3  ;;  %v2956_v9 = vpop.permute.xlu0 %2955  ;;  %3727 = vst [vmem:[#allocation3 + $0x60] sm:$0x8] %v3726_v13 }
 0x1e6   : > { %v3308_v48 = vsel %vm3282_vm13, %v3272_v59, %v10446_v50  ;;  %v3616_v50 = vadd.f32 %v10256_v37, %v3615_v21  ;;  %v5278_v61 = vshrl.u32 %v5172_v22, 16  ;;  %v4997_v59 = vrot.slane %v4996_v33, 4  ;;  %v10626_v22 = vld [vmem:[#allocation3 + $0x64] sm:$0xf] }
 0x1e7   : > { %v3341_v58 = vsel %vm3315_vm14, %v3308_v48, %v10369_v8  ;;  %v5288_v8 = vor.u32 %v12845_v1, %v5285_v45  ;;  %v3829_v62 = vpack.c.bf16 %v3675_v51, %v3675_v51  ;;  %v8510_v48 = vld [vmem:[%s12768_s3 + $0x50] sm:$0xff]  ;;  %v8488_v45 = vld [vmem:[#allocation3 + $0x64] sm:$0xff]  ;;  %v3343_v33 = vsel %vm3315_vm14, %v3310_v43, %v2764_v60  ;;  %13063 = vst [vmem:[#allocation12_spill] sm:$0xff] %v10626_v22 }
 0x1e8   : > { %v3374_v6 = vsel %vm3348_vm15, %v3341_v58, %v10448_v17  ;;  %v3676_v21 = vmax.f32 %v3616_v50, 0.0  ;;  %v8049_v28 = vrot.slane %v5278_v61, 11  ;;  %v4926_v17 = vld [vmem:[#allocation3 + $0x5c] sm:$0x1]  ;;  %v4999_v51 = vsel %vm8710_vm10, %v4997_v59, %v4998_v7  ;;  %v10633_v3 = vld [vmem:[#allocation3 + $0x68] sm:$0xf]  ;;  %7071 = vmatpush.bf16.msra.mxu2 %v8510_v48 }
 0x1e9   : > { %v3407_v40 = vsel %vm13041_vm0, %v3374_v6, %v10502_v56  ;;  %v3618_v56 = vpop.f32.mrf.mxu0  ;;  %v5002_v50 = vrot.slane %v5001_v16, 4  ;;  %v5004_v6 = vshll.u32 %v4926_v17, 16  ;;  %3862 = vst.msk [vmem:[#allocation3 + $0x74] sm:$0xf] %vm3695_vm2, %v3829_v62  ;;  %v3376_v7 = vsel %vm3348_vm15, %v3343_v33, %v10542_v12  ;;  %v3781_v59 = vld [vmem:[#allocation3 + $0x6c] sm:$0x1] }
 0x1ea   : > { %v3440_v58 = vsel %vm3414_vm5, %v3407_v40, %v10432_v18  ;;  %13064 = vst [vmem:[#allocation13_spill] sm:$0xff] %v10633_v3  ;;  %v5289_v18 = vsel %vm8744_vm11, %v8049_v28, %v5288_v8  ;;  %v3830_v60 = vpack.c.bf16 %v3676_v21, %v3676_v21  ;;  %v10641_v16 = vld [vmem:[#allocation3 + $0x64] sm:$0xf]  ;;  %v6211_v62 = vunpack.c.l.b16 %v4999_v51  ;;  %v10650_v12 = vld [vmem:[#allocation3 + $0x68] sm:$0xf] }
 0x1eb   : > { %v3473_v61 = vsel %vm3447_vm8, %v3440_v58, %v10504_v35  ;;  %v6289_v40 = vunpack.c.l.b16 %v5289_v18  ;;  %v5006_v35 = vrot.slane %v5004_v6, 5  ;;  %v3409_v28 = vsel %vm13066_vm7, %v3376_v7, %v2956_v9  ;;  %6451 = vrot.lane.b32.xlu1 %v8488_v45, %s8576_s12  ;;  %v8509_v33 = vld [vmem:[%s12768_s3 + $0x48] sm:$0xff]  ;;  %v10667_v6 = vpop.permute.xlu2 %2685 }
 0x1ec   : > { %v3506_v43 = vsel %vm3480_vm9, %v3473_v61, %v10559_v57  ;;  %3863 = vst.msk [vmem:[#allocation3 + $0x78] sm:$0xf] %vm3695_vm2, %v3830_v60  ;;  %v12842_v57 = vshrl.u32 %v10626_v22, 16  ;;  %v12843_v8 = vshrl.u32 %v10633_v3, 16  ;;  %v3782_v2 = vsel %vm10092_vm1, 0, %v3781_v59  ;;  %7072 = vmatpush.bf16.msra.mxu2 %v8509_v33 }
 0x1ed   : > { %8010 = vmatmul.msk.bf16.gmra.mxu1 %vm13065_vm6, %v3506_v43  ;;  %v6318_v21 = vpack.c.b16 %v6290_v36, %v6289_v40  ;;  %v5007_v17 = vsel %vm8710_vm10, %v5002_v50, %v5006_v35  ;;  %v12849_v58 = vshrl.u32 %v10641_v16, 16  ;;  %v12844_v45 = vshll.u32 %v10633_v3, 16  ;;  %3783 = vst [vmem:[#allocation3 + $0x6c] sm:$0x1] %v3782_v2  ;;  %v3036_v50 = vpop.permute.xlu1 %3035  ;;  %v565_v60 = vld [vmem:[#allocation2 + $0xe0] sm:$0x8] }
 0x1ee   : > { %v6212_v9 = vunpack.c.l.b16 %v5007_v17  ;;  %v5307_v36 = vrot.slane %v12842_v57, 7  ;;  %v5316_v51 = vrot.slane %v12843_v8, 7  ;;  %v12847_v48 = vshll.u32 %v10641_v16, 16  ;;  %v3228_v57 = vpop.permute.xlu0 %3227 }
 0x1ef   : > { %6337 = vrot.lane.b32.xlu0 %v6318_v21, %s8577_s13  ;;  %v12848_v61 = vshrl.u32 %v10650_v12, 16  ;;  %v12846_v18 = vshll.u32 %v10650_v12, 16  ;;  %v5008_v43 = vrot.slane %v12849_v58, 4  ;;  %v12852_v59 = vshll.u32 %v10626_v22, 16 }
 0x1f0   : > { %v6239_v7 = vpack.c.b16 %v6212_v9, %v6211_v62  ;;  %v5312_v40 = vrot.slane %v5307_v36, 4  ;;  %v5319_v35 = vor.u32 %v12844_v45, %v5316_v51  ;;  %v5009_v13 = vrot.slane %v12847_v48, 5  ;;  %v8508_v62 = vld [vmem:[%s12768_s3 + $0x40] sm:$0xff]  ;;  %v10704_v23 = vld [vmem:[#allocation3 + $0x74] sm:$0xf] }
 0x1f1   : > { %v5012_v21 = vrot.slane %v12846_v18, 5  ;;  %v5014_v17 = vrot.slane %v12848_v61, 4  ;;  %v3442_v2 = vsel %vm3414_vm5, %v3409_v28, %v3036_v50  ;;  %v3619_v51 = vadd.f32 %v10256_v37, %v3618_v56  ;;  %v3620_v1 = vpop.f32.mrf.mxu0  ;;  %v5175_v48 = vld [vmem:[#allocation3 + $0x60] sm:$0x8]  ;;  %7073 = vmatpush.bf16.msra.mxu2 %v8508_v62  ;;  %13070 = vst [vmem:[#allocation14_spill] sm:$0xff] %v10704_v23 }
 0x1f2   : > { %6259 = vrot.lane.b32.xlu2 %v6239_v7, %s8575_s22  ;;  %v5320_v9 = vsel %vm8744_vm11, %v5312_v40, %v5319_v35  ;;  %v3475_v8 = vsel %vm3447_vm8, %v3442_v2, %v10608_v20  ;;  %v882_v45 = vshrl.u32 %v565_v60, 16  ;;  %v5310_v28 = vor.u32 %v12852_v59, %v5307_v36  ;;  %v3784_v62 = vld [vmem:[#allocation3 + $0x7c] sm:$0x1] }
 0x1f3   : > { %v5010_v33 = vor.u32 %v5009_v13, %v5008_v43  ;;  %v5015_v50 = vor.u32 %v5014_v17, %v5012_v21  ;;  %v8489_v18 = vld [vmem:[#allocation3 + $0x74] sm:$0xff]  ;;  %v6292_v61 = vunpack.c.l.b16 %v5320_v9  ;;  %v3677_v7 = vmax.f32 %v3619_v51, 0.0  ;;  %v3728_v43 = vld [vmem:[#allocation3 + $0x70] sm:$0x8] }
 0x1f4   : > { %v13067_v58 = vshrl.u32 %v9980_v26, 16  ;;  %v13068_v56 = vshrl.u32 %v9984_v0, 16  ;;  %v5300_v46 = vshrl.u32 %v5175_v48, 16  ;;  %v4927_v4 = vld [vmem:[#allocation3 + $0x6c] sm:$0x1]  ;;  %v3508_v20 = vsel %vm3480_vm9, %v3475_v8, %v3228_v57  ;;  %6453 = vrot.lane.b32.xlu1 %v8489_v18, %s8576_s12 }
 0x1f5   : > { %v7764_v60 = vrot.slane %v882_v45, 11  ;;  %v3621_v36 = vadd.f32 %v10256_v37, %v3620_v1  ;;  %v5011_v13 = vrot.slane %v5010_v33, 4  ;;  %v5016_v17 = vrot.slane %v5015_v50, 4  ;;  %v10722_v50 = vld [vmem:[#allocation3 + $0x74] sm:$0xf] }
 0x1f6   : > { %v889_v40 = vrot.slane %v13067_v58, 7  ;;  %v898_v35 = vrot.slane %v13068_v56, 7  ;;  %v5018_v2 = vshll.u32 %v4927_v4, 16  ;;  %v3831_v9 = vpack.c.bf16 %v3677_v7, %v3677_v7 }
 0x1f7   : > { %v8050_v51 = vrot.slane %v5300_v46, 11  ;;  %v13069_v58 = vshll.u32 %v9980_v26, 16  ;;  %v3678_v48 = vmax.f32 %v3621_v36, 0.0  ;;  %v5013_v57 = vsel %vm8710_vm10, %v5011_v13, %v5012_v21  ;;  %v10713_v46 = vld [vmem:[#allocation3 + $0x78] sm:$0xf]  ;;  %v10715_v26 = vpop.permute.xlu2 %2957 }
 0x1f8   : > { %v894_v56 = vrot.slane %v889_v40, 4  ;;  %v5020_v8 = vrot.slane %v5018_v2, 5  ;;  %3864 = vst.msk [vmem:[#allocation3 + $0x84] sm:$0xf] %vm3695_vm2, %v3831_v9  ;;  %v13071_v37 = vshll.u32 %v9984_v0, 16  ;;  %v3729_v4 = vsel %vm10154_vm3, 0, %v3728_v43 }
 0x1f9   : > { %v892_v59 = vor.u32 %v13069_v58, %v889_v40  ;;  %13072 = vst [vmem:[#allocation15_spill] sm:$0xff] %v10713_v46  ;;  %v5311_v45 = vsel %vm8744_vm11, %v8050_v51, %v5310_v28  ;;  %v3832_v18 = vpack.c.bf16 %v3678_v48, %v3678_v48  ;;  %v12854_v0 = vshrl.u32 %v10704_v23, 16  ;;  %v10735_v2 = vld [vmem:[#allocation3 + $0x78] sm:$0xf] }
 0x1fa   : > { %v901_v1 = vor.u32 %v13071_v37, %v898_v35  ;;  %3730 = vst [vmem:[#allocation3 + $0x70] sm:$0x8] %v3729_v4  ;;  %v6291_v21 = vunpack.c.l.b16 %v5311_v45  ;;  %v5021_v33 = vsel %vm8710_vm10, %v5016_v17, %v5020_v8  ;;  %v6213_v7 = vunpack.c.l.b16 %v5013_v57 }
 0x1fb   : > { %v6214_v40 = vunpack.c.l.b16 %v5021_v33  ;;  %v893_v35 = vsel %vm8744_vm11, %v7764_v60, %v892_v59  ;;  %3865 = vst.msk [vmem:[#allocation3 + $0x88] sm:$0xf] %vm3695_vm2, %v3832_v18  ;;  %v12856_v28 = vshrl.u32 %v10713_v46, 16  ;;  %v5329_v13 = vrot.slane %v12854_v0, 7 }
 0x1fc   : > { %v6319_v36 = vpack.c.b16 %v6292_v61, %v6291_v21  ;;  %v902_v43 = vsel %vm8744_vm11, %v894_v56, %v901_v1  ;;  %v3785_v17 = vsel %vm10092_vm1, 0, %v3784_v62  ;;  %v12857_v60 = vshll.u32 %v10713_v46, 16 }
 0x1fd   : > { %8011 = vmatmul.msk.bf16.gmra.mxu1 %vm13038_vm4, %v3508_v20  ;;  %v6240_v20 = vpack.c.b16 %v6214_v40, %v6213_v7  ;;  %v5338_v59 = vrot.slane %v12856_v28, 7  ;;  %3786 = vst [vmem:[#allocation3 + $0x7c] sm:$0x1] %v3785_v17  ;;  %v12860_v61 = vshrl.u32 %v10722_v50, 16  ;;  %v2477_v9 = vunpack.c.l.b16 %v893_v35  ;;  %v3623_v40 = vpop.f32.mrf.mxu0  ;;  %v10761_v35 = vpop.permute.xlu1 %2605 }
 0x1fe   : > { %6339 = vrot.lane.b32.xlu0 %v6319_v36, %s8577_s13  ;;  %v12855_v51 = vshll.u32 %v10704_v23, 16  ;;  %v12858_v58 = vshll.u32 %v10722_v50, 16  ;;  %v5334_v56 = vrot.slane %v5329_v13, 4  ;;  %v12861_v57 = vshrl.u32 %v10735_v2, 16  ;;  %v10763_v36 = vpop.permute.xlu0 %2765 }
 0x1ff   : > { %6261 = vrot.lane.b32.xlu2 %v6240_v20, %s8575_s22  ;;  %v5341_v48 = vor.u32 %v12857_v60, %v5338_v59  ;;  %v12859_v8 = vshll.u32 %v10735_v2, 16  ;;  %v2478_v37 = vunpack.c.l.b16 %v902_v43  ;;  %v5022_v45 = vrot.slane %v12860_v61, 4  ;;  %v3731_v59 = vld [vmem:[#allocation3 + $0x80] sm:$0x8] }
 0x200   : > { %v5332_v4 = vor.u32 %v12855_v51, %v5329_v13  ;;  %v5023_v18 = vrot.slane %v12858_v58, 5  ;;  %v5028_v7 = vrot.slane %v12861_v57, 4  ;;  %v10768_v13 = vld [vmem:[%s12767_s2] ss:$0 sm:$0xff]  ;;  %vm6571_vm0 = vcmask 523264  }
 0x201   : > { %v5178_v1 = vld [vmem:[#allocation3 + $0x70] sm:$0x8]  ;;  %v5342_v21 = vsel %vm8744_vm11, %v5334_v56, %v5341_v48  ;;  %v5026_v33 = vrot.slane %v12859_v8, 5  ;;  %v3624_v17 = vadd.f32 %v10768_v13, %v3623_v40  ;;  %v10771_v56 = vld [vmem:[#allocation3 + $0x84] sm:$0xf]  ;;  %v10773_v48 = vpop.permute.xlu2 %3229  ;;  %v3732_v51 = vsel %vm10154_vm3, 0, %v3731_v59 }
 0x202   : > { %v5322_v62 = vshrl.u32 %v5178_v1, 16  ;;  %v5024_v43 = vor.u32 %v5023_v18, %v5022_v45  ;;  %v8490_v20 = vld [vmem:[#allocation3 + $0x84] sm:$0xff]  ;;  %13073 = vst [vmem:[#allocation16_spill] sm:$0xff] %v10771_v56  ;;  %v12864_v18 = vshrl.u32 %v10771_v56, 16  ;;  %v10780_v28 = vpack.c.b16 %v2478_v37, %v2477_v9  ;;  %v3787_v57 = vld [vmem:[#allocation3 + $0x8c] sm:$0x1] }
 0x203   : > { %v5029_v0 = vor.u32 %v5028_v7, %v5026_v33  ;;  %v10777_v45 = vld [vmem:[#allocation3 + $0x88] sm:$0xf]  ;;  %v6294_v60 = vunpack.c.l.b16 %v5342_v21  ;;  %vm6604_vm6 = vcmask 785408   ;;  %v3679_v8 = vmax.f32 %v3624_v17, 0.0  ;;  %6455 = vrot.lane.b32.xlu1 %v8490_v20, %s8576_s12  ;;  %3733 = vst [vmem:[#allocation3 + $0x80] sm:$0x8] %v3732_v51 }
 0x204   : > { %v8051_v1 = vrot.slane %v5322_v62, 11  ;;  %13074 = vst [vmem:[#allocation17_spill] sm:$0xff] %v10777_v45  ;;  %v4928_v40 = vld [vmem:[#allocation3 + $0x7c] sm:$0x1]  ;;  %v5025_v58 = vrot.slane %v5024_v43, 4  ;;  %v5351_v59 = vrot.slane %v12864_v18, 7 }
 0x205   : > { %v5030_v7 = vrot.slane %v5029_v0, 4  ;;  %v5032_v61 = vshll.u32 %v4928_v40, 16  ;;  %v3833_v37 = vpack.c.bf16 %v3679_v8, %v3679_v8  ;;  %v12863_v21 = vshll.u32 %v10771_v56, 16  ;;  %v10790_v43 = vld [vmem:[#allocation3 + $0x84] sm:$0xf]  ;;  %v8468_v18 = vld [vmem:[#allocation3 + $0x14] sm:$0xff] }
 0x206   : > { %v5333_v62 = vsel %vm8744_vm11, %v8051_v1, %v5332_v4  ;;  %v5027_v9 = vsel %vm8710_vm10, %v5025_v58, %v5026_v33  ;;  %v5356_v20 = vrot.slane %v5351_v59, 4  ;;  %v12865_v4 = vshrl.u32 %v10777_v45, 16  ;;  %v10793_v0 = vld [vmem:[#allocation3 + $0x88] sm:$0xf]  ;;  %v3710_v33 = vld [vmem:[#allocation3 + $0x10] sm:$0x8] }
 0x207   : > { %v6293_v32 = vunpack.c.l.b16 %v5333_v62  ;;  %v5034_v17 = vrot.slane %v5032_v61, 5  ;;  %v6215_v51 = vunpack.c.l.b16 %v5027_v9  ;;  %3866 = vst.msk [vmem:[#allocation3 + $0x94] sm:$0xf] %vm3695_vm2, %v3833_v37  ;;  %v5354_v40 = vor.u32 %v12863_v21, %v5351_v59  ;;  %v3625_v62 = vpop.f32.mrf.mxu0 }
 0x208   : > { %v12874_v58 = vshll.u32 %v10777_v45, 16  ;;  %v3788_v8 = vsel %vm10092_vm1, 0, %v3787_v57  ;;  %v5360_v9 = vrot.slane %v12865_v4, 7  ;;  %v3626_v37 = vadd.f32 %v10768_v13, %v3625_v62  ;;  %v6444_v62 = vpop.permute.xlu0 %6443 }
 0x209   : > { %v6320_v1 = vpack.c.b16 %v6294_v60, %v6293_v32  ;;  %v5035_v61 = vsel %vm8710_vm10, %v5030_v7, %v5034_v17  ;;  %3789 = vst [vmem:[#allocation3 + $0x8c] sm:$0x1] %v3788_v8  ;;  %v12875_v32 = vshrl.u32 %v10790_v43, 16  ;;  %v12876_v60 = vshll.u32 %v10790_v43, 16  ;;  %v6332_v45 = vpop.permute.xlu2 %6331 }
 0x20a   : > { %v6216_v59 = vunpack.c.l.b16 %v5035_v61  ;;  %v12883_v21 = vshll.u32 %v10793_v0, 16  ;;  %v5181_v7 = vld [vmem:[#allocation3 + $0x80] sm:$0x8]  ;;  %v5363_v17 = vor.u32 %v12874_v58, %v5360_v9  ;;  %v6252_v61 = vpop.permute.xlu1 %6251  ;;  %v3680_v57 = vmax.f32 %v3626_v37, 0.0 }
 0x20b   : > { %6341 = vrot.lane.b32.xlu0 %v6320_v1, %s8577_s13  ;;  %v5036_v8 = vrot.slane %v12875_v32, 4  ;;  %v5037_v4 = vrot.slane %v12876_v60, 5  ;;  %v3711_v1 = vsel %vm10154_vm3, 0, %v3710_v33  ;;  %v5344_v23 = vshrl.u32 %v5181_v7, 16 }
 0x20c   : > { %v6241_v56 = vpack.c.b16 %v6216_v59, %v6215_v51  ;;  %v5040_v46 = vrot.slane %v12883_v21, 5  ;;  %3712 = vst [vmem:[#allocation3 + $0x10] sm:$0x8] %v3711_v1  ;;  %v6655_v9 = vsel %vm3480_vm9, %v8468_v18, %v6252_v61  ;;  %v5364_v58 = vsel %vm8744_vm11, %v5356_v20, %v5363_v17 }
 0x20d   : > { %v5038_v32 = vor.u32 %v5037_v4, %v5036_v8  ;;  %v13075_v60 = vshrl.u32 %v10793_v0, 16  ;;  %v6702_v51 = vsel %vm6571_vm0, %v6655_v9, %v6332_v45  ;;  %v3834_v33 = vpack.c.bf16 %v3680_v57, %v3680_v57 }
 0x20e   : > { %6263 = vrot.lane.b32.xlu2 %v6241_v56, %s8575_s22  ;;  %v8052_v59 = vrot.slane %v5344_v23, 11  ;;  %v3278_v37 = vsel %vm3233_vm12, %v10780_v28, %v10761_v35  ;;  %v6734_v7 = vsel %vm6604_vm6, %v6702_v51, %v6444_v62  ;;  %v6296_v18 = vunpack.c.l.b16 %v5364_v58 }
 0x20f   : > { %v5042_v22 = vrot.slane %v13075_v60, 4  ;;  %7074 = vmatmul.bf16.vlgmr.msra.gmra.mxu2 %v6734_v7  ;;  %3867 = vst.msk [vmem:[#allocation3 + $0x98] sm:$0xf] %vm3695_vm2, %v3834_v33  ;;  %v5039_v60 = vrot.slane %v5038_v32, 4  ;;  %v3312_v23 = vsel %vm3282_vm13, %v3278_v37, %v10667_v6  ;;  %v568_v32 = vld [vmem:[#allocation2 + $0xf0] sm:$0x8] }
 0x210   : > { %v5355_v20 = vsel %vm8744_vm11, %v8052_v59, %v5354_v40  ;;  %v4929_v4 = vld [vmem:[#allocation3 + $0x8c] sm:$0x1]  ;;  %v3345_v58 = vsel %vm3315_vm14, %v3312_v23, %v10763_v36  ;;  %v904_v51 = vshrl.u32 %v568_v32, 16  ;;  %v13076_v33 = vshrl.u32 %v10207_v5, 16  ;;  %v3734_v36 = vld [vmem:[#allocation3 + $0x90] sm:$0x8] }
 0x211   : > { %v5043_v1 = vor.u32 %v5042_v22, %v5040_v46  ;;  %v6295_v56 = vunpack.c.l.b16 %v5355_v20  ;;  %v5046_v57 = vshll.u32 %v4929_v4, 16  ;;  %v5041_v28 = vsel %vm8710_vm10, %v5039_v60, %v5040_v46  ;;  %v8517_v7 = vld [vmem:[%s12768_s3 + $0x88] sm:$0xff]  ;;  %v3790_v32 = vld [vmem:[#allocation3 + $0x9c] sm:$0x1] }
 0x212   : > { %v2878_v22 = vpop.permute.xlu1 %2877  ;;  %v6217_v61 = vunpack.c.l.b16 %v5041_v28  ;;  %v10849_v59 = vrot.slane %v13076_v33, 7  ;;  %v10860_v60 = vrot.slane %v904_v51, 11  ;;  %8531 = vmatpush.bf16.msra.mxu3 %v8517_v7  ;;  %7161 = vmatpush.bf16.msrb.mxu2 %v8517_v7 }
 0x213   : > { %v5044_v45 = vrot.slane %v5043_v1, 4  ;;  %v6321_v17 = vpack.c.b16 %v6296_v18, %v6295_v56  ;;  %v5048_v35 = vrot.slane %v5046_v57, 5  ;;  %v3378_v8 = vsel %vm3348_vm15, %v3345_v58, %v2878_v22  ;;  %v3038_v6 = vpop.permute.xlu0 %3037 }
 0x214   : > { %v3411_v46 = vsel %vm13066_vm7, %v3378_v8, %v10715_v26  ;;  %v3735_v18 = vsel %vm10154_vm3, 0, %v3734_v36  ;;  %v13077_v1 = vshrl.u32 %v10210_v29, 16  ;;  %v5185_v26 = vld [vmem:[#allocation3 + $0x94] sm:$0xf]  ;;  %v916_v7 = vrot.slane %v10849_v59, 4 }
 0x215   : > { %6343 = vrot.lane.b32.xlu0 %v6321_v17, %s8577_s13  ;;  %v5049_v40 = vsel %vm8710_vm10, %v5044_v45, %v5048_v35  ;;  %3736 = vst [vmem:[#allocation3 + $0x90] sm:$0x8] %v3735_v18  ;;  %v3444_v4 = vsel %vm3414_vm5, %v3411_v46, %v3038_v6  ;;  %v8516_v45 = vld [vmem:[%s12768_s3 + $0x80] sm:$0xff]  ;;  %v5371_v23 = vshrl.u32 %v5185_v26, 16  ;;  %v5374_v17 = vshll.u32 %v5185_v26, 16 }
 0x216   : > { %v6218_v62 = vunpack.c.l.b16 %v5049_v40  ;;  %v8491_v37 = vld [vmem:[#allocation3 + $0x94] sm:$0xff]  ;;  %v920_v20 = vrot.slane %v13077_v1, 7  ;;  %v13078_v35 = vshll.u32 %v10207_v5, 16  ;;  %v3791_v6 = vsel %vm10092_vm1, 0, %v3790_v32  ;;  %8532 = vmatpush.bf16.msra.mxu3 %v8516_v45  ;;  %7162 = vmatpush.bf16.msrb.mxu2 %v8516_v45 }
 0x217   : > { %6457 = vrot.lane.b32.xlu1 %v8491_v37, %s8576_s12  ;;  %v5186_v57 = vld [vmem:[#allocation3 + $0x98] sm:$0xf]  ;;  %v10872_v8 = vld [vmem:[#allocation3 + $0x94] sm:$0xf]  ;;  %3792 = vst [vmem:[#allocation3 + $0x9c] sm:$0x1] %v3791_v6 }
 0x218   : > { %v6242_v9 = vpack.c.b16 %v6218_v62, %v6217_v61  ;;  %v10870_v22 = vor.u32 %v13078_v35, %v10849_v59  ;;  %v5380_v58 = vshrl.u32 %v5186_v57, 16  ;;  %v5383_v40 = vshll.u32 %v5186_v57, 16  ;;  %v10878_v51 = vld [vmem:[#allocation3 + $0x98] sm:$0xf] }
 0x219   : > { %v5373_v62 = vrot.slane %v5371_v23, 7  ;;  %v5678_v33 = vrot.slane %v5374_v17, 5  ;;  %v12882_v1 = vshrl.u32 %v10872_v8, 16  ;;  %v12880_v57 = vshll.u32 %v10872_v8, 16 }
 0x21a   : > { %6265 = vrot.lane.b32.xlu2 %v6242_v9, %s8575_s22  ;;  %v3150_v56 = vpop.permute.xlu1 %3149  ;;  %v5677_v9 = vrot.slane %v5371_v23, 4  ;;  %v5382_v46 = vrot.slane %v5380_v58, 7  ;;  %v5681_v36 = vrot.slane %v5383_v40, 5  ;;  %v5683_v37 = vrot.slane %v5380_v58, 4 }
 0x21b   : > { %v3477_v28 = vsel %vm3447_vm8, %v3444_v4, %v3150_v56  ;;  %v12881_v59 = vshrl.u32 %v10878_v51, 16  ;;  %v5050_v45 = vrot.slane %v12882_v1, 4  ;;  %v6446_v1 = vpop.permute.xlu2 %6445 }
 0x21c   : > { %v3510_v61 = vsel %vm3480_vm9, %v3477_v28, %v10773_v48  ;;  %v3628_v5 = vpop.f32.mrf.mxu1  ;;  %v5378_v48 = vrot.slane %v5373_v62, 4  ;;  %v5385_v26 = vor.u32 %v5383_v40, %v5382_v46  ;;  %v5679_v4 = vor.u32 %v5678_v33, %v5677_v9  ;;  %v5184_v32 = vld [vmem:[#allocation3 + $0x90] sm:$0x8] }
 0x21d   : > { %8012 = vmatmul.msk.bf16.gmra.mxu1 %vm13038_vm4, %v3510_v61  ;;  %v3629_v18 = vadd.f32 %v10768_v13, %v3628_v5  ;;  %v5684_v56 = vor.u32 %v5683_v37, %v5681_v36  ;;  %v10885_v23 = vpop.permute.xlu0 %6253  ;;  %v13079_v28 = vshll.u32 %v10210_v29, 16  ;;  %v12879_v61 = vshll.u32 %v10878_v51, 16 }
 0x21e   : > { %v5366_v6 = vshrl.u32 %v5184_v32, 16  ;;  %v5376_v5 = vor.u32 %v5374_v17, %v5373_v62  ;;  %v5386_v40 = vsel %vm8744_vm11, %v5378_v48, %v5385_v26  ;;  %v5680_v46 = vrot.slane %v5679_v4, 4  ;;  %v5570_v26 = vld [vmem:[#allocation3 + $0x9c] sm:$0x1] }
 0x21f   : > { %v923_v35 = vor.u32 %v13079_v28, %v920_v20  ;;  %v3681_v58 = vmax.f32 %v3629_v18, 0.0  ;;  %v5051_v29 = vrot.slane %v12880_v57, 5  ;;  %v5685_v33 = vrot.slane %v5684_v56, 4  ;;  %v4930_v4 = vld [vmem:[#allocation3 + $0x9c] sm:$0x1] }
 0x220   : > { %v8053_v20 = vrot.slane %v5366_v6, 11  ;;  %v5054_v37 = vrot.slane %v12879_v61, 5  ;;  %v5056_v18 = vrot.slane %v12881_v59, 4  ;;  %v915_v17 = vsel %vm8744_vm11, %v10860_v60, %v10870_v22 }
 0x221   : > { %v3835_v9 = vpack.c.bf16 %v3681_v58, %v3681_v58  ;;  %v924_v62 = vsel %vm8744_vm11, %v916_v7, %v923_v35  ;;  %v6298_v48 = vunpack.c.l.b16 %v5386_v40  ;;  %v5052_v56 = vor.u32 %v5051_v29, %v5050_v45 }
 0x222   : > { %v5377_v58 = vsel %vm8744_vm11, %v8053_v20, %v5376_v5  ;;  %v5687_v32 = vshll.u32 %v5570_v26, 16  ;;  %v5057_v6 = vor.u32 %v5056_v18, %v5054_v37  ;;  %v5060_v61 = vshll.u32 %v4930_v4, 16  ;;  %v2688_v57 = vpop.permute.xlu1 %2687 }
 0x223   : > { %3868 = vst.msk [vmem:[#allocation3 + $0xa4] sm:$0xf] %vm3695_vm2, %v3835_v9  ;;  %v6297_v60 = vunpack.c.l.b16 %v5377_v58  ;;  %v5682_v22 = vsel %vm8710_vm10, %v5680_v46, %v5681_v36  ;;  %v5053_v7 = vrot.slane %v5052_v56, 4  ;;  %v2479_v45 = vunpack.c.l.b16 %v915_v17 }
 0x224   : > { %v3630_v28 = vpop.f32.mrf.mxu1  ;;  %v5689_v35 = vrot.slane %v5687_v32, 5  ;;  %v5058_v40 = vrot.slane %v5057_v6, 4  ;;  %v5062_v9 = vrot.slane %v5060_v61, 5  ;;  %v2480_v20 = vunpack.c.l.b16 %v924_v62  ;;  %v8469_v62 = vld [vmem:[#allocation3 + $0x24] sm:$0xff] }
 0x225   : > { %v3631_v59 = vadd.f32 %v10768_v13, %v3630_v28  ;;  %v6322_v21 = vpack.c.b16 %v6298_v48, %v6297_v60  ;;  %v5055_v5 = vsel %vm8710_vm10, %v5053_v7, %v5054_v37  ;;  %v6489_v26 = vunpack.c.l.b16 %v5682_v22  ;;  %v2608_v36 = vpop.permute.xlu0 %2607  ;;  %v2768_v7 = vpop.permute.xlu2 %2767 }
 0x226   : > { %v5690_v18 = vsel %vm8710_vm10, %v5685_v33, %v5689_v35  ;;  %v5063_v4 = vsel %vm8710_vm10, %v5058_v40, %v5062_v9  ;;  %v6219_v56 = vunpack.c.l.b16 %v5055_v5  ;;  %v2496_v37 = vpack.c.b16 %v2480_v20, %v2479_v45  ;;  %v3737_v33 = vld [vmem:[#allocation3 + $0xa0] sm:$0x8] }
 0x227   : > { %v3682_v29 = vmax.f32 %v3631_v59, 0.0  ;;  %6345 = vrot.lane.b32.xlu0 %v6322_v21, %s8577_s13  ;;  %v6490_v61 = vunpack.c.l.b16 %v5690_v18  ;;  %v6220_v17 = vunpack.c.l.b16 %v5063_v4  ;;  %v3738_v58 = vsel %vm10154_vm3, 0, %v3737_v33  ;;  %v3793_v18 = vld [vmem:[#allocation3 + $0xac] sm:$0x1] }
 0x228   : > { %v6658_v21 = vsel %vm3480_vm9, %v8469_v62, %v10885_v23  ;;  %3739 = vst [vmem:[#allocation3 + $0xa0] sm:$0x8] %v3738_v58  ;;  %v3281_v60 = vsel %vm3233_vm12, %v2496_v37, %v2608_v36  ;;  %vm13080_vm12 = vmmov %vm13066_vm7 }
 0x229   : > { %v3836_v46 = vpack.c.bf16 %v3682_v29, %v3682_v29  ;;  %v6514_v59 = vpack.c.b16 %v6490_v61, %v6489_v26  ;;  %v6243_v48 = vpack.c.b16 %v6220_v17, %v6219_v56  ;;  %v3314_v45 = vsel %vm3282_vm13, %v3281_v60, %v2688_v57  ;;  %vm13082_vm13 = vmmov %vm13038_vm4 }
 0x22a   : > { %v5188_v23 = vld [vmem:[#allocation3 + $0xa4] sm:$0xf]  ;;  %v3794_v61 = vsel %vm10092_vm1, 0, %v3793_v18 }
 0x22b   : > { %3869 = vst.msk [vmem:[#allocation3 + $0xa8] sm:$0xf] %vm3695_vm2, %v3836_v46  ;;  %8333 = vmatmul.msk.bf16.vlgmr.msra.gmra.mxu3 %vm3480_vm9, %v6514_v59  ;;  %6267 = vrot.lane.b32.xlu2 %v6243_v48, %s8575_s22  ;;  %v5393_v26 = vshrl.u32 %v5188_v23, 16  ;;  %v5396_v4 = vshll.u32 %v5188_v23, 16  ;;  %v3347_v46 = vsel %vm3315_vm14, %v3314_v45, %v2768_v7 }
 0x22c   : > { %3795 = vst [vmem:[#allocation3 + $0xac] sm:$0x1] %v3794_v61 }
 0x22d   : > { %v2880_v29 = vpop.permute.xlu0 %2879  ;;  %v5395_v59 = vrot.slane %v5393_v26, 7  ;;  %v5692_v58 = vrot.slane %v5396_v4, 5  ;;  %v3040_v45 = vpop.permute.xlu2 %3039 }
 0x22e   : > { %v3633_v28 = vpop.f32.mrf.mxu1  ;;  %v3380_v62 = vsel %vm3348_vm15, %v3347_v46, %v2880_v29 }
 0x22f   : > { %v6334_v32 = vpop.permute.xlu1 %6333  ;;  %v3634_v6 = vadd.f32 %v10768_v13, %v3633_v28  ;;  %v5691_v28 = vrot.slane %v5393_v26, 4  ;;  %v5398_v60 = vor.u32 %v5396_v4, %v5395_v59  ;;  %v5400_v7 = vrot.slane %v5395_v59, 4 }
 0x230   : > { %v6704_v22 = vsel %vm6571_vm0, %v6658_v21, %v6334_v32  ;;  %v10939_v21 = vld [vmem:[#allocation3 + $0xa4] sm:$0xf] }
 0x231   : > { %v6737_v35 = vsel %vm6604_vm6, %v6704_v22, %v6446_v1  ;;  %v3683_v40 = vmax.f32 %v3634_v6, 0.0  ;;  %v5187_v1 = vld [vmem:[#allocation3 + $0xa0] sm:$0x8] }
 0x232   : > { %7079 = vmatmul.bf16.gmra.mxu2 %v6737_v35  ;;  %v8492_v9 = vld [vmem:[#allocation3 + $0xa4] sm:$0xff]  ;;  %v5388_v17 = vshrl.u32 %v5187_v1, 16 }
 0x233   : > { %v3837_v5 = vpack.c.bf16 %v3683_v40, %v3683_v40  ;;  %6459 = vrot.lane.b32.xlu1 %v8492_v9, %s8576_s12  ;;  %v5189_v20 = vld [vmem:[#allocation3 + $0xa8] sm:$0xf]  ;;  %v5693_v40 = vor.u32 %v5692_v58, %v5691_v28  ;;  %v5571_v59 = vld [vmem:[#allocation3 + $0xac] sm:$0x1] }
 0x234   : > { %v5402_v36 = vshrl.u32 %v5189_v20, 16  ;;  %v5405_v37 = vshll.u32 %v5189_v20, 16  ;;  %v8054_v6 = vrot.slane %v5388_v17, 11  ;;  %v10942_v9 = vld [vmem:[#allocation3 + $0xa8] sm:$0xf]  ;;  %v12893_v20 = vshrl.u32 %v10939_v21, 16 }
 0x235   : > { %3870 = vst.msk [vmem:[#allocation3 + $0xb4] sm:$0xf] %vm3695_vm2, %v3837_v5  ;;  %v5694_v4 = vrot.slane %v5693_v40, 4  ;;  %v3152_v1 = vpop.permute.xlu0 %3151  ;;  %v12886_v17 = vshrl.u32 %v10942_v9, 16  ;;  %v5701_v28 = vshll.u32 %v5571_v59, 16 }
 0x236   : > { %v3635_v57 = vpop.f32.mrf.mxu1  ;;  %v5404_v48 = vrot.slane %v5402_v36, 7  ;;  %13081 = vst [vmem:[#allocation18_spill] sm:$0xff] %v10942_v9  ;;  %v5399_v29 = vsel %vm8744_vm11, %v8054_v6, %v5398_v60  ;;  %v5695_v5 = vrot.slane %v5405_v37, 5  ;;  %v5697_v23 = vrot.slane %v5402_v36, 4  ;;  %v4931_v58 = vld [vmem:[#allocation3 + $0xac] sm:$0x1] }
 0x237   : > { %v2960_v56 = vpop.permute.xlu1 %2959  ;;  %v3636_v33 = vadd.f32 %v10768_v13, %v3635_v57  ;;  %v6299_v46 = vunpack.c.l.b16 %v5399_v29  ;;  %v12885_v57 = vshll.u32 %v10939_v21, 16  ;;  %v12884_v36 = vshll.u32 %v10942_v9, 16  ;;  %v3740_v6 = vld [vmem:[#allocation3 + $0xb0] sm:$0x8] }
 0x238   : > { %v3413_v32 = vsel %vm13080_vm12, %v3380_v62, %v2960_v56  ;;  %v5407_v35 = vor.u32 %v5405_v37, %v5404_v48  ;;  %v5698_v56 = vor.u32 %v5697_v23, %v5695_v5  ;;  %v5064_v48 = vrot.slane %v12893_v20, 4 }
 0x239   : > { %v3684_v22 = vmax.f32 %v3636_v33, 0.0  ;;  %v3446_v37 = vsel %vm3414_vm5, %v3413_v32, %v3040_v45  ;;  %v5065_v60 = vrot.slane %v12885_v57, 5  ;;  %v5696_v32 = vsel %vm8710_vm10, %v5694_v4, %v5695_v5  ;;  %v3796_v5 = vld [vmem:[#allocation3 + $0xbc] sm:$0x1]  ;;  %v6256_v4 = vpop.permute.xlu2 %6255 }
 0x23a   : > { %v5408_v26 = vsel %vm8744_vm11, %v5400_v7, %v5407_v35  ;;  %v5699_v33 = vrot.slane %v5698_v56, 4  ;;  %v5070_v7 = vrot.slane %v12886_v17, 4  ;;  %v5074_v35 = vshll.u32 %v4931_v58, 16 }
 0x23b   : > { %v3838_v18 = vpack.c.bf16 %v3684_v22, %v3684_v22  ;;  %v6300_v61 = vunpack.c.l.b16 %v5408_v26  ;;  %v5068_v22 = vrot.slane %v12884_v36, 5  ;;  %v5703_v40 = vrot.slane %v5701_v28, 5 }
 0x23c   : > { %v3741_v45 = vsel %vm10154_vm3, 0, %v3740_v6  ;;  %v5066_v29 = vor.u32 %v5065_v60, %v5064_v48  ;;  %v3479_v26 = vsel %vm3447_vm8, %v3446_v37, %v3152_v1  ;;  %v6491_v56 = vunpack.c.l.b16 %v5696_v32  ;;  %v5191_v36 = vld [vmem:[#allocation3 + $0xb4] sm:$0xf] }
 0x23d   : > { %3871 = vst.msk [vmem:[#allocation3 + $0xb8] sm:$0xf] %vm3695_vm2, %v3838_v18  ;;  %v6323_v62 = vpack.c.b16 %v6300_v61, %v6299_v46  ;;  %v5071_v23 = vor.u32 %v5070_v7, %v5068_v22  ;;  %v5076_v18 = vrot.slane %v5074_v35, 5  ;;  %v5704_v46 = vsel %vm8710_vm10, %v5699_v33, %v5703_v40  ;;  %v8470_v37 = vld [vmem:[#allocation3 + $0x34] sm:$0xff] }
 0x23e   : > { %3742 = vst [vmem:[#allocation3 + $0xb0] sm:$0x8] %v3741_v45  ;;  %v6492_v59 = vunpack.c.l.b16 %v5704_v46  ;;  %v5415_v60 = vshrl.u32 %v5191_v36, 16  ;;  %v5418_v7 = vshll.u32 %v5191_v36, 16  ;;  %v3797_v1 = vsel %vm10092_vm1, 0, %v3796_v5 }
 0x23f   : > { %6347 = vrot.lane.b32.xlu0 %v6323_v62, %s8577_s13  ;;  %v5067_v62 = vrot.slane %v5066_v29, 4  ;;  %v5072_v58 = vrot.slane %v5071_v23, 4  ;;  %3798 = vst [vmem:[#allocation3 + $0xbc] sm:$0x1] %v3797_v1  ;;  %v10979_v46 = vld [vmem:[#allocation3 + $0xb4] sm:$0xf] }
 0x240   : > { %v6515_v33 = vpack.c.b16 %v6492_v59, %v6491_v56  ;;  %v5417_v36 = vrot.slane %v5415_v60, 7  ;;  %13083 = vst [vmem:[#allocation19_spill] sm:$0xff] %v10979_v46  ;;  %v5706_v59 = vrot.slane %v5418_v7, 5 }
 0x241   : > { %v5069_v35 = vsel %vm8710_vm10, %v5067_v62, %v5068_v22  ;;  %v5077_v32 = vsel %vm8710_vm10, %v5072_v58, %v5076_v18  ;;  %v5705_v22 = vrot.slane %v5415_v60, 4  ;;  %v12887_v60 = vshll.u32 %v10979_v46, 16 }
 0x242   : > { %v6221_v29 = vunpack.c.l.b16 %v5069_v35  ;;  %v6222_v23 = vunpack.c.l.b16 %v5077_v32  ;;  %8334 = vmatmul.msk.bf16.gmra.mxu3 %vm3480_vm9, %v6515_v33  ;;  %v5422_v35 = vrot.slane %v5417_v36, 4 }
 0x243   : > { %v5707_v32 = vor.u32 %v5706_v59, %v5705_v22 }
 0x244   : > { %v8493_v6 = vld [vmem:[#allocation3 + $0xb4] sm:$0xff]  ;;  %v6244_v58 = vpack.c.b16 %v6222_v23, %v6221_v29 }
 0x245   : > { %v3232_v61 = vpop.permute.xlu1 %3231  ;;  %v5192_v48 = vld [vmem:[#allocation3 + $0xb8] sm:$0xf]  ;;  %6461 = vrot.lane.b32.xlu1 %v8493_v6, %s8576_s12  ;;  %v5190_v5 = vld [vmem:[#allocation3 + $0xb0] sm:$0x8] }
 0x246   : > { %v3512_v28 = vsel %vm3480_vm9, %v3479_v26, %v3232_v61  ;;  %v5424_v40 = vshrl.u32 %v5192_v48, 16  ;;  %v5427_v26 = vshll.u32 %v5192_v48, 16  ;;  %v6661_v61 = vsel %vm3480_vm9, %v8470_v37, %v6256_v4  ;;  %v10983_v62 = vld [vmem:[#allocation3 + $0xb8] sm:$0xf]  ;;  %6269 = vrot.lane.b32.xlu2 %v6244_v58, %s8575_s22 }
 0x247   : > { %8013 = vmatmul.msk.bf16.gmra.mxu1 %vm13082_vm13, %v3512_v28  ;;  %13084 = vst [vmem:[#allocation20_spill] sm:$0xff] %v10983_v62  ;;  %v5420_v28 = vor.u32 %v5418_v7, %v5417_v36  ;;  %v5410_v6 = vshrl.u32 %v5190_v5, 16  ;;  %v12891_v37 = vshrl.u32 %v10979_v46, 16  ;;  %v12892_v33 = vshrl.u32 %v10983_v62, 16 }
 0x248   : > { %v6336_v45 = vpop.permute.xlu0 %6335  ;;  %v5426_v56 = vrot.slane %v5424_v40, 7  ;;  %v5709_v1 = vrot.slane %v5427_v26, 5  ;;  %v5711_v4 = vrot.slane %v5424_v40, 4  ;;  %v5708_v7 = vrot.slane %v5707_v32, 4  ;;  %v4932_v40 = vld [vmem:[#allocation3 + $0xbc] sm:$0x1] }
 0x249   : > { %v6706_v18 = vsel %vm6571_vm0, %v6661_v61, %v6336_v45  ;;  %v8055_v17 = vrot.slane %v5410_v6, 11  ;;  %v12888_v29 = vshll.u32 %v10983_v62, 16  ;;  %v5079_v58 = vrot.slane %v12887_v60, 5 }
 0x24a   : > { %v5429_v48 = vor.u32 %v5427_v26, %v5426_v56  ;;  %v5572_v26 = vld [vmem:[#allocation3 + $0xbc] sm:$0x1]  ;;  %v5712_v61 = vor.u32 %v5711_v4, %v5709_v1  ;;  %v5078_v56 = vrot.slane %v12891_v37, 4  ;;  %v5710_v6 = vsel %vm8710_vm10, %v5708_v7, %v5709_v1 }
 0x24b   : > { %v5421_v22 = vsel %vm8744_vm11, %v8055_v17, %v5420_v28  ;;  %v5715_v59 = vshll.u32 %v5572_v26, 16  ;;  %v5084_v32 = vrot.slane %v12892_v33, 4  ;;  %v5088_v4 = vshll.u32 %v4932_v40, 16 }
 0x24c   : > { %v5430_v45 = vsel %vm8744_vm11, %v5422_v35, %v5429_v48  ;;  %v6301_v5 = vunpack.c.l.b16 %v5421_v22  ;;  %v5080_v48 = vor.u32 %v5079_v58, %v5078_v56  ;;  %v6493_v1 = vunpack.c.l.b16 %v5710_v6  ;;  %v3743_v56 = vld [vmem:[#allocation3 + $0xc0] sm:$0x8]  ;;  %v3799_v6 = vld [vmem:[#allocation3 + $0xcc] sm:$0x1] }
 0x24d   : > { %v6448_v57 = vpop.permute.xlu1 %6447  ;;  %v6302_v36 = vunpack.c.l.b16 %v5430_v45  ;;  %v5717_v35 = vrot.slane %v5715_v59, 5  ;;  %v5090_v26 = vrot.slane %v5088_v4, 5 }
 0x24e   : > { %v6740_v23 = vsel %vm6604_vm6, %v6706_v18, %v6448_v57  ;;  %v5713_v57 = vrot.slane %v5712_v61, 4  ;;  %v5082_v18 = vrot.slane %v12888_v29, 5  ;;  %v5081_v28 = vrot.slane %v5080_v48, 4 }
 0x24f   : > { %7084 = vmatmul.bf16.gmra.mxu2 %v6740_v23  ;;  %v6324_v45 = vpack.c.b16 %v6302_v36, %v6301_v5  ;;  %v3744_v36 = vsel %vm10154_vm3, 0, %v3743_v56 }
 0x250   : > { %v5718_v17 = vsel %vm8710_vm10, %v5713_v57, %v5717_v35  ;;  %v5085_v23 = vor.u32 %v5084_v32, %v5082_v18  ;;  %v5083_v61 = vsel %vm8710_vm10, %v5081_v28, %v5082_v18  ;;  %3745 = vst [vmem:[#allocation3 + $0xc0] sm:$0x8] %v3744_v36  ;;  %v3800_v18 = vsel %vm10092_vm1, 0, %v3799_v6 }
 0x251   : > { %6349 = vrot.lane.b32.xlu0 %v6324_v45, %s8577_s13  ;;  %v6494_v7 = vunpack.c.l.b16 %v5718_v17  ;;  %v6223_v57 = vunpack.c.l.b16 %v5083_v61  ;;  %3801 = vst [vmem:[#allocation3 + $0xcc] sm:$0x1] %v3800_v18  ;;  %v6258_v45 = vpop.permute.xlu2 %6257  ;;  %v8471_v17 = vld [vmem:[#allocation3 + $0x44] sm:$0xff] }
 0x252   : > { %v5086_v22 = vrot.slane %v5085_v23, 4  ;;  %v6664_v23 = vsel %vm3480_vm9, %v8471_v17, %v6258_v45 }
 0x253   : > { %v6516_v58 = vpack.c.b16 %v6494_v7, %v6493_v1 }
 0x254   : > { %v5091_v5 = vsel %vm8710_vm10, %v5086_v22, %v5090_v26 }
 0x255   : > { %v6224_v35 = vunpack.c.l.b16 %v5091_v5  ;;  %8335 = vmatmul.msk.bf16.gmra.mxu3 %vm3480_vm9, %v6516_v58  ;;  %v6450_v7 = vpop.permute.xlu1 %6449 }
 0x257   : > { %v6245_v32 = vpack.c.b16 %v6224_v35, %v6223_v57  ;;  %v5193_v22 = vld [vmem:[#allocation3 + $0xc0] sm:$0x8] }
 0x258   : > { %v3638_v59 = vpop.f32.mrf.mxu1  ;;  %v5432_v36 = vshrl.u32 %v5193_v22, 16  ;;  %v3802_v22 = vld [vmem:[#allocation3 + $0xdc] sm:$0x1] }
 0x259   : > { %v3639_v40 = vadd.f32 %v10768_v13, %v3638_v59  ;;  %6271 = vrot.lane.b32.xlu2 %v6245_v32, %s8575_s22  ;;  %v3746_v32 = vld [vmem:[#allocation3 + $0xd0] sm:$0x8] }
 0x25a   : > { %v8056_v45 = vrot.slane %v5432_v36, 11  ;;  %v3803_v36 = vsel %vm10092_vm1, 0, %v3802_v22 }
 0x25b   : > { %v3685_v48 = vmax.f32 %v3639_v40, 0.0  ;;  %3804 = vst [vmem:[#allocation3 + $0xdc] sm:$0x1] %v3803_v36 }
 0x25d   : > { %v3839_v4 = vpack.c.bf16 %v3685_v48, %v3685_v48 }
 0x25f   : > { %3872 = vst.msk [vmem:[#allocation3 + $0xc4] sm:$0xf] %vm3695_vm2, %v3839_v4 }
 0x260   : > { %v3640_v28 = vpop.f32.mrf.mxu1 }
 0x261   : > { %v6338_v26 = vpop.permute.xlu0 %6337  ;;  %v3641_v1 = vadd.f32 %v10768_v13, %v3640_v28  ;;  %v5573_v28 = vld [vmem:[#allocation3 + $0xcc] sm:$0x1] }
 0x262   : > { %v6708_v61 = vsel %vm6571_vm0, %v6664_v23, %v6338_v26  ;;  %v5729_v60 = vshll.u32 %v5573_v28, 16 }
 0x263   : > { %v6743_v56 = vsel %vm6604_vm6, %v6708_v61, %v6450_v7  ;;  %v3686_v59 = vmax.f32 %v3641_v1, 0.0  ;;  %v3747_v61 = vsel %vm10154_vm3, 0, %v3746_v32 }
 0x264   : > { %7089 = vmatmul.bf16.gmra.mxu2 %v6743_v56  ;;  %v6260_v56 = vpop.permute.xlu2 %6259  ;;  %3748 = vst [vmem:[#allocation3 + $0xd0] sm:$0x8] %v3747_v61 }
 0x265   : > { %v3840_v58 = vpack.c.bf16 %v3686_v59, %v3686_v59 }
 0x266   : > { %v5194_v40 = vld [vmem:[#allocation3 + $0xc4] sm:$0xf] }
 0x267   : > { %v11025_v5 = vld [vmem:[#allocation3 + $0xc4] sm:$0xf]  ;;  %3873 = vst.msk [vmem:[#allocation3 + $0xc8] sm:$0xf] %vm3695_vm2, %v3840_v58  ;;  %v5437_v57 = vshrl.u32 %v5194_v40, 16  ;;  %v5440_v35 = vshll.u32 %v5194_v40, 16 }
 0x268   : > { %13085 = vst [vmem:[#allocation21_spill] sm:$0xff] %v11025_v5  ;;  %v12889_v6 = vshrl.u32 %v11025_v5, 16  ;;  %v12890_v48 = vshll.u32 %v11025_v5, 16  ;;  %v4933_v58 = vld [vmem:[#allocation3 + $0xcc] sm:$0x1]  ;;  %v8472_v40 = vld [vmem:[#allocation3 + $0x54] sm:$0xff] }
 0x269   : > { %v5439_v17 = vrot.slane %v5437_v57, 7  ;;  %v5719_v23 = vrot.slane %v5437_v57, 4  ;;  %v5720_v26 = vrot.slane %v5440_v35, 5  ;;  %v5102_v20 = vshll.u32 %v4933_v58, 16 }
 0x26a   : > { %v3643_v18 = vpop.f32.mrf.mxu1  ;;  %v5092_v1 = vrot.slane %v12889_v6, 4  ;;  %v5093_v7 = vrot.slane %v12890_v48, 5  ;;  %v6667_v48 = vsel %vm3480_vm9, %v8472_v40, %v6260_v56 }
 0x26b   : > { %v3644_v4 = vadd.f32 %v10768_v13, %v3643_v18  ;;  %v5442_v57 = vor.u32 %v5440_v35, %v5439_v17  ;;  %v5721_v18 = vor.u32 %v5720_v26, %v5719_v23 }
 0x26c   : > { %v5094_v29 = vor.u32 %v5093_v7, %v5092_v1  ;;  %v5731_v7 = vrot.slane %v5729_v60, 5 }
 0x26d   : > { %v3687_v59 = vmax.f32 %v3644_v4, 0.0  ;;  %v5443_v26 = vsel %vm8744_vm11, %v8056_v45, %v5442_v57  ;;  %v5722_v1 = vrot.slane %v5721_v18, 4  ;;  %v5444_v57 = vrot.slane %v5439_v17, 4  ;;  %v5196_v18 = vld [vmem:[#allocation3 + $0xd0] sm:$0x8] }
 0x26e   : > { %v8494_v37 = vld [vmem:[#allocation3 + $0xc4] sm:$0xff]  ;;  %v5095_v56 = vrot.slane %v5094_v29, 4  ;;  %v5104_v29 = vrot.slane %v5102_v20, 5 }
 0x26f   : > { %v3841_v6 = vpack.c.bf16 %v3687_v59, %v3687_v59  ;;  %v5195_v33 = vld [vmem:[#allocation3 + $0xc8] sm:$0xf]  ;;  %6463 = vrot.lane.b32.xlu1 %v8494_v37, %s8576_s12  ;;  %v6452_v59 = vpop.permute.xlu1 %6451 }
 0x270   : > { %v11040_v32 = vld [vmem:[#allocation3 + $0xc8] sm:$0xf]  ;;  %v5446_v4 = vshrl.u32 %v5195_v33, 16  ;;  %v5449_v61 = vshll.u32 %v5195_v33, 16  ;;  %v6340_v23 = vpop.permute.xlu0 %6339 }
 0x271   : > { %13086 = vst [vmem:[#allocation22_spill] sm:$0xff] %v11040_v32  ;;  %v12898_v35 = vshll.u32 %v11040_v32, 16  ;;  %v6710_v58 = vsel %vm6571_vm0, %v6667_v48, %v6340_v23  ;;  %v13087_v3 = vshrl.u32 %v11040_v32, 16 }
 0x272   : > { %3874 = vst.msk [vmem:[#allocation3 + $0xd4] sm:$0xf] %vm3695_vm2, %v3841_v6  ;;  %v3645_v28 = vpop.f32.mrf.mxu1  ;;  %v5448_v33 = vrot.slane %v5446_v4, 7  ;;  %v5723_v36 = vrot.slane %v5449_v61, 5  ;;  %v6746_v40 = vsel %vm6604_vm6, %v6710_v58, %v6452_v59  ;;  %v5725_v22 = vrot.slane %v5446_v4, 4 }
 0x273   : > { %v3646_v6 = vadd.f32 %v10768_v13, %v3645_v28  ;;  %v5096_v37 = vrot.slane %v12898_v35, 5  ;;  %v5098_v10 = vrot.slane %v13087_v3, 4  ;;  %v6303_v35 = vunpack.c.l.b16 %v5443_v26  ;;  %v5574_v3 = vld [vmem:[#allocation3 + $0xdc] sm:$0x1] }
 0x274   : > { %v5451_v60 = vor.u32 %v5449_v61, %v5448_v33  ;;  %7094 = vmatmul.bf16.gmra.mxu2 %v6746_v40  ;;  %v5724_v48 = vsel %vm8710_vm10, %v5722_v1, %v5723_v36  ;;  %v5726_v23 = vor.u32 %v5725_v22, %v5723_v36  ;;  %v5454_v33 = vshrl.u32 %v5196_v18, 16 }
 0x275   : > { %v3688_v45 = vmax.f32 %v3646_v6, 0.0  ;;  %v5097_v28 = vsel %vm8710_vm10, %v5095_v56, %v5096_v37  ;;  %v5099_v4 = vor.u32 %v5098_v10, %v5096_v37  ;;  %v6495_v40 = vunpack.c.l.b16 %v5724_v48 }
 0x276   : > { %v5452_v58 = vsel %vm8744_vm11, %v5444_v57, %v5451_v60  ;;  %v5727_v17 = vrot.slane %v5726_v23, 4  ;;  %v6225_v1 = vunpack.c.l.b16 %v5097_v28  ;;  %v5743_v37 = vshll.u32 %v5574_v3, 16  ;;  %v6262_v57 = vpop.permute.xlu2 %6261  ;;  %v8473_v28 = vld [vmem:[#allocation3 + $0x64] sm:$0xff] }
 0x277   : > { %v3842_v59 = vpack.c.bf16 %v3688_v45, %v3688_v45  ;;  %v6304_v6 = vunpack.c.l.b16 %v5452_v58  ;;  %v5100_v61 = vrot.slane %v5099_v4, 4  ;;  %v6670_v3 = vsel %vm3480_vm9, %v8473_v28, %v6262_v57 }
 0x278   : > { %v5732_v10 = vsel %vm8710_vm10, %v5727_v17, %v5731_v7 }
 0x279   : > { %v5197_v20 = vld [vmem:[#allocation3 + $0xd4] sm:$0xf]  ;;  %3875 = vst.msk [vmem:[#allocation3 + $0xd8] sm:$0xf] %vm3695_vm2, %v3842_v59  ;;  %v6325_v27 = vpack.c.b16 %v6304_v6, %v6303_v35  ;;  %v5105_v56 = vsel %vm8710_vm10, %v5100_v61, %v5104_v29  ;;  %v6496_v60 = vunpack.c.l.b16 %v5732_v10  ;;  %v4934_v59 = vld [vmem:[#allocation3 + $0xdc] sm:$0x1] }
 0x27a   : > { %v5459_v22 = vshrl.u32 %v5197_v20, 16  ;;  %v5462_v36 = vshll.u32 %v5197_v20, 16  ;;  %v3648_v26 = vpop.f32.mrf.mxu1  ;;  %v11066_v45 = vld [vmem:[#allocation3 + $0xd4] sm:$0xf]  ;;  %v6226_v18 = vunpack.c.l.b16 %v5105_v56  ;;  %v8057_v61 = vrot.slane %v5454_v33, 11 }
 0x27b   : > { %13088 = vst [vmem:[#allocation23_spill] sm:$0xff] %v11066_v45  ;;  %v3649_v23 = vadd.f32 %v10768_v13, %v3648_v26  ;;  %6351 = vrot.lane.b32.xlu0 %v6325_v27, %s8577_s13  ;;  %v12902_v7 = vshrl.u32 %v11066_v45, 16  ;;  %v6517_v58 = vpack.c.b16 %v6496_v60, %v6495_v40  ;;  %v12901_v10 = vshll.u32 %v11066_v45, 16 }
 0x27c   : > { %v5461_v48 = vrot.slane %v5459_v22, 7  ;;  %v5733_v35 = vrot.slane %v5459_v22, 4  ;;  %v5734_v4 = vrot.slane %v5462_v36, 5  ;;  %v6246_v29 = vpack.c.b16 %v6226_v18, %v6225_v1 }
 0x27d   : > { %v3689_v6 = vmax.f32 %v3649_v23, 0.0  ;;  %v6342_v17 = vpop.permute.xlu0 %6341  ;;  %8336 = vmatmul.msk.bf16.gmra.mxu3 %vm3480_vm9, %v6517_v58  ;;  %v5745_v22 = vrot.slane %v5743_v37, 5  ;;  %v5116_v56 = vshll.u32 %v4934_v59, 16  ;;  %v5106_v33 = vrot.slane %v12902_v7, 4 }
 0x27e   : > { %v5464_v20 = vor.u32 %v5462_v36, %v5461_v48  ;;  %6273 = vrot.lane.b32.xlu2 %v6246_v29, %s8575_s22  ;;  %v6712_v13 = vsel %vm6571_vm0, %v6670_v3, %v6342_v17  ;;  %v5735_v1 = vor.u32 %v5734_v4, %v5733_v35  ;;  %v6454_v36 = vpop.permute.xlu1 %6453  ;;  %v5466_v4 = vrot.slane %v5461_v48, 4  ;;  %v11092_v29 = vld [vmem:[%s12767_s2] ss:$0 sm:$0xff] }
 0x27f   : > { %v3843_v27 = vpack.c.bf16 %v3689_v6, %v3689_v6  ;;  %v6749_v37 = vsel %vm6604_vm6, %v6712_v13, %v6454_v36  ;;  %v5107_v58 = vrot.slane %v12901_v10, 5  ;;  %v5118_v7 = vrot.slane %v5116_v56, 5 }
 0x280   : > { %v8495_v26 = vld [vmem:[#allocation3 + $0xd4] sm:$0xff]  ;;  %v5465_v35 = vsel %vm8744_vm11, %v8057_v61, %v5464_v20  ;;  %v5736_v13 = vrot.slane %v5735_v1, 4  ;;  %v3749_v61 = vld [vmem:[#allocation3 + $0xe0] sm:$0x8] }
 0x281   : > { %v5198_v40 = vld [vmem:[#allocation3 + $0xd8] sm:$0xf]  ;;  %3876 = vst.msk [vmem:[#allocation3 + $0xe4] sm:$0xf] %vm3695_vm2, %v3843_v27  ;;  %6465 = vrot.lane.b32.xlu1 %v8495_v26, %s8576_s12  ;;  %v5108_v26 = vor.u32 %v5107_v58, %v5106_v33  ;;  %v3750_v1 = vsel %vm10154_vm3, 0, %v3749_v61  ;;  %v6305_v56 = vunpack.c.l.b16 %v5465_v35 }
 0x282   : > { %v11076_v60 = vld [vmem:[#allocation3 + $0xd8] sm:$0xf]  ;;  %v5468_v57 = vshrl.u32 %v5198_v40, 16  ;;  %v5471_v18 = vshll.u32 %v5198_v40, 16  ;;  %v3650_v59 = vpop.f32.mrf.mxu1  ;;  %3751 = vst [vmem:[#allocation3 + $0xe0] sm:$0x8] %v3750_v1 }
 0x283   : > { %13089 = vst [vmem:[#allocation24_spill] sm:$0xff] %v11076_v60  ;;  %v12910_v23 = vshrl.u32 %v11076_v60, 16  ;;  %v12907_v28 = vshll.u32 %v11076_v60, 16  ;;  %v3651_v6 = vadd.f32 %v11092_v29, %v3650_v59  ;;  %v5109_v42 = vrot.slane %v5108_v26, 4 }
 0x284   : > { %v5470_v3 = vrot.slane %v5468_v57, 7  ;;  %v5737_v17 = vrot.slane %v5471_v18, 5  ;;  %v5739_v27 = vrot.slane %v5468_v57, 4  ;;  %7099 = vmatmul.bf16.gmra.mxu2 %v6749_v37 }
 0x285   : > { %v5110_v40 = vrot.slane %v12907_v28, 5  ;;  %v5112_v48 = vrot.slane %v12910_v23, 4  ;;  %v3690_v20 = vmax.f32 %v3651_v6, 0.0 }
 0x286   : > { %v5473_v36 = vor.u32 %v5471_v18, %v5470_v3  ;;  %v5740_v10 = vor.u32 %v5739_v27, %v5737_v17  ;;  %v5738_v59 = vsel %vm8710_vm10, %v5736_v13, %v5737_v17  ;;  %v3806_v18 = vsel %vm10092_vm1, 0, %v3805_v25 }
 0x287   : > { %v5113_v57 = vor.u32 %v5112_v48, %v5110_v40  ;;  %v3844_v33 = vpack.c.bf16 %v3690_v20, %v3690_v20  ;;  %v5111_v37 = vsel %vm8710_vm10, %v5109_v42, %v5110_v40  ;;  %3807 = vst [vmem:[#allocation3 + $0xec] sm:$0x1] %v3806_v18  ;;  %v6497_v48 = vunpack.c.l.b16 %v5738_v59  ;;  %v6344_v59 = vpop.permute.xlu0 %6343 }
 0x288   : > { %v5474_v58 = vsel %vm8744_vm11, %v5466_v4, %v5473_v36  ;;  %v5741_v28 = vrot.slane %v5740_v10, 4  ;;  %v5200_v17 = vld [vmem:[#allocation3 + $0xe4] sm:$0xf]  ;;  %v6227_v61 = vunpack.c.l.b16 %v5111_v37  ;;  %v6264_v36 = vpop.permute.xlu2 %6263 }
 0x289   : > { %v6306_v6 = vunpack.c.l.b16 %v5474_v58  ;;  %v5114_v3 = vrot.slane %v5113_v57, 4  ;;  %3877 = vst.msk [vmem:[#allocation3 + $0xe8] sm:$0xf] %vm3695_vm2, %v3844_v33  ;;  %v5481_v13 = vshrl.u32 %v5200_v17, 16  ;;  %v5484_v4 = vshll.u32 %v5200_v17, 16  ;;  %v8474_v33 = vld [vmem:[#allocation3 + $0x74] sm:$0xff] }
 0x28a   : > { %v5746_v27 = vsel %vm8710_vm10, %v5741_v28, %v5745_v22  ;;  %v11112_v10 = vld [vmem:[#allocation3 + $0xe4] sm:$0xf]  ;;  %v5199_v18 = vld [vmem:[#allocation3 + $0xe0] sm:$0x8] }
 0x28b   : > { %13090 = vst [vmem:[#allocation25_spill] sm:$0xff] %v11112_v10  ;;  %v6326_v26 = vpack.c.b16 %v6306_v6, %v6305_v56  ;;  %v6498_v25 = vunpack.c.l.b16 %v5746_v27  ;;  %v5119_v35 = vsel %vm8710_vm10, %v5114_v3, %v5118_v7  ;;  %v5483_v40 = vrot.slane %v5481_v13, 7 }
 0x28c   : > { %v6228_v42 = vunpack.c.l.b16 %v5119_v35  ;;  %v5747_v20 = vrot.slane %v5481_v13, 4  ;;  %v5748_v1 = vrot.slane %v5484_v4, 5  ;;  %v12908_v22 = vshrl.u32 %v11112_v10, 16 }
 0x28d   : > { %6353 = vrot.lane.b32.xlu0 %v6326_v26, %s8577_s13  ;;  %v6518_v57 = vpack.c.b16 %v6498_v25, %v6497_v48  ;;  %v12909_v28 = vshll.u32 %v11112_v10, 16  ;;  %v6673_v6 = vsel %vm3480_vm9, %v8474_v33, %v6264_v36  ;;  %v5476_v37 = vshrl.u32 %v5199_v18, 16  ;;  %v6456_v36 = vpop.permute.xlu1 %6455 }
 0x28e   : > { %v6247_v58 = vpack.c.b16 %v6228_v42, %v6227_v61  ;;  %v5120_v7 = vrot.slane %v12908_v22, 4  ;;  %v5575_v3 = vld [vmem:[#allocation3 + $0xec] sm:$0x1]  ;;  %v6714_v27 = vsel %vm6571_vm0, %v6673_v6, %v6344_v59  ;;  %v5486_v48 = vor.u32 %v5484_v4, %v5483_v40 }
 0x28f   : > { %v5121_v56 = vrot.slane %v12909_v28, 5  ;;  %8337 = vmatmul.msk.bf16.gmra.mxu3 %vm3480_vm9, %v6518_v57  ;;  %v4935_v17 = vld [vmem:[#allocation3 + $0xec] sm:$0x1]  ;;  %v5749_v25 = vor.u32 %v5748_v1, %v5747_v20  ;;  %v8058_v35 = vrot.slane %v5476_v37, 11  ;;  %v5757_v22 = vshll.u32 %v5575_v3, 16 }
 0x290   : > { %6275 = vrot.lane.b32.xlu2 %v6247_v58, %s8575_s22  ;;  %v8496_v13 = vld [vmem:[#allocation3 + $0xe4] sm:$0xff]  ;;  %v5130_v18 = vshll.u32 %v4935_v17, 16  ;;  %v6752_v59 = vsel %vm6604_vm6, %v6714_v27, %v6456_v36  ;;  %v5488_v1 = vrot.slane %v5483_v40, 4 }
 0x291   : > { %v5201_v26 = vld [vmem:[#allocation3 + $0xe8] sm:$0xf]  ;;  %6467 = vrot.lane.b32.xlu1 %v8496_v13, %s8576_s12  ;;  %v5122_v58 = vor.u32 %v5121_v56, %v5120_v7  ;;  %v5750_v37 = vrot.slane %v5749_v25, 4  ;;  %v5487_v13 = vsel %vm8744_vm11, %v8058_v35, %v5486_v48  ;;  %v5759_v7 = vrot.slane %v5757_v22, 5 }
 0x292   : > { %v5490_v61 = vshrl.u32 %v5201_v26, 16  ;;  %v5493_v42 = vshll.u32 %v5201_v26, 16  ;;  %v11127_v28 = vld [vmem:[#allocation3 + $0xe8] sm:$0xf]  ;;  %v5132_v27 = vrot.slane %v5130_v18, 5  ;;  %v6307_v36 = vunpack.c.l.b16 %v5487_v13 }
 0x293   : > { %13091 = vst [vmem:[#allocation26_spill] sm:$0xff] %v11127_v28  ;;  %v12914_v57 = vshrl.u32 %v11127_v28, 16  ;;  %v12913_v33 = vshll.u32 %v11127_v28, 16  ;;  %v5123_v56 = vrot.slane %v5122_v58, 4 }
 0x294   : > { %v5492_v6 = vrot.slane %v5490_v61, 7  ;;  %v5751_v4 = vrot.slane %v5493_v42, 5  ;;  %v5753_v20 = vrot.slane %v5490_v61, 4  ;;  %7104 = vmatmul.bf16.gmra.mxu2 %v6752_v59 }
 0x295   : > { %v5124_v3 = vrot.slane %v12913_v33, 5  ;;  %v5126_v26 = vrot.slane %v12914_v57, 4  ;;  %v6458_v13 = vpop.permute.xlu1 %6457 }
 0x296   : > { %v5495_v23 = vor.u32 %v5493_v42, %v5492_v6  ;;  %v5754_v55 = vor.u32 %v5753_v20, %v5751_v4  ;;  %v5752_v25 = vsel %vm8710_vm10, %v5750_v37, %v5751_v4  ;;  %v6266_v6 = vpop.permute.xlu2 %6265  ;;  %v8475_v20 = vld [vmem:[#allocation3 + $0x84] sm:$0xff] }
 0x297   : > { %v5127_v17 = vor.u32 %v5126_v26, %v5124_v3  ;;  %v5125_v57 = vsel %vm8710_vm10, %v5123_v56, %v5124_v3  ;;  %v6499_v42 = vunpack.c.l.b16 %v5752_v25 }
 0x298   : > { %v5496_v40 = vsel %vm8744_vm11, %v5488_v1, %v5495_v23  ;;  %v5755_v61 = vrot.slane %v5754_v55, 4  ;;  %v6229_v23 = vunpack.c.l.b16 %v5125_v57 }
 0x299   : > { %v6308_v33 = vunpack.c.l.b16 %v5496_v40  ;;  %v5128_v48 = vrot.slane %v5127_v17, 4  ;;  %v6346_v3 = vpop.permute.xlu0 %6345  ;;  %v3752_v17 = vld [vmem:[#allocation3 + $0xf0] sm:$0x8] }
 0x29a   : > { %v5760_v22 = vsel %vm8710_vm10, %v5755_v61, %v5759_v7  ;;  %v3653_v1 = vpop.f32.mrf.mxu1 }
 0x29b   : > { %v6327_v35 = vpack.c.b16 %v6308_v33, %v6307_v36  ;;  %v6500_v58 = vunpack.c.l.b16 %v5760_v22  ;;  %v5133_v18 = vsel %vm8710_vm10, %v5128_v48, %v5132_v27  ;;  %v3654_v37 = vadd.f32 %v11092_v29, %v3653_v1 }
 0x29c   : > { %v6230_v59 = vunpack.c.l.b16 %v5133_v18  ;;  %v6676_v33 = vsel %vm3480_vm9, %v8475_v20, %v6266_v6  ;;  %v3753_v27 = vsel %vm10154_vm3, 0, %v3752_v17  ;;  %v3808_v18 = vld [vmem:[#allocation3 + $0xfc] sm:$0x1] }
 0x29d   : > { %6355 = vrot.lane.b32.xlu0 %v6327_v35, %s8577_s13  ;;  %v6519_v55 = vpack.c.b16 %v6500_v58, %v6499_v42  ;;  %v3691_v26 = vmax.f32 %v3654_v37, 0.0  ;;  %v6716_v57 = vsel %vm6571_vm0, %v6676_v33, %v6346_v3  ;;  %3754 = vst [vmem:[#allocation3 + $0xf0] sm:$0x8] %v3753_v27  ;;  %v8476_v3 = vld [vmem:[#allocation3 + $0x94] sm:$0xff] }
 0x29e   : > { %v6248_v4 = vpack.c.b16 %v6230_v59, %v6229_v23  ;;  %v6755_v56 = vsel %vm6604_vm6, %v6716_v57, %v6458_v13 }
 0x29f   : > { %8338 = vmatmul.msk.bf16.gmra.mxu3 %vm3480_vm9, %v6519_v55  ;;  %v3845_v7 = vpack.c.bf16 %v3691_v26, %v3691_v26  ;;  %v3809_v55 = vsel %vm10092_vm1, 0, %v3808_v18  ;;  %v6268_v26 = vpop.permute.xlu2 %6267 }
 0x2a0   : > { %6277 = vrot.lane.b32.xlu2 %v6248_v4, %s8575_s22  ;;  %3810 = vst [vmem:[#allocation3 + $0xfc] sm:$0x1] %v3809_v55 }
 0x2a1   : > { %3878 = vst.msk [vmem:[#allocation3 + $0xf4] sm:$0xf] %vm3695_vm2, %v3845_v7 }
 0x2a2   : > { %v3655_v40 = vpop.f32.mrf.mxu1 }
 0x2a3   : > { %v3656_v25 = vadd.f32 %v11092_v29, %v3655_v40 }
 0x2a4   : > { %7109 = vmatmul.bf16.gmra.mxu2 %v6755_v56  ;;  %v5202_v35 = vld [vmem:[#allocation3 + $0xf0] sm:$0x8] }
 0x2a5   : > { %v3692_v61 = vmax.f32 %v3656_v25, 0.0  ;;  %v5498_v6 = vshrl.u32 %v5202_v35, 16  ;;  %v6460_v10 = vpop.permute.xlu1 %6459 }
 0x2a7   : > { %v3846_v36 = vpack.c.bf16 %v3692_v61, %v3692_v61  ;;  %v8059_v7 = vrot.slane %v5498_v6, 11  ;;  %v5576_v18 = vld [vmem:[#allocation3 + $0xfc] sm:$0x1] }
 0x2a8   : > { %v5203_v48 = vld [vmem:[#allocation3 + $0xf4] sm:$0xf] }
 0x2a9   : > { %v11160_v22 = vld [vmem:[#allocation3 + $0xf4] sm:$0xf]  ;;  %3879 = vst.msk [vmem:[#allocation3 + $0xf8] sm:$0xf] %vm3695_vm2, %v3846_v36  ;;  %v5503_v42 = vshrl.u32 %v5203_v48, 16  ;;  %v5506_v58 = vshll.u32 %v5203_v48, 16  ;;  %v6679_v48 = vsel %vm3480_vm9, %v8476_v3, %v6268_v26 }
 0x2aa   : > { %13092 = vst [vmem:[#allocation27_spill] sm:$0xff] %v11160_v22  ;;  %v12916_v23 = vshrl.u32 %v11160_v22, 16  ;;  %v12915_v59 = vshll.u32 %v11160_v22, 16 }
 0x2ab   : > { %v5505_v4 = vrot.slane %v5503_v42, 7  ;;  %v5761_v20 = vrot.slane %v5503_v42, 4  ;;  %v5762_v1 = vrot.slane %v5506_v58, 5 }
 0x2ac   : > { %v5134_v37 = vrot.slane %v12916_v23, 4  ;;  %v5135_v33 = vrot.slane %v12915_v59, 5  ;;  %v4936_v23 = vld [vmem:[#allocation3 + $0xfc] sm:$0x1] }
 0x2ad   : > { %v5508_v56 = vor.u32 %v5506_v58, %v5505_v4  ;;  %v5763_v17 = vor.u32 %v5762_v1, %v5761_v20  ;;  %v5510_v20 = vrot.slane %v5505_v4, 4 }
 0x2ae   : > { %v5136_v35 = vor.u32 %v5135_v33, %v5134_v37 }
 0x2af   : > { %v5509_v6 = vsel %vm8744_vm11, %v8059_v7, %v5508_v56  ;;  %v5764_v33 = vrot.slane %v5763_v17, 4  ;;  %v5144_v56 = vshll.u32 %v4936_v23, 16 }
 0x2b0   : > { %v8497_v57 = vld [vmem:[#allocation3 + $0xf4] sm:$0xff] }
 0x2b1   : > { %v5204_v13 = vld [vmem:[#allocation3 + $0xf8] sm:$0xf]  ;;  %6469 = vrot.lane.b32.xlu1 %v8497_v57, %s8576_s12  ;;  %v6348_v1 = vpop.permute.xlu0 %6347 }
 0x2b2   : > { %v11171_v27 = vld [vmem:[#allocation3 + $0xf8] sm:$0xf]  ;;  %v5512_v40 = vshrl.u32 %v5204_v13, 16  ;;  %v5515_v25 = vshll.u32 %v5204_v13, 16  ;;  %v5771_v13 = vshll.u32 %v5576_v18, 16  ;;  %v6718_v37 = vsel %vm6571_vm0, %v6679_v48, %v6348_v1 }
 0x2b3   : > { %13093 = vst [vmem:[#allocation28_spill] sm:$0xff] %v11171_v27  ;;  %v12926_v61 = vshrl.u32 %v11171_v27, 16  ;;  %v12923_v36 = vshll.u32 %v11171_v27, 16  ;;  %v6309_v18 = vunpack.c.l.b16 %v5509_v6  ;;  %v5146_v48 = vrot.slane %v5144_v56, 5  ;;  %v4522_v6 = vld [vmem:[#allocation3 + $0x10] sm:$0x8] }
 0x2b4   : > { %v5514_v42 = vrot.slane %v5512_v40, 7  ;;  %v5765_v55 = vrot.slane %v5515_v25, 5  ;;  %v5767_v59 = vrot.slane %v5512_v40, 4  ;;  %v5773_v22 = vrot.slane %v5771_v13, 5 }
 0x2b5   : > { %v5138_v58 = vrot.slane %v12923_v36, 5  ;;  %v5140_v3 = vrot.slane %v12926_v61, 4  ;;  %v5137_v40 = vrot.slane %v5136_v35, 4  ;;  %v13095_v13 = vshrl.u32 %v10075_v31, 16 }
 0x2b6   : > { %v5517_v26 = vor.u32 %v5515_v25, %v5514_v42  ;;  %v5768_v57 = vor.u32 %v5767_v59, %v5765_v55  ;;  %v5766_v4 = vsel %vm8710_vm10, %v5764_v33, %v5765_v55  ;;  %v6758_v25 = vsel %vm6604_vm6, %v6718_v37, %v6460_v10  ;;  %v6270_v37 = vpop.permute.xlu2 %6269  ;;  %v8477_v33 = vld [vmem:[#allocation3 + $0xa4] sm:$0xff] }
 0x2b7   : > { %v5141_v28 = vor.u32 %v5140_v3, %v5138_v58  ;;  %v5139_v17 = vsel %vm8710_vm10, %v5137_v40, %v5138_v58  ;;  %7114 = vmatmul.bf16.gmra.mxu2 %v6758_v25  ;;  %v6501_v42 = vunpack.c.l.b16 %v5766_v4  ;;  %v4578_v3 = vrot.slane %v13095_v13, 7  ;;  %v11229_v13 = vld [vmem:[#allocation3 + $0x18] sm:$0xf] }
 0x2b8   : > { %v5518_v36 = vsel %vm8744_vm11, %v5510_v20, %v5517_v26  ;;  %v5769_v7 = vrot.slane %v5768_v57, 4  ;;  %v4525_v26 = vld [vmem:[#allocation3 + $0x20] sm:$0x8]  ;;  %v13096_v40 = vshll.u32 %v10083_v47, 16  ;;  %13102 = vst [vmem:[#allocation30_spill] sm:$0xff] %v11229_v13 }
 0x2b9   : > { %v6310_v27 = vunpack.c.l.b16 %v5518_v36  ;;  %v5142_v61 = vrot.slane %v5141_v28, 4  ;;  %v6231_v28 = vunpack.c.l.b16 %v5139_v17  ;;  %v4593_v56 = vshrl.u32 %v4525_v26, 16 }
 0x2ba   : > { %v5774_v59 = vsel %vm8710_vm10, %v5769_v7, %v5773_v22  ;;  %v3755_v22 = vld [vmem:[#allocation3 + $0x100] sm:$0x8] }
 0x2bb   : > { %v6328_v35 = vpack.c.b16 %v6310_v27, %v6309_v18  ;;  %v6502_v20 = vunpack.c.l.b16 %v5774_v59  ;;  %v5147_v55 = vsel %vm8710_vm10, %v5142_v61, %v5146_v48  ;;  %v3756_v58 = vsel %vm10154_vm3, 0, %v3755_v22  ;;  %v3811_v48 = vld [vmem:[#allocation3 + $0x10c] sm:$0x1]  ;;  %v11217_v22 = vld [vmem:[#allocation3 + $0x14] sm:$0xf] }
 0x2bc   : > { %v6232_v36 = vunpack.c.l.b16 %v5147_v55  ;;  %3757 = vst [vmem:[#allocation3 + $0x100] sm:$0x8] %v3756_v58  ;;  %v13094_v27 = vshrl.u32 %v10083_v47, 16  ;;  %v4571_v61 = vshrl.u32 %v4522_v6, 16  ;;  %v13097_v18 = vshrl.u32 %v10182_v41, 16  ;;  %v6462_v47 = vpop.permute.xlu1 %6461 }
 0x2bd   : > { %6357 = vrot.lane.b32.xlu0 %v6328_v35, %s8577_s13  ;;  %v6520_v23 = vpack.c.b16 %v6502_v20, %v6501_v42  ;;  %v6682_v59 = vsel %vm3480_vm9, %v8477_v33, %v6270_v37  ;;  %v13098_v42 = vshll.u32 %v10075_v31, 16  ;;  %v4583_v55 = vrot.slane %v4578_v3, 4  ;;  %13099 = vst [vmem:[#allocation29_spill] sm:$0xff] %v11217_v22  ;;  %v4283_v33 = vld [vmem:[#allocation3 + $0x1c] sm:$0x1] }
 0x2be   : > { %v6249_v10 = vpack.c.b16 %v6232_v36, %v6231_v28  ;;  %v4587_v1 = vrot.slane %v13094_v27, 7  ;;  %v11209_v25 = vrot.slane %v13097_v18, 7  ;;  %v8030_v35 = vrot.slane %v4571_v61, 11 }
 0x2bf   : > { %8339 = vmatmul.msk.bf16.gmra.mxu3 %vm3480_vm9, %v6520_v23  ;;  %v4581_v20 = vor.u32 %v13098_v42, %v4578_v3  ;;  %v4528_v23 = vld [vmem:[#allocation3 + $0x30] sm:$0x8]  ;;  %v13100_v58 = vor.u32 %v10174_v24, %v10172_v15  ;;  %v8031_v26 = vrot.slane %v4593_v56, 11  ;;  %v13103_v37 = vshll.u32 %v10182_v41, 16 }
 0x2c0   : > { %6279 = vrot.lane.b32.xlu2 %v6249_v10, %s8575_s22  ;;  %v4590_v4 = vor.u32 %v13096_v40, %v4587_v1  ;;  %v3812_v10 = vsel %vm10092_vm1, 0, %v3811_v48  ;;  %v13101_v1 = vshrl.u32 %v10190_v34, 16  ;;  %v4615_v24 = vshrl.u32 %v4528_v23, 16 }
 0x2c1   : > { %v11222_v6 = vrot.slane %v13100_v58, 4  ;;  %3813 = vst [vmem:[#allocation3 + $0x10c] sm:$0x1] %v3812_v10  ;;  %v4603_v15 = vor.u32 %v13103_v37, %v11209_v25  ;;  %v4582_v40 = vsel %vm8744_vm11, %v8030_v35, %v4581_v20  ;;  %v12928_v18 = vshrl.u32 %v11217_v22, 16  ;;  %v3758_v10 = vld [vmem:[#allocation3 + $0x110] sm:$0x8] }
 0x2c2   : > { %v4591_v31 = vsel %vm8744_vm11, %v4583_v55, %v4590_v4  ;;  %v4609_v61 = vrot.slane %v13101_v1, 7  ;;  %v13104_v4 = vshrl.u32 %v10375_v14, 16  ;;  %v12927_v56 = vshll.u32 %v11217_v22, 16  ;;  %v11255_v58 = vld [vmem:[#allocation3 + $0x114] sm:$0xf] }
 0x2c3   : > { %v6350_v17 = vpop.permute.xlu0 %6349  ;;  %v12929_v41 = vshrl.u32 %v11229_v13, 16  ;;  %v4605_v35 = vrot.slane %v11209_v25, 4  ;;  %v13105_v42 = vshll.u32 %v10190_v34, 16  ;;  %v12930_v55 = vshll.u32 %v11229_v13, 16  ;;  %13106 = vst [vmem:[#allocation31_spill] sm:$0xff] %v11255_v58 }
 0x2c4   : > { %v3658_v57 = vpop.f32.mrf.mxu1  ;;  %v6720_v36 = vsel %vm6571_vm0, %v6682_v59, %v6350_v17  ;;  %v6044_v59 = vunpack.c.l.b16 %v4591_v31  ;;  %v4322_v23 = vshll.u32 %v4283_v33, 16  ;;  %v11259_v31 = vrot.slane %v4615_v24, 11  ;;  %v11263_v25 = vld [vmem:[#allocation3 + $0x118] sm:$0xf]  ;;  %v11318_v22 = vld [vmem:[#allocation3 + $0x4] sm:$0xf] }
 0x2c5   : > { %v3659_v7 = vadd.f32 %v11092_v29, %v3658_v57  ;;  %v6761_v27 = vsel %vm6604_vm6, %v6720_v36, %v6462_v47  ;;  %v5205_v57 = vld [vmem:[#allocation3 + $0x100] sm:$0x8]  ;;  %v4612_v20 = vor.u32 %v13105_v42, %v4609_v61  ;;  %v3759_v34 = vsel %vm10154_vm3, 0, %v3758_v10  ;;  %13107 = vst [vmem:[#allocation32_spill] sm:$0xff] %v11263_v25 }
 0x2c6   : > { %v5520_v36 = vshrl.u32 %v5205_v57, 16  ;;  %v13108_v61 = vshrl.u32 %v10384_v54, 16  ;;  %v12931_v33 = vshrl.u32 %v11255_v58, 16  ;;  %v6043_v57 = vunpack.c.l.b16 %v4582_v40  ;;  %3760 = vst [vmem:[#allocation3 + $0x110] sm:$0x8] %v3759_v34 }
 0x2c7   : > { %v3693_v28 = vmax.f32 %v3659_v7, 0.0  ;;  %7119 = vmatmul.bf16.gmra.mxu2 %v6761_v27  ;;  %v11238_v7 = vrot.slane %v13104_v4, 7  ;;  %v4604_v27 = vsel %vm8744_vm11, %v8031_v26, %v4603_v15  ;;  %v11275_v26 = vrot.slane %v12927_v56, 5  ;;  %13111 = vst [vmem:[#allocation34_spill] sm:$0xff] %v11318_v22 }
 0x2c8   : > { %v11279_v15 = vrot.slane %v12929_v41, 4  ;;  %v5577_v24 = vld [vmem:[#allocation3 + $0x10c] sm:$0x1]  ;;  %v11283_v4 = vrot.slane %v12930_v55, 5  ;;  %v11295_v40 = vpack.c.b16 %v6044_v59, %v6043_v57  ;;  %v11299_v34 = vsel %vm8744_vm11, %v4605_v35, %v4612_v20  ;;  %v11320_v59 = vld [vmem:[#allocation3 + $0x8] sm:$0xf] }
 0x2c9   : > { %v3847_v3 = vpack.c.bf16 %v3693_v28, %v3693_v28  ;;  %v11252_v28 = vld [vmem:[#allocation3 + $0x24] sm:$0xf]  ;;  %v11293_v41 = vld [vmem:[#allocation3 + $0x10c] sm:$0x1]  ;;  %v5785_v55 = vshll.u32 %v5577_v24, 16  ;;  %v11306_v17 = vrot.slane %v12931_v33, 7 }
 0x2ca   : > { %v3763_v20 = vld [vmem:[#allocation3 + $0xc] sm:$0x1]  ;;  %v13112_v35 = vshll.u32 %v10375_v14, 16  ;;  %v13119_v19 = vshrl.u32 %v11318_v22, 16  ;;  %v13120_v62 = vshll.u32 %v11318_v22, 16 }
 0x2cb   : > { %3880 = vst.msk [vmem:[#allocation3 + $0x104] sm:$0xf] %vm3695_vm2, %v3847_v3  ;;  %v4631_v3 = vrot.slane %v13108_v61, 7  ;;  %v3764_v61 = vsel %vm10092_vm1, 0, %v3763_v20  ;;  %v5554_v13 = vrot.slane %v11306_v17, 4 }
 0x2cc   : > { %v3660_v48 = vpop.f32.mrf.mxu1  ;;  %v11325_v57 = vor.u32 %v13112_v35, %v11238_v7  ;;  %3765 = vst [vmem:[#allocation3 + $0xc] sm:$0x1] %v3764_v61  ;;  %v4299_v9 = vrot.slane %v13120_v62, 5 }
 0x2cd   : > { %v3661_v47 = vadd.f32 %v11092_v29, %v3660_v48  ;;  %v11270_v29 = vrot.slane %v12928_v18, 4  ;;  %v11285_v48 = vrot.slane %v4322_v23, 5  ;;  %v11301_v23 = vunpack.c.l.b16 %v4604_v27 }
 0x2cf   : > { %v3694_v37 = vmax.f32 %v3661_v47, 0.0  ;;  %v11287_v47 = vrot.slane %v5520_v36, 11 }
 0x2d1   : > { %v3848_v42 = vpack.c.bf16 %v3694_v37, %v3694_v37 }
 0x2d2   : > { %v5206_v56 = vld [vmem:[#allocation3 + $0x104] sm:$0xf] }
 0x2d3   : > { %v11291_v18 = vld [vmem:[#allocation3 + $0x104] sm:$0xf]  ;;  %3881 = vst.msk [vmem:[#allocation3 + $0x108] sm:$0xf] %vm3695_vm2, %v3848_v42  ;;  %v5525_v36 = vshrl.u32 %v5206_v56, 16  ;;  %v5528_v37 = vshll.u32 %v5206_v56, 16 }
 0x2d4   : > { %13109 = vst [vmem:[#allocation33_spill] sm:$0xff] %v11291_v18  ;;  %v5158_v42 = vshll.u32 %v11293_v41, 16  ;;  %v13110_v56 = vshrl.u32 %v11263_v25, 16  ;;  %v5208_v41 = vld [vmem:[#allocation3 + $0x110] sm:$0x8]  ;;  %v13114_v45 = vshrl.u32 %v11291_v18, 16 }
 0x2d5   : > { %v5527_v27 = vrot.slane %v5525_v36, 7  ;;  %v5775_v1 = vrot.slane %v5525_v36, 4  ;;  %v5776_v10 = vrot.slane %v5528_v37, 5  ;;  %v11327_v36 = vrot.slane %v5785_v55, 5  ;;  %v4282_v22 = vld [vmem:[#allocation3 + $0xc] sm:$0x1] }
 0x2d6   : > { %v5558_v24 = vrot.slane %v13110_v56, 7  ;;  %v13113_v56 = vshll.u32 %v10384_v54, 16  ;;  %v5148_v14 = vrot.slane %v13114_v45, 4  ;;  %v13115_v35 = vshll.u32 %v11291_v18, 16 }
 0x2d7   : > { %v5530_v11 = vor.u32 %v5528_v37, %v5527_v27  ;;  %v5777_v60 = vor.u32 %v5776_v10, %v5775_v1  ;;  %v5542_v5 = vshrl.u32 %v5208_v41, 16  ;;  %v13117_v1 = vshll.u32 %v11255_v58, 16 }
 0x2d8   : > { %v11332_v33 = vor.u32 %v13113_v56, %v4631_v3  ;;  %v5149_v55 = vrot.slane %v13115_v35, 5  ;;  %v13118_v45 = vshll.u32 %v11263_v25, 16  ;;  %v4319_v41 = vor.u32 %v11279_v15, %v11283_v4 }
 0x2d9   : > { %v5552_v10 = vor.u32 %v13117_v1, %v11306_v17  ;;  %v5531_v17 = vsel %vm8744_vm11, %v11287_v47, %v5530_v11  ;;  %v5532_v1 = vrot.slane %v5527_v27, 4  ;;  %v5778_v25 = vrot.slane %v5777_v60, 4 }
 0x2da   : > { %v8498_v3 = vld [vmem:[#allocation3 + $0x104] sm:$0xff]  ;;  %v5561_v37 = vor.u32 %v13118_v45, %v5558_v24  ;;  %v5150_v24 = vor.u32 %v5149_v55, %v5148_v14  ;;  %v8061_v18 = vrot.slane %v5542_v5, 11  ;;  %v13121_v60 = vshll.u32 %v11320_v59, 16  ;;  %v11373_v55 = vpop.f32.mrf.mxu2 }
 0x2db   : > { %v5207_v56 = vld [vmem:[#allocation3 + $0x108] sm:$0xf]  ;;  %6471 = vrot.lane.b32.xlu1 %v8498_v3, %s8576_s12  ;;  %v4298_v3 = vrot.slane %v13119_v19, 4  ;;  %13123 = vst [vmem:[#allocation36_spill] sm:$0xff] %v11373_v55 }
 0x2dc   : > { %v11343_v46 = vld [vmem:[#allocation3 + $0x108] sm:$0xf]  ;;  %v5534_v20 = vshrl.u32 %v5207_v56, 16  ;;  %v5537_v61 = vshll.u32 %v5207_v56, 16  ;;  %v11369_v27 = vrot.slane %v13121_v60, 5  ;;  %v5562_v19 = vsel %vm8744_vm11, %v5554_v13, %v5561_v37 }
 0x2dd   : > { %13116 = vst [vmem:[#allocation35_spill] sm:$0xff] %v11343_v46  ;;  %v12959_v54 = vshrl.u32 %v11343_v46, 16  ;;  %v12958_v32 = vshll.u32 %v11343_v46, 16  ;;  %v5160_v46 = vrot.slane %v5158_v42, 5  ;;  %v5553_v42 = vsel %vm8744_vm11, %v8061_v18, %v5552_v10 }
 0x2de   : > { %v5536_v45 = vrot.slane %v5534_v20, 7  ;;  %v5779_v35 = vrot.slane %v5537_v61, 5  ;;  %v5781_v58 = vrot.slane %v5534_v20, 4  ;;  %v13122_v20 = vshrl.u32 %v11320_v59, 16 }
 0x2df   : > { %v5152_v15 = vrot.slane %v12958_v32, 5  ;;  %v5154_v56 = vrot.slane %v12959_v54, 4  ;;  %v8499_v32 = vld [vmem:[#allocation3 + $0x114] sm:$0xff]  ;;  %v5151_v54 = vrot.slane %v5150_v24, 4  ;;  %v11385_v24 = vld [vmem:[#allocation3 + $0x28] sm:$0xf]  ;;  %v4300_v37 = vor.u32 %v4299_v9, %v4298_v3  ;;  %v6272_v3 = vpop.permute.xlu2 %6271 }
 0x2e0   : > { %v5539_v11 = vor.u32 %v5537_v61, %v5536_v45  ;;  %v5782_v47 = vor.u32 %v5781_v58, %v5779_v35  ;;  %v4304_v14 = vrot.slane %v13122_v20, 4  ;;  %v6311_v58 = vunpack.c.l.b16 %v5531_v17 }
 0x2e1   : > { %v5155_v5 = vor.u32 %v5154_v56, %v5152_v15  ;;  %v5780_v61 = vsel %vm8710_vm10, %v5778_v25, %v5779_v35  ;;  %v5153_v20 = vsel %vm8710_vm10, %v5151_v54, %v5152_v15  ;;  %v12982_v10 = vshrl.u32 %v11385_v24, 16 }
 0x2e2   : > { %v5540_v62 = vsel %vm8744_vm11, %v5532_v1, %v5539_v11  ;;  %v5783_v45 = vrot.slane %v5782_v47, 4  ;;  %v4305_v17 = vor.u32 %v4304_v14, %v11369_v27  ;;  %v4308_v1 = vshll.u32 %v4282_v22, 16  ;;  %v11396_v47 = vld [vmem:[#allocation3 + $0x38] sm:$0xf] }
 0x2e3   : > { %v6312_v60 = vunpack.c.l.b16 %v5540_v62  ;;  %v5156_v55 = vrot.slane %v5155_v5, 4  ;;  %6473 = vrot.lane.b32.xlu1 %v8499_v32, %s8576_s12  ;;  %v6503_v35 = vunpack.c.l.b16 %v5780_v61  ;;  %v6233_v15 = vunpack.c.l.b16 %v5153_v20 }
 0x2e4   : > { %v5788_v13 = vsel %vm8710_vm10, %v5783_v45, %v11327_v36  ;;  %v12981_v11 = vshll.u32 %v11385_v24, 16  ;;  %v6313_v22 = vunpack.c.l.b16 %v5553_v42  ;;  %v6314_v36 = vunpack.c.l.b16 %v5562_v19 }
 0x2e5   : > { %v6329_v25 = vpack.c.b16 %v6312_v60, %v6311_v58  ;;  %v6504_v56 = vunpack.c.l.b16 %v5788_v13  ;;  %v5161_v54 = vsel %vm8710_vm10, %v5156_v55, %v5160_v46  ;;  %v4320_v32 = vrot.slane %v4319_v41, 4  ;;  %v8478_v46 = vld [vmem:[#allocation3 + $0xb4] sm:$0xff] }
 0x2e6   : > { %v6234_v18 = vunpack.c.l.b16 %v5161_v54  ;;  %v4301_v5 = vrot.slane %v4300_v37, 4  ;;  %v4306_v62 = vrot.slane %v4305_v17, 4  ;;  %v4310_v58 = vrot.slane %v4308_v1, 5  ;;  %v8507_v13 = vld [vmem:[%s12768_s3 + $0x38] sm:$0xff]  ;;  %v11427_v37 = vpop.f32.mrf.mxu2  ;;  %v4531_v17 = vld [vmem:[#allocation3 + $0x40] sm:$0x8] }
 0x2e7   : > { %6359 = vrot.lane.b32.xlu0 %v6329_v25, %s8577_s13  ;;  %v6521_v9 = vpack.c.b16 %v6504_v56, %v6503_v35  ;;  %v13124_v55 = vor.u32 %v11275_v26, %v11270_v29  ;;  %v12980_v45 = vshll.u32 %v11252_v28, 16  ;;  %v12978_v60 = vshrl.u32 %v11396_v47, 16  ;;  %v11437_v35 = vld [vmem:[#allocation3 + $0x34] sm:$0xf]  ;;  %v6464_v56 = vpop.permute.xlu1 %6463  ;;  %6977 = vmatpush.bf16.msrb.mxu1 %v8507_v13 }
 0x2e8   : > { %v6250_v14 = vpack.c.b16 %v6234_v18, %v6233_v15  ;;  %v12965_v20 = vshll.u32 %v11396_v47, 16  ;;  %v4626_v41 = vsel %vm8744_vm11, %v11259_v31, %v11325_v57  ;;  %v13125_v19 = vrot.slane %v11238_v7, 4 }
 0x2e9   : > { %8340 = vmatmul.msk.bf16.gmra.mxu3 %vm3480_vm9, %v6521_v9  ;;  %v4315_v61 = vrot.slane %v13124_v55, 4  ;;  %v11420_v26 = vrot.slane %v12981_v11, 5  ;;  %v4332_v42 = vrot.slane %v12982_v10, 4  ;;  %v6685_v31 = vsel %vm3480_vm9, %v8478_v46, %v6272_v3 }
 0x2ea   : > { %6281 = vrot.lane.b32.xlu2 %v6250_v14, %s8575_s22  ;;  %v11416_v29 = vsel %vm8744_vm11, %v13125_v19, %v11332_v33  ;;  %v6330_v7 = vpack.c.b16 %v6314_v36, %v6313_v22  ;;  %v13126_v1 = vshrl.u32 %v11252_v28, 16  ;;  %v4303_v15 = vsel %vm8710_vm10, %v4301_v5, %v11369_v27  ;;  %v4284_v22 = vld [vmem:[#allocation3 + $0x2c] sm:$0x1]  ;;  %v8452_v14 = vld [vmem:[#allocation3 + $0x4] sm:$0xff] }
 0x2eb   : > { %v4317_v33 = vsel %vm8710_vm10, %v4315_v61, %v11283_v4  ;;  %v4311_v18 = vsel %vm8710_vm10, %v4306_v62, %v4310_v58  ;;  %v4325_v4 = vsel %vm8710_vm10, %v4320_v32, %v11285_v48  ;;  %6091 = vrot.lane.b32.xlu1 %v11295_v40, %s8576_s12  ;;  %v4327_v36 = vrot.slane %v12980_v45, 5  ;;  %v4285_v62 = vld [vmem:[#allocation3 + $0x3c] sm:$0x1] }
 0x2ec   : > { %v11435_v25 = vrot.slane %v13126_v1, 4  ;;  %v11455_v27 = vrot.slane %v12965_v20, 5  ;;  %v4346_v3 = vrot.slane %v12978_v60, 4  ;;  %v4637_v48 = vshrl.u32 %v4531_v17, 16 }
 0x2ed   : > { %v6352_v57 = vpop.permute.xlu0 %6351  ;;  %v4333_v32 = vor.u32 %v4332_v42, %v11420_v26  ;;  %v12977_v40 = vshrl.u32 %v11437_v35, 16  ;;  %v12964_v5 = vshll.u32 %v11437_v35, 16  ;;  %v5963_v58 = vunpack.c.l.b16 %v4303_v15 }
 0x2ee   : > { %v6722_v54 = vsel %vm6571_vm0, %v6685_v31, %v6352_v57  ;;  %v5964_v46 = vunpack.c.l.b16 %v4311_v18  ;;  %v13127_v55 = vshrl.u32 %v10455_v39, 16  ;;  %v13128_v19 = vshrl.u32 %v10458_v38, 16  ;;  %v11476_v18 = vld [vmem:[#allocation3 + $0x44] sm:$0xf] }
 0x2ef   : > { %v6764_v9 = vsel %vm6604_vm6, %v6722_v54, %v6464_v56  ;;  %6361 = vrot.lane.b32.xlu0 %v6330_v7, %s8577_s13  ;;  %v13129_v31 = vunpack.c.l.b16 %v11299_v34  ;;  %v6047_v42 = vunpack.c.l.b16 %v4626_v41  ;;  %v6048_v17 = vunpack.c.l.b16 %v11416_v29  ;;  %v11486_v29 = vpop.f32.mrf.mxu2 }
 0x2f0   : > { %7124 = vmatmul.bf16.gmra.mxu2 %v6764_v9  ;;  %v4644_v61 = vrot.slane %v13127_v55, 7  ;;  %v4653_v13 = vrot.slane %v13128_v19, 7  ;;  %v4336_v1 = vshll.u32 %v4284_v22, 16  ;;  %v11471_v56 = vunpack.c.l.b16 %v4317_v33  ;;  %v11478_v9 = vld [vmem:[#allocation3 + $0x48] sm:$0xf] }
 0x2f1   : > { %v6076_v57 = vpack.c.b16 %v13129_v31, %v11301_v23  ;;  %v11473_v54 = vunpack.c.l.b16 %v4325_v4  ;;  %v4347_v7 = vor.u32 %v4346_v3, %v11455_v27  ;;  %v4350_v15 = vshll.u32 %v4285_v62, 16 }
 0x2f2   : > { %5931 = vrot.lane.b32.xlu2 %v8452_v14, %s8575_s22  ;;  %v8033_v55 = vrot.slane %v4637_v48, 11  ;;  %v4328_v34 = vor.u32 %v4327_v36, %v11435_v25  ;;  %v4340_v23 = vrot.slane %v12977_v40, 4  ;;  %v4341_v41 = vrot.slane %v12964_v5, 5 }
 0x2f3   : > { %v5995_v33 = vpack.c.b16 %v5964_v46, %v5963_v58  ;;  %v13130_v4 = vshll.u32 %v10455_v39, 16  ;;  %v13131_v3 = vshll.u32 %v10458_v38, 16  ;;  %v4334_v19 = vrot.slane %v4333_v32, 4  ;;  %6093 = vrot.lane.b32.xlu1 %v6076_v57, %s8576_s12  ;;  %v4534_v46 = vld [vmem:[#allocation3 + $0x50] sm:$0x8] }
 0x2f4   : > { %v4338_v14 = vrot.slane %v4336_v1, 5  ;;  %v12968_v48 = vshrl.u32 %v11476_v18, 16  ;;  %v12966_v25 = vshll.u32 %v11476_v18, 16  ;;  %v12967_v36 = vshll.u32 %v11478_v9, 16 }
 0x2f5   : > { %v4647_v22 = vor.u32 %v13130_v4, %v4644_v61  ;;  %v4656_v62 = vor.u32 %v13131_v3, %v4653_v13  ;;  %v4649_v31 = vrot.slane %v4644_v61, 4  ;;  %v4348_v5 = vrot.slane %v4347_v7, 4  ;;  %v8453_v4 = vld [vmem:[#allocation3 + $0x14] sm:$0xff] }
 0x2f6   : > { %v4352_v20 = vrot.slane %v4350_v15, 5  ;;  %v12975_v58 = vshrl.u32 %v11478_v9, 16  ;;  %v13132_v39 = vor.u32 %v10179_v63, %v10188_v52  ;;  %v6077_v32 = vpack.c.b16 %v6048_v17, %v6047_v42  ;;  %v6274_v15 = vpop.permute.xlu2 %6273 }
 0x2f7   : > { %v4342_v13 = vor.u32 %v4341_v41, %v4340_v23  ;;  %6011 = vrot.lane.b32.xlu0 %v5995_v33, %s8577_s13  ;;  %v5996_v1 = vpack.c.b16 %v11473_v54, %v11471_v56  ;;  %v4648_v61 = vsel %vm8744_vm11, %v8033_v55, %v4647_v22  ;;  %v4657_v57 = vsel %vm8744_vm11, %v4649_v31, %v4656_v62  ;;  %v5563_v54 = vld [vmem:[#allocation3 + $0x2c] sm:$0x1]  ;;  %v8479_v55 = vld [vmem:[#allocation3 + $0xc4] sm:$0xff] }
 0x2f8   : > { %v11500_v38 = vrot.slane %v13132_v39, 4  ;;  %v4329_v7 = vrot.slane %v4328_v34, 4  ;;  %v4339_v63 = vsel %vm8710_vm10, %v4334_v19, %v4338_v14  ;;  %v4354_v42 = vrot.slane %v12968_v48, 4  ;;  %v8506_v39 = vld [vmem:[%s12768_s3 + $0x30] sm:$0xff] }
 0x2f9   : > { %v4355_v17 = vrot.slane %v12966_v25, 5  ;;  %v11517_v56 = vrot.slane %v12967_v36, 5  ;;  %v4659_v23 = vshrl.u32 %v4534_v46, 16  ;;  %v13133_v34 = vshrl.u32 %v10544_v44, 16  ;;  %v4537_v25 = vld [vmem:[#allocation3 + $0x60] sm:$0x8]  ;;  %v6466_v36 = vpop.permute.xlu1 %6465  ;;  %6978 = vmatpush.bf16.msrb.mxu1 %v8506_v39 }
 0x2fa   : > { %v4353_v33 = vsel %vm8710_vm10, %v4348_v5, %v4352_v20  ;;  %v4360_v22 = vrot.slane %v12975_v58, 4  ;;  %5933 = vrot.lane.b32.xlu2 %v8453_v4, %s8575_s22  ;;  %v6049_v3 = vunpack.c.l.b16 %v4648_v61  ;;  %v4331_v62 = vsel %vm8710_vm10, %v4329_v7, %v11420_v26  ;;  %v4286_v4 = vld [vmem:[#allocation3 + $0x4c] sm:$0x1]  ;;  %v8454_v39 = vld [vmem:[#allocation3 + $0x24] sm:$0xff] }
 0x2fb   : > { %v4666_v41 = vrot.slane %v13133_v34, 7  ;;  %v13134_v19 = vshrl.u32 %v10567_v49, 16  ;;  %v4343_v31 = vrot.slane %v4342_v13, 4  ;;  %v6688_v20 = vsel %vm3480_vm9, %v8479_v55, %v6274_v15  ;;  %6095 = vrot.lane.b32.xlu1 %v6077_v32, %s8576_s12 }
 0x2fc   : > { %v6050_v5 = vunpack.c.l.b16 %v4657_v57  ;;  %v5968_v46 = vunpack.c.l.b16 %v4339_v63  ;;  %v5589_v61 = vshll.u32 %v5563_v54, 16  ;;  %v11539_v13 = vunpack.c.l.b16 %v4353_v33 }
 0x2fd   : > { %v4675_v14 = vrot.slane %v13134_v19, 7  ;;  %v4345_v26 = vsel %vm8710_vm10, %v4343_v31, %v11455_v27  ;;  %v4356_v7 = vor.u32 %v4355_v17, %v4354_v42  ;;  %v11541_v19 = vpop.f32.mrf.mxu2  ;;  %v8034_v15 = vrot.slane %v4659_v23, 11 }
 0x2fe   : > { %13135 = vst [vmem:[#allocation37_spill] sm:$0xff] %v11541_v19  ;;  %v13136_v63 = vshll.u32 %v10544_v44, 16  ;;  %v4361_v55 = vor.u32 %v4360_v22, %v11517_v56  ;;  %v13137_v27 = vshll.u32 %v10567_v49, 16  ;;  %v4681_v31 = vshrl.u32 %v4537_v25, 16  ;;  %v4567_v19 = vld [vmem:[#allocation3 + $0x100] sm:$0x8] }
 0x2ff   : > { %v6354_v34 = vpop.permute.xlu0 %6353  ;;  %v4364_v42 = vshll.u32 %v4286_v4, 16  ;;  %6013 = vrot.lane.b32.xlu0 %v5996_v1, %s8577_s13  ;;  %v11551_v17 = vunpack.c.l.b16 %v4345_v26  ;;  %v13138_v32 = vshrl.u32 %v10641_v16, 16  ;;  %v5591_v23 = vrot.slane %v5589_v61, 5  ;;  %v11563_v4 = vld [vmem:[#allocation3 + $0x58] sm:$0xf] }
 0x300   : > { %v6724_v48 = vsel %vm6571_vm0, %v6688_v20, %v6354_v34  ;;  %v4669_v54 = vor.u32 %v13136_v63, %v4666_v41  ;;  %v5967_v20 = vunpack.c.l.b16 %v4331_v62  ;;  %v4678_v33 = vor.u32 %v13137_v27, %v4675_v14 }
 0x301   : > { %v6767_v57 = vsel %vm6604_vm6, %v6724_v48, %v6466_v36  ;;  %v4688_v48 = vrot.slane %v13138_v32, 7  ;;  %v13139_v36 = vshrl.u32 %v10650_v12, 16  ;;  %v6078_v22 = vpack.c.b16 %v6050_v5, %v6049_v3 }
 0x302   : > { %7129 = vmatmul.bf16.gmra.mxu2 %v6767_v57  ;;  %v5997_v62 = vpack.c.b16 %v5968_v46, %v5967_v20  ;;  %v4671_v34 = vrot.slane %v4666_v41, 4  ;;  %v11557_v57 = vld [vmem:[#allocation3 + $0x54] sm:$0xf]  ;;  %v4670_v49 = vsel %vm8744_vm11, %v8034_v15, %v4669_v54  ;;  %v5998_v25 = vpack.c.b16 %v11539_v13, %v11551_v17  ;;  %5935 = vrot.lane.b32.xlu2 %v8454_v39, %s8575_s22  ;;  %v11568_v41 = vld [vmem:[#allocation3 + $0x68] sm:$0xf] }
 0x303   : > { %v4697_v44 = vrot.slane %v13139_v36, 7  ;;  %v4357_v1 = vrot.slane %v4356_v7, 4  ;;  %v4362_v14 = vrot.slane %v4361_v55, 4  ;;  %v8035_v3 = vrot.slane %v4681_v31, 11  ;;  %v11579_v20 = vld [vmem:[#allocation3 + $0x64] sm:$0xf]  ;;  %6097 = vrot.lane.b32.xlu1 %v6078_v22, %s8576_s12 }
 0x304   : > { %v4679_v61 = vsel %vm8744_vm11, %v4671_v34, %v4678_v33  ;;  %v4366_v5 = vrot.slane %v4364_v42, 5  ;;  %v5592_v46 = vsel %vm8710_vm10, %v11500_v38, %v5591_v23  ;;  %v13140_v26 = vshll.u32 %v10641_v16, 16 }
 0x305   : > { %v13141_v7 = vshll.u32 %v10650_v12, 16  ;;  %v12971_v54 = vshrl.u32 %v11557_v57, 16  ;;  %v12969_v55 = vshll.u32 %v11557_v57, 16  ;;  %v12973_v27 = vshrl.u32 %v11563_v4, 16  ;;  %v11592_v12 = vpop.f32.mrf.mxu2 }
 0x306   : > { %v4691_v15 = vor.u32 %v13140_v26, %v4688_v48  ;;  %v12970_v33 = vshll.u32 %v11563_v4, 16  ;;  %v13142_v38 = vsel %vm8710_vm10, %v11222_v6, %v10188_v52  ;;  %v11590_v31 = vunpack.c.l.b16 %v5592_v46  ;;  %13143 = vst [vmem:[#allocation38_spill] sm:$0xff] %v11592_v12 }
 0x307   : > { %v4700_v63 = vor.u32 %v13141_v7, %v4697_v44  ;;  %v11588_v16 = vunpack.c.l.b16 %v13142_v38  ;;  %v6052_v42 = vunpack.c.l.b16 %v4679_v61  ;;  %v4693_v32 = vrot.slane %v4688_v48, 4  ;;  %6015 = vrot.lane.b32.xlu0 %v5997_v62, %s8577_s13  ;;  %v4288_v7 = vld [vmem:[#allocation3 + $0x6c] sm:$0x1] }
 0x308   : > { %v12974_v36 = vshrl.u32 %v11568_v41, 16  ;;  %v12972_v44 = vshll.u32 %v11568_v41, 16  ;;  %v6051_v23 = vunpack.c.l.b16 %v4670_v49  ;;  %v4359_v39 = vsel %vm8710_vm10, %v4357_v1, %v11517_v56  ;;  %v4287_v49 = vld [vmem:[#allocation3 + $0x5c] sm:$0x1]  ;;  %v6276_v56 = vpop.permute.xlu2 %6275  ;;  %v8455_v1 = vld [vmem:[#allocation3 + $0x34] sm:$0xff] }
 0x309   : > { %v12976_v52 = vshrl.u32 %v11579_v20, 16  ;;  %v4692_v22 = vsel %vm8744_vm11, %v8035_v3, %v4691_v15  ;;  %v4701_v48 = vsel %vm8744_vm11, %v4693_v32, %v4700_v63  ;;  %v4367_v34 = vsel %vm8710_vm10, %v4362_v14, %v4366_v5  ;;  %v8480_v15 = vld [vmem:[#allocation3 + $0xd4] sm:$0xff] }
 0x30a   : > { %v12979_v61 = vshll.u32 %v11579_v20, 16  ;;  %v4368_v46 = vrot.slane %v12971_v54, 4  ;;  %v4369_v62 = vrot.slane %v12969_v55, 5  ;;  %v11617_v3 = vrot.slane %v12970_v33, 5  ;;  %5937 = vrot.lane.b32.xlu2 %v8455_v1, %s8575_s22  ;;  %v4540_v33 = vld [vmem:[#allocation3 + $0x70] sm:$0x8]  ;;  %v6468_v1 = vpop.permute.xlu1 %6467 }
 0x30b   : > { %v4374_v26 = vrot.slane %v12973_v27, 4  ;;  %v6079_v14 = vpack.c.b16 %v6052_v42, %v6051_v23  ;;  %v11621_v5 = vunpack.c.l.b16 %v4359_v39  ;;  %v11625_v63 = vrot.slane %v12972_v44, 5  ;;  %v8505_v23 = vld [vmem:[%s12768_s3 + $0x28] sm:$0xff] }
 0x30c   : > { %v4388_v38 = vrot.slane %v12974_v36, 4  ;;  %v6053_v32 = vunpack.c.l.b16 %v4692_v22  ;;  %v11630_v55 = vunpack.c.l.b16 %v4367_v34  ;;  %v4378_v54 = vshll.u32 %v4287_v49, 16  ;;  %v11642_v34 = vld [vmem:[#allocation3 + $0x74] sm:$0xf]  ;;  %v11644_v49 = vld [vmem:[#allocation3 + $0x78] sm:$0xf]  ;;  %6979 = vmatpush.bf16.msrb.mxu1 %v8505_v23 }
 0x30d   : > { %v4382_v42 = vrot.slane %v12976_v52, 4  ;;  %v6691_v39 = vsel %vm3480_vm9, %v8480_v15, %v6276_v56  ;;  %v6054_v44 = vunpack.c.l.b16 %v4701_v48  ;;  %v13144_v36 = vshrl.u32 %v10735_v2, 16  ;;  %6099 = vrot.lane.b32.xlu1 %v6079_v14, %s8576_s12 }
 0x30e   : > { %v4383_v22 = vrot.slane %v12979_v61, 5  ;;  %v4370_v40 = vor.u32 %v4369_v62, %v4368_v46  ;;  %v4375_v60 = vor.u32 %v4374_v26, %v11617_v3  ;;  %v4392_v6 = vshll.u32 %v4288_v7, 16  ;;  %v11657_v26 = vpop.f32.mrf.mxu2 }
 0x30f   : > { %v6356_v27 = vpop.permute.xlu0 %6355  ;;  %v4719_v58 = vrot.slane %v13144_v36, 7  ;;  %v4703_v36 = vshrl.u32 %v4540_v33, 16  ;;  %v13145_v56 = vshrl.u32 %v10722_v50, 16  ;;  %v4389_v61 = vor.u32 %v4388_v38, %v11625_v63  ;;  %13146 = vst [vmem:[#allocation39_spill] sm:$0xff] %v11657_v26  ;;  %6017 = vrot.lane.b32.xlu0 %v5998_v25, %s8577_s13  ;;  %v8456_v33 = vld [vmem:[#allocation3 + $0x44] sm:$0xff] }
 0x310   : > { %v6726_v52 = vsel %vm6571_vm0, %v6691_v39, %v6356_v27  ;;  %v12992_v45 = vshrl.u32 %v11642_v34, 16  ;;  %v12991_v27 = vshll.u32 %v11642_v34, 16  ;;  %v5999_v14 = vpack.c.b16 %v11630_v55, %v11621_v5  ;;  %v11669_v25 = vld [vmem:[#allocation3 + $0x84] sm:$0xf] }
 0x311   : > { %v6770_v48 = vsel %vm6604_vm6, %v6726_v52, %v6468_v1  ;;  %v4710_v15 = vrot.slane %v13145_v56, 7  ;;  %v6080_v52 = vpack.c.b16 %v6054_v44, %v6053_v32  ;;  %v13147_v7 = vshll.u32 %v10735_v2, 16  ;;  %v4543_v56 = vld [vmem:[#allocation3 + $0x80] sm:$0x8]  ;;  %v4289_v32 = vld [vmem:[#allocation3 + $0x7c] sm:$0x1] }
 0x312   : > { %7134 = vmatmul.bf16.gmra.mxu2 %v6770_v48  ;;  %v4384_v23 = vor.u32 %v4383_v22, %v4382_v42  ;;  %v4371_v39 = vrot.slane %v4370_v40, 4  ;;  %v4376_v1 = vrot.slane %v4375_v60, 4  ;;  %v4380_v48 = vrot.slane %v4378_v54, 5  ;;  %5939 = vrot.lane.b32.xlu2 %v8456_v33, %s8575_s22 }
 0x313   : > { %v4722_v38 = vor.u32 %v13147_v7, %v4719_v58  ;;  %v4394_v11 = vrot.slane %v4392_v6, 5  ;;  %v8036_v10 = vrot.slane %v4703_v36, 11  ;;  %v13148_v46 = vshll.u32 %v10722_v50, 16 }
 0x314   : > { %v4715_v13 = vrot.slane %v4710_v15, 4  ;;  %v4390_v17 = vrot.slane %v4389_v61, 4  ;;  %v4396_v2 = vrot.slane %v12992_v45, 4  ;;  %v4397_v40 = vrot.slane %v12991_v27, 5  ;;  %v11832_v45 = vld [vmem:[#allocation3 + $0xb4] sm:$0xf] }
 0x315   : > { %v4713_v62 = vor.u32 %v13148_v46, %v4710_v15  ;;  %v13149_v60 = vshll.u32 %v11644_v49, 16  ;;  %v13150_v54 = vshrl.u32 %v11644_v49, 16  ;;  %v4725_v44 = vshrl.u32 %v4543_v56, 16  ;;  %v11691_v15 = vld [vmem:[#allocation3 + $0x88] sm:$0xf]  ;;  %6101 = vrot.lane.b32.xlu1 %v6080_v52, %s8576_s12 }
 0x316   : > { %v4723_v55 = vsel %vm8744_vm11, %v4715_v13, %v4722_v38  ;;  %v13151_v6 = vshrl.u32 %v10790_v43, 16  ;;  %v4385_v5 = vrot.slane %v4384_v23, 4  ;;  %v4373_v42 = vsel %vm8710_vm10, %v4371_v39, %v11617_v3 }
 0x317   : > { %v11678_v58 = vrot.slane %v13149_v60, 5  ;;  %v4402_v50 = vrot.slane %v13150_v54, 4  ;;  %v13152_v22 = vshrl.u32 %v10793_v0, 16  ;;  %v12989_v46 = vshrl.u32 %v11669_v25, 16  ;;  %6019 = vrot.lane.b32.xlu0 %v5999_v14, %s8577_s13  ;;  %v11720_v54 = vpop.f32.mrf.mxu2 }
 0x318   : > { %v4732_v61 = vrot.slane %v13151_v6, 7  ;;  %v12983_v33 = vshll.u32 %v11669_v25, 16  ;;  %v4714_v7 = vsel %vm8744_vm11, %v8036_v10, %v4713_v62  ;;  %v4381_v38 = vsel %vm8710_vm10, %v4376_v1, %v4380_v48  ;;  %13155 = vst [vmem:[#allocation40_spill] sm:$0xff] %v11720_v54 }
 0x319   : > { %v4741_v36 = vrot.slane %v13152_v22, 7  ;;  %v4387_v3 = vsel %vm8710_vm10, %v4385_v5, %v11625_v63  ;;  %v4395_v23 = vsel %vm8710_vm10, %v4390_v17, %v4394_v11  ;;  %v6056_v39 = vunpack.c.l.b16 %v4723_v55  ;;  %v8504_v63 = vld [vmem:[%s12768_s3 + $0x20] sm:$0xff]  ;;  %v8457_v11 = vld [vmem:[#allocation3 + $0x54] sm:$0xff] }
 0x31a   : > { %v4398_v56 = vor.u32 %v4397_v40, %v4396_v2  ;;  %v4403_v13 = vor.u32 %v4402_v50, %v11678_v58  ;;  %v4406_v60 = vshll.u32 %v4289_v32, 16  ;;  %v8037_v52 = vrot.slane %v4725_v44, 11  ;;  %6980 = vmatpush.bf16.msrb.mxu1 %v8504_v63  ;;  %5941 = vrot.lane.b32.xlu2 %v8457_v11, %s8575_s22 }
 0x31b   : > { %v13153_v10 = vshll.u32 %v10790_v43, 16  ;;  %v12990_v1 = vshrl.u32 %v11691_v15, 16  ;;  %v12984_v48 = vshll.u32 %v11691_v15, 16  ;;  %v6055_v17 = vunpack.c.l.b16 %v4714_v7  ;;  %v4546_v7 = vld [vmem:[#allocation3 + $0x90] sm:$0x8] }
 0x31c   : > { %v13154_v2 = vshll.u32 %v10793_v0, 16  ;;  %v4410_v14 = vrot.slane %v12989_v46, 4  ;;  %v4411_v43 = vrot.slane %v12983_v33, 5  ;;  %v5973_v50 = vunpack.c.l.b16 %v4373_v42 }
 0x31d   : > { %v4735_v62 = vor.u32 %v13153_v10, %v4732_v61  ;;  %v5974_v55 = vunpack.c.l.b16 %v4381_v38  ;;  %v11722_v44 = vunpack.c.l.b16 %v4387_v3  ;;  %v11724_v6 = vunpack.c.l.b16 %v4395_v23 }
 0x31e   : > { %v4744_v40 = vor.u32 %v13154_v2, %v4741_v36  ;;  %v6081_v5 = vpack.c.b16 %v6056_v39, %v6055_v17  ;;  %v4737_v0 = vrot.slane %v4732_v61, 4  ;;  %v4399_v32 = vrot.slane %v4398_v56, 4  ;;  %v4549_v17 = vld [vmem:[#allocation3 + $0xa0] sm:$0x8]  ;;  %v11745_v2 = vld [vmem:[#allocation3 + $0x94] sm:$0xf] }
 0x31f   : > { %v4404_v22 = vrot.slane %v4403_v13, 4  ;;  %v4736_v36 = vsel %vm8744_vm11, %v8037_v52, %v4735_v62  ;;  %v4408_v10 = vrot.slane %v4406_v60, 5  ;;  %v4414_v42 = vrot.slane %v12984_v48, 5  ;;  %v4290_v13 = vld [vmem:[#allocation3 + $0x8c] sm:$0x1] }
 0x320   : > { %v4416_v38 = vrot.slane %v12990_v1, 4  ;;  %v4745_v3 = vsel %vm8744_vm11, %v4737_v0, %v4744_v40  ;;  %v13156_v23 = vshrl.u32 %v10872_v8, 16  ;;  %v13157_v61 = vshrl.u32 %v10878_v51, 16  ;;  %6103 = vrot.lane.b32.xlu1 %v6081_v5, %s8576_s12 }
 0x321   : > { %v4412_v63 = vor.u32 %v4411_v43, %v4410_v14  ;;  %v6000_v60 = vpack.c.b16 %v5974_v55, %v5973_v50  ;;  %v6001_v52 = vpack.c.b16 %v11724_v6, %v11722_v44  ;;  %v4747_v62 = vshrl.u32 %v4546_v7, 16  ;;  %v11748_v43 = vld [vmem:[#allocation3 + $0x98] sm:$0xf]  ;;  %v8458_v50 = vld [vmem:[#allocation3 + $0x64] sm:$0xff] }
 0x322   : > { %v4754_v39 = vrot.slane %v13156_v23, 7  ;;  %v4763_v56 = vrot.slane %v13157_v61, 7  ;;  %v4401_v11 = vsel %vm8710_vm10, %v4399_v32, %v11678_v58  ;;  %v6057_v40 = vunpack.c.l.b16 %v4736_v36  ;;  %5943 = vrot.lane.b32.xlu2 %v8458_v50, %s8575_s22 }
 0x323   : > { %6021 = vrot.lane.b32.xlu0 %v6000_v60, %s8577_s13  ;;  %v6058_v0 = vunpack.c.l.b16 %v4745_v3  ;;  %v4417_v23 = vor.u32 %v4416_v38, %v4414_v42  ;;  %v4420_v14 = vshll.u32 %v4290_v13, 16  ;;  %v13158_v55 = vshll.u32 %v10872_v8, 16 }
 0x324   : > { %v13159_v6 = vshll.u32 %v10878_v51, 16  ;;  %v4409_v58 = vsel %vm8710_vm10, %v4404_v22, %v4408_v10  ;;  %v4413_v32 = vrot.slane %v4412_v63, 4  ;;  %v4769_v7 = vshrl.u32 %v4549_v17, 16 }
 0x325   : > { %v4757_v44 = vor.u32 %v13158_v55, %v4754_v39  ;;  %v13160_v61 = vshrl.u32 %v10939_v21, 16  ;;  %v12987_v38 = vshrl.u32 %v11745_v2, 16  ;;  %v12985_v3 = vshll.u32 %v11745_v2, 16 }
 0x326   : > { %v4766_v5 = vor.u32 %v13159_v6, %v4763_v56  ;;  %v8038_v13 = vrot.slane %v4747_v62, 11  ;;  %v4759_v8 = vrot.slane %v4754_v39, 4  ;;  %v12988_v60 = vshrl.u32 %v11748_v43, 16  ;;  %v11763_v56 = vpop.f32.mrf.mxu2 }
 0x327   : > { %v4776_v36 = vrot.slane %v13160_v61, 7  ;;  %v12986_v51 = vshll.u32 %v11748_v43, 16  ;;  %13161 = vst [vmem:[#allocation41_spill] sm:$0xff] %v11763_v56  ;;  %v6082_v22 = vpack.c.b16 %v6058_v0, %v6057_v40  ;;  %v11765_v10 = vunpack.c.l.b16 %v4409_v58  ;;  %v13162_v61 = vld [vmem:[#allocation18_spill] sm:$0xff] }
 0x328   : > { %v4418_v63 = vrot.slane %v4417_v23, 4  ;;  %v4422_v17 = vrot.slane %v4420_v14, 5  ;;  %v4767_v55 = vsel %vm8744_vm11, %v4759_v8, %v4766_v5  ;;  %v5977_v6 = vunpack.c.l.b16 %v4401_v11  ;;  %v8503_v11 = vld [vmem:[%s12768_s3 + $0x18] sm:$0xff] }
 0x329   : > { %v13163_v33 = vshrl.u32 %v13162_v61, 16  ;;  %v4415_v39 = vsel %vm8710_vm10, %v4413_v32, %v4414_v42  ;;  %6105 = vrot.lane.b32.xlu1 %v6082_v22, %s8576_s12  ;;  %v8039_v62 = vrot.slane %v4769_v7, 11  ;;  %v13164_v48 = vshll.u32 %v10939_v21, 16  ;;  %v4291_v14 = vld [vmem:[#allocation3 + $0x9c] sm:$0x1]  ;;  %6981 = vmatpush.bf16.msrb.mxu1 %v8503_v11 }
 0x32a   : > { %v4424_v0 = vrot.slane %v12987_v38, 4  ;;  %v4425_v23 = vrot.slane %v12985_v3, 5  ;;  %v4758_v42 = vsel %vm8744_vm11, %v8038_v13, %v4757_v44  ;;  %v11789_v21 = vrot.slane %v12986_v51, 5  ;;  %v11797_v7 = vld [vmem:[#allocation3 + $0xa4] sm:$0xf]  ;;  %v8459_v44 = vld [vmem:[#allocation3 + $0x74] sm:$0xff] }
 0x32b   : > { %v4785_v50 = vrot.slane %v13163_v33, 7  ;;  %v4779_v40 = vor.u32 %v13164_v48, %v4776_v36  ;;  %v11783_v33 = vld [vmem:[#allocation3 + $0xa8] sm:$0xf]  ;;  %v4430_v48 = vrot.slane %v12988_v60, 4  ;;  %6023 = vrot.lane.b32.xlu0 %v6001_v52, %s8577_s13  ;;  %v6060_v5 = vunpack.c.l.b16 %v4767_v55  ;;  %5945 = vrot.lane.b32.xlu2 %v8459_v44, %s8575_s22  ;;  %v4552_v11 = vld [vmem:[#allocation3 + $0xb0] sm:$0x8] }
 0x32c   : > { %v6002_v58 = vpack.c.b16 %v11765_v10, %v5977_v6  ;;  %v4423_v32 = vsel %vm8710_vm10, %v4418_v63, %v4422_v17  ;;  %v13165_v13 = vshll.u32 %v13162_v61, 16  ;;  %v11801_v22 = vunpack.c.l.b16 %v4415_v39  ;;  %v3707_v39 = vld [vmem:[#allocation3] sm:$0x8] }
 0x32d   : > { %v12994_v3 = vshrl.u32 %v11783_v33, 16  ;;  %v12993_v51 = vshll.u32 %v11783_v33, 16  ;;  %v6059_v52 = vunpack.c.l.b16 %v4758_v42  ;;  %v4780_v10 = vsel %vm8744_vm11, %v8039_v62, %v4779_v40  ;;  %v13167_v42 = vld [vmem:[#allocation20_spill] sm:$0xff] }
 0x32e   : > { %v4788_v8 = vor.u32 %v13165_v13, %v4785_v50  ;;  %v4426_v55 = vor.u32 %v4425_v23, %v4424_v0  ;;  %v4434_v6 = vshll.u32 %v4291_v14, 16  ;;  %v4781_v63 = vrot.slane %v4776_v36, 4  ;;  %v11812_v13 = vpop.f32.mrf.mxu2  ;;  %v11819_v36 = vld [vmem:[#allocation3 + $0xb8] sm:$0xf]  ;;  %v8481_v23 = vld [vmem:[#allocation3 + $0xe4] sm:$0xff]  ;;  %v6278_v14 = vpop.permute.xlu2 %6277 }
 0x32f   : > { %v11808_v17 = vunpack.c.l.b16 %v4423_v32  ;;  %v4431_v61 = vor.u32 %v4430_v48, %v11789_v21  ;;  %v12995_v50 = vshrl.u32 %v11797_v7, 16  ;;  %13166 = vst [vmem:[#allocation18_spill] sm:$0xff] %v11812_v13  ;;  %v6083_v38 = vpack.c.b16 %v6060_v5, %v6059_v52  ;;  %v13170_v52 = vld [vmem:[#allocation19_spill] sm:$0xff]  ;;  %v8460_v13 = vld [vmem:[#allocation3 + $0x84] sm:$0xff] }
 0x330   : > { %v13168_v60 = vshrl.u32 %v13167_v42, 16  ;;  %v12996_v62 = vshll.u32 %v11797_v7, 16  ;;  %v3708_v0 = vsel %vm10154_vm3, 0, %v3707_v39  ;;  %v4789_v48 = vsel %vm8744_vm11, %v4781_v63, %v4788_v8 }
 0x331   : > { %v6061_v32 = vunpack.c.l.b16 %v4780_v10  ;;  %v11825_v44 = vrot.slane %v12993_v51, 5  ;;  %3709 = vst [vmem:[#allocation3] sm:$0x8] %v3708_v0  ;;  %6107 = vrot.lane.b32.xlu1 %v6083_v38, %s8576_s12  ;;  %v4791_v5 = vshrl.u32 %v4552_v11, 16  ;;  %v13171_v39 = vshrl.u32 %v13170_v52, 16  ;;  %v6358_v11 = vpop.permute.xlu0 %6357 }
 0x332   : > { %v4807_v46 = vrot.slane %v13168_v60, 7  ;;  %v4444_v60 = vrot.slane %v12994_v3, 4  ;;  %v4427_v1 = vrot.slane %v4426_v55, 4  ;;  %v4436_v27 = vrot.slane %v4434_v6, 5  ;;  %v4292_v6 = vld [vmem:[#allocation3 + $0xac] sm:$0x1]  ;;  %v6470_v3 = vpop.permute.xlu1 %6469 }
 0x333   : > { %v4798_v40 = vrot.slane %v13171_v39, 7  ;;  %v4432_v8 = vrot.slane %v4431_v61, 4  ;;  %v4438_v10 = vrot.slane %v12995_v50, 4  ;;  %v6694_v0 = vsel %vm3480_vm9, %v8481_v23, %v6278_v14  ;;  %6025 = vrot.lane.b32.xlu0 %v6002_v58, %s8577_s13  ;;  %5947 = vrot.lane.b32.xlu2 %v8460_v13, %s8575_s22 }
 0x334   : > { %v6062_v38 = vunpack.c.l.b16 %v4789_v48  ;;  %v13172_v39 = vshll.u32 %v13167_v42, 16  ;;  %v4439_v61 = vrot.slane %v12996_v62, 5  ;;  %v6728_v50 = vsel %vm6571_vm0, %v6694_v0, %v6358_v11  ;;  %v4555_v0 = vld [vmem:[#allocation3 + $0xc0] sm:$0x8] }
 0x335   : > { %v4445_v63 = vor.u32 %v4444_v60, %v11825_v44  ;;  %v12997_v51 = vshrl.u32 %v11832_v45, 16  ;;  %v6773_v58 = vsel %vm6604_vm6, %v6728_v50, %v6470_v3  ;;  %v8040_v14 = vrot.slane %v4791_v5, 11 }
 0x336   : > { %v4810_v55 = vor.u32 %v13172_v39, %v4807_v46  ;;  %v13173_v42 = vshll.u32 %v13170_v52, 16  ;;  %v4803_v48 = vrot.slane %v4798_v40, 4  ;;  %v6003_v39 = vpack.c.b16 %v11808_v17, %v11801_v22  ;;  %7139 = vmatmul.bf16.gmra.mxu2 %v6773_v58  ;;  %v13176_v52 = vld [vmem:[#allocation22_spill] sm:$0xff] }
 0x337   : > { %v4448_v11 = vshll.u32 %v4292_v6, 16  ;;  %v13174_v60 = vshll.u32 %v11819_v36, 16  ;;  %v13175_v23 = vshrl.u32 %v11819_v36, 16  ;;  %v6084_v50 = vpack.c.b16 %v6062_v38, %v6061_v32 }
 0x338   : > { %v4801_v46 = vor.u32 %v13173_v42, %v4798_v40  ;;  %v4811_v5 = vsel %vm8744_vm11, %v4803_v48, %v4810_v55  ;;  %v4429_v13 = vsel %vm8710_vm10, %v4427_v1, %v11789_v21  ;;  %v13177_v22 = vshrl.u32 %v13176_v52, 16  ;;  %v4293_v40 = vld [vmem:[#allocation3 + $0xbc] sm:$0x1]  ;;  %v13180_v55 = vld [vmem:[#allocation21_spill] sm:$0xff] }
 0x339   : > { %v11856_v62 = vrot.slane %v13174_v60, 5  ;;  %v4458_v3 = vrot.slane %v13175_v23, 4  ;;  %v4437_v6 = vsel %vm8710_vm10, %v4432_v8, %v4436_v27  ;;  %v4440_v58 = vor.u32 %v4439_v61, %v4438_v10  ;;  %v11873_v23 = vpop.f32.mrf.mxu2  ;;  %6109 = vrot.lane.b32.xlu1 %v6084_v50, %s8576_s12  ;;  %v8502_v27 = vld [vmem:[%s12768_s3 + $0x10] sm:$0xff] }
 0x33a   : > { %v4829_v17 = vrot.slane %v13177_v22, 7  ;;  %v4452_v42 = vrot.slane %v12997_v51, 4  ;;  %v13178_v32 = vshll.u32 %v11832_v45, 16  ;;  %13179 = vst [vmem:[#allocation20_spill] sm:$0xff] %v11873_v23  ;;  %v4802_v1 = vsel %vm8744_vm11, %v8040_v14, %v4801_v46  ;;  %6982 = vmatpush.bf16.msrb.mxu1 %v8502_v27  ;;  %v8461_v14 = vld [vmem:[#allocation3 + $0x94] sm:$0xff] }
 0x33b   : > { %v4813_v21 = vshrl.u32 %v4555_v0, 16  ;;  %v13181_v48 = vshrl.u32 %v13180_v55, 16  ;;  %v4446_v22 = vrot.slane %v4445_v63, 4  ;;  %v6064_v8 = vunpack.c.l.b16 %v4811_v5  ;;  %6027 = vrot.lane.b32.xlu0 %v6003_v39, %s8577_s13  ;;  %v4558_v63 = vld [vmem:[#allocation3 + $0xd0] sm:$0x8]  ;;  %5949 = vrot.lane.b32.xlu2 %v8461_v14, %s8575_s22 }
 0x33c   : > { %v4453_v38 = vrot.slane %v13178_v32, 5  ;;  %v4450_v10 = vrot.slane %v4448_v11, 5  ;;  %v4459_v61 = vor.u32 %v4458_v3, %v11856_v62  ;;  %v4462_v32 = vshll.u32 %v4293_v40, 16  ;;  %v11892_v40 = vld [vmem:[#allocation3 + $0xc8] sm:$0xf] }
 0x33d   : > { %v4820_v60 = vrot.slane %v13181_v48, 7  ;;  %v13182_v50 = vshll.u32 %v13176_v52, 16  ;;  %v6063_v46 = vunpack.c.l.b16 %v4802_v1  ;;  %v5981_v0 = vunpack.c.l.b16 %v4429_v13 }
 0x33e   : > { %v5982_v48 = vunpack.c.l.b16 %v4437_v6  ;;  %v4454_v23 = vor.u32 %v4453_v38, %v4452_v42  ;;  %v8041_v56 = vrot.slane %v4813_v21, 11  ;;  %v13183_v54 = vshll.u32 %v13180_v55, 16  ;;  %v13184_v42 = vld [vmem:[#allocation23_spill] sm:$0xff] }
 0x33f   : > { %v4832_v51 = vor.u32 %v13182_v50, %v4829_v17  ;;  %v4825_v11 = vrot.slane %v4820_v60, 4  ;;  %v4441_v26 = vrot.slane %v4440_v58, 4  ;;  %v6085_v3 = vpack.c.b16 %v6064_v8, %v6063_v46  ;;  %v11908_v8 = vld [vmem:[#allocation3 + $0xc4] sm:$0xf] }
 0x340   : > { %v4823_v5 = vor.u32 %v13183_v54, %v4820_v60  ;;  %v4451_v39 = vsel %vm8710_vm10, %v4446_v22, %v4450_v10  ;;  %v4460_v52 = vrot.slane %v4459_v61, 4  ;;  %v4464_v17 = vrot.slane %v4462_v32, 5  ;;  %v13186_v54 = vld [vmem:[#allocation24_spill] sm:$0xff]  ;;  %13189 = vst [vmem:[#allocation19_spill] sm:$0xff] %v11908_v8 }
 0x341   : > { %v4833_v13 = vsel %vm8744_vm11, %v4825_v11, %v4832_v51  ;;  %v4835_v6 = vshrl.u32 %v4558_v63, 16  ;;  %v13185_v38 = vshrl.u32 %v13184_v42, 16  ;;  %v13187_v21 = vshrl.u32 %v13186_v54, 16  ;;  %v11900_v27 = vpop.f32.mrf.mxu2  ;;  %6111 = vrot.lane.b32.xlu1 %v6085_v3, %s8576_s12 }
 0x342   : > { %v6004_v55 = vpack.c.b16 %v5982_v48, %v5981_v0  ;;  %v4455_v60 = vrot.slane %v4454_v23, 4  ;;  %13188 = vst [vmem:[#allocation5_spill] sm:$0xff] %v11900_v27  ;;  %v4824_v22 = vsel %vm8744_vm11, %v8041_v56, %v4823_v5  ;;  %v4443_v51 = vsel %vm8710_vm10, %v4441_v26, %v11825_v44  ;;  %v8462_v48 = vld [vmem:[#allocation3 + $0xa4] sm:$0xff] }
 0x343   : > { %v4842_v1 = vrot.slane %v13185_v38, 7  ;;  %v4851_v58 = vrot.slane %v13187_v21, 7  ;;  %v13001_v10 = vshrl.u32 %v11892_v40, 16  ;;  %v12998_v61 = vshll.u32 %v11892_v40, 16  ;;  %5951 = vrot.lane.b32.xlu2 %v8462_v48, %s8575_s22  ;;  %v11935_v21 = vld [vmem:[#allocation3 + $0xd8] sm:$0xf] }
 0x344   : > { %v6066_v32 = vunpack.c.l.b16 %v4833_v13  ;;  %v5984_v50 = vunpack.c.l.b16 %v4451_v39  ;;  %v4457_v23 = vsel %vm8710_vm10, %v4455_v60, %v11856_v62  ;;  %6029 = vrot.lane.b32.xlu0 %v6004_v55, %s8577_s13  ;;  %v8042_v14 = vrot.slane %v4835_v6, 11  ;;  %v4561_v39 = vld [vmem:[#allocation3 + $0xe0] sm:$0x8]  ;;  %13192 = vst [vmem:[#allocation22_spill] sm:$0xff] %v11935_v21  ;;  %v13193_v55 = vld [vmem:[#allocation34_spill] sm:$0xff] }
 0x345   : > { %v13190_v56 = vshll.u32 %v13184_v42, 16  ;;  %v13191_v26 = vshll.u32 %v13186_v54, 16  ;;  %v4465_v0 = vsel %vm8710_vm10, %v4460_v52, %v4464_v17  ;;  %v6065_v63 = vunpack.c.l.b16 %v4824_v22  ;;  %v4294_v54 = vld [vmem:[#allocation3 + $0xcc] sm:$0x1]  ;;  %v13197_v48 = vld [vmem:[#allocation26_spill] sm:$0xff] }
 0x346   : > { %v5983_v5 = vunpack.c.l.b16 %v4443_v51  ;;  %v13000_v11 = vshrl.u32 %v11908_v8, 16  ;;  %v12999_v3 = vshll.u32 %v11908_v8, 16  ;;  %v4847_v62 = vrot.slane %v4842_v1, 4 }
 0x347   : > { %v4845_v46 = vor.u32 %v13190_v56, %v4842_v1  ;;  %v4854_v44 = vor.u32 %v13191_v26, %v4851_v58  ;;  %v11926_v13 = vrot.slane %v12998_v61, 5  ;;  %v4472_v6 = vrot.slane %v13001_v10, 4  ;;  %v8501_v1 = vld [vmem:[%s12768_s3 + $0x8] sm:$0xff]  ;;  %v6280_v58 = vpop.permute.xlu2 %6279  ;;  %v8482_v26 = vld [vmem:[#allocation3 + $0xf4] sm:$0xff] }
 0x348   : > { %v6086_v42 = vpack.c.b16 %v6066_v32, %v6065_v63  ;;  %v6005_v52 = vpack.c.b16 %v5984_v50, %v5983_v5  ;;  %v11931_v17 = vunpack.c.l.b16 %v4457_v23  ;;  %v11933_v38 = vunpack.c.l.b16 %v4465_v0  ;;  %v13195_v50 = vld [vmem:[#allocation25_spill] sm:$0xff]  ;;  %6983 = vmatpush.bf16.msrb.mxu1 %v8501_v1  ;;  %v11975_v10 = vld [vmem:[#allocation3 + $0xd4] sm:$0xf] }
 0x349   : > { %v13194_v60 = vshrl.u32 %v13193_v55, 16  ;;  %v4846_v51 = vsel %vm8744_vm11, %v8042_v14, %v4845_v46  ;;  %v4855_v32 = vsel %vm8744_vm11, %v4847_v62, %v4854_v44  ;;  %v13196_v23 = vshrl.u32 %v13195_v50, 16  ;;  %13202 = vst [vmem:[#allocation23_spill] sm:$0xff] %v11975_v10  ;;  %v4564_v62 = vld [vmem:[#allocation3 + $0xf0] sm:$0x8] }
 0x34a   : > { %v4857_v0 = vshrl.u32 %v4561_v39, 16  ;;  %v13198_v63 = vshrl.u32 %v13197_v48, 16  ;;  %v4466_v61 = vrot.slane %v13000_v11, 4  ;;  %6113 = vrot.lane.b32.xlu1 %v6086_v42, %s8576_s12  ;;  %v4473_v14 = vor.u32 %v4472_v6, %v11926_v13 }
 0x34b   : > { %v11942_v22 = vrot.slane %v13194_v60, 7  ;;  %v4864_v56 = vrot.slane %v13196_v23, 7  ;;  %v4467_v60 = vrot.slane %v12999_v3, 5  ;;  %v4476_v46 = vshll.u32 %v4294_v54, 16 }
 0x34c   : > { %v4873_v5 = vrot.slane %v13198_v63, 7  ;;  %v11961_v39 = vsel %vm3480_vm9, %v8482_v26, %v6280_v58  ;;  %v6006_v23 = vpack.c.b16 %v11933_v38, %v11931_v17  ;;  %v11965_v63 = vpop.f32.mrf.mxu2  ;;  %6031 = vrot.lane.b32.xlu0 %v6005_v52, %s8577_s13  ;;  %v13200_v42 = vshll.u32 %v13193_v55, 16  ;;  %v8500_v17 = vld [vmem:[%s12768_s3] sm:$0xff]  ;;  %v8463_v38 = vld [vmem:[#allocation3 + $0xb4] sm:$0xff] }
 0x34d   : > { %13199 = vst [vmem:[#allocation21_spill] sm:$0xff] %v11965_v63  ;;  %v13201_v6 = vshrl.u32 %v11320_v59, 16  ;;  %v6067_v3 = vunpack.c.l.b16 %v4846_v51  ;;  %v6068_v11 = vunpack.c.l.b16 %v4855_v32  ;;  %v8043_v58 = vrot.slane %v4857_v0, 11  ;;  %v3882_v63 = vld [vmem:[#allocation3] sm:$0x8]  ;;  %6984 = vmatpush.bf16.msrb.mxu1 %v8500_v17  ;;  %5953 = vrot.lane.b32.xlu2 %v8463_v38, %s8575_s22 }
 0x34e   : > { %v11971_v1 = vor.u32 %v13200_v42, %v11942_v22  ;;  %v13203_v52 = vshll.u32 %v13195_v50, 16  ;;  %v13204_v55 = vshll.u32 %v13197_v48, 16  ;;  %v4468_v44 = vor.u32 %v4467_v60, %v4466_v61  ;;  %v12000_v17 = vld [vmem:[#allocation3 + $0xe8] sm:$0xf]  ;;  %v13211_v61 = vld [vmem:[#allocation28_spill] sm:$0xff] }
 0x34f   : > { %v3947_v54 = vrot.slane %v13201_v6, 7  ;;  %v4474_v6 = vrot.slane %v4473_v14, 4  ;;  %v4478_v51 = vrot.slane %v4476_v46, 5  ;;  %v13205_v32 = vshll.u32 %v11935_v21, 16  ;;  %13210 = vst [vmem:[#allocation24_spill] sm:$0xff] %v12000_v17 }
 0x350   : > { %v4867_v26 = vor.u32 %v13203_v52, %v4864_v56  ;;  %v4876_v42 = vor.u32 %v13204_v55, %v4873_v5  ;;  %v13206_v12 = vshrl.u32 %v11935_v21, 16  ;;  %v4869_v0 = vrot.slane %v4864_v56, 4  ;;  %v4295_v5 = vld [vmem:[#allocation3 + $0xdc] sm:$0x1] }
 0x351   : > { %v11986_v27 = vrot.slane %v13205_v32, 5  ;;  %v13207_v60 = vshll.u32 %v11320_v59, 16  ;;  %v6087_v46 = vpack.c.b16 %v6068_v11, %v6067_v3  ;;  %v4879_v52 = vshrl.u32 %v4564_v62, 16  ;;  %v13208_v55 = vld [vmem:[#allocation27_spill] sm:$0xff] }
 0x352   : > { %v4486_v8 = vrot.slane %v13206_v12, 4  ;;  %v13209_v32 = vshrl.u32 %v13208_v55, 16  ;;  %v3931_v38 = vshrl.u32 %v3882_v63, 16  ;;  %v4868_v56 = vsel %vm8744_vm11, %v8043_v58, %v4867_v26 }
 0x353   : > { %v11996_v14 = vor.u32 %v13207_v60, %v3947_v54  ;;  %v4877_v50 = vsel %vm8744_vm11, %v4869_v0, %v4876_v42  ;;  %v13212_v48 = vshrl.u32 %v13211_v61, 16  ;;  %6115 = vrot.lane.b32.xlu1 %v6087_v46, %s8576_s12  ;;  %v4469_v59 = vrot.slane %v4468_v44, 4  ;;  %v12016_v60 = vld [vmem:[#allocation3 + $0xe4] sm:$0xf] }
 0x354   : > { %v4886_v12 = vrot.slane %v13209_v32, 7  ;;  %v4479_v11 = vsel %vm8710_vm10, %v4474_v6, %v4478_v51  ;;  %v4487_v3 = vor.u32 %v4486_v8, %v11986_v27  ;;  %v4490_v62 = vshll.u32 %v4295_v5, 16  ;;  %13215 = vst [vmem:[#allocation34_spill] sm:$0xff] %v12016_v60  ;;  %6033 = vrot.lane.b32.xlu0 %v6006_v23, %s8577_s13  ;;  %v8464_v46 = vld [vmem:[#allocation3 + $0xc4] sm:$0xff] }
 0x355   : > { %v4895_v21 = vrot.slane %v13212_v48, 7  ;;  %v13213_v63 = vshrl.u32 %v11975_v10, 16  ;;  %v13214_v58 = vshll.u32 %v11975_v10, 16  ;;  %v12020_v48 = vpop.f32.mrf.mxu2  ;;  %v6070_v44 = vunpack.c.l.b16 %v4877_v50  ;;  %5955 = vrot.lane.b32.xlu2 %v8464_v46, %s8575_s22  ;;  %v12043_v50 = vld [vmem:[#allocation3 + $0xf8] sm:$0xf] }
 0x356   : > { %13216 = vst [vmem:[#allocation25_spill] sm:$0xff] %v12020_v48  ;;  %v4471_v8 = vsel %vm8710_vm10, %v4469_v59, %v11926_v13  ;;  %v8044_v6 = vrot.slane %v4879_v52, 11  ;;  %v13217_v51 = vshll.u32 %v13208_v55, 16  ;;  %v6069_v32 = vunpack.c.l.b16 %v4868_v56  ;;  %v4296_v55 = vld [vmem:[#allocation3 + $0xec] sm:$0x1]  ;;  %v13223_v46 = vld [vmem:[#allocation35_spill] sm:$0xff] }
 0x357   : > { %v4480_v54 = vrot.slane %v13213_v63, 4  ;;  %v4481_v26 = vrot.slane %v13214_v58, 5  ;;  %v5988_v63 = vunpack.c.l.b16 %v4479_v11  ;;  %v4891_v58 = vrot.slane %v4886_v12, 4 }
 0x358   : > { %v4889_v5 = vor.u32 %v13217_v51, %v4886_v12  ;;  %v13218_v42 = vshll.u32 %v13211_v61, 16  ;;  %v4488_v10 = vrot.slane %v4487_v3, 4  ;;  %v4492_v48 = vrot.slane %v4490_v62, 5  ;;  %v13221_v62 = vld [vmem:[#allocation33_spill] sm:$0xff] }
 0x359   : > { %v5987_v13 = vunpack.c.l.b16 %v4471_v8  ;;  %v4482_v52 = vor.u32 %v4481_v26, %v4480_v54  ;;  %v13219_v59 = vshll.u32 %v12000_v17, 16  ;;  %v13220_v12 = vshrl.u32 %v12000_v17, 16 }
 0x35a   : > { %v4898_v0 = vor.u32 %v13218_v42, %v4895_v21  ;;  %v8014_v21 = vrot.slane %v3931_v38, 11  ;;  %v6088_v11 = vpack.c.b16 %v6070_v44, %v6069_v32  ;;  %v4890_v3 = vsel %vm8744_vm11, %v8044_v6, %v4889_v5 }
 0x35b   : > { %v12035_v56 = vrot.slane %v13219_v59, 5  ;;  %v4500_v61 = vrot.slane %v13220_v12, 4  ;;  %v13222_v42 = vshrl.u32 %v13221_v62, 16  ;;  %v6007_v8 = vpack.c.b16 %v5988_v63, %v5987_v13  ;;  %v6472_v63 = vpop.permute.xlu1 %6471 }
 0x35c   : > { %v4899_v54 = vsel %vm8744_vm11, %v4891_v58, %v4898_v0  ;;  %v4901_v26 = vshrl.u32 %v4567_v19, 16  ;;  %v13224_v59 = vshrl.u32 %v13223_v46, 16  ;;  %6117 = vrot.lane.b32.xlu1 %v6088_v11, %s8576_s12  ;;  %v4493_v38 = vsel %vm8710_vm10, %v4488_v10, %v4492_v48  ;;  %v12057_v19 = vld [vmem:[#allocation3 + $0xf4] sm:$0xf]  ;;  %v6360_v11 = vpop.permute.xlu0 %6359 }
 0x35d   : > { %v4908_v51 = vrot.slane %v13222_v42, 7  ;;  %v13225_v44 = vshrl.u32 %v12016_v60, 16  ;;  %v13226_v5 = vshll.u32 %v12016_v60, 16  ;;  %v4504_v12 = vshll.u32 %v4296_v55, 16  ;;  %6035 = vrot.lane.b32.xlu0 %v6007_v8, %s8577_s13  ;;  %v12069_v17 = vpop.f32.mrf.mxu2 }
 0x35e   : > { %v4917_v23 = vrot.slane %v13224_v59, 7  ;;  %v4483_v13 = vrot.slane %v4482_v52, 4  ;;  %v4501_v0 = vor.u32 %v4500_v61, %v12035_v56  ;;  %v6071_v10 = vunpack.c.l.b16 %v4890_v3 }
 0x35f   : > { %v4494_v6 = vrot.slane %v13225_v44, 4  ;;  %v4495_v32 = vrot.slane %v13226_v5, 5  ;;  %v6072_v48 = vunpack.c.l.b16 %v4899_v54  ;;  %v13227_v42 = vshll.u32 %v13221_v62, 16  ;;  %v8465_v5 = vld [vmem:[#allocation3 + $0xd4] sm:$0xff] }
 0x360   : > { %v4913_v44 = vrot.slane %v4908_v51, 4  ;;  %v4485_v52 = vsel %vm8710_vm10, %v4483_v13, %v11986_v27  ;;  %v5990_v55 = vunpack.c.l.b16 %v4493_v38  ;;  %v8045_v61 = vrot.slane %v4901_v26, 11  ;;  %5957 = vrot.lane.b32.xlu2 %v8465_v5, %s8575_s22  ;;  %v4297_v38 = vld [vmem:[#allocation3 + $0xfc] sm:$0x1]  ;;  %v6282_v13 = vpop.permute.xlu2 %6281 }
 0x361   : > { %v4911_v59 = vor.u32 %v13227_v42, %v4908_v51  ;;  %v13228_v60 = vshll.u32 %v13223_v46, 16  ;;  %v4496_v8 = vor.u32 %v4495_v32, %v4494_v6  ;;  %v4506_v3 = vrot.slane %v4504_v12, 5 }
 0x362   : > { %v4266_v54 = vshrl.u32 %v12057_v19, 16  ;;  %v4269_v62 = vshll.u32 %v12057_v19, 16  ;;  %v6730_v51 = vsel %vm6571_vm0, %v11961_v39, %v6360_v11  ;;  %v4502_v27 = vrot.slane %v4501_v0, 4 }
 0x363   : > { %v4920_v58 = vor.u32 %v13228_v60, %v4917_v23  ;;  %v13229_v26 = vshll.u32 %v12043_v50, 16  ;;  %v13230_v60 = vshrl.u32 %v12043_v50, 16  ;;  %v6776_v6 = vsel %vm6604_vm6, %v6730_v51, %v6472_v63 }
 0x364   : > { %v6089_v32 = vpack.c.b16 %v6072_v48, %v6071_v10  ;;  %v5989_v12 = vunpack.c.l.b16 %v4485_v52  ;;  %v3942_v39 = vsel %vm8744_vm11, %v8014_v21, %v11971_v1  ;;  %v13231_v0 = vrot.slane %v11942_v22, 4  ;;  %7144 = vmatmul.bf16.gmra.mxu2 %v6776_v6  ;;  %v8519_v1 = vld [vmem:[%s12770_s5 + $0x8] sm:$0xff]  ;;  %v6362_v51 = vpop.permute.xlu0 %6361 }
 0x365   : > { %v12078_v46 = vrot.slane %v13229_v26, 5  ;;  %v4514_v23 = vrot.slane %v13230_v60, 4  ;;  %v4921_v42 = vsel %vm8744_vm11, %v4913_v44, %v4920_v58  ;;  %v4912_v10 = vsel %vm8744_vm11, %v8045_v61, %v4911_v59  ;;  %7366 = vmatpush.bf16.msrb.mxu3 %v8519_v1  ;;  %v8466_v61 = vld [vmem:[#allocation3 + $0xe4] sm:$0xff] }
 0x366   : > { %v3951_v11 = vsel %vm8744_vm11, %v13231_v0, %v11996_v14  ;;  %6119 = vrot.lane.b32.xlu1 %v6089_v32, %s8576_s12  ;;  %v6008_v63 = vpack.c.b16 %v5990_v55, %v5989_v12  ;;  %v4497_v48 = vrot.slane %v4496_v8, 4  ;;  %v4518_v5 = vshll.u32 %v4297_v38, 16  ;;  %v6474_v55 = vpop.permute.xlu1 %6473  ;;  %v3885_v0 = vld [vmem:[#allocation3 + $0x10] sm:$0x8] }
 0x367   : > { %v4507_v22 = vsel %vm8710_vm10, %v4502_v27, %v4506_v3  ;;  %v4508_v14 = vrot.slane %v4266_v54, 4  ;;  %v4509_v21 = vrot.slane %v4269_v62, 5  ;;  %v4515_v58 = vor.u32 %v4514_v23, %v12078_v46  ;;  %v12110_v3 = vpop.f32.mrf.mxu2 }
 0x368   : > { %v5803_v44 = vunpack.c.l.b16 %v3942_v39  ;;  %v5804_v52 = vunpack.c.l.b16 %v3951_v11  ;;  %6037 = vrot.lane.b32.xlu0 %v6008_v63, %s8577_s13  ;;  %v6074_v59 = vunpack.c.l.b16 %v4921_v42  ;;  %v4499_v8 = vsel %vm8710_vm10, %v4497_v48, %v12035_v56  ;;  %5959 = vrot.lane.b32.xlu2 %v8466_v61, %s8575_s22  ;;  %v8483_v39 = vld [vmem:[#allocation3 + $0x104] sm:$0xff]  ;;  %v5932_v42 = vpop.permute.xlu2 %5931  ;;  %v13232_v56 = vld [vmem:[#allocation30_spill] sm:$0xff] }
 0x369   : > { %v6073_v27 = vunpack.c.l.b16 %v4912_v10  ;;  %v5992_v38 = vunpack.c.l.b16 %v4507_v22  ;;  %v4510_v26 = vor.u32 %v4509_v21, %v4508_v14  ;;  %v4516_v60 = vrot.slane %v4515_v58, 4  ;;  %v13234_v21 = vld [vmem:[#allocation29_spill] sm:$0xff] }
 0x36a   : > { %v4520_v23 = vrot.slane %v4518_v5, 5  ;;  %v5835_v6 = vpack.c.b16 %v5804_v52, %v5803_v44  ;;  %v5991_v12 = vunpack.c.l.b16 %v4499_v8  ;;  %v13233_v63 = vshrl.u32 %v13232_v56, 16 }
 0x36b   : > { %v6090_v32 = vpack.c.b16 %v6074_v59, %v6073_v27  ;;  %v4511_v1 = vrot.slane %v4510_v26, 4  ;;  %v6700_v22 = vsel %vm3480_vm9, %v8483_v39, %v6282_v13  ;;  %v3953_v14 = vshrl.u32 %v3885_v0, 16  ;;  %v8467_v59 = vld [vmem:[#allocation3 + $0xf4] sm:$0xff] }
 0x36c   : > { %v6009_v11 = vpack.c.b16 %v5992_v38, %v5991_v12  ;;  %v3969_v48 = vrot.slane %v13233_v63, 7  ;;  %v4521_v10 = vsel %vm8710_vm10, %v4516_v60, %v4520_v23  ;;  %v6525_v5 = vsel %vm3480_vm9, %v5835_v6, %v5932_v42  ;;  %v6012_v8 = vpop.permute.xlu0 %6011 }
 0x36d   : > { %v13235_v58 = vshrl.u32 %v13234_v21, 16  ;;  %v6732_v52 = vsel %vm6571_vm0, %v6700_v22, %v6362_v51  ;;  %v4513_v61 = vsel %vm8710_vm10, %v4511_v1, %v12078_v46  ;;  %v5994_v27 = vunpack.c.l.b16 %v4521_v10  ;;  %v3888_v22 = vld [vmem:[#allocation3 + $0x20] sm:$0x8] }
 0x36e   : > { %6121 = vrot.lane.b32.xlu1 %v6090_v32, %s8576_s12  ;;  %v13236_v38 = vshll.u32 %v13232_v56, 16  ;;  %v6092_v26 = vpop.permute.xlu1 %6091  ;;  %v6573_v60 = vsel %vm6571_vm0, %v6525_v5, %v6012_v8  ;;  %v6779_v51 = vsel %vm6604_vm6, %v6732_v52, %v6474_v55  ;;  %v5993_v32 = vunpack.c.l.b16 %v4513_v61 }
 0x36f   : > { %v3960_v44 = vrot.slane %v13235_v58, 7  ;;  %v12131_v23 = vpop.f32.mrf.mxu2  ;;  %v6606_v6 = vsel %vm6604_vm6, %v6573_v60, %v6092_v26  ;;  %v8015_v12 = vrot.slane %v3953_v14, 11  ;;  %v13237_v46 = vshll.u32 %v13234_v21, 16  ;;  %v5564_v60 = vld [vmem:[#allocation3 + $0x3c] sm:$0x1] }
 0x370   : > { %6039 = vrot.lane.b32.xlu0 %v6009_v11, %s8577_s13  ;;  %v3972_v13 = vor.u32 %v13236_v38, %v3969_v48  ;;  %5961 = vrot.lane.b32.xlu2 %v8467_v59, %s8575_s22  ;;  %v6010_v11 = vpack.c.b16 %v5994_v27, %v5993_v32  ;;  %v5934_v1 = vpop.permute.xlu2 %5933  ;;  %v13238_v14 = vshrl.u32 %v11385_v24, 16  ;;  %v3975_v27 = vshrl.u32 %v3888_v22, 16 }
 0x371   : > { %v3963_v39 = vor.u32 %v13237_v46, %v3960_v44  ;;  %v3965_v0 = vrot.slane %v3960_v44, 4  ;;  %6985 = vmatmul.bf16.vlgmr.msrb.gmra.mxu1 %v6606_v6  ;;  %v13239_v44 = vld [vmem:[#allocation7_spill] sm:$0xff]  ;;  %v13242_v38 = vshrl.u32 %v11252_v28, 16  ;;  %v13243_v6 = vld [vmem:[#allocation6_spill] sm:$0xff]  ;;  %v13311_v30 = vshrl.u32 %v11745_v2, 16 }
 0x372   : > { %v3991_v21 = vrot.slane %v13238_v14, 7  ;;  %v13240_v52 = vshll.u32 %v13239_v44, 16  ;;  %v13241_v61 = vshrl.u32 %v13239_v44, 16 }
 0x373   : > { %v3973_v42 = vsel %vm8744_vm11, %v3965_v0, %v3972_v13  ;;  %v3964_v56 = vsel %vm8744_vm11, %v8015_v12, %v3963_v39  ;;  %v3982_v13 = vrot.slane %v13242_v38, 7  ;;  %v13245_v12 = vshll.u32 %v11385_v24, 16 }
 0x374   : > { %7149 = vmatmul.bf16.gmra.mxu2 %v6779_v51  ;;  %v5806_v63 = vunpack.c.l.b16 %v3973_v42  ;;  %v5805_v55 = vunpack.c.l.b16 %v3964_v56  ;;  %v6014_v5 = vpop.permute.xlu0 %6013  ;;  %v5597_v59 = vrot.slane %v13240_v52, 5  ;;  %v5599_v8 = vrot.slane %v13241_v61, 4 }
 0x375   : > { %v13244_v51 = vshll.u32 %v13243_v6, 16  ;;  %v3994_v46 = vor.u32 %v13245_v12, %v3991_v21  ;;  %v3987_v22 = vrot.slane %v3982_v13, 4 }
 0x376   : > { %v5836_v10 = vpack.c.b16 %v5806_v63, %v5805_v55  ;;  %v6094_v39 = vpop.permute.xlu1 %6093  ;;  %v5600_v56 = vor.u32 %v5599_v8, %v5597_v59  ;;  %v5603_v63 = vshll.u32 %v5564_v60, 16  ;;  %v8016_v55 = vrot.slane %v3975_v27, 11 }
 0x377   : > { %v12142_v48 = vpop.f32.mrf.mxu2  ;;  %v5594_v32 = vrot.slane %v13244_v51, 5  ;;  %v3995_v14 = vsel %vm8744_vm11, %v3987_v22, %v3994_v46  ;;  %v13250_v46 = vld [vmem:[#allocation9_spill] sm:$0xff]  ;;  %v13254_v22 = vld [vmem:[#allocation8_spill] sm:$0xff] }
 0x378   : > { %6041 = vrot.lane.b32.xlu0 %v6010_v11, %s8577_s13  ;;  %v6528_v58 = vsel %vm3480_vm9, %v5836_v10, %v5934_v1  ;;  %v13246_v11 = vshrl.u32 %v13243_v6, 16  ;;  %v13247_v1 = vshll.u32 %v11252_v28, 16  ;;  %v5605_v44 = vrot.slane %v5603_v63, 5 }
 0x379   : > { %v6575_v26 = vsel %vm6571_vm0, %v6528_v58, %v6014_v5  ;;  %v13248_v5 = vpack.c.b16 %v11590_v31, %v11588_v16  ;;  %v5601_v58 = vrot.slane %v5600_v56, 4  ;;  %v5808_v28 = vunpack.c.l.b16 %v3995_v14  ;;  %v5936_v16 = vpop.permute.xlu2 %5935 }
 0x37a   : > { %v6609_v0 = vsel %vm6604_vm6, %v6575_v26, %v6094_v39  ;;  %v5593_v42 = vrot.slane %v13246_v11, 4  ;;  %v3985_v10 = vor.u32 %v13247_v1, %v3982_v13  ;;  %v3891_v13 = vld [vmem:[#allocation3 + $0x30] sm:$0x8]  ;;  %v13249_v6 = vshrl.u32 %v11396_v47, 16 }
 0x37b   : > { %v5606_v27 = vsel %vm8710_vm10, %v5601_v58, %v5605_v44  ;;  %v13251_v39 = vshll.u32 %v13250_v46, 16  ;;  %v13252_v11 = vshrl.u32 %v13250_v46, 16  ;;  %v3997_v56 = vshrl.u32 %v3891_v13, 16 }
 0x37c   : > { %v5595_v21 = vor.u32 %v5594_v32, %v5593_v42  ;;  %v3986_v52 = vsel %vm8744_vm11, %v8016_v55, %v3985_v10  ;;  %v6016_v26 = vpop.permute.xlu0 %6015  ;;  %v4013_v51 = vrot.slane %v13249_v6, 7  ;;  %v6478_v32 = vunpack.c.l.b16 %v5606_v27 }
 0x37d   : > { %v5807_v61 = vunpack.c.l.b16 %v3986_v52  ;;  %v5613_v42 = vrot.slane %v13252_v11, 4  ;;  %v13253_v63 = vshrl.u32 %v11437_v35, 16  ;;  %v13258_v13 = vshll.u32 %v11437_v35, 16 }
 0x37e   : > { %v5596_v8 = vrot.slane %v5595_v21, 4  ;;  %v13256_v21 = vshll.u32 %v11396_v47, 16  ;;  %v6096_v44 = vpop.permute.xlu1 %6095 }
 0x37f   : > { %v12167_v24 = vpop.f32.mrf.mxu2  ;;  %v5837_v31 = vpack.c.b16 %v5808_v28, %v5807_v61  ;;  %v4004_v55 = vrot.slane %v13253_v63, 7  ;;  %v13257_v61 = vshrl.u32 %v13254_v22, 16 }
 0x380   : > { %v5598_v60 = vsel %vm8710_vm10, %v5596_v8, %v5597_v59  ;;  %v5565_v59 = vld [vmem:[#allocation3 + $0x4c] sm:$0x1]  ;;  %v4016_v58 = vor.u32 %v13256_v21, %v4013_v51 }
 0x381   : > { %6990 = vmatmul.bf16.gmra.mxu1 %v6609_v0  ;;  %v6531_v12 = vsel %vm3480_vm9, %v5837_v31, %v5936_v16  ;;  %v5611_v0 = vrot.slane %v13251_v39, 5  ;;  %v6477_v10 = vunpack.c.l.b16 %v5598_v60  ;;  %v5607_v8 = vrot.slane %v13257_v61, 4 }
 0x382   : > { %v6577_v1 = vsel %vm6571_vm0, %v6531_v12, %v6016_v26  ;;  %v5617_v16 = vshll.u32 %v5565_v59, 16  ;;  %v8017_v31 = vrot.slane %v3997_v56, 11  ;;  %v4007_v26 = vor.u32 %v13258_v13, %v4004_v55  ;;  %v5938_v56 = vpop.permute.xlu2 %5937  ;;  %v5566_v13 = vld [vmem:[#allocation3 + $0x5c] sm:$0x1] }
 0x383   : > { %v6508_v52 = vpack.c.b16 %v6478_v32, %v6477_v10  ;;  %v6612_v28 = vsel %vm6604_vm6, %v6577_v1, %v6096_v44  ;;  %v5614_v27 = vor.u32 %v5613_v42, %v5611_v0  ;;  %v4009_v60 = vrot.slane %v4004_v55, 4  ;;  %v3894_v55 = vld [vmem:[#allocation3 + $0x40] sm:$0x8] }
 0x384   : > { %8326 = vmatmul.msk.bf16.vlgmr.msrb.gmra.mxu2 %vm3480_vm9, %v13248_v5  ;;  %v13255_v5 = vshll.u32 %v13254_v22, 16  ;;  %v5619_v12 = vrot.slane %v5617_v16, 5  ;;  %v4008_v46 = vsel %vm8744_vm11, %v8017_v31, %v4007_v26  ;;  %v6018_v1 = vpop.permute.xlu0 %6017  ;;  %v13259_v59 = vshrl.u32 %v11478_v9, 16  ;;  %v13264_v26 = vld [vmem:[#allocation10_spill] sm:$0xff] }
 0x385   : > { %v4017_v47 = vsel %vm8744_vm11, %v4009_v60, %v4016_v58  ;;  %v5615_v32 = vrot.slane %v5614_v27, 4  ;;  %v5809_v11 = vunpack.c.l.b16 %v4008_v46  ;;  %v13260_v58 = vld [vmem:[#allocation11_spill] sm:$0xff]  ;;  %v13263_v27 = vshrl.u32 %v11476_v18, 16 }
 0x386   : > { %v5608_v14 = vrot.slane %v13255_v5, 5  ;;  %v5810_v39 = vunpack.c.l.b16 %v4017_v47  ;;  %v4035_v22 = vrot.slane %v13259_v59, 7  ;;  %v13261_v44 = vshll.u32 %v13260_v58, 16 }
 0x387   : > { %v12175_v38 = vpop.f32.mrf.mxu2  ;;  %v5620_v35 = vsel %vm8710_vm10, %v5615_v32, %v5619_v12  ;;  %v4026_v16 = vrot.slane %v13263_v27, 7  ;;  %v13265_v60 = vshll.u32 %v13264_v26, 16  ;;  %v6098_v12 = vpop.permute.xlu1 %6097 }
 0x388   : > { %v5609_v51 = vor.u32 %v5608_v14, %v5607_v8  ;;  %v5838_v63 = vpack.c.b16 %v5810_v39, %v5809_v11  ;;  %v6480_v5 = vunpack.c.l.b16 %v5620_v35  ;;  %v4019_v8 = vshrl.u32 %v3894_v55, 16 }
 0x389   : > { %v5622_v47 = vrot.slane %v13265_v60, 5  ;;  %v13267_v11 = vshrl.u32 %v13264_v26, 16  ;;  %v13268_v55 = vshll.u32 %v11476_v18, 16  ;;  %v13269_v26 = vshrl.u32 %v11563_v4, 16 }
 0x38a   : > { %v5610_v42 = vrot.slane %v5609_v51, 4  ;;  %v6534_v14 = vsel %vm3480_vm9, %v5838_v63, %v5938_v56  ;;  %v13266_v51 = vshll.u32 %v11478_v9, 16  ;;  %v5631_v56 = vshll.u32 %v5566_v13, 16  ;;  %v8518_v13 = vld [vmem:[%s12770_s5] sm:$0xff] }
 0x38b   : > { %v8018_v63 = vrot.slane %v4019_v8, 11  ;;  %v5940_v8 = vpop.permute.xlu2 %5939  ;;  %v4057_v60 = vrot.slane %v13269_v26, 7  ;;  %7367 = vmatpush.bf16.msrb.mxu3 %v8518_v13 }
 0x38c   : > { %v5612_v10 = vsel %vm8710_vm10, %v5610_v42, %v5611_v0  ;;  %v6579_v0 = vsel %vm6571_vm0, %v6534_v14, %v6018_v1  ;;  %v4038_v32 = vor.u32 %v13266_v51, %v4035_v22  ;;  %v5621_v42 = vrot.slane %v13267_v11, 4 }
 0x38d   : > { %v6479_v31 = vunpack.c.l.b16 %v5612_v10  ;;  %v6615_v39 = vsel %vm6604_vm6, %v6579_v0, %v6098_v12  ;;  %v4029_v1 = vor.u32 %v13268_v55, %v4026_v16  ;;  %v4031_v10 = vrot.slane %v4026_v16, 4  ;;  %v3897_v16 = vld [vmem:[#allocation3 + $0x50] sm:$0x8]  ;;  %v6020_v0 = vpop.permute.xlu0 %6019  ;;  %v5567_v55 = vld [vmem:[#allocation3 + $0x6c] sm:$0x1] }
 0x38e   : > { %v5623_v59 = vor.u32 %v5622_v47, %v5621_v42  ;;  %v4041_v42 = vshrl.u32 %v3897_v16, 16 }
 0x38f   : > { %v12201_v6 = vpop.f32.mrf.mxu2  ;;  %v6509_v46 = vpack.c.b16 %v6480_v5, %v6479_v31  ;;  %v4039_v9 = vsel %vm8744_vm11, %v4031_v10, %v4038_v32  ;;  %v5633_v5 = vrot.slane %v5631_v56, 5  ;;  %v4030_v14 = vsel %vm8744_vm11, %v8018_v63, %v4029_v1  ;;  %v13270_v32 = vld [vmem:[#allocation13_spill] sm:$0xff]  ;;  %v13274_v10 = vld [vmem:[#allocation12_spill] sm:$0xff] }
 0x390   : > { %v13271_v12 = vshll.u32 %v13270_v32, 16  ;;  %v8019_v16 = vrot.slane %v4041_v42, 11 }
 0x391   : > { %6995 = vmatmul.bf16.gmra.mxu1 %v6612_v28  ;;  %v13262_v28 = vshrl.u32 %v13260_v58, 16  ;;  %v5812_v58 = vunpack.c.l.b16 %v4039_v9  ;;  %v13275_v9 = vshll.u32 %v13274_v10, 16 }
 0x393   : > { %v5627_v61 = vrot.slane %v13262_v28, 4  ;;  %v5811_v28 = vunpack.c.l.b16 %v4030_v14  ;;  %v6100_v14 = vpop.permute.xlu1 %6099  ;;  %v5942_v42 = vpop.permute.xlu2 %5941 }
 0x394   : > { %8327 = vmatmul.msk.bf16.gmra.mxu2 %vm3480_vm9, %v6508_v52  ;;  %v5625_v52 = vrot.slane %v13261_v44, 5 }
 0x395   : > { %v5839_v27 = vpack.c.b16 %v5812_v58, %v5811_v28 }
 0x396   : > { %v5628_v35 = vor.u32 %v5627_v61, %v5625_v52  ;;  %v5624_v61 = vrot.slane %v5623_v59, 4  ;;  %v5636_v59 = vrot.slane %v13275_v9, 5 }
 0x397   : > { %v12212_v21 = vpop.f32.mrf.mxu2  ;;  %v6537_v51 = vsel %vm3480_vm9, %v5839_v27, %v5940_v8  ;;  %v5645_v27 = vshll.u32 %v5567_v55, 16  ;;  %v13279_v55 = vshrl.u32 %v11568_v41, 16 }
 0x398   : > { %v5629_v22 = vrot.slane %v5628_v35, 4  ;;  %v5626_v31 = vsel %vm8710_vm10, %v5624_v61, %v5625_v52  ;;  %v13273_v52 = vshrl.u32 %v11557_v57, 16  ;;  %v6581_v56 = vsel %vm6571_vm0, %v6537_v51, %v6020_v0 }
 0x399   : > { %v6481_v63 = vunpack.c.l.b16 %v5626_v31  ;;  %v6618_v28 = vsel %vm6604_vm6, %v6581_v56, %v6100_v14  ;;  %v13277_v61 = vshrl.u32 %v13274_v10, 16  ;;  %v13278_v0 = vshll.u32 %v11557_v57, 16  ;;  %v6022_v56 = vpop.permute.xlu0 %6021 }
 0x39a   : > { %v5634_v18 = vsel %vm8710_vm10, %v5629_v22, %v5633_v5  ;;  %v4048_v35 = vrot.slane %v13273_v52, 7  ;;  %v13276_v22 = vshll.u32 %v11563_v4, 16  ;;  %v4079_v10 = vrot.slane %v13279_v55, 7 }
 0x39b   : > { %v6482_v47 = vunpack.c.l.b16 %v5634_v18  ;;  %v5635_v18 = vrot.slane %v13277_v61, 4 }
 0x39c   : > { %v4060_v5 = vor.u32 %v13276_v22, %v4057_v60  ;;  %v4051_v31 = vor.u32 %v13278_v0, %v4048_v35  ;;  %v4053_v13 = vrot.slane %v4048_v35, 4  ;;  %v3900_v35 = vld [vmem:[#allocation3 + $0x60] sm:$0x8]  ;;  %v13280_v22 = vld [vmem:[#allocation15_spill] sm:$0xff]  ;;  %v13284_v0 = vld [vmem:[#allocation14_spill] sm:$0xff] }
 0x39d   : > { %v6510_v58 = vpack.c.b16 %v6482_v47, %v6481_v63  ;;  %v5637_v26 = vor.u32 %v5636_v59, %v5635_v18  ;;  %v5647_v47 = vrot.slane %v5645_v27, 5  ;;  %v4063_v61 = vshrl.u32 %v3900_v35, 16 }
 0x39e   : > { %v4061_v4 = vsel %vm8744_vm11, %v4053_v13, %v4060_v5  ;;  %v4052_v51 = vsel %vm8744_vm11, %v8019_v16, %v4051_v31  ;;  %v13281_v5 = vshll.u32 %v13280_v22, 16  ;;  %v13283_v18 = vshrl.u32 %v11579_v20, 16 }
 0x39f   : > { %v12235_v44 = vpop.f32.mrf.mxu2  ;;  %v13285_v31 = vshll.u32 %v13284_v0, 16  ;;  %v13288_v35 = vshll.u32 %v11579_v20, 16 }
 0x3a0   : > { %v5653_v14 = vrot.slane %v13281_v5, 5 }
 0x3a1   : > { %7000 = vmatmul.bf16.gmra.mxu1 %v6615_v39  ;;  %v13272_v39 = vshrl.u32 %v13270_v32, 16  ;;  %v5814_v32 = vunpack.c.l.b16 %v4061_v4  ;;  %v5650_v13 = vrot.slane %v13285_v31, 5  ;;  %v13286_v4 = vshll.u32 %v11568_v41, 16 }
 0x3a3   : > { %v5641_v11 = vrot.slane %v13272_v39, 4 }
 0x3a4   : > { %8328 = vmatmul.msk.bf16.gmra.mxu2 %vm3480_vm9, %v6509_v46  ;;  %v5639_v46 = vrot.slane %v13271_v12, 5  ;;  %v5813_v12 = vunpack.c.l.b16 %v4052_v51 }
 0x3a6   : > { %v5642_v8 = vor.u32 %v5641_v11, %v5639_v46  ;;  %v5638_v11 = vrot.slane %v5637_v26, 4  ;;  %v5840_v52 = vpack.c.b16 %v5814_v32, %v5813_v12  ;;  %v4082_v26 = vor.u32 %v13286_v4, %v4079_v10  ;;  %v13290_v4 = vld [vmem:[#allocation17_spill] sm:$0xff] }
 0x3a7   : > { %v12254_v1 = vpop.f32.mrf.mxu2  ;;  %v13287_v12 = vshrl.u32 %v13284_v0, 16 }
 0x3a8   : > { %v5643_v60 = vrot.slane %v5642_v8, 4  ;;  %v5640_v63 = vsel %vm8710_vm10, %v5638_v11, %v5639_v46  ;;  %v6540_v59 = vsel %vm3480_vm9, %v5840_v52, %v5942_v42  ;;  %v4070_v8 = vrot.slane %v13283_v18, 7  ;;  %v5568_v46 = vld [vmem:[#allocation3 + $0x7c] sm:$0x1]  ;;  %v3903_v18 = vld [vmem:[#allocation3 + $0x70] sm:$0x8] }
 0x3a9   : > { %v6583_v27 = vsel %vm6571_vm0, %v6540_v59, %v6022_v56  ;;  %v6483_v16 = vunpack.c.l.b16 %v5640_v63  ;;  %v5649_v11 = vrot.slane %v13287_v12, 4  ;;  %v5659_v42 = vshll.u32 %v5568_v46, 16 }
 0x3aa   : > { %v5648_v57 = vsel %vm8710_vm10, %v5643_v60, %v5647_v47  ;;  %v6102_v60 = vpop.permute.xlu1 %6101  ;;  %v8020_v52 = vrot.slane %v4063_v61, 11  ;;  %v4073_v56 = vor.u32 %v13288_v35, %v4070_v8  ;;  %v4075_v63 = vrot.slane %v4070_v8, 4  ;;  %v6024_v8 = vpop.permute.xlu0 %6023 }
 0x3ab   : > { %v6484_v9 = vunpack.c.l.b16 %v5648_v57  ;;  %v6621_v32 = vsel %vm6604_vm6, %v6583_v27, %v6102_v60  ;;  %v5651_v55 = vor.u32 %v5650_v13, %v5649_v11  ;;  %v13289_v46 = vshrl.u32 %v11644_v49, 16 }
 0x3ac   : > { %v4083_v41 = vsel %vm8744_vm11, %v4075_v63, %v4082_v26  ;;  %v4074_v59 = vsel %vm8744_vm11, %v8020_v52, %v4073_v56  ;;  %v13291_v26 = vshll.u32 %v13290_v4, 16  ;;  %v4085_v12 = vshrl.u32 %v3903_v18, 16 }
 0x3ad   : > { %v6511_v47 = vpack.c.b16 %v6484_v9, %v6483_v16  ;;  %v5661_v9 = vrot.slane %v5659_v42, 5  ;;  %v5815_v5 = vunpack.c.l.b16 %v4074_v59  ;;  %v4101_v0 = vrot.slane %v13289_v46, 7 }
 0x3ae   : > { %v5667_v60 = vrot.slane %v13291_v26, 5  ;;  %v13293_v11 = vshrl.u32 %v11642_v34, 16  ;;  %v13294_v35 = vshll.u32 %v11644_v49, 16  ;;  %v3814_v26 = vld [vmem:[#allocation3 + $0x11c] sm:$0x1] }
 0x3af   : > { %v12270_v39 = vpop.f32.mrf.mxu2 }
 0x3b0   : > { %v4104_v56 = vor.u32 %v13294_v35, %v4101_v0  ;;  %v3815_v35 = vsel %vm10092_vm1, 0, %v3814_v26 }
 0x3b1   : > { %7005 = vmatmul.bf16.gmra.mxu1 %v6618_v28  ;;  %3816 = vst [vmem:[#allocation3 + $0x11c] sm:$0x1] %v3815_v35 }
 0x3b2   : > { %v6104_v63 = vpop.permute.xlu1 %6103 }
 0x3b4   : > { %8329 = vmatmul.msk.bf16.gmra.mxu2 %vm3480_vm9, %v6510_v58  ;;  %v13282_v58 = vshrl.u32 %v13280_v22, 16  ;;  %v5816_v22 = vunpack.c.l.b16 %v4083_v41 }
 0x3b6   : > { %v5655_v28 = vrot.slane %v13282_v58, 4  ;;  %v5652_v58 = vrot.slane %v5651_v55, 4  ;;  %v5841_v61 = vpack.c.b16 %v5816_v22, %v5815_v5  ;;  %v13295_v55 = vld [vmem:[#allocation16_spill] sm:$0xff] }
 0x3b7   : > { %v12290_v51 = vpop.f32.mrf.mxu2  ;;  %v13297_v22 = vshll.u32 %v13295_v55, 16 }
 0x3b8   : > { %v5656_v57 = vor.u32 %v5655_v28, %v5653_v14  ;;  %v5944_v28 = vpop.permute.xlu2 %5943  ;;  %v5654_v16 = vsel %vm8710_vm10, %v5652_v58, %v5653_v14  ;;  %v5569_v14 = vld [vmem:[#allocation3 + $0x8c] sm:$0x1] }
 0x3b9   : > { %v6543_v13 = vsel %vm3480_vm9, %v5841_v61, %v5944_v28  ;;  %v6485_v52 = vunpack.c.l.b16 %v5654_v16  ;;  %v5664_v5 = vrot.slane %v13297_v22, 5  ;;  %v8021_v28 = vrot.slane %v4085_v12, 11 }
 0x3ba   : > { %v5657_v10 = vrot.slane %v5656_v57, 4  ;;  %v4092_v57 = vrot.slane %v13293_v11, 7  ;;  %v6585_v42 = vsel %vm6571_vm0, %v6543_v13, %v6024_v8  ;;  %v13298_v61 = vshll.u32 %v11642_v34, 16 }
 0x3bb   : > { %v6624_v59 = vsel %vm6604_vm6, %v6585_v42, %v6104_v63  ;;  %v3906_v63 = vld [vmem:[#allocation3 + $0x80] sm:$0x8] }
 0x3bc   : > { %v5662_v20 = vsel %vm8710_vm10, %v5657_v10, %v5661_v9  ;;  %v13296_v10 = vshrl.u32 %v13295_v55, 16  ;;  %v4095_v18 = vor.u32 %v13298_v61, %v4092_v57  ;;  %v4097_v8 = vrot.slane %v4092_v57, 4  ;;  %v13303_v55 = vld [vmem:[#allocation32_spill] sm:$0xff] }
 0x3bd   : > { %v6486_v31 = vunpack.c.l.b16 %v5662_v20  ;;  %v5673_v20 = vshll.u32 %v5569_v14, 16  ;;  %v5578_v14 = vld [vmem:[#allocation3 + $0x11c] sm:$0x1] }
 0x3be   : > { %v5663_v9 = vrot.slane %v13296_v10, 4  ;;  %v4105_v16 = vsel %vm8744_vm11, %v4097_v8, %v4104_v56  ;;  %v4096_v13 = vsel %vm8744_vm11, %v8021_v28, %v4095_v18  ;;  %v13304_v10 = vshll.u32 %v13303_v55, 16 }
 0x3bf   : > { %v12304_v27 = vpop.f32.mrf.mxu2  ;;  %v6512_v41 = vpack.c.b16 %v6486_v31, %v6485_v52  ;;  %v5675_v31 = vrot.slane %v5673_v20, 5  ;;  %v5817_v57 = vunpack.c.l.b16 %v4096_v13  ;;  %v13306_v28 = vshrl.u32 %v11691_v15, 16 }
 0x3c0   : > { %v5665_v46 = vor.u32 %v5664_v5, %v5663_v9  ;;  %v5946_v56 = vpop.permute.xlu2 %5945  ;;  %v5793_v9 = vrot.slane %v13304_v10, 5 }
 0x3c1   : > { %7010 = vmatmul.bf16.gmra.mxu1 %v6621_v32  ;;  %v4123_v61 = vrot.slane %v13306_v28, 7 }
 0x3c2   : > { %v5666_v42 = vrot.slane %v5665_v46, 4  ;;  %v13307_v46 = vshrl.u32 %v11669_v25, 16 }
 0x3c4   : > { %8330 = vmatmul.msk.bf16.gmra.mxu2 %vm3480_vm9, %v6511_v47  ;;  %v13292_v47 = vshrl.u32 %v13290_v4, 16  ;;  %v5818_v4 = vunpack.c.l.b16 %v4105_v16  ;;  %v5668_v20 = vsel %vm8710_vm10, %v5666_v42, %v5667_v60  ;;  %v4107_v16 = vshrl.u32 %v3906_v63, 16 }
 0x3c5   : > { %v6487_v26 = vunpack.c.l.b16 %v5668_v20 }
 0x3c6   : > { %v5669_v32 = vrot.slane %v13292_v47, 4  ;;  %v13299_v47 = vld [vmem:[#allocation31_spill] sm:$0xff]  ;;  %v5842_v5 = vpack.c.b16 %v5818_v4, %v5817_v57  ;;  %v13309_v57 = vshll.u32 %v11669_v25, 16 }
 0x3c7   : > { %v12328_v49 = vpop.f32.mrf.mxu2  ;;  %v13300_v34 = vshrl.u32 %v13299_v47, 16  ;;  %v13301_v12 = vshll.u32 %v13299_v47, 16 }
 0x3c8   : > { %v5670_v58 = vor.u32 %v5669_v32, %v5667_v60  ;;  %v6546_v8 = vsel %vm3480_vm9, %v5842_v5, %v5946_v56 }
 0x3c9   : > { %v5789_v32 = vrot.slane %v13300_v34, 4  ;;  %v5790_v11 = vrot.slane %v13301_v12, 5  ;;  %v13308_v34 = vshll.u32 %v11691_v15, 16 }
 0x3ca   : > { %v5671_v0 = vrot.slane %v5670_v58, 4  ;;  %v6026_v58 = vpop.permute.xlu0 %6025 }
 0x3cb   : > { %v6587_v13 = vsel %vm6571_vm0, %v6546_v8, %v6026_v58  ;;  %v4126_v60 = vor.u32 %v13308_v34, %v4123_v61 }
 0x3cc   : > { %v5676_v52 = vsel %vm8710_vm10, %v5671_v0, %v5675_v31  ;;  %v4114_v0 = vrot.slane %v13307_v46, 7 }
 0x3cd   : > { %v6488_v18 = vunpack.c.l.b16 %v5676_v52 }
 0x3ce   : > { %v4117_v42 = vor.u32 %v13309_v57, %v4114_v0  ;;  %v4119_v35 = vrot.slane %v4114_v0, 4 }
 0x3cf   : > { %v12353_v31 = vpop.f32.mrf.mxu2  ;;  %v6513_v12 = vpack.c.b16 %v6488_v18, %v6487_v26  ;;  %v3909_v18 = vld [vmem:[#allocation3 + $0x90] sm:$0x8] }
 0x3d0   : > { %v4127_v15 = vsel %vm8744_vm11, %v4119_v35, %v4126_v60  ;;  %v4129_v26 = vshrl.u32 %v3909_v18, 16  ;;  %v13312_v60 = vshll.u32 %v11748_v43, 16  ;;  %v13315_v18 = vshrl.u32 %v11797_v7, 16 }
 0x3d1   : > { %7015 = vmatmul.bf16.gmra.mxu1 %v6624_v59  ;;  %v13305_v59 = vshrl.u32 %v13303_v55, 16  ;;  %v5820_v5 = vunpack.c.l.b16 %v4127_v15 }
 0x3d2   : > { %v6028_v8 = vpop.permute.xlu0 %6027  ;;  %v8023_v57 = vrot.slane %v4129_v26, 11  ;;  %v13316_v26 = vshll.u32 %v11783_v33, 16 }
 0x3d3   : > { %v5795_v22 = vrot.slane %v13305_v59, 4 }
 0x3d4   : > { %8331 = vmatmul.msk.bf16.gmra.mxu2 %vm3480_vm9, %v6512_v41  ;;  %v5791_v41 = vor.u32 %v5790_v11, %v5789_v32  ;;  %v6106_v32 = vpop.permute.xlu1 %6105  ;;  %v8022_v11 = vrot.slane %v4107_v16, 11  ;;  %v13310_v16 = vshrl.u32 %v11748_v43, 16 }
 0x3d5   : > { %v5796_v47 = vor.u32 %v5795_v22, %v5793_v9  ;;  %v6627_v52 = vsel %vm6604_vm6, %v6587_v13, %v6106_v32 }
 0x3d6   : > { %v5792_v4 = vrot.slane %v5791_v41, 4  ;;  %v5799_v41 = vshll.u32 %v5578_v14, 16  ;;  %v4118_v59 = vsel %vm8744_vm11, %v8022_v11, %v4117_v42  ;;  %v4145_v46 = vrot.slane %v13310_v16, 7 }
 0x3d7   : > { %v5797_v63 = vrot.slane %v5796_v47, 4  ;;  %v5819_v20 = vunpack.c.l.b16 %v4118_v59  ;;  %v13313_v42 = vshll.u32 %v11745_v2, 16 }
 0x3d8   : > { %v5794_v56 = vsel %vm8710_vm10, %v5792_v4, %v5793_v9  ;;  %v5801_v55 = vrot.slane %v5799_v41, 5  ;;  %v5948_v9 = vpop.permute.xlu2 %5947  ;;  %v4136_v4 = vrot.slane %v13311_v30, 7  ;;  %v4148_v32 = vor.u32 %v13312_v60, %v4145_v46 }
 0x3d9   : > { %v6505_v25 = vunpack.c.l.b16 %v5794_v56  ;;  %v5843_v61 = vpack.c.b16 %v5820_v5, %v5819_v20  ;;  %v12388_v56 = vpop.f32.mrf.mxu3 }
 0x3da   : > { %v5802_v22 = vsel %vm8710_vm10, %v5797_v63, %v5801_v55  ;;  %v4141_v14 = vrot.slane %v4136_v4, 4  ;;  %v8527_v55 = vld [vmem:[%s12772_s7 + $0x38] sm:$0xff]  ;;  %v6030_v5 = vpop.permute.xlu0 %6029 }
 0x3db   : > { %v6506_v58 = vunpack.c.l.b16 %v5802_v22  ;;  %v6549_v0 = vsel %vm3480_vm9, %v5843_v61, %v5948_v9  ;;  %7565 = vmatpush.bf16.msrb.mxu0 %v8527_v55  ;;  %v3912_v22 = vld [vmem:[#allocation3 + $0xa0] sm:$0x8]  ;;  %v8526_v55 = vld [vmem:[%s12772_s7 + $0x30] sm:$0xff] }
 0x3dc   : > { %v6589_v47 = vsel %vm6571_vm0, %v6549_v0, %v6028_v8  ;;  %v4149_v35 = vsel %vm8744_vm11, %v4141_v14, %v4148_v32  ;;  %v4151_v61 = vshrl.u32 %v3912_v22, 16  ;;  %v4158_v8 = vrot.slane %v13315_v18, 7 }
 0x3dd   : > { %v6522_v28 = vpack.c.b16 %v6506_v58, %v6505_v25  ;;  %v5822_v41 = vunpack.c.l.b16 %v4149_v35  ;;  %v13314_v58 = vshrl.u32 %v11783_v33, 16  ;;  %v13317_v32 = vshll.u32 %v11797_v7, 16 }
 0x3de   : > { %v8024_v60 = vrot.slane %v4151_v61, 11 }
 0x3df   : > { %8341 = vmatmul.msk.bf16.gmra.mxu3 %vm3480_vm9, %v6522_v28  ;;  %v4167_v20 = vrot.slane %v13314_v58, 7  ;;  %7566 = vmatpush.bf16.msrb.mxu0 %v8526_v55  ;;  %v3915_v58 = vld [vmem:[#allocation3 + $0xb0] sm:$0x8] }
 0x3e0   : > { %v5950_v25 = vpop.permute.xlu2 %5949 }
 0x3e1   : > { %7020 = vmatmul.bf16.gmra.mxu1 %v6627_v52  ;;  %v4139_v52 = vor.u32 %v13313_v42, %v4136_v4  ;;  %v12405_v46 = vpop.f32.mrf.mxu3  ;;  %v4170_v30 = vor.u32 %v13316_v26, %v4167_v20  ;;  %v13320_v26 = vshrl.u32 %v11832_v45, 16 }
 0x3e2   : > { %v6032_v20 = vpop.permute.xlu0 %6031 }
 0x3e3   : > { %v4140_v43 = vsel %vm8744_vm11, %v8023_v57, %v4139_v52  ;;  %v12415_v57 = vld [vmem:[%s12769_s4] ss:$0 sm:$0xff] }
 0x3e4   : > { %8332 = vmatmul.msk.bf16.gmra.mxu2 %vm3480_vm9, %v6513_v12  ;;  %v6108_v12 = vpop.permute.xlu1 %6107  ;;  %v5821_v2 = vunpack.c.l.b16 %v4140_v43 }
 0x3e5   : > { %v6630_v11 = vsel %vm6604_vm6, %v6589_v47, %v6108_v12  ;;  %v4161_v12 = vor.u32 %v13317_v32, %v4158_v8  ;;  %v13321_v32 = vshll.u32 %v11819_v36, 16 }
 0x3e6   : > { %v5844_v59 = vpack.c.b16 %v5822_v41, %v5821_v2 }
 0x3e7   : > { %v12366_v10 = vpop.f32.mrf.mxu2  ;;  %v4162_v33 = vsel %vm8744_vm11, %v8024_v60, %v4161_v12 }
 0x3e8   : > { %v6552_v28 = vsel %vm3480_vm9, %v5844_v59, %v5950_v25  ;;  %v5823_v2 = vunpack.c.l.b16 %v4162_v33  ;;  %v5952_v25 = vpop.permute.xlu2 %5951  ;;  %v13318_v59 = vld [vmem:[#allocation36_spill] sm:$0xff] }
 0x3e9   : > { %v6591_v16 = vsel %vm6571_vm0, %v6552_v28, %v6030_v5  ;;  %v12422_v35 = vpop.f32.mrf.mxu3 }
 0x3ec   : > { %v6110_v4 = vpop.permute.xlu1 %6109 }
 0x3ed   : > { %v6633_v47 = vsel %vm6604_vm6, %v6591_v16, %v6110_v4  ;;  %v4173_v16 = vshrl.u32 %v3915_v58, 16 }
 0x3ee   : > { %v6986_v34 = vpop.f32.mrf.mxu1 }
 0x3ef   : > { %v12376_v13 = vpop.f32.mrf.mxu2  ;;  %v6987_v14 = vadd.f32 %v12415_v57, %v6986_v34  ;;  %v13319_v34 = vshrl.u32 %v11819_v36, 16 }
 0x3f1   : > { %7025 = vmatmul.bf16.gmra.mxu1 %v6630_v11  ;;  %v4163_v11 = vrot.slane %v4158_v8, 4  ;;  %v7076_v22 = vadd.f32 %v13318_v59, %v6987_v14  ;;  %v4189_v28 = vrot.slane %v13319_v34, 7  ;;  %v8025_v14 = vrot.slane %v4173_v16, 11  ;;  %v6034_v16 = vpop.permute.xlu0 %6033 }
 0x3f3   : > { %v4171_v42 = vsel %vm8744_vm11, %v4163_v11, %v4170_v30  ;;  %v4180_v30 = vrot.slane %v13320_v26, 7  ;;  %v4192_v12 = vor.u32 %v13321_v32, %v4189_v28 }
 0x3f4   : > { %v5824_v7 = vunpack.c.l.b16 %v4171_v42  ;;  %v6112_v11 = vpop.permute.xlu1 %6111 }
 0x3f5   : > { %v4185_v55 = vrot.slane %v4180_v30, 4 }
 0x3f6   : > { %v6988_v15 = vpop.f32.mrf.mxu1  ;;  %v5845_v5 = vpack.c.b16 %v5824_v7, %v5823_v2  ;;  %v13322_v7 = vshll.u32 %v11832_v45, 16  ;;  %v8525_v45 = vld [vmem:[%s12772_s7 + $0x28] sm:$0xff] }
 0x3f7   : > { %v12390_v63 = vpop.f32.mrf.mxu2  ;;  %v6989_v41 = vadd.f32 %v12415_v57, %v6988_v15  ;;  %7567 = vmatpush.bf16.msrb.mxu0 %v8525_v45 }
 0x3f8   : > { %v6555_v15 = vsel %vm3480_vm9, %v5845_v5, %v5952_v25  ;;  %v4193_v25 = vsel %vm8744_vm11, %v4185_v55, %v4192_v12 }
 0x3f9   : > { %v7078_v18 = vadd.f32 %v11427_v37, %v6989_v41  ;;  %v6593_v4 = vsel %vm6571_vm0, %v6555_v15, %v6032_v20  ;;  %v4183_v41 = vor.u32 %v13322_v7, %v4180_v30  ;;  %v5826_v5 = vunpack.c.l.b16 %v4193_v25 }
 0x3fa   : > { %v6636_v37 = vsel %vm6604_vm6, %v6593_v4, %v6112_v11  ;;  %v13324_v4 = vld [vmem:[#allocation37_spill] sm:$0xff]  ;;  %v13325_v11 = vld [vmem:[#allocation19_spill] sm:$0xff]  ;;  %v13327_v7 = vshll.u32 %v11892_v40, 16 }
 0x3fb   : > { %v4184_v59 = vsel %vm8744_vm11, %v8025_v14, %v4183_v41 }
 0x3fc   : > { %v5825_v28 = vunpack.c.l.b16 %v4184_v59  ;;  %v6114_v55 = vpop.permute.xlu1 %6113 }
 0x3fe   : > { %v6991_v0 = vpop.f32.mrf.mxu1  ;;  %v5846_v15 = vpack.c.b16 %v5826_v5, %v5825_v28 }
 0x3ff   : > { %v12400_v9 = vpop.f32.mrf.mxu2 }
 0x401   : > { %7030 = vmatmul.bf16.gmra.mxu1 %v6633_v47 }
 0x406   : > { %v6993_v43 = vpop.f32.mrf.mxu1 }
 0x407   : > { %v7164_v52 = vpop.f32.mrf.mxu2  ;;  %v6994_v20 = vadd.f32 %v12415_v57, %v6993_v43 }
 0x408   : > { %v7165_v61 = vadd.f32 %v7164_v52, %v7076_v22  ;;  %v12438_v52 = vpop.f32.mrf.mxu3  ;;  %v6992_v22 = vadd.f32 %v12415_v57, %v6991_v0  ;;  %v13323_v0 = vshrl.u32 %v11892_v40, 16 }
 0x409   : > { %v7083_v43 = vadd.f32 %v13324_v4, %v6994_v20 }
 0x40a   : > { %v7244_v42 = vmax.f32 %v7165_v61, 0.0  ;;  %v5954_v61 = vpop.permute.xlu2 %5953  ;;  %v4211_v26 = vrot.slane %v13323_v0, 7 }
 0x40c   : > { %v4214_v41 = vor.u32 %v13327_v7, %v4211_v26  ;;  %v8524_v26 = vld [vmem:[%s12772_s7 + $0x20] sm:$0xff]  ;;  %v13332_v7 = vld [vmem:[#allocation39_spill] sm:$0xff] }
 0x40d   : > { %7568 = vmatpush.bf16.msrb.mxu0 %v8524_v26 }
 0x40e   : > { %v6996_v60 = vpop.f32.mrf.mxu1 }
 0x40f   : > { %v7166_v8 = vpop.f32.mrf.mxu2 }
 0x410   : > { %v7167_v47 = vadd.f32 %v7166_v8, %v7078_v18  ;;  %v12453_v34 = vpop.f32.mrf.mxu3  ;;  %v7081_v18 = vadd.f32 %v11486_v29, %v6992_v22  ;;  %v3918_v8 = vld [vmem:[#allocation3 + $0xc0] sm:$0x8]  ;;  %v13328_v22 = vshll.u32 %v13325_v11, 16 }
 0x411   : > { %7035 = vmatmul.bf16.gmra.mxu1 %v6636_v37  ;;  %v4195_v12 = vshrl.u32 %v3918_v8, 16 }
 0x412   : > { %v7245_v33 = vmax.f32 %v7167_v47, 0.0  ;;  %v6558_v47 = vsel %vm3480_vm9, %v5846_v15, %v5954_v61  ;;  %v6997_v15 = vadd.f32 %v12415_v57, %v6996_v60  ;;  %v5956_v4 = vpop.permute.xlu2 %5955 }
 0x413   : > { %v6595_v37 = vsel %vm6571_vm0, %v6558_v47, %v6034_v16  ;;  %v8026_v59 = vrot.slane %v4195_v12, 11 }
 0x414   : > { %v7276_v2 = vpack.c.bf16 %v7245_v33, %v7244_v42  ;;  %v13326_v42 = vshrl.u32 %v13325_v11, 16  ;;  %v3921_v11 = vld [vmem:[#allocation3 + $0xd0] sm:$0x8] }
 0x416   : > { %8350 = vmatmul.msk.bf16.vlgmr.msrb.gmra.mxu3 %vm3480_vm9, %v7276_v2  ;;  %v6998_v58 = vpop.f32.mrf.mxu1  ;;  %v4202_v33 = vrot.slane %v13326_v42, 7  ;;  %v6036_v42 = vpop.permute.xlu0 %6035 }
 0x417   : > { %v7169_v36 = vpop.f32.mrf.mxu2  ;;  %v6999_v0 = vadd.f32 %v12415_v57, %v6998_v58 }
 0x418   : > { %v7170_v30 = vadd.f32 %v7169_v36, %v7081_v18  ;;  %v6639_v36 = vsel %vm6604_vm6, %v6595_v37, %v6114_v55  ;;  %v4205_v5 = vor.u32 %v13328_v22, %v4202_v33  ;;  %v4207_v20 = vrot.slane %v4202_v33, 4  ;;  %v12468_v28 = vpop.f32.mrf.mxu3  ;;  %v13330_v33 = vld [vmem:[#allocation22_spill] sm:$0xff] }
 0x419   : > { %v13331_v60 = vshrl.u32 %v13330_v33, 16  ;;  %v7088_v58 = vadd.f32 %v13332_v7, %v6999_v0 }
 0x41a   : > { %v7246_v2 = vmax.f32 %v7170_v30, 0.0  ;;  %v4215_v61 = vsel %vm8744_vm11, %v4207_v20, %v4214_v41  ;;  %v4206_v18 = vsel %vm8744_vm11, %v8026_v59, %v4205_v5 }
 0x41b   : > { %v5828_v8 = vunpack.c.l.b16 %v4215_v61  ;;  %v5827_v30 = vunpack.c.l.b16 %v4206_v18  ;;  %v4233_v37 = vrot.slane %v13331_v60, 7  ;;  %v6116_v18 = vpop.permute.xlu1 %6115 }
 0x41d   : > { %v5847_v12 = vpack.c.b16 %v5828_v8, %v5827_v30 }
 0x41e   : > { %v7001_v14 = vpop.f32.mrf.mxu1 }
 0x41f   : > { %v7171_v32 = vpop.f32.mrf.mxu2  ;;  %v6561_v41 = vsel %vm3480_vm9, %v5847_v12, %v5956_v4 }
 0x420   : > { %v7172_v29 = vadd.f32 %v7171_v32, %v7083_v43  ;;  %v13329_v43 = vld [vmem:[#allocation38_spill] sm:$0xff]  ;;  %v12481_v32 = vpop.f32.mrf.mxu3  ;;  %v6597_v22 = vsel %vm6571_vm0, %v6561_v41, %v6036_v42  ;;  %v13337_v41 = vld [vmem:[#allocation40_spill] sm:$0xff] }
 0x421   : > { %7040 = vmatmul.bf16.gmra.mxu1 %v6639_v36  ;;  %v7086_v47 = vadd.f32 %v13329_v43, %v6997_v15 }
 0x422   : > { %v7247_v25 = vmax.f32 %v7172_v29, 0.0 }
 0x424   : > { %v7277_v45 = vpack.c.bf16 %v7247_v25, %v7246_v2  ;;  %v4217_v2 = vshrl.u32 %v3921_v11, 16  ;;  %v13333_v25 = vld [vmem:[#allocation23_spill] sm:$0xff] }
 0x425   : > { %v13334_v36 = vshrl.u32 %v13333_v25, 16  ;;  %v13336_v26 = vshll.u32 %v13333_v25, 16  ;;  %v3924_v25 = vld [vmem:[#allocation3 + $0xe0] sm:$0x8] }
 0x426   : > { %8351 = vmatmul.msk.bf16.gmra.mxu3 %vm3480_vm9, %v7277_v45  ;;  %v7003_v16 = vpop.f32.mrf.mxu1  ;;  %v13335_v45 = vshll.u32 %v13330_v33, 16  ;;  %v8027_v0 = vrot.slane %v4217_v2, 11  ;;  %v7002_v33 = vadd.f32 %v12415_v57, %v7001_v14 }
 0x427   : > { %v7174_v40 = vpop.f32.mrf.mxu2  ;;  %v4224_v59 = vrot.slane %v13334_v36, 7  ;;  %v6038_v36 = vpop.permute.xlu0 %6037 }
 0x428   : > { %v7175_v29 = vadd.f32 %v7174_v40, %v7086_v47  ;;  %v4236_v61 = vor.u32 %v13335_v45, %v4233_v37  ;;  %v6642_v40 = vsel %vm6604_vm6, %v6597_v22, %v6116_v18  ;;  %v12498_v12 = vpop.f32.mrf.mxu3 }
 0x429   : > { %v4227_v30 = vor.u32 %v13336_v26, %v4224_v59  ;;  %v4229_v4 = vrot.slane %v4224_v59, 4  ;;  %v13338_v59 = vld [vmem:[#allocation24_spill] sm:$0xff] }
 0x42a   : > { %v7248_v15 = vmax.f32 %v7175_v29, 0.0  ;;  %v7004_v29 = vadd.f32 %v12415_v57, %v7003_v16  ;;  %v13339_v22 = vshrl.u32 %v13338_v59, 16  ;;  %v13341_v16 = vld [vmem:[#allocation34_spill] sm:$0xff] }
 0x42b   : > { %v4237_v47 = vsel %vm8744_vm11, %v4229_v4, %v4236_v61  ;;  %v4228_v42 = vsel %vm8744_vm11, %v8027_v0, %v4227_v30  ;;  %v13340_v61 = vld [vmem:[#allocation41_spill] sm:$0xff]  ;;  %v13342_v0 = vshrl.u32 %v13341_v16, 16 }
 0x42c   : > { %v5830_v60 = vunpack.c.l.b16 %v4237_v47  ;;  %v5829_v7 = vunpack.c.l.b16 %v4228_v42  ;;  %v7093_v18 = vadd.f32 %v13340_v61, %v7004_v29  ;;  %v13343_v47 = vshll.u32 %v13338_v59, 16 }
 0x42d   : > { %v4246_v26 = vrot.slane %v13342_v0, 7 }
 0x42e   : > { %v7006_v20 = vpop.f32.mrf.mxu1  ;;  %v5848_v2 = vpack.c.b16 %v5830_v60, %v5829_v7 }
 0x42f   : > { %v7176_v55 = vpop.f32.mrf.mxu2 }
 0x430   : > { %v7177_v5 = vadd.f32 %v7176_v55, %v7088_v58  ;;  %v5958_v58 = vpop.permute.xlu2 %5957  ;;  %v7091_v55 = vadd.f32 %v13337_v41, %v7002_v33  ;;  %v6118_v33 = vpop.permute.xlu1 %6117 }
 0x431   : > { %7045 = vmatmul.bf16.gmra.mxu1 %v6642_v40  ;;  %v6564_v14 = vsel %vm3480_vm9, %v5848_v2, %v5958_v58  ;;  %v4239_v40 = vshrl.u32 %v3924_v25, 16  ;;  %v13344_v58 = vshll.u32 %v13341_v16, 16  ;;  %v8523_v25 = vld [vmem:[%s12772_s7 + $0x18] sm:$0xff]  ;;  %v13345_v16 = vld [vmem:[#allocation18_spill] sm:$0xff] }
 0x432   : > { %v7249_v8 = vmax.f32 %v7177_v5, 0.0  ;;  %v4255_v5 = vrot.slane %v13339_v22, 7  ;;  %v6599_v30 = vsel %vm6571_vm0, %v6564_v14, %v6038_v36  ;;  %7569 = vmatpush.bf16.msrb.mxu0 %v8523_v25  ;;  %v13348_v25 = vshll.u32 %v12043_v50, 16 }
 0x433   : > { %v6645_v29 = vsel %vm6604_vm6, %v6599_v30, %v6118_v33  ;;  %v8028_v7 = vrot.slane %v4239_v40, 11  ;;  %v4249_v41 = vor.u32 %v13344_v58, %v4246_v26  ;;  %v3927_v30 = vld [vmem:[#allocation3 + $0xf0] sm:$0x8] }
 0x434   : > { %v7278_v43 = vpack.c.bf16 %v7249_v8, %v7248_v15  ;;  %v12508_v15 = vpop.f32.mrf.mxu3  ;;  %v4258_v42 = vor.u32 %v13343_v47, %v4255_v5  ;;  %v7007_v5 = vadd.f32 %v12415_v57, %v7006_v20  ;;  %v13346_v47 = vshrl.u32 %v12043_v50, 16 }
 0x435   : > { %v4250_v22 = vsel %vm8744_vm11, %v8028_v7, %v4249_v41  ;;  %v4261_v7 = vshrl.u32 %v3927_v30, 16  ;;  %v8522_v30 = vld [vmem:[%s12772_s7 + $0x10] sm:$0xff] }
 0x436   : > { %8352 = vmatmul.msk.bf16.gmra.mxu3 %vm3480_vm9, %v7278_v43  ;;  %v7008_v37 = vpop.f32.mrf.mxu1  ;;  %v7096_v0 = vadd.f32 %v13345_v16, %v7007_v5  ;;  %7570 = vmatpush.bf16.msrb.mxu0 %v8522_v30 }
 0x437   : > { %v7179_v11 = vpop.f32.mrf.mxu2  ;;  %v7009_v14 = vadd.f32 %v12415_v57, %v7008_v37  ;;  %v4268_v37 = vrot.slane %v4266_v54, 7 }
 0x438   : > { %v7180_v45 = vadd.f32 %v7179_v11, %v7091_v55  ;;  %v4251_v55 = vrot.slane %v4246_v26, 4  ;;  %v5960_v40 = vpop.permute.xlu2 %5959 }
 0x43a   : > { %v7250_v11 = vmax.f32 %v7180_v45, 0.0  ;;  %v4259_v36 = vsel %vm8744_vm11, %v4251_v55, %v4258_v42  ;;  %v4277_v42 = vrot.slane %v13346_v47, 7 }
 0x43b   : > { %v5832_v61 = vunpack.c.l.b16 %v4259_v36 }
 0x43c   : > { %v12528_v45 = vpop.f32.mrf.mxu3  ;;  %v4280_v36 = vor.u32 %v13348_v25, %v4277_v42 }
 0x43e   : > { %v7011_v43 = vpop.f32.mrf.mxu1 }
 0x43f   : > { %v7181_v8 = vpop.f32.mrf.mxu2 }
 0x440   : > { %v7182_v4 = vadd.f32 %v7181_v8, %v7093_v18  ;;  %v5831_v8 = vunpack.c.l.b16 %v4250_v22  ;;  %v6120_v22 = vpop.permute.xlu1 %6119 }
 0x441   : > { %7050 = vmatmul.bf16.gmra.mxu1 %v6645_v29 }
 0x442   : > { %v7251_v60 = vmax.f32 %v7182_v4, 0.0  ;;  %v5849_v26 = vpack.c.b16 %v5832_v61, %v5831_v8  ;;  %v6040_v4 = vpop.permute.xlu0 %6039  ;;  %v4271_v8 = vor.u32 %v4269_v62, %v4268_v37 }
 0x444   : > { %v7279_v2 = vpack.c.bf16 %v7251_v60, %v7250_v11  ;;  %v13347_v11 = vld [vmem:[#allocation20_spill] sm:$0xff]  ;;  %v6567_v20 = vsel %vm3480_vm9, %v5849_v26, %v5960_v40  ;;  %v12539_v55 = vpop.f32.mrf.mxu3  ;;  %v4273_v40 = vrot.slane %v4268_v37, 4  ;;  %v7012_v26 = vadd.f32 %v12415_v57, %v7011_v43 }
 0x445   : > { %v7098_v60 = vadd.f32 %v13347_v11, %v7009_v14  ;;  %v6601_v58 = vsel %vm6571_vm0, %v6567_v20, %v6040_v4  ;;  %v8029_v14 = vrot.slane %v4261_v7, 11  ;;  %v13349_v11 = vld [vmem:[#allocation5_spill] sm:$0xff] }
 0x446   : > { %8353 = vmatmul.msk.bf16.gmra.mxu3 %vm3480_vm9, %v7279_v2  ;;  %v7013_v18 = vpop.f32.mrf.mxu1  ;;  %v6648_v61 = vsel %vm6604_vm6, %v6601_v58, %v6120_v22  ;;  %v4281_v16 = vsel %vm8744_vm11, %v4273_v40, %v4280_v36  ;;  %v13350_v7 = vld [vmem:[#allocation21_spill] sm:$0xff] }
 0x447   : > { %v7184_v59 = vpop.f32.mrf.mxu2  ;;  %v4272_v50 = vsel %vm8744_vm11, %v8029_v14, %v4271_v8  ;;  %v5834_v19 = vunpack.c.l.b16 %v4281_v16  ;;  %v7014_v4 = vadd.f32 %v12415_v57, %v7013_v18 }
 0x448   : > { %v7185_v33 = vadd.f32 %v7184_v59, %v7096_v0  ;;  %v5833_v42 = vunpack.c.l.b16 %v4272_v50  ;;  %v6122_v18 = vpop.permute.xlu1 %6121  ;;  %v13351_v50 = vld [vmem:[#allocation25_spill] sm:$0xff] }
 0x449   : > { %v7103_v43 = vadd.f32 %v13350_v7, %v7014_v4 }
 0x44a   : > { %v7252_v59 = vmax.f32 %v7185_v33, 0.0  ;;  %v5962_v33 = vpop.permute.xlu2 %5961  ;;  %v5850_v20 = vpack.c.b16 %v5834_v19, %v5833_v42  ;;  %v6042_v53 = vpop.permute.xlu0 %6041 }
 0x44c   : > { %v12556_v47 = vpop.f32.mrf.mxu3  ;;  %v6570_v37 = vsel %vm3480_vm9, %v5850_v20, %v5962_v33 }
 0x44e   : > { %v7016_v2 = vpop.f32.mrf.mxu1 }
 0x44f   : > { %v7186_v29 = vpop.f32.mrf.mxu2  ;;  %v7017_v40 = vadd.f32 %v12415_v57, %v7016_v2 }
 0x450   : > { %v7187_v41 = vadd.f32 %v7186_v29, %v7098_v60  ;;  %v7101_v60 = vadd.f32 %v13349_v11, %v7012_v26 }
 0x451   : > { %7055 = vmatmul.bf16.gmra.mxu1 %v6648_v61  ;;  %v7106_v26 = vadd.f32 %v13351_v50, %v7017_v40 }
 0x452   : > { %v7253_v5 = vmax.f32 %v7187_v41, 0.0  ;;  %v6603_v41 = vsel %vm6571_vm0, %v6570_v37, %v6042_v53 }
 0x453   : > { %v6651_v61 = vsel %vm6604_vm6, %v6603_v41, %v6122_v18 }
 0x454   : > { %v7280_v54 = vpack.c.bf16 %v7253_v5, %v7252_v59  ;;  %v12562_v5 = vpop.f32.mrf.mxu3 }
 0x456   : > { %8354 = vmatmul.msk.bf16.gmra.mxu3 %vm3480_vm9, %v7280_v54  ;;  %v7018_v62 = vpop.f32.mrf.mxu1  ;;  %v8521_v54 = vld [vmem:[%s12772_s7 + $0x8] sm:$0xff] }
 0x457   : > { %v7189_v0 = vpop.f32.mrf.mxu2  ;;  %7571 = vmatpush.bf16.msrb.mxu0 %v8521_v54 }
 0x458   : > { %v7190_v29 = vadd.f32 %v7189_v0, %v7101_v60  ;;  %v7019_v0 = vadd.f32 %v12415_v57, %v7018_v62 }
 0x45a   : > { %v7254_v22 = vmax.f32 %v7190_v29, 0.0  ;;  %v7108_v4 = vadd.f32 %v12069_v17, %v7019_v0  ;;  %v8520_v17 = vld [vmem:[%s12772_s7] sm:$0xff] }
 0x45b   : > { %7572 = vmatpush.bf16.msrb.mxu0 %v8520_v17 }
 0x45c   : > { %v12572_v30 = vpop.f32.mrf.mxu3 }
 0x45e   : > { %v7021_v36 = vpop.f32.mrf.mxu1 }
 0x45f   : > { %v7191_v58 = vpop.f32.mrf.mxu2  ;;  %v7022_v62 = vadd.f32 %v12415_v57, %v7021_v36 }
 0x460   : > { %v7192_v25 = vadd.f32 %v7191_v58, %v7103_v43 }
 0x461   : > { %7060 = vmatmul.bf16.gmra.mxu1 %v6651_v61  ;;  %v7111_v37 = vadd.f32 %v12110_v3, %v7022_v62 }
 0x462   : > { %v7255_v59 = vmax.f32 %v7192_v25, 0.0 }
 0x463   : > { %v7200_v41 = vadd.f32 %v12388_v56, %v7111_v37 }
 0x464   : > { %v7281_v14 = vpack.c.bf16 %v7255_v59, %v7254_v22  ;;  %v12576_v29 = vpop.f32.mrf.mxu3 }
 0x465   : > { %v7258_v22 = vmax.f32 %v7200_v41, 0.0 }
 0x466   : > { %8355 = vmatmul.msk.bf16.gmra.mxu3 %vm3480_vm9, %v7281_v14  ;;  %v7023_v16 = vpop.f32.mrf.mxu1 }
 0x467   : > { %v7194_v8 = vpop.f32.mrf.mxu2  ;;  %v7024_v20 = vadd.f32 %v12415_v57, %v7023_v16 }
 0x468   : > { %v7195_v19 = vadd.f32 %v7194_v8, %v7106_v26 }
 0x469   : > { %v7113_v7 = vadd.f32 %v12131_v23, %v7024_v20 }
 0x46a   : > { %v7256_v60 = vmax.f32 %v7195_v19, 0.0 }
 0x46b   : > { %v7202_v58 = vadd.f32 %v12405_v46, %v7113_v7 }
 0x46c   : > { %v12587_v25 = vpop.f32.mrf.mxu3 }
 0x46d   : > { %v7259_v18 = vmax.f32 %v7202_v58, 0.0 }
 0x46e   : > { %v7026_v11 = vpop.f32.mrf.mxu1 }
 0x46f   : > { %v7196_v42 = vpop.f32.mrf.mxu2  ;;  %v7283_v59 = vpack.c.bf16 %v7259_v18, %v7258_v22  ;;  %v7027_v61 = vadd.f32 %v12415_v57, %v7026_v11 }
 0x470   : > { %v7197_v33 = vadd.f32 %v7196_v42, %v7108_v4 }
 0x471   : > { %v7116_v46 = vadd.f32 %v12142_v48, %v7027_v61 }
 0x472   : > { %v7257_v2 = vmax.f32 %v7197_v33, 0.0  ;;  %v12609_v33 = vld [vmem:[%s12771_s6] ss:$0 sm:$0xff] }
 0x473   : > { %v7205_v40 = vadd.f32 %v12422_v35, %v7116_v46 }
 0x474   : > { %v7282_v53 = vpack.c.bf16 %v7257_v2, %v7256_v60  ;;  %v12592_v14 = vpop.f32.mrf.mxu3 }
 0x475   : > { %v7260_v50 = vmax.f32 %v7205_v40, 0.0 }
 0x476   : > { %8356 = vmatmul.msk.bf16.gmra.mxu3 %vm3480_vm9, %v7282_v53  ;;  %v7028_v43 = vpop.f32.mrf.mxu1 }
 0x477   : > { %v7029_v23 = vadd.f32 %v12415_v57, %v7028_v43 }
 0x479   : > { %v7118_v3 = vadd.f32 %v12167_v24, %v7029_v23 }
 0x47b   : > { %v7207_v56 = vadd.f32 %v12438_v52, %v7118_v3 }
 0x47c   : > { %v12598_v16 = vpop.f32.mrf.mxu3 }
 0x47d   : > { %v7261_v54 = vmax.f32 %v7207_v56, 0.0 }
 0x47e   : > { %v7031_v36 = vpop.f32.mrf.mxu1 }
 0x47f   : > { %v7284_v26 = vpack.c.bf16 %v7261_v54, %v7260_v50  ;;  %v7032_v4 = vadd.f32 %v12415_v57, %v7031_v36 }
 0x481   : > { %v7121_v52 = vadd.f32 %v12175_v38, %v7032_v4 }
 0x483   : > { %v7210_v11 = vadd.f32 %v12453_v34, %v7121_v52 }
 0x485   : > { %v7262_v62 = vmax.f32 %v7210_v11, 0.0 }
 0x486   : > { %8357 = vmatmul.msk.bf16.gmra.mxu3 %vm3480_vm9, %v7283_v59  ;;  %v7033_v8 = vpop.f32.mrf.mxu1 }
 0x487   : > { %v7034_v19 = vadd.f32 %v12415_v57, %v7033_v8 }
 0x489   : > { %v7123_v24 = vadd.f32 %v12201_v6, %v7034_v19 }
 0x48b   : > { %v7212_v35 = vadd.f32 %v12468_v28, %v7123_v24 }
 0x48d   : > { %v7263_v60 = vmax.f32 %v7212_v35, 0.0 }
 0x48e   : > { %v7036_v0 = vpop.f32.mrf.mxu1 }
 0x48f   : > { %v7285_v7 = vpack.c.bf16 %v7263_v60, %v7262_v62  ;;  %v7037_v43 = vadd.f32 %v12415_v57, %v7036_v0 }
 0x491   : > { %v7126_v18 = vadd.f32 %v12212_v21, %v7037_v43 }
 0x493   : > { %v7215_v22 = vadd.f32 %v12481_v32, %v7126_v18 }
 0x495   : > { %v7264_v8 = vmax.f32 %v7215_v22, 0.0 }
 0x496   : > { %8358 = vmatmul.msk.bf16.gmra.mxu3 %vm3480_vm9, %v7284_v26  ;;  %v7038_v42 = vpop.f32.mrf.mxu1 }
 0x497   : > { %v7039_v38 = vadd.f32 %v12415_v57, %v7038_v42 }
 0x499   : > { %v7369_v48 = vpop.f32.mrf.mxu3  ;;  %v7128_v34 = vadd.f32 %v12235_v44, %v7039_v38 }
 0x49a   : > { %v7370_v2 = vadd.f32 %v12609_v33, %v7369_v48 }
 0x49b   : > { %v7217_v36 = vadd.f32 %v12498_v12, %v7128_v34 }
 0x49c   : > { %v7449_v17 = vmax.f32 %v7370_v2, 0.0 }
 0x49d   : > { %v7265_v59 = vmax.f32 %v7217_v36, 0.0 }
 0x49e   : > { %v7041_v20 = vpop.f32.mrf.mxu1 }
 0x49f   : > { %v7286_v56 = vpack.c.bf16 %v7265_v59, %v7264_v8  ;;  %v7042_v0 = vadd.f32 %v12415_v57, %v7041_v20 }
 0x4a1   : > { %v7371_v53 = vpop.f32.mrf.mxu3  ;;  %v7131_v26 = vadd.f32 %v12254_v1, %v7042_v0 }
 0x4a2   : > { %v7372_v6 = vadd.f32 %v12609_v33, %v7371_v53 }
 0x4a3   : > { %v7220_v4 = vadd.f32 %v12508_v15, %v7131_v26 }
 0x4a4   : > { %v7450_v28 = vmax.f32 %v7372_v6, 0.0 }
 0x4a5   : > { %v7266_v35 = vmax.f32 %v7220_v4, 0.0 }
 0x4a6   : > { %8359 = vmatmul.msk.bf16.gmra.mxu3 %vm3480_vm9, %v7285_v7  ;;  %v7481_v37 = vpack.c.bf16 %v7450_v28, %v7449_v17  ;;  %v7043_v58 = vpop.f32.mrf.mxu1 }
 0x4a7   : > { %v7044_v44 = vadd.f32 %v12415_v57, %v7043_v58 }
 0x4a8   : > { %7573 = vmatmul.bf16.vlgmr.msrb.gmra.mxu0 %v7481_v37 }
 0x4a9   : > { %v7374_v41 = vpop.f32.mrf.mxu3  ;;  %v7133_v32 = vadd.f32 %v12270_v39, %v7044_v44 }
 0x4aa   : > { %v7375_v23 = vadd.f32 %v12609_v33, %v7374_v41 }
 0x4ab   : > { %v7222_v19 = vadd.f32 %v12528_v45, %v7133_v32 }
 0x4ac   : > { %v7451_v40 = vmax.f32 %v7375_v23, 0.0 }
 0x4ad   : > { %v7267_v24 = vmax.f32 %v7222_v19, 0.0 }
 0x4ae   : > { %v7046_v61 = vpop.f32.mrf.mxu1 }
 0x4af   : > { %v7287_v60 = vpack.c.bf16 %v7267_v24, %v7266_v35  ;;  %v7047_v53 = vadd.f32 %v12415_v57, %v7046_v61 }
 0x4b1   : > { %v7376_v3 = vpop.f32.mrf.mxu3  ;;  %v7136_v6 = vadd.f32 %v12290_v51, %v7047_v53 }
 0x4b2   : > { %v7377_v46 = vadd.f32 %v12609_v33, %v7376_v3 }
 0x4b3   : > { %v7225_v38 = vadd.f32 %v12539_v55, %v7136_v6 }
 0x4b4   : > { %v7452_v54 = vmax.f32 %v7377_v46, 0.0 }
 0x4b5   : > { %v7268_v37 = vmax.f32 %v7225_v38, 0.0 }
 0x4b6   : > { %8360 = vmatmul.msk.bf16.gmra.mxu3 %vm3480_vm9, %v7286_v56  ;;  %v7482_v21 = vpack.c.bf16 %v7452_v54, %v7451_v40  ;;  %v7048_v12 = vpop.f32.mrf.mxu1 }
 0x4b7   : > { %v7049_v39 = vadd.f32 %v12415_v57, %v7048_v12 }
 0x4b8   : > { %7578 = vmatmul.bf16.gmra.mxu0 %v7482_v21 }
 0x4b9   : > { %v7379_v50 = vpop.f32.mrf.mxu3  ;;  %v7138_v15 = vadd.f32 %v12304_v27, %v7049_v39 }
 0x4ba   : > { %v7380_v42 = vadd.f32 %v12609_v33, %v7379_v50 }
 0x4bb   : > { %v7227_v7 = vadd.f32 %v12556_v47, %v7138_v15 }
 0x4bc   : > { %v7453_v2 = vmax.f32 %v7380_v42, 0.0 }
 0x4bd   : > { %v7269_v17 = vmax.f32 %v7227_v7, 0.0 }
 0x4be   : > { %v7051_v48 = vpop.f32.mrf.mxu1 }
 0x4bf   : > { %v7288_v41 = vpack.c.bf16 %v7269_v17, %v7268_v37  ;;  %v7052_v22 = vadd.f32 %v12415_v57, %v7051_v48 }
 0x4c1   : > { %v7381_v52 = vpop.f32.mrf.mxu3  ;;  %v7141_v59 = vadd.f32 %v12328_v49, %v7052_v22 }
 0x4c2   : > { %v7382_v11 = vadd.f32 %v12609_v33, %v7381_v52 }
 0x4c3   : > { %v7230_v3 = vadd.f32 %v12562_v5, %v7141_v59 }
 0x4c4   : > { %v7454_v20 = vmax.f32 %v7382_v11, 0.0 }
 0x4c5   : > { %v7270_v44 = vmax.f32 %v7230_v3, 0.0 }
 0x4c6   : > { %8361 = vmatmul.msk.bf16.gmra.mxu3 %vm3480_vm9, %v7287_v60  ;;  %v7483_v1 = vpack.c.bf16 %v7454_v20, %v7453_v2  ;;  %v7053_v45 = vpop.f32.mrf.mxu1 }
 0x4c7   : > { %v7054_v27 = vadd.f32 %v12415_v57, %v7053_v45 }
 0x4c8   : > { %7583 = vmatmul.bf16.gmra.mxu0 %v7483_v1 }
 0x4c9   : > { %v7384_v62 = vpop.f32.mrf.mxu3  ;;  %v7143_v55 = vadd.f32 %v12353_v31, %v7054_v27 }
 0x4ca   : > { %v7385_v28 = vadd.f32 %v12609_v33, %v7384_v62 }
 0x4cb   : > { %v7232_v23 = vadd.f32 %v12572_v30, %v7143_v55 }
 0x4cc   : > { %v7455_v18 = vmax.f32 %v7385_v28, 0.0 }
 0x4cd   : > { %v7271_v8 = vmax.f32 %v7232_v23, 0.0 }
 0x4ce   : > { %v7056_v58 = vpop.f32.mrf.mxu1 }
 0x4cf   : > { %v7289_v54 = vpack.c.bf16 %v7271_v8, %v7270_v44  ;;  %v7057_v32 = vadd.f32 %v12415_v57, %v7056_v58 }
 0x4d1   : > { %v7386_v43 = vpop.f32.mrf.mxu3  ;;  %v7146_v50 = vadd.f32 %v12366_v10, %v7057_v32 }
 0x4d2   : > { %v7387_v34 = vadd.f32 %v12609_v33, %v7386_v43 }
 0x4d3   : > { %v7235_v19 = vadd.f32 %v12576_v29, %v7146_v50 }
 0x4d4   : > { %v7456_v36 = vmax.f32 %v7387_v34, 0.0 }
 0x4d5   : > { %v7272_v52 = vmax.f32 %v7235_v19, 0.0 }
 0x4d6   : > { %8362 = vmatmul.msk.bf16.gmra.mxu3 %vm3480_vm9, %v7288_v41  ;;  %v7484_v51 = vpack.c.bf16 %v7456_v36, %v7455_v18  ;;  %v7058_v61 = vpop.f32.mrf.mxu1  ;;  %v12677_v36 = vld [vmem:[%s12773_s8] ss:$0 sm:$0xff] }
 0x4d7   : > { %v7059_v0 = vadd.f32 %v12415_v57, %v7058_v61 }
 0x4d8   : > { %7588 = vmatmul.bf16.gmra.mxu0 %v7484_v51 }
 0x4d9   : > { %v7389_v47 = vpop.f32.mrf.mxu3  ;;  %v7148_v5 = vadd.f32 %v12376_v13, %v7059_v0 }
 0x4da   : > { %v7390_v46 = vadd.f32 %v12609_v33, %v7389_v47 }
 0x4db   : > { %v7237_v26 = vadd.f32 %v12587_v25, %v7148_v5 }
 0x4dc   : > { %v7457_v31 = vmax.f32 %v7390_v46, 0.0 }
 0x4dd   : > { %v7273_v4 = vmax.f32 %v7237_v26, 0.0 }
 0x4de   : > { %v7061_v30 = vpop.f32.mrf.mxu1 }
 0x4df   : > { %v7290_v11 = vpack.c.bf16 %v7273_v4, %v7272_v52  ;;  %v7062_v2 = vadd.f32 %v12415_v57, %v7061_v30 }
 0x4e1   : > { %v7391_v56 = vpop.f32.mrf.mxu3  ;;  %v7151_v20 = vadd.f32 %v12390_v63, %v7062_v2 }
 0x4e2   : > { %v7392_v40 = vadd.f32 %v12609_v33, %v7391_v56 }
 0x4e3   : > { %v7240_v1 = vadd.f32 %v12592_v14, %v7151_v20 }
 0x4e4   : > { %v7458_v21 = vmax.f32 %v7392_v40, 0.0 }
 0x4e5   : > { %v7274_v6 = vmax.f32 %v7240_v1, 0.0 }
 0x4e6   : > { %v7485_v49 = vpack.c.bf16 %v7458_v21, %v7457_v31  ;;  %8363 = vmatmul.msk.bf16.gmra.mxu3 %vm3480_vm9, %v7289_v54  ;;  %v7063_v42 = vpop.f32.mrf.mxu1 }
 0x4e7   : > { %v7064_v60 = vadd.f32 %v12415_v57, %v7063_v42 }
 0x4e8   : > { %7593 = vmatmul.bf16.gmra.mxu0 %v7485_v49 }
 0x4e9   : > { %v7394_v12 = vpop.f32.mrf.mxu3  ;;  %v7153_v29 = vadd.f32 %v12400_v9, %v7064_v60 }
 0x4ea   : > { %v7395_v24 = vadd.f32 %v12609_v33, %v7394_v12 }
 0x4eb   : > { %v7242_v53 = vadd.f32 %v12598_v16, %v7153_v29 }
 0x4ec   : > { %v7459_v13 = vmax.f32 %v7395_v24, 0.0 }
 0x4ed   : > { %v7275_v15 = vmax.f32 %v7242_v53, 0.0 }
 0x4ef   : > { %v7291_v7 = vpack.c.bf16 %v7275_v15, %v7274_v6 }
 0x4f1   : > { %v7396_v48 = vpop.f32.mrf.mxu3 }
 0x4f2   : > { %v7397_v35 = vadd.f32 %v12609_v33, %v7396_v48 }
 0x4f4   : > { %v7460_v39 = vmax.f32 %v7397_v35, 0.0 }
 0x4f6   : > { %v7486_v10 = vpack.c.bf16 %v7460_v39, %v7459_v13  ;;  %8364 = vmatmul.msk.bf16.gmra.mxu3 %vm3480_vm9, %v7290_v11 }
 0x4f8   : > { %7598 = vmatmul.bf16.gmra.mxu0 %v7486_v10 }
 0x4f9   : > { %v7399_v25 = vpop.f32.mrf.mxu3 }
 0x4fa   : > { %v7400_v45 = vadd.f32 %v12609_v33, %v7399_v25 }
 0x4fc   : > { %v7461_v38 = vmax.f32 %v7400_v45, 0.0 }
 0x501   : > { %v7401_v62 = vpop.f32.mrf.mxu3 }
 0x502   : > { %v7402_v57 = vadd.f32 %v12609_v33, %v7401_v62 }
 0x504   : > { %v7462_v17 = vmax.f32 %v7402_v57, 0.0 }
 0x506   : > { %v7487_v9 = vpack.c.bf16 %v7462_v17, %v7461_v38  ;;  %8365 = vmatmul.msk.bf16.gmra.mxu3 %vm3480_vm9, %v7291_v7 }
 0x508   : > { %7603 = vmatmul.bf16.gmra.mxu0 %v7487_v9 }
 0x509   : > { %v7404_v63 = vpop.f32.mrf.mxu3 }
 0x50a   : > { %v7405_v16 = vadd.f32 %v12609_v33, %v7404_v63 }
 0x50c   : > { %v7463_v43 = vmax.f32 %v7405_v16, 0.0 }
 0x511   : > { %v7406_v28 = vpop.f32.mrf.mxu3 }
 0x512   : > { %v7407_v14 = vadd.f32 %v12609_v33, %v7406_v28 }
 0x514   : > { %v7464_v37 = vmax.f32 %v7407_v14, 0.0 }
 0x516   : > { %v7488_v34 = vpack.c.bf16 %v7464_v37, %v7463_v43 }
 0x518   : > { %7608 = vmatmul.bf16.gmra.mxu0 %v7488_v34 }
 0x519   : > { %v7409_v58 = vpop.f32.mrf.mxu3 }
 0x51a   : > { %v7410_v41 = vadd.f32 %v12609_v33, %v7409_v58 }
 0x51c   : > { %v7465_v22 = vmax.f32 %v7410_v41, 0.0 }
 0x521   : > { %v7411_v27 = vpop.f32.mrf.mxu3 }
 0x522   : > { %v7412_v18 = vadd.f32 %v12609_v33, %v7411_v27 }
 0x524   : > { %v7466_v51 = vmax.f32 %v7412_v18, 0.0 }
 0x525   : > { %v7574_v55 = vpop.f32.mrf.mxu0 }
 0x526   : > { %v7489_v47 = vpack.c.bf16 %v7466_v51, %v7465_v22  ;;  %v7575_v59 = vadd.f32 %v12677_v36, %v7574_v55 }
 0x528   : > { %7654 = vst [vmem:[%s12682_s23] sm:$0xff] %v7575_v59  ;;  %7613 = vmatmul.bf16.gmra.mxu0 %v7489_v47 }
 0x529   : > { %v7414_v23 = vpop.f32.mrf.mxu3 }
 0x52a   : > { %v7415_v8 = vadd.f32 %v12609_v33, %v7414_v23 }
 0x52c   : > { %v7467_v44 = vmax.f32 %v7415_v8, 0.0 }
 0x52d   : > { %v7576_v61 = vpop.f32.mrf.mxu0 }
 0x52e   : > { %v7577_v3 = vadd.f32 %v12677_v36, %v7576_v61 }
 0x530   : > { %7655 = vst [vmem:[%s12682_s23 + $0x8] sm:$0xff] %v7577_v3 }
 0x531   : > { %v7416_v46 = vpop.f32.mrf.mxu3 }
 0x532   : > { %v7417_v56 = vadd.f32 %v12609_v33, %v7416_v46 }
 0x534   : > { %v7468_v40 = vmax.f32 %v7417_v56, 0.0 }
 0x535   : > { %v7579_v54 = vpop.f32.mrf.mxu0 }
 0x536   : > { %v7490_v0 = vpack.c.bf16 %v7468_v40, %v7467_v44  ;;  %v7580_v31 = vadd.f32 %v12677_v36, %v7579_v54 }
 0x538   : > { %7656 = vst [vmem:[%s12682_s23 + $0x10] sm:$0xff] %v7580_v31  ;;  %7618 = vmatmul.bf16.gmra.mxu0 %v7490_v0 }
 0x539   : > { %v7419_v21 = vpop.f32.mrf.mxu3 }
 0x53a   : > { %v7420_v30 = vadd.f32 %v12609_v33, %v7419_v21 }
 0x53c   : > { %v7469_v50 = vmax.f32 %v7420_v30, 0.0 }
 0x53d   : > { %v7581_v32 = vpop.f32.mrf.mxu0 }
 0x53e   : > { %v7582_v49 = vadd.f32 %v12677_v36, %v7581_v32 }
 0x540   : > { %7657 = vst [vmem:[%s12682_s23 + $0x18] sm:$0xff] %v7582_v49 }
 0x541   : > { %v7421_v5 = vpop.f32.mrf.mxu3 }
 0x542   : > { %v7422_v12 = vadd.f32 %v12609_v33, %v7421_v5 }
 0x544   : > { %v7470_v26 = vmax.f32 %v7422_v12, 0.0 }
 0x545   : > { %v7584_v19 = vpop.f32.mrf.mxu0 }
 0x546   : > { %v7491_v4 = vpack.c.bf16 %v7470_v26, %v7469_v50  ;;  %v7585_v24 = vadd.f32 %v12677_v36, %v7584_v19 }
 0x548   : > { %7658 = vst [vmem:[%s12682_s23 + $0x20] sm:$0xff] %v7585_v24  ;;  %7623 = vmatmul.bf16.gmra.mxu0 %v7491_v4 }
 0x549   : > { %v7424_v42 = vpop.f32.mrf.mxu3 }
 0x54a   : > { %v7425_v35 = vadd.f32 %v12609_v33, %v7424_v42 }
 0x54c   : > { %v7471_v13 = vmax.f32 %v7425_v35, 0.0 }
 0x54d   : > { %v7586_v48 = vpop.f32.mrf.mxu0 }
 0x54e   : > { %v7587_v52 = vadd.f32 %v12677_v36, %v7586_v48 }
 0x550   : > { %7659 = vst [vmem:[%s12682_s23 + $0x28] sm:$0xff] %v7587_v52 }
 0x551   : > { %v7426_v11 = vpop.f32.mrf.mxu3 }
 0x552   : > { %v7427_v60 = vadd.f32 %v12609_v33, %v7426_v11 }
 0x554   : > { %v7472_v39 = vmax.f32 %v7427_v60, 0.0 }
 0x555   : > { %v7589_v2 = vpop.f32.mrf.mxu0 }
 0x556   : > { %v7492_v10 = vpack.c.bf16 %v7472_v39, %v7471_v13  ;;  %v7590_v29 = vadd.f32 %v12677_v36, %v7589_v2 }
 0x558   : > { %7660 = vst [vmem:[%s12682_s23 + $0x30] sm:$0xff] %v7590_v29  ;;  %7628 = vmatmul.bf16.gmra.mxu0 %v7492_v10 }
 0x559   : > { %v7429_v25 = vpop.f32.mrf.mxu3 }
 0x55a   : > { %v7430_v1 = vadd.f32 %v12609_v33, %v7429_v25 }
 0x55c   : > { %v7473_v62 = vmax.f32 %v7430_v1, 0.0 }
 0x55d   : > { %v7591_v20 = vpop.f32.mrf.mxu0 }
 0x55e   : > { %v7592_v53 = vadd.f32 %v12677_v36, %v7591_v20 }
 0x560   : > { %7661 = vst [vmem:[%s12682_s23 + $0x38] sm:$0xff] %v7592_v53 }
 0x561   : > { %v7431_v15 = vpop.f32.mrf.mxu3 }
 0x562   : > { %v7432_v45 = vadd.f32 %v12609_v33, %v7431_v15 }
 0x564   : > { %v7474_v6 = vmax.f32 %v7432_v45, 0.0 }
 0x565   : > { %v7594_v57 = vpop.f32.mrf.mxu0 }
 0x566   : > { %v7493_v7 = vpack.c.bf16 %v7474_v6, %v7473_v62  ;;  %v7595_v38 = vadd.f32 %v12677_v36, %v7594_v57 }
 0x568   : > { %7662 = vst [vmem:[%s12682_s23 + $0x40] sm:$0xff] %v7595_v38  ;;  %7633 = vmatmul.bf16.gmra.mxu0 %v7493_v7 }
 0x569   : > { %v7434_v17 = vpop.f32.mrf.mxu3 }
 0x56a   : > { %v7435_v16 = vadd.f32 %v12609_v33, %v7434_v17 }
 0x56c   : > { %v7475_v43 = vmax.f32 %v7435_v16, 0.0 }
 0x56d   : > { %v7596_v9 = vpop.f32.mrf.mxu0 }
 0x56e   : > { %v7597_v63 = vadd.f32 %v12677_v36, %v7596_v9 }
 0x570   : > { %7663 = vst [vmem:[%s12682_s23 + $0x48] sm:$0xff] %v7597_v63 }
 0x571   : > { %v7436_v28 = vpop.f32.mrf.mxu3 }
 0x572   : > { %v7437_v14 = vadd.f32 %v12609_v33, %v7436_v28 }
 0x574   : > { %v7476_v37 = vmax.f32 %v7437_v14, 0.0 }
 0x575   : > { %v7599_v34 = vpop.f32.mrf.mxu0 }
 0x576   : > { %v7494_v58 = vpack.c.bf16 %v7476_v37, %v7475_v43  ;;  %v7600_v41 = vadd.f32 %v12677_v36, %v7599_v34 }
 0x578   : > { %7664 = vst [vmem:[%s12682_s23 + $0x50] sm:$0xff] %v7600_v41  ;;  %7638 = vmatmul.bf16.gmra.mxu0 %v7494_v58 }
 0x579   : > { %v7439_v27 = vpop.f32.mrf.mxu3 }
 0x57a   : > { %v7440_v51 = vadd.f32 %v12609_v33, %v7439_v27 }
 0x57c   : > { %v7477_v59 = vmax.f32 %v7440_v51, 0.0 }
 0x57d   : > { %v7601_v18 = vpop.f32.mrf.mxu0 }
 0x57e   : > { %v7602_v22 = vadd.f32 %v12677_v36, %v7601_v18 }
 0x580   : > { %7665 = vst [vmem:[%s12682_s23 + $0x58] sm:$0xff] %v7602_v22 }
 0x581   : > { %v7441_v55 = vpop.f32.mrf.mxu3 }
 0x582   : > { %v7442_v47 = vadd.f32 %v12609_v33, %v7441_v55 }
 0x584   : > { %v7478_v23 = vmax.f32 %v7442_v47, 0.0 }
 0x585   : > { %v7604_v61 = vpop.f32.mrf.mxu0 }
 0x586   : > { %v7495_v3 = vpack.c.bf16 %v7478_v23, %v7477_v59  ;;  %v7605_v8 = vadd.f32 %v12677_v36, %v7604_v61 }
 0x588   : > { %7666 = vst [vmem:[%s12682_s23 + $0x60] sm:$0xff] %v7605_v8  ;;  %7643 = vmatmul.bf16.gmra.mxu0 %v7495_v3 }
 0x589   : > { %v7444_v46 = vpop.f32.mrf.mxu3 }
 0x58a   : > { %v7445_v40 = vadd.f32 %v12609_v33, %v7444_v46 }
 0x58c   : > { %v7479_v31 = vmax.f32 %v7445_v40, 0.0 }
 0x58d   : > { %v7606_v56 = vpop.f32.mrf.mxu0 }
 0x58e   : > { %v7607_v44 = vadd.f32 %v12677_v36, %v7606_v56 }
 0x590   : > { %7667 = vst [vmem:[%s12682_s23 + $0x68] sm:$0xff] %v7607_v44 }
 0x591   : > { %v7446_v54 = vpop.f32.mrf.mxu3 }
 0x592   : > { %v7447_v0 = vadd.f32 %v12609_v33, %v7446_v54 }
 0x594   : > { %v7480_v21 = vmax.f32 %v7447_v0, 0.0 }
 0x595   : > { %v7609_v32 = vpop.f32.mrf.mxu0 }
 0x596   : > { %v7496_v49 = vpack.c.bf16 %v7480_v21, %v7479_v31  ;;  %v7610_v30 = vadd.f32 %v12677_v36, %v7609_v32 }
 0x598   : > { %7668 = vst [vmem:[%s12682_s23 + $0x70] sm:$0xff] %v7610_v30  ;;  %7648 = vmatmul.bf16.gmra.mxu0 %v7496_v49 }
 0x59d   : > { %v7611_v5 = vpop.f32.mrf.mxu0 }
 0x59e   : > { %v7612_v12 = vadd.f32 %v12677_v36, %v7611_v5 }
 0x5a0   : > { %7669 = vst [vmem:[%s12682_s23 + $0x78] sm:$0xff] %v7612_v12 }
 0x5a5   : > { %v7614_v50 = vpop.f32.mrf.mxu0 }
 0x5a6   : > { %v7615_v26 = vadd.f32 %v12677_v36, %v7614_v50 }
 0x5a8   : > { %7670 = vst [vmem:[%s12682_s23 + $0x80] sm:$0xff] %v7615_v26 }
 0x5ad   : > { %v7616_v33 = vpop.f32.mrf.mxu0 }
 0x5ae   : > { %v7617_v19 = vadd.f32 %v12677_v36, %v7616_v33 }
 0x5b0   : > { %7671 = vst [vmem:[%s12682_s23 + $0x88] sm:$0xff] %v7617_v19 }
 0x5b5   : > { %v7619_v4 = vpop.f32.mrf.mxu0 }
 0x5b6   : > { %v7620_v24 = vadd.f32 %v12677_v36, %v7619_v4 }
 0x5b8   : > { %7672 = vst [vmem:[%s12682_s23 + $0x90] sm:$0xff] %v7620_v24 }
 0x5bd   : > { %v7621_v42 = vpop.f32.mrf.mxu0 }
 0x5be   : > { %v7622_v48 = vadd.f32 %v12677_v36, %v7621_v42 }
 0x5c0   : > { %7673 = vst [vmem:[%s12682_s23 + $0x98] sm:$0xff] %v7622_v48 }
 0x5c5   : > { %v7624_v52 = vpop.f32.mrf.mxu0 }
 0x5c6   : > { %v7625_v35 = vadd.f32 %v12677_v36, %v7624_v52 }
 0x5c8   : > { %7674 = vst [vmem:[%s12682_s23 + $0xa0] sm:$0xff] %v7625_v35 }
 0x5cd   : > { %v7626_v11 = vpop.f32.mrf.mxu0 }
 0x5ce   : > { %v7627_v60 = vadd.f32 %v12677_v36, %v7626_v11 }
 0x5d0   : > { %7675 = vst [vmem:[%s12682_s23 + $0xa8] sm:$0xff] %v7627_v60 }
 0x5d5   : > { %v7629_v13 = vpop.f32.mrf.mxu0 }
 0x5d6   : > { %v7630_v39 = vadd.f32 %v12677_v36, %v7629_v13 }
 0x5d8   : > { %7676 = vst [vmem:[%s12682_s23 + $0xb0] sm:$0xff] %v7630_v39 }
 0x5dd   : > { %v7631_v2 = vpop.f32.mrf.mxu0 }
 0x5de   : > { %v7632_v10 = vadd.f32 %v12677_v36, %v7631_v2 }
 0x5e0   : > { %7677 = vst [vmem:[%s12682_s23 + $0xb8] sm:$0xff] %v7632_v10 }
 0x5e5   : > { %v7634_v29 = vpop.f32.mrf.mxu0 }
 0x5e6   : > { %v7635_v25 = vadd.f32 %v12677_v36, %v7634_v29 }
 0x5e8   : > { %7678 = vst [vmem:[%s12682_s23 + $0xc0] sm:$0xff] %v7635_v25 }
 0x5ed   : > { %v7636_v20 = vpop.f32.mrf.mxu0 }
 0x5ee   : > { %v7637_v53 = vadd.f32 %v12677_v36, %v7636_v20 }
 0x5f0   : > { %7679 = vst [vmem:[%s12682_s23 + $0xc8] sm:$0xff] %v7637_v53 }
 0x5f5   : > { %v7639_v1 = vpop.f32.mrf.mxu0 }
 0x5f6   : > { %v7640_v15 = vadd.f32 %v12677_v36, %v7639_v1 }
 0x5f8   : > { %7680 = vst [vmem:[%s12682_s23 + $0xd0] sm:$0xff] %v7640_v15 }
 0x5fd   : > { %v7641_v45 = vpop.f32.mrf.mxu0 }
 0x5fe   : > { %v7642_v62 = vadd.f32 %v12677_v36, %v7641_v45 }
 0x600   : > { %7681 = vst [vmem:[%s12682_s23 + $0xd8] sm:$0xff] %v7642_v62 }
 0x605   : > { %v7644_v6 = vpop.f32.mrf.mxu0 }
 0x606   : > { %v7645_v57 = vadd.f32 %v12677_v36, %v7644_v6 }
 0x608   : > { %7682 = vst [vmem:[%s12682_s23 + $0xe0] sm:$0xff] %v7645_v57 }
 0x60d   : > { %v7646_v7 = vpop.f32.mrf.mxu0 }
 0x60e   : > { %v7647_v38 = vadd.f32 %v12677_v36, %v7646_v7 }
 0x610   : > { %7683 = vst [vmem:[%s12682_s23 + $0xe8] sm:$0xff] %v7647_v38 }
 0x615   : > { %v7649_v17 = vpop.f32.mrf.mxu0 }
 0x616   : > { %v7650_v9 = vadd.f32 %v12677_v36, %v7649_v17 }
 0x618   : > { %7684 = vst [vmem:[%s12682_s23 + $0xf0] sm:$0xff] %v7650_v9 }
 0x61d   : > { %v7651_v63 = vpop.f32.mrf.mxu0 }
 0x61e   : > { %v7652_v16 = vadd.f32 %v12677_v36, %v7651_v63 }
 0x620   : > { %7685 = vst [vmem:[%s12682_s23 + $0xf8] sm:$0xff] %v7652_v16 }
 0x621 PF: > { %s19_s30 = sadd.s32 1, %s8565_s30  }
 0x622   : > { %p16_p4 = scmp.ge.s32.totalorder %s19_s30, 4  }
 0x624   :  { %18 = sbr.rel (!%p16_p4) target bundleno = 1 (0x1), region = 92 }

</bundles_post_ra>
